<compile_context>
chip_gen: v5e
topology: v5e:2x2
jax: 0.10.0
libtpu: 0.0.40
codegen_flags: <defaults>
</compile_context>

<pallas_src>
import functools
import math

import jax
import jax.numpy as jnp
from jax import lax
from jax.experimental import pallas as pl
from jax.experimental.pallas import tpu as pltpu

_VMEM_LIMIT = 32 * 1024 * 1024  # safe scoped-VMEM limit on v5e/v6e/v7x


# ----------------------------------------------------------------------------
# helpers
# ----------------------------------------------------------------------------
def _round_up(x, m):
    return ((x + m - 1) // m) * m


def _tile_or_pad(dim, cap):
    """Full-dim block when the dim fits under the cap (no pad), else cap-sized
    tiles with zero padding up to a multiple of the cap (rare path)."""
    if dim <= cap:
        return dim, dim
    return cap, _round_up(dim, cap)


def _largest_divisor(n, cap):
    cap = max(1, min(n, cap))
    for d in range(cap, 0, -1):
        if n % d == 0:
            return d
    return 1


# ----------------------------------------------------------------------------
# Pallas kernels
# ----------------------------------------------------------------------------
def _matmul_kernel(compute_dtype, x_ref, w_ref, b_ref, o_ref):
    # Output block (f32) is the accumulator; bias folded into the first k step.
    x = x_ref[...].astype(compute_dtype)
    w = w_ref[...].astype(compute_dtype)
    part = jnp.dot(x, w, preferred_element_type=jnp.float32)

    @pl.when(pl.program_id(2) == 0)
    def _first():
        o_ref[...] = part + b_ref[...]

    @pl.when(pl.program_id(2) > 0)
    def _accum():
        o_ref[...] += part


def pallas_matmul(x, w, b=None, compute_dtype=jnp.bfloat16,
                  tm_cap=1024, tn_cap=512, tk_cap=512):
    """o = x @ w + b, tiled & pipelined. x:(M,K), w:(K,N), b:(N,) or None.
    Small dims become full-dim blocks (no HBM padding / slicing)."""
    M, K = x.shape
    K2, N = w.shape
    assert K == K2
    tm, Mp = _tile_or_pad(M, tm_cap)
    tk, Kp = _tile_or_pad(K, tk_cap)
    tn, Np = _tile_or_pad(N, tn_cap)

    xp = x if (Mp, Kp) == (M, K) else jnp.pad(x, ((0, Mp - M), (0, Kp - K)))
    wp = w if (Kp, Np) == (K, N) else jnp.pad(w, ((0, Kp - K), (0, Np - N)))
    if b is None:
        b = jnp.zeros((N,), jnp.float32)
    bp = b.astype(jnp.float32).reshape(1, N)
    if Np != N:
        bp = jnp.pad(bp, ((0, 0), (0, Np - N)))

    out = pl.pallas_call(
        functools.partial(_matmul_kernel, compute_dtype),
        grid=(Mp // tm, Np // tn, Kp // tk),
        in_specs=[pl.BlockSpec((tm, tk), lambda i, j, k: (i, k)),
                  pl.BlockSpec((tk, tn), lambda i, j, k: (k, j)),
                  pl.BlockSpec((1, tn), lambda i, j, k: (0, j))],
        out_specs=pl.BlockSpec((tm, tn), lambda i, j, k: (i, j)),
        out_shape=jax.ShapeDtypeStruct((Mp, Np), jnp.float32),
        compiler_params=pltpu.CompilerParams(
            dimension_semantics=("parallel", "parallel", "arbitrary"),
            vmem_limit_bytes=_VMEM_LIMIT),
    )(xp, wp, bp)
    if (Mp, Np) != (M, N):
        out = out[:M, :N]
    return out


def _sublane_norm_kernel(eps, x_ref, g_ref, b_ref, o_ref):
    # Normalize over the sublane axis S; lanes carry the spatial axis.
    x = x_ref[0].astype(jnp.float32)                       # (S, tl)
    mu = jnp.mean(x, axis=0, keepdims=True)
    var = jnp.mean(jnp.square(x - mu), axis=0, keepdims=True)
    o_ref[0] = (x - mu) * lax.rsqrt(var + eps) * g_ref[0] + b_ref[0]


def pallas_sublane_norm(x3, gamma, beta, eps, lane_cap=2048):
    """x3:(B,S,L) normalized over S per (b, lane); gamma/beta:(S,).
    Used for channel-LN (S=C, L=F*T) and (C,F)-LN (S=C*F, L=T) with no HBM
    transposes and the big spatial axis on lanes."""
    B, S, L = x3.shape
    tl, Lp = _tile_or_pad(L, lane_cap)
    xp = x3 if Lp == L else jnp.pad(x3, ((0, 0), (0, 0), (0, Lp - L)))
    g3 = gamma.reshape(1, S, 1).astype(jnp.float32)
    b3 = beta.reshape(1, S, 1).astype(jnp.float32)
    out = pl.pallas_call(
        functools.partial(_sublane_norm_kernel, eps),
        grid=(B, Lp // tl),
        in_specs=[pl.BlockSpec((1, S, tl), lambda b_, j: (b_, 0, j)),
                  pl.BlockSpec((1, S, 1), lambda b_, j: (0, 0, 0)),
                  pl.BlockSpec((1, S, 1), lambda b_, j: (0, 0, 0))],
        out_specs=pl.BlockSpec((1, S, tl), lambda b_, j: (b_, 0, j)),
        out_shape=jax.ShapeDtypeStruct((B, S, Lp), jnp.float32),
        compiler_params=pltpu.CompilerParams(
            dimension_semantics=("parallel", "parallel"),
            vmem_limit_bytes=_VMEM_LIMIT),
    )(xp, g3, b3)
    return out if Lp == L else out[:, :, :L]


def _rownorm_kernel(eps, x_ref, g_ref, b_ref, o_ref):
    x = x_ref[0].astype(jnp.float32)                       # (tr, N)
    mu = jnp.mean(x, axis=-1, keepdims=True)
    var = jnp.mean(jnp.square(x - mu), axis=-1, keepdims=True)
    o_ref[0] = (x - mu) * lax.rsqrt(var + eps) * g_ref[0] + b_ref[0]


def pallas_rownorm(x, gamma, beta, eps=1e-5, row_cap=512):
    """Row-wise LayerNorm, grouped: x:(G,M,N), gamma/beta:(G,N). One launch."""
    G, M, N = x.shape
    tr, Mp = _tile_or_pad(M, row_cap)
    xp = x if Mp == M else jnp.pad(x, ((0, 0), (0, Mp - M), (0, 0)))
    g3 = gamma.reshape(G, 1, N).astype(jnp.float32)
    b3 = beta.reshape(G, 1, N).astype(jnp.float32)
    out = pl.pallas_call(
        functools.partial(_rownorm_kernel, eps),
        grid=(G, Mp // tr),
        in_specs=[pl.BlockSpec((1, tr, N), lambda g, i: (g, i, 0)),
                  pl.BlockSpec((1, 1, N), lambda g, i: (g, 0, 0)),
                  pl.BlockSpec((1, 1, N), lambda g, i: (g, 0, 0))],
        out_specs=pl.BlockSpec((1, tr, N), lambda g, i: (g, i, 0)),
        out_shape=jax.ShapeDtypeStruct((G, Mp, N), jnp.float32),
        compiler_params=pltpu.CompilerParams(
            dimension_semantics=("parallel", "parallel"),
            vmem_limit_bytes=_VMEM_LIMIT),
    )(xp, g3, b3)
    return out if Mp == M else out[:, :M, :]


def _groupnorm_kernel(eps, x_ref, g_ref, b_ref, o_ref):
    # Fused GroupNorm(1,C): per-batch stats over (C,L) + per-channel affine.
    x = x_ref[0].astype(jnp.float32)                       # (C, L)
    mu = jnp.mean(x, keepdims=True)
    var = jnp.mean(jnp.square(x - mu), keepdims=True)
    o_ref[0] = (x - mu) * lax.rsqrt(var + eps) * g_ref[0] + b_ref[0]


def groupnorm1(x, g, b, eps):
    """GroupNorm(num_groups=1, C): one fused Pallas pass per batch element."""
    # TODO(synk): for production-length F*T the per-batch slab should switch to
    # a two-phase grid (stats pass + scale/shift pass) to stay under VMEM.
    B, C, F, T = x.shape
    L = F * T
    out = pl.pallas_call(
        functools.partial(_groupnorm_kernel, eps),
        grid=(B,),
        in_specs=[pl.BlockSpec((1, C, L), lambda i: (i, 0, 0)),
                  pl.BlockSpec((1, C, 1), lambda i: (0, 0, 0)),
                  pl.BlockSpec((1, C, 1), lambda i: (0, 0, 0))],
        out_specs=pl.BlockSpec((1, C, L), lambda i: (i, 0, 0)),
        out_shape=jax.ShapeDtypeStruct((B, C, L), jnp.float32),
        compiler_params=pltpu.CompilerParams(
            dimension_semantics=("parallel",),
            vmem_limit_bytes=_VMEM_LIMIT),
    )(x.reshape(B, C, L), g.reshape(1, C, 1).astype(jnp.float32),
      b.reshape(1, C, 1).astype(jnp.float32))
    return out.reshape(B, C, F, T)


def _rms_kernel(eps, x_ref, o_ref, std_ref):
    x = x_ref[0].astype(jnp.float32)                       # (C, L)
    ms = jnp.mean(jnp.square(x), keepdims=True) + eps      # (1, 1)
    inv = lax.rsqrt(ms)
    o_ref[0] = x * inv
    std_ref[0] = ms * inv                                  # sqrt(ms)


def pallas_rms_normalize(x, eps=1e-8):
    """x:(B,C,L) -> (x / rms, rms:(B,1,1)); rms over (C,L). Fused single pass."""
    B, C, L = x.shape
    y, std = pl.pallas_call(
        functools.partial(_rms_kernel, eps),
        grid=(B,),
        in_specs=[pl.BlockSpec((1, C, L), lambda i: (i, 0, 0))],
        out_specs=(pl.BlockSpec((1, C, L), lambda i: (i, 0, 0)),
                   pl.BlockSpec((1, 1, 1), lambda i: (i, 0, 0))),
        out_shape=(jax.ShapeDtypeStruct((B, C, L), jnp.float32),
                   jax.ShapeDtypeStruct((B, 1, 1), jnp.float32)),
        compiler_params=pltpu.CompilerParams(
            dimension_semantics=("parallel",),
            vmem_limit_bytes=_VMEM_LIMIT),
    )(x.astype(jnp.float32))
    return y, std


def _gate_kernel(x_ref, f_ref, b_ref, w1_ref, w2_ref, o_ref):
    # WHYV filter gate:  y = x * sigmoid(w1 * f) + w2 * b   (broadcast over T)
    gate = jax.nn.sigmoid(w1_ref[...] * f_ref[...])        # (1, C, F, 1)
    o_ref[...] = x_ref[...] * gate + w2_ref[...] * b_ref[...]


def pallas_whyv_gate(x, f, b, w1, w2, t_cap=256):
    # x:(B,C,F,T); f,b:(B,C,F,1); w1,w2:(C,F,1) — read directly by BlockSpec
    # (no HBM broadcast), single launch over (B, T tiles).
    # TODO(synk): WHYVFilterGate internals reconstructed (source not provided).
    B, C, F, T = x.shape
    tT, Tp = _tile_or_pad(T, t_cap)
    xp = x if Tp == T else jnp.pad(x, ((0, 0), (0, 0), (0, 0), (0, Tp - T)))
    out = pl.pallas_call(
        _gate_kernel,
        grid=(B, Tp // tT),
        in_specs=[pl.BlockSpec((1, C, F, tT), lambda i, j: (i, 0, 0, j)),
                  pl.BlockSpec((1, C, F, 1), lambda i, j: (i, 0, 0, 0)),
                  pl.BlockSpec((1, C, F, 1), lambda i, j: (i, 0, 0, 0)),
                  pl.BlockSpec((1, C, F, 1), lambda i, j: (0, 0, 0, 0)),
                  pl.BlockSpec((1, C, F, 1), lambda i, j: (0, 0, 0, 0))],
        out_specs=pl.BlockSpec((1, C, F, tT), lambda i, j: (i, 0, 0, j)),
        out_shape=jax.ShapeDtypeStruct((B, C, F, Tp), jnp.float32),
        compiler_params=pltpu.CompilerParams(
            dimension_semantics=("parallel", "parallel"),
            vmem_limit_bytes=_VMEM_LIMIT),
    )(xp.astype(jnp.float32),
      f.astype(jnp.float32), b.astype(jnp.float32),
      w1.reshape(1, C, F, 1).astype(jnp.float32),
      w2.reshape(1, C, F, 1).astype(jnp.float32))
    return out if Tp == T else out[..., :T]


def _attn_kernel(scale, q_ref, k_ref, v_ref, o_ref):
    q = q_ref[...].astype(jnp.bfloat16)                    # (hb, T, dk)
    k = k_ref[...].astype(jnp.bfloat16)
    v = v_ref[...].astype(jnp.bfloat16)
    s = jnp.einsum('hqd,hkd->hqk', q, k,
                   preferred_element_type=jnp.float32) * scale
    s = s - jnp.max(s, axis=-1, keepdims=True)
    p = jnp.exp(s)
    inv = pl.reciprocal(jnp.sum(p, axis=-1, keepdims=True), approx=True)
    p = (p * inv).astype(jnp.bfloat16)
    o_ref[...] = jnp.einsum('hqk,hkd->hqd', p, v,
                            preferred_element_type=jnp.float32)


def pallas_attention(q, k, v, scale):
    """q,k:(BH,T,dk) v:(BH,T,dv) f32 -> (BH,T,dv) f32.  Several heads per grid
    step (MXU occupancy), no dk/dv padding."""
    # TODO(synk): add flash-style KV tiling (running max/sum) for production T
    # so the score block stays bounded under v7x's 64 MiB VMEM.
    BH, T, dk = q.shape
    dv = v.shape[-1]
    hb_cap = max(1, (2 << 20) // max(1, T * T * 4))        # bound score VMEM
    if BH >= 2:
        hb_cap = min(hb_cap, max(1, BH // 2))              # >=2 blocks for 2 TCs
    hb = _largest_divisor(BH, hb_cap)
    out = pl.pallas_call(
        functools.partial(_attn_kernel, scale),
        grid=(BH // hb,),
        in_specs=[pl.BlockSpec((hb, T, dk), lambda i: (i, 0, 0)),
                  pl.BlockSpec((hb, T, dk), lambda i: (i, 0, 0)),
                  pl.BlockSpec((hb, T, dv), lambda i: (i, 0, 0))],
        out_specs=pl.BlockSpec((hb, T, dv), lambda i: (i, 0, 0)),
        out_shape=jax.ShapeDtypeStruct((BH, T, dv), jnp.float32),
        compiler_params=pltpu.CompilerParams(
            dimension_semantics=("parallel",),
            vmem_limit_bytes=_VMEM_LIMIT),
    )(q, k, v)
    return out


# ----------------------------------------------------------------------------
# Layers built on top of the Pallas kernels (glue is plain JAX / XLA conv)
# ----------------------------------------------------------------------------
def prelu(x, a):
    return jnp.where(x >= 0, x, a * x)


def conv2d(x, w, b, padding):
    pH, pW = padding
    y = lax.conv_general_dilated(
        x.astype(jnp.float32), w.astype(jnp.float32),
        window_strides=(1, 1), padding=((pH, pH), (pW, pW)),
        dimension_numbers=('NCHW', 'OIHW', 'NCHW'))
    return y + b.reshape(1, -1, 1, 1)


def conv_transpose2d(x, w, b, padding):
    """stride-1 ConvTranspose2d (torch weight layout (Cin,Cout,kH,kW))."""
    Cin, Cout, kH, kW = w.shape
    pH, pW = padding
    w_eq = jnp.flip(w, axis=(2, 3)).transpose(1, 0, 2, 3)
    return conv2d(x, w_eq, b, (kH - 1 - pH, kW - 1 - pW))


def conv_transpose1d(x, w, b, stride):
    """ConvTranspose1d via lhs-dilated conv. x:(N,Cin,L), w:(Cin,Cout,K)."""
    Cin, Cout, K = w.shape
    w_t = jnp.flip(w, axis=2).transpose(1, 0, 2)           # (Cout, Cin, K)
    y = lax.conv_general_dilated(
        x.astype(jnp.float32), w_t.astype(jnp.float32),
        window_strides=(1,), padding=((K - 1, K - 1),),
        lhs_dilation=(stride,),
        dimension_numbers=('NCH', 'OIH', 'NCH'))
    return y + b.reshape(1, -1, 1)


def lstm_scan(g_in, Whh, reverse):
    # TODO(synk): the recurrence stays in lax.scan (strict sequential dep);
    # the large input projection is done in the tiled Pallas matmul (bilstm).
    N, L, H4 = g_in.shape
    H = H4 // 4
    if reverse:
        g_in = g_in[:, ::-1, :]

    def step(carry, g):
        h, c = carry
        g = g + jnp.dot(h, Whh.T)
        i, f, gg, o = jnp.split(g, 4, axis=-1)
        i, f, o = jax.nn.sigmoid(i), jax.nn.sigmoid(f), jax.nn.sigmoid(o)
        gg = jnp.tanh(gg)
        c = f * c + i * gg
        h = o * jnp.tanh(c)
        return (h, c), h

    h0 = jnp.zeros((N, H), jnp.float32)
    _, hs = lax.scan(step, (h0, h0), g_in.transpose(1, 0, 2))
    hs = hs.transpose(1, 0, 2)
    if reverse:
        hs = hs[:, ::-1, :]
    return hs


def bilstm(x, p):
    """Forward/backward input projections fused into one Pallas matmul."""
    N, L, In = x.shape
    H = p['Whh_f'].shape[1]
    W = jnp.concatenate([p['Wih_f'].T, p['Wih_b'].T], axis=1)        # (In, 8H)
    bias = jnp.concatenate([p['bih_f'] + p['bhh_f'], p['bih_b'] + p['bhh_b']])
    g = pallas_matmul(x.reshape(N * L, In), W, bias).reshape(N, L, 8 * H)
    hf = lstm_scan(g[..., :4 * H], p['Whh_f'], reverse=False)
    hb = lstm_scan(g[..., 4 * H:], p['Whh_b'], reverse=True)
    return jnp.concatenate([hf, hb], axis=-1)


def layernorm_channel(x, g, b, eps):
    """LayerNorm over C per (b,f,t): sublane reduction, F*T on lanes."""
    B, C, F, T = x.shape
    y = pallas_sublane_norm(x.reshape(B, C, F * T), g, b, eps)
    return y.reshape(B, C, F, T)


def layernorm_cf(x, g, b, eps):
    """LayerNorm over (C,F) per (b,t): sublane reduction, T on lanes."""
    B, C, F, T = x.shape
    y = pallas_sublane_norm(x.reshape(B, C * F, T),
                            g.reshape(-1), b.reshape(-1), eps)
    return y.reshape(B, C, F, T)


def stft(x, n_fft, hop, window):
    """x:(B,C,L) -> (B, 2*C, Fq, T)  (real/imag stacked on channel axis)."""
    B, C, L = x.shape
    pad = n_fft // 2
    xp = jnp.pad(x, ((0, 0), (0, 0), (pad, pad)), mode='reflect')
    P = L + 2 * pad
    T = 1 + (P - n_fft) // hop
    idx = hop * jnp.arange(T)[:, None] + jnp.arange(n_fft)[None, :]
    frames = xp[:, :, idx] * window[None, None, None, :]             # (B,C,T,n_fft)
    Fq = n_fft // 2 + 1
    n = jnp.arange(n_fft)[:, None].astype(jnp.float32)
    k = jnp.arange(Fq)[None, :].astype(jnp.float32)
    ang = 2.0 * math.pi * n * k / n_fft
    dft = jnp.concatenate([jnp.cos(ang), -jnp.sin(ang)], axis=1)     # (n_fft, 2Fq)
    spec = pallas_matmul(frames.reshape(B * C * T, n_fft), dft, None,
                         compute_dtype=jnp.float32)                   # f32 DFT
    spec = spec.reshape(B, C, T, 2, Fq).transpose(0, 1, 3, 4, 2)      # (B,C,2,Fq,T)
    return spec.reshape(B, 2 * C, Fq, T)


def istft(real, imag, n_fft, hop, window, length):
    """real,imag:(B,N,Fq,T) -> wave (B,N,length)."""
    B, Ns, Fq, T = real.shape
    n = jnp.arange(n_fft)[None, :].astype(jnp.float32)
    k = jnp.arange(Fq)[:, None].astype(jnp.float32)
    ang = 2.0 * math.pi * k * n / n_fft
    nyq = (k == 0) | (k == n_fft // 2)
    cr = jnp.where(nyq, 1.0, 2.0) / n_fft
    ci = jnp.where(nyq, 0.0, -2.0) / n_fft
    idft = jnp.concatenate([cr * jnp.cos(ang), ci * jnp.sin(ang)], axis=0)  # (2Fq,n_fft)
    spec = jnp.concatenate([real, imag], axis=2)                      # (B,N,2Fq,T)
    spec = spec.transpose(0, 1, 3, 2).reshape(B * Ns * T, 2 * Fq)
    frames = pallas_matmul(spec, idft, None,
                           compute_dtype=jnp.float32).reshape(B, Ns, T, n_fft)
    frames = frames * window[None, None, None, :]
    P = n_fft + hop * (T - 1)
    idx = hop * jnp.arange(T)[:, None] + jnp.arange(n_fft)[None, :]
    out = jnp.zeros((B, Ns, P), jnp.float32).at[:, :, idx].add(frames)
    wsq = jnp.zeros((P,), jnp.float32).at[idx].add(
        jnp.broadcast_to(window ** 2, (T, n_fft)))
    out = out / jnp.maximum(wsq, 1e-8)[None, None, :]
    pad = n_fft // 2
    return out[:, :, pad:pad + length]


def tf_gridnet_block(x, p, cfg):
    # TODO(synk): TFGridnetBlock reconstructed from the standard TF-GridNet block
    # (intra-freq BLSTM, inter-time BLSTM, full-band multi-head attention).
    B, C, F, T = x.shape
    ks, hs = cfg['emb_ks'], cfg['emb_hs']
    h, E = cfg['n_head'], cfg['qk_channel']
    D = C // h
    eps = cfg['eps']

    # ---- intra (frequency) BLSTM ----
    y = layernorm_channel(x, p['intra_norm_g'], p['intra_norm_b'], eps)
    y = y.transpose(0, 3, 1, 2).reshape(B * T, C, F)
    Lf = (F - ks) // hs + 1
    u = jnp.stack([y[:, :, k:k + (Lf - 1) * hs + 1:hs] for k in range(ks)], axis=-1)
    u = u.transpose(0, 2, 1, 3).reshape(B * T, Lf, C * ks)
    hseq = bilstm(u, p['intra_lstm'])
    z = conv_transpose1d(hseq.transpose(0, 2, 1), p['intra_lin_w'], p['intra_lin_b'], hs)
    z = z[:, :, :F].reshape(B, T, C, F).transpose(0, 2, 3, 1)
    x = x + z

    # ---- inter (time) BLSTM ----
    y = layernorm_channel(x, p['inter_norm_g'], p['inter_norm_b'], eps)
    y = y.transpose(0, 2, 1, 3).reshape(B * F, C, T)
    Lt = (T - ks) // hs + 1
    u = jnp.stack([y[:, :, k:k + (Lt - 1) * hs + 1:hs] for k in range(ks)], axis=-1)
    u = u.transpose(0, 2, 1, 3).reshape(B * F, Lt, C * ks)
    hseq = bilstm(u, p['inter_lstm'])
    z = conv_transpose1d(hseq.transpose(0, 2, 1), p['inter_lin_w'], p['inter_lin_b'], hs)
    z = z[:, :, :T].reshape(B, F, C, T).transpose(0, 2, 1, 3)
    x = x + z

    # ---- full-band self-attention over time frames ----
    feat = x.transpose(0, 2, 3, 1).reshape(B * F * T, C)
    qkv = pallas_matmul(feat, p['attn_w'], p['attn_b']).reshape(B, F, T, -1)
    q_all, k_all, v_all = jnp.split(qkv, [h * E, 2 * h * E], axis=-1)
    q_all = prelu(q_all, p['attn_aq'])
    k_all = prelu(k_all, p['attn_ak'])
    v_all = prelu(v_all, p['attn_av'])

    def norm_heads(a, g, b, d):
        # one batched per-head LayerNorm over (d, F) features
        a5 = a.reshape(B, F, T, h, d).transpose(3, 0, 2, 4, 1)        # (h,B,T,d,F)
        a3 = a5.reshape(h, B * T, d * F)
        y3 = pallas_rownorm(a3, g.reshape(h, d * F), b.reshape(h, d * F), eps)
        return y3.reshape(h * B, T, d * F)

    q = norm_heads(q_all, p['q_norm_g'], p['q_norm_b'], E)
    k = norm_heads(k_all, p['k_norm_g'], p['k_norm_b'], E)
    v = norm_heads(v_all, p['v_norm_g'], p['v_norm_b'], D)
    att = pallas_attention(q, k, v, 1.0 / math.sqrt(E * F))           # (hB,T,D*F)
    att = att.reshape(h, B, T, D, F).transpose(1, 0, 3, 4, 2).reshape(B, C, F, T)

    proj = pallas_matmul(att.transpose(0, 2, 3, 1).reshape(B * F * T, C),
                         p['proj_w'], p['proj_b'])
    proj = prelu(proj, p['proj_a']).reshape(B, F, T, C).transpose(0, 3, 1, 2)
    proj = layernorm_cf(proj, p['proj_norm_g'], p['proj_norm_b'], eps)
    return x + proj


# ----------------------------------------------------------------------------
# Parameter initialization (deterministic, synthetic)
# ----------------------------------------------------------------------------
class KeyGen:
    def __init__(self, seed=0):
        self.key = jax.random.PRNGKey(seed)

    def __call__(self):
        self.key, sub = jax.random.split(self.key)
        return sub


def _nrm(kg, shape, scale=0.1):
    return scale * jax.random.normal(kg(), shape, jnp.float32)


def init_block(kg, cfg):
    C, ks, H = cfg['emb_dim'], cfg['emb_ks'], cfg['hidden']
    h, E, Fq = cfg['n_head'], cfg['qk_channel'], cfg['n_freqs']
    D = C // h

    def lstm_params(in_dim):
        return dict(
            Wih_f=_nrm(kg, (4 * H, in_dim)), Whh_f=_nrm(kg, (4 * H, H)),
            bih_f=jnp.zeros((4 * H,)), bhh_f=jnp.zeros((4 * H,)),
            Wih_b=_nrm(kg, (4 * H, in_dim)), Whh_b=_nrm(kg, (4 * H, H)),
            bih_b=jnp.zeros((4 * H,)), bhh_b=jnp.zeros((4 * H,)))

    return dict(
        intra_norm_g=jnp.ones((C,)), intra_norm_b=jnp.zeros((C,)),
        intra_lstm=lstm_params(C * ks),
        intra_lin_w=_nrm(kg, (2 * H, C, ks)), intra_lin_b=jnp.zeros((C,)),
        inter_norm_g=jnp.ones((C,)), inter_norm_b=jnp.zeros((C,)),
        inter_lstm=lstm_params(C * ks),
        inter_lin_w=_nrm(kg, (2 * H, C, ks)), inter_lin_b=jnp.zeros((C,)),
        attn_w=_nrm(kg, (C, 2 * h * E + C)), attn_b=jnp.zeros((2 * h * E + C,)),
        attn_aq=jnp.array(0.25, jnp.float32), attn_ak=jnp.array(0.25, jnp.float32),
        attn_av=jnp.array(0.25, jnp.float32),
        q_norm_g=jnp.ones((h, E, Fq)), q_norm_b=jnp.zeros((h, E, Fq)),
        k_norm_g=jnp.ones((h, E, Fq)), k_norm_b=jnp.zeros((h, E, Fq)),
        v_norm_g=jnp.ones((h, D, Fq)), v_norm_b=jnp.zeros((h, D, Fq)),
        proj_w=_nrm(kg, (C, C)), proj_b=jnp.zeros((C,)),
        proj_a=jnp.array(0.25, jnp.float32),
        proj_norm_g=jnp.ones((C, Fq)), proj_norm_b=jnp.zeros((C, Fq)))


def init_params(cfg):
    kg = KeyGen(0)
    C, Fq, ac = cfg['emb_dim'], cfg['n_freqs'], cfg['n_audio_channel']
    return dict(
        emb_conv_w=_nrm(kg, (C, 2 * ac, cfg['in_kF'], cfg['in_kT'])),
        emb_conv_b=jnp.zeros((C,)),
        emb_gn_g=jnp.ones((C,)), emb_gn_b=jnp.zeros((C,)),
        filter_w=_nrm(kg, (cfg['cond_dim'], C * Fq)), filter_b=jnp.zeros((C * Fq,)),
        bias_w=_nrm(kg, (cfg['cond_dim'], C * Fq)), bias_b=jnp.zeros((C * Fq,)),
        gates=[dict(w1=jax.random.uniform(kg(), (C, Fq, 1)),
                    w2=jax.random.uniform(kg(), (C, Fq, 1)))
               for _ in range(cfg['n_layers'])],
        blocks=[init_block(kg, cfg) for _ in range(cfg['n_layers'])],
        deconv_w=_nrm(kg, (C, cfg['n_srcs'] * 2, cfg['out_kF'], cfg['out_kT'])),
        deconv_b=jnp.zeros((cfg['n_srcs'] * 2,)))


# ----------------------------------------------------------------------------
# WHYVv1 forward
# ----------------------------------------------------------------------------
def whyv_forward(params, audio, clue, cfg):
    B = audio.shape[0]
    L = audio.shape[-1]
    x = audio[:, None, :] if audio.ndim == 2 else audio               # (B,Ca,L)

    # RMS input normalization over (channel, time) -- fused Pallas kernel
    x, std = pallas_rms_normalize(x)                                  # std:(B,1,1)

    window = 0.5 - 0.5 * jnp.cos(2.0 * math.pi * jnp.arange(cfg['n_fft']) / cfg['n_fft'])
    spec = stft(x, cfg['n_fft'], cfg['hop'], window)                  # (B,2*Ca,Fq,T)

    # Dimension embedding: Conv2d + GroupNorm(1, emb_dim)
    emb = conv2d(spec, params['emb_conv_w'], params['emb_conv_b'],
                 (cfg['in_kF'] // 2, cfg['in_kT'] // 2))
    emb = groupnorm1(emb, params['emb_gn_g'], params['emb_gn_b'], cfg['eps'])

    Fq = emb.shape[-2]
    f = pallas_matmul(clue, params['filter_w'], params['filter_b']).reshape(
        B, cfg['emb_dim'], Fq, 1)
    bgen = pallas_matmul(clue, params['bias_w'], params['bias_b']).reshape(
        B, cfg['emb_dim'], Fq, 1)

    x = emb
    for i in range(cfg['n_layers']):
        x = tf_gridnet_block(x, params['blocks'][i], cfg)
        x = pallas_whyv_gate(x, f, bgen,
                             params['gates'][i]['w1'], params['gates'][i]['w2'])

    y = conv_transpose2d(x, params['deconv_w'], params['deconv_b'],
                         (cfg['out_kF'] // 2, cfg['out_kT'] // 2))    # (B,2*n_srcs,Fq,T)
    T = y.shape[-1]
    y = y.reshape(B, cfg['n_srcs'], 2, Fq, T)                         # 'B C N F T'
    y = y.transpose(0, 2, 1, 3, 4)                                    # 'B N C F T'
    real, imag = y[:, 0], y[:, 1]
    wave = istft(real, imag, cfg['n_fft'], cfg['hop'], window, L)     # (B,n_srcs,L)
    wave = wave * std                                                 # RMS denormalize
    return wave[:, 0]


# ----------------------------------------------------------------------------
if __name__ == "__main__":
    cfg = dict(
        n_fft=32, hop=16, n_audio_channel=1, n_layers=2,
        in_kF=3, in_kT=3, out_kF=3, out_kT=3,
        hidden=16, n_head=2, qk_channel=4, emb_dim=16,
        emb_ks=2, emb_hs=1, eps=1e-5, cond_dim=32, n_srcs=1,
    )
    cfg['n_freqs'] = cfg['n_fft'] // 2 + 1

    params = init_params(cfg)

    key = jax.random.PRNGKey(0)
    k1, k2 = jax.random.split(key)
    audio = jax.random.normal(k1, (2, 256), jnp.float32)
    clue = jax.random.normal(k2, (2, cfg['cond_dim']), jnp.float32)

    fwd = jax.jit(lambda p, a, c: whyv_forward(p, a, c, cfg))
    out = jax.block_until_ready(fwd(params, audio, clue))

    assert out.shape == (2, 256), out.shape
    assert bool(jnp.all(jnp.isfinite(out)))
    print("KERNEL_OK")
</pallas_src>

<mosaic_0001>
module attributes {stable_mosaic.version = 11 : i64} {
  func.func @_rms_kernel(%arg0: i32, %arg1: memref<1x1x256xf32, #tpu.memory_space<vmem>>, %arg2: memref<1x1x256xf32, #tpu.memory_space<vmem>>, %arg3: memref<1x1x1xf32, #tpu.memory_space<vmem>>) attributes {dimension_semantics = [#tpu.dimension_semantics<parallel>], iteration_bounds = array<i64: 2>, scalar_prefetch = 0 : i64, scratch_operands = 0 : i64, tpu.core_type = #tpu.core_type<tc>, window_params = [{transform_indices = @transform_0, window_bounds = array<i64: 1, 1, 256>}, {transform_indices = @transform_1, window_bounds = array<i64: 1, 1, 256>}, {transform_indices = @transform_2, window_bounds = array<i64: 1, 1, 1>}]} {
    %c0 = arith.constant 0 : index
    %c0_0 = arith.constant 0 : index
    %c0_1 = arith.constant 0 : index
    %0 = vector.load %arg1[%c0, %c0_0, %c0_1] : memref<1x1x256xf32, #tpu.memory_space<vmem>>, vector<1x1x256xf32>
    %1 = vector.shape_cast %0 : vector<1x1x256xf32> to vector<1x256xf32>
    %2 = arith.mulf %1, %1 : vector<1x256xf32>
    %3 = vector.shape_cast %2 : vector<1x256xf32> to vector<1x1x256xf32>
    %cst = arith.constant dense<0.000000e+00> : vector<1xf32>
    %4 = vector.multi_reduction <add>, %3, %cst [1, 2] : vector<1x1x256xf32> to vector<1xf32>
    %5 = vector.shape_cast %4 : vector<1xf32> to vector<1x1x1xf32>
    %6 = vector.extract %5[0, 0, 0] : f32 from vector<1x1x1xf32>
    %7 = vector.broadcast %6 : f32 to vector<1x1xf32>
    %cst_2 = arith.constant 2.560000e+02 : f32
    %8 = vector.broadcast %cst_2 : f32 to vector<1x1xf32>
    %9 = arith.divf %7, %8 : vector<1x1xf32>
    %cst_3 = arith.constant 9.99999993E-9 : f32
    %10 = vector.broadcast %cst_3 : f32 to vector<1x1xf32>
    %11 = arith.addf %9, %10 : vector<1x1xf32>
    %12 = math.rsqrt %11 : vector<1x1xf32>
    %13 = vector.broadcast %12 : vector<1x1xf32> to vector<1x256xf32>
    %14 = arith.mulf %1, %13 : vector<1x256xf32>
    %c0_4 = arith.constant 0 : index
    %c0_5 = arith.constant 0 : index
    %c0_6 = arith.constant 0 : index
    %15 = vector.load %arg2[%c0_4, %c0_5, %c0_6] : memref<1x1x256xf32, #tpu.memory_space<vmem>>, vector<1x1x256xf32>
    %16 = vector.shape_cast %15 : vector<1x1x256xf32> to vector<1x256xf32>
    %17 = vector.shape_cast %14 : vector<1x256xf32> to vector<1x1x256xf32>
    tpu.vector_store %arg2[%c0_4, %c0_5, %c0_6], %17 {strides = array<i32>} : memref<1x1x256xf32, #tpu.memory_space<vmem>>, vector<1x1x256xf32>,
    %18 = arith.mulf %11, %12 : vector<1x1xf32>
    %c0_7 = arith.constant 0 : index
    %c0_8 = arith.constant 0 : index
    %c0_9 = arith.constant 0 : index
    %19 = vector.load %arg3[%c0_7, %c0_8, %c0_9] : memref<1x1x1xf32, #tpu.memory_space<vmem>>, vector<1x1x1xf32>
    %20 = vector.shape_cast %19 : vector<1x1x1xf32> to vector<1x1xf32>
    %21 = vector.shape_cast %18 : vector<1x1xf32> to vector<1x1x1xf32>
    tpu.vector_store %arg3[%c0_7, %c0_8, %c0_9], %21 {strides = array<i32>} : memref<1x1x1xf32, #tpu.memory_space<vmem>>, vector<1x1x1xf32>,
    return
  }
  func.func @transform_0(%arg0: i32) -> (i32, i32, i32) {
    %c0_i32 = arith.constant 0 : i32
    %c0_i32_0 = arith.constant 0 : i32
    %c0_i32_1 = arith.constant 0 : i32
    return %arg0, %c0_i32, %c0_i32_0 : i32, i32, i32
  }
  func.func @transform_1(%arg0: i32) -> (i32, i32, i32) {
    %c0_i32 = arith.constant 0 : i32
    %c0_i32_0 = arith.constant 0 : i32
    %c0_i32_1 = arith.constant 0 : i32
    return %arg0, %c0_i32, %c0_i32_0 : i32, i32, i32
  }
  func.func @transform_2(%arg0: i32) -> (i32, i32, i32) {
    %c0_i32 = arith.constant 0 : i32
    %c0_i32_0 = arith.constant 0 : i32
    %c0_i32_1 = arith.constant 0 : i32
    return %arg0, %c0_i32, %c0_i32_0 : i32, i32, i32
  }
}

module attributes {stable_mosaic.version = 11 : i64} {
  func.func @_matmul_kernel(%arg0: i32, %arg1: i32, %arg2: i32, %arg3: memref<34x32xf32, #tpu.memory_space<vmem>>, %arg4: memref<32x34xf32, #tpu.memory_space<vmem>>, %arg5: memref<1x34xf32, #tpu.memory_space<vmem>>, %arg6: memref<34x34xf32, #tpu.memory_space<vmem>>) attributes {dimension_semantics = [#tpu.dimension_semantics<parallel>, #tpu.dimension_semantics<parallel>, #tpu.dimension_semantics<arbitrary>], iteration_bounds = array<i64: 1, 1, 1>, scalar_prefetch = 0 : i64, scratch_operands = 0 : i64, tpu.core_type = #tpu.core_type<tc>, window_params = [{transform_indices = @transform_0, window_bounds = array<i64: 34, 32>}, {transform_indices = @transform_1, window_bounds = array<i64: 32, 34>}, {transform_indices = @transform_2, window_bounds = array<i64: 1, 34>}, {transform_indices = @transform_3, window_bounds = array<i64: 34, 34>}]} {
    %c0 = arith.constant 0 : index
    %c0_0 = arith.constant 0 : index
    %0 = vector.load %arg3[%c0, %c0_0] : memref<34x32xf32, #tpu.memory_space<vmem>>, vector<34x32xf32>
    %c0_1 = arith.constant 0 : index
    %c0_2 = arith.constant 0 : index
    %1 = vector.load %arg4[%c0_1, %c0_2] : memref<32x34xf32, #tpu.memory_space<vmem>>, vector<32x34xf32>
    %cst = arith.constant dense<0.000000e+00> : vector<34x34xf32>
    %2 = tpu.matmul %0, %1, %cst {dimension_numbers = #tpu.dot_dimension_numbers<[1], [0], [0], [1], [0, 0, 1, 1], [], []>} : vector<34x32xf32>, vector<32x34xf32>, vector<34x34xf32> -> vector<34x34xf32>
    %c0_i32 = arith.constant 0 : i32
    %3 = arith.cmpi eq, %arg2, %c0_i32 : i32
    %4 = arith.extui %3 : i1 to i32
    %c0_i32_3 = arith.constant 0 : i32
    %5 = arith.cmpi ne, %4, %c0_i32_3 : i32
    scf.if %5 {
      %c0_6 = arith.constant 0 : index
      %c0_7 = arith.constant 0 : index
      %9 = vector.load %arg5[%c0_6, %c0_7] : memref<1x34xf32, #tpu.memory_space<vmem>>, vector<1x34xf32>
      %10 = vector.broadcast %9 : vector<1x34xf32> to vector<34x34xf32>
      %11 = arith.addf %2, %10 : vector<34x34xf32>
      %c0_8 = arith.constant 0 : index
      %c0_9 = arith.constant 0 : index
      %12 = vector.load %arg6[%c0_8, %c0_9] : memref<34x34xf32, #tpu.memory_space<vmem>>, vector<34x34xf32>
      tpu.vector_store %arg6[%c0_8, %c0_9], %11 {strides = array<i32>} : memref<34x34xf32, #tpu.memory_space<vmem>>, vector<34x34xf32>,
    } else {
    }
    %c0_i32_4 = arith.constant 0 : i32
    %6 = arith.cmpi sgt, %arg2, %c0_i32_4 : i32
    %7 = arith.extui %6 : i1 to i32
    %c0_i32_5 = arith.constant 0 : i32
    %8 = arith.cmpi ne, %7, %c0_i32_5 : i32
    scf.if %8 {
      %c0_6 = arith.constant 0 : index
      %c0_7 = arith.constant 0 : index
      %9 = vector.load %arg6[%c0_6, %c0_7] : memref<34x34xf32, #tpu.memory_space<vmem>>, vector<34x34xf32>
      %10 = arith.addf %9, %2 : vector<34x34xf32>
      %c0_8 = arith.constant 0 : index
      %c0_9 = arith.constant 0 : index
      %11 = vector.load %arg6[%c0_8, %c0_9] : memref<34x34xf32, #tpu.memory_space<vmem>>, vector<34x34xf32>
      tpu.vector_store %arg6[%c0_8, %c0_9], %10 {strides = array<i32>} : memref<34x34xf32, #tpu.memory_space<vmem>>, vector<34x34xf32>,
    } else {
    }
    return
  }
  func.func @transform_0(%arg0: i32, %arg1: i32, %arg2: i32) -> (i32, i32) {
    %c0_i32 = arith.constant 0 : i32
    return %arg0, %arg2 : i32, i32
  }
  func.func @transform_1(%arg0: i32, %arg1: i32, %arg2: i32) -> (i32, i32) {
    %c0_i32 = arith.constant 0 : i32
    return %arg2, %arg1 : i32, i32
  }
  func.func @transform_2(%arg0: i32, %arg1: i32, %arg2: i32) -> (i32, i32) {
    %c0_i32 = arith.constant 0 : i32
    %c0_i32_0 = arith.constant 0 : i32
    return %c0_i32, %arg1 : i32, i32
  }
  func.func @transform_3(%arg0: i32, %arg1: i32, %arg2: i32) -> (i32, i32) {
    %c0_i32 = arith.constant 0 : i32
    return %arg0, %arg1 : i32, i32
  }
}

module attributes {stable_mosaic.version = 11 : i64} {
  func.func @_sublane_norm_kernel(%arg0: i32, %arg1: i32, %arg2: memref<1x16x289xf32, #tpu.memory_space<vmem>>, %arg3: memref<1x16x1xf32, #tpu.memory_space<vmem>>, %arg4: memref<1x16x1xf32, #tpu.memory_space<vmem>>, %arg5: memref<1x16x289xf32, #tpu.memory_space<vmem>>) attributes {dimension_semantics = [#tpu.dimension_semantics<parallel>, #tpu.dimension_semantics<parallel>], iteration_bounds = array<i64: 2, 1>, scalar_prefetch = 0 : i64, scratch_operands = 0 : i64, tpu.core_type = #tpu.core_type<tc>, window_params = [{transform_indices = @transform_0, window_bounds = array<i64: 1, 16, 289>}, {pipeline_mode = #tpu.pipeline_mode<synchronous>, transform_indices = @transform_1, window_bounds = array<i64: 1, 16, 1>}, {pipeline_mode = #tpu.pipeline_mode<synchronous>, transform_indices = @transform_2, window_bounds = array<i64: 1, 16, 1>}, {transform_indices = @transform_3, window_bounds = array<i64: 1, 16, 289>}]} {
    %c0 = arith.constant 0 : index
    %c0_0 = arith.constant 0 : index
    %c0_1 = arith.constant 0 : index
    %0 = vector.load %arg2[%c0, %c0_0, %c0_1] : memref<1x16x289xf32, #tpu.memory_space<vmem>>, vector<1x16x289xf32>
    %1 = vector.shape_cast %0 : vector<1x16x289xf32> to vector<16x289xf32>
    %cst = arith.constant dense<0.000000e+00> : vector<289xf32>
    %2 = vector.multi_reduction <add>, %1, %cst [0] : vector<16x289xf32> to vector<289xf32>
    %3 = vector.shape_cast %2 : vector<289xf32> to vector<1x289xf32>
    %cst_2 = arith.constant 1.600000e+01 : f32
    %4 = vector.broadcast %cst_2 : f32 to vector<1x289xf32>
    %5 = arith.divf %3, %4 : vector<1x289xf32>
    %6 = vector.broadcast %5 : vector<1x289xf32> to vector<16x289xf32>
    %7 = arith.subf %1, %6 : vector<16x289xf32>
    %8 = arith.mulf %7, %7 : vector<16x289xf32>
    %cst_3 = arith.constant dense<0.000000e+00> : vector<289xf32>
    %9 = vector.multi_reduction <add>, %8, %cst_3 [0] : vector<16x289xf32> to vector<289xf32>
    %10 = vector.shape_cast %9 : vector<289xf32> to vector<1x289xf32>
    %cst_4 = arith.constant 1.600000e+01 : f32
    %11 = vector.broadcast %cst_4 : f32 to vector<1x289xf32>
    %12 = arith.divf %10, %11 : vector<1x289xf32>
    %13 = vector.broadcast %5 : vector<1x289xf32> to vector<16x289xf32>
    %14 = arith.subf %1, %13 : vector<16x289xf32>
    %cst_5 = arith.constant 9.99999974E-6 : f32
    %15 = vector.broadcast %cst_5 : f32 to vector<1x289xf32>
    %16 = arith.addf %12, %15 : vector<1x289xf32>
    %17 = math.rsqrt %16 : vector<1x289xf32>
    %18 = vector.broadcast %17 : vector<1x289xf32> to vector<16x289xf32>
    %19 = arith.mulf %14, %18 : vector<16x289xf32>
    %c0_6 = arith.constant 0 : index
    %c0_7 = arith.constant 0 : index
    %c0_8 = arith.constant 0 : index
    %20 = vector.load %arg3[%c0_6, %c0_7, %c0_8] : memref<1x16x1xf32, #tpu.memory_space<vmem>>, vector<1x16x1xf32>
    %21 = vector.shape_cast %20 : vector<1x16x1xf32> to vector<16x1xf32>
    %22 = vector.broadcast %21 : vector<16x1xf32> to vector<16x289xf32>
    %23 = arith.mulf %19, %22 : vector<16x289xf32>
    %c0_9 = arith.constant 0 : index
    %c0_10 = arith.constant 0 : index
    %c0_11 = arith.constant 0 : index
    %24 = vector.load %arg4[%c0_9, %c0_10, %c0_11] : memref<1x16x1xf32, #tpu.memory_space<vmem>>, vector<1x16x1xf32>
    %25 = vector.shape_cast %24 : vector<1x16x1xf32> to vector<16x1xf32>
    %26 = vector.broadcast %25 : vector<16x1xf32> to vector<16x289xf32>
    %27 = arith.addf %23, %26 : vector<16x289xf32>
    %c0_12 = arith.constant 0 : index
    %c0_13 = arith.constant 0 : index
    %c0_14 = arith.constant 0 : index
    %28 = vector.load %arg5[%c0_12, %c0_13, %c0_14] : memref<1x16x289xf32, #tpu.memory_space<vmem>>, vector<1x16x289xf32>
    %29 = vector.shape_cast %28 : vector<1x16x289xf32> to vector<16x289xf32>
    %30 = vector.shape_cast %27 : vector<16x289xf32> to vector<1x16x289xf32>
    tpu.vector_store %arg5[%c0_12, %c0_13, %c0_14], %30 {strides = array<i32>} : memref<1x16x289xf32, #tpu.memory_space<vmem>>, vector<1x16x289xf32>,
    return
  }
  func.func @transform_0(%arg0: i32, %arg1: i32) -> (i32, i32, i32) {
    %c0_i32 = arith.constant 0 : i32
    %c0_i32_0 = arith.constant 0 : i32
    return %arg0, %c0_i32, %arg1 : i32, i32, i32
  }
  func.func @transform_1(%arg0: i32, %arg1: i32) -> (i32, i32, i32) {
    %c0_i32 = arith.constant 0 : i32
    %c0_i32_0 = arith.constant 0 : i32
    %c0_i32_1 = arith.constant 0 : i32
    %c0_i32_2 = arith.constant 0 : i32
    return %c0_i32, %c0_i32_0, %c0_i32_1 : i32, i32, i32
  }
  func.func @transform_2(%arg0: i32, %arg1: i32) -> (i32, i32, i32) {
    %c0_i32 = arith.constant 0 : i32
    %c0_i32_0 = arith.constant 0 : i32
    %c0_i32_1 = arith.constant 0 : i32
    %c0_i32_2 = arith.constant 0 : i32
    return %c0_i32, %c0_i32_0, %c0_i32_1 : i32, i32, i32
  }
  func.func @transform_3(%arg0: i32, %arg1: i32) -> (i32, i32, i32) {
    %c0_i32 = arith.constant 0 : i32
    %c0_i32_0 = arith.constant 0 : i32
    return %arg0, %c0_i32, %arg1 : i32, i32, i32
  }
}

module attributes {stable_mosaic.version = 11 : i64} {
  func.func @_groupnorm_kernel(%arg0: i32, %arg1: memref<1x16x289xf32, #tpu.memory_space<vmem>>, %arg2: memref<1x16x1xf32, #tpu.memory_space<vmem>>, %arg3: memref<1x16x1xf32, #tpu.memory_space<vmem>>, %arg4: memref<1x16x289xf32, #tpu.memory_space<vmem>>) attributes {dimension_semantics = [#tpu.dimension_semantics<parallel>], iteration_bounds = array<i64: 2>, scalar_prefetch = 0 : i64, scratch_operands = 0 : i64, tpu.core_type = #tpu.core_type<tc>, window_params = [{transform_indices = @transform_0, window_bounds = array<i64: 1, 16, 289>}, {pipeline_mode = #tpu.pipeline_mode<synchronous>, transform_indices = @transform_1, window_bounds = array<i64: 1, 16, 1>}, {pipeline_mode = #tpu.pipeline_mode<synchronous>, transform_indices = @transform_2, window_bounds = array<i64: 1, 16, 1>}, {transform_indices = @transform_3, window_bounds = array<i64: 1, 16, 289>}]} {
    %c0 = arith.constant 0 : index
    %c0_0 = arith.constant 0 : index
    %c0_1 = arith.constant 0 : index
    %0 = vector.load %arg1[%c0, %c0_0, %c0_1] : memref<1x16x289xf32, #tpu.memory_space<vmem>>, vector<1x16x289xf32>
    %1 = vector.shape_cast %0 : vector<1x16x289xf32> to vector<16x289xf32>
    %2 = vector.shape_cast %1 : vector<16x289xf32> to vector<1x16x289xf32>
    %cst = arith.constant dense<0.000000e+00> : vector<1xf32>
    %3 = vector.multi_reduction <add>, %2, %cst [1, 2] : vector<1x16x289xf32> to vector<1xf32>
    %4 = vector.shape_cast %3 : vector<1xf32> to vector<1x1x1xf32>
    %5 = vector.extract %4[0, 0, 0] : f32 from vector<1x1x1xf32>
    %6 = vector.broadcast %5 : f32 to vector<1x1xf32>
    %cst_2 = arith.constant 4.624000e+03 : f32
    %7 = vector.broadcast %cst_2 : f32 to vector<1x1xf32>
    %8 = arith.divf %6, %7 : vector<1x1xf32>
    %9 = vector.broadcast %8 : vector<1x1xf32> to vector<16x289xf32>
    %10 = arith.subf %1, %9 : vector<16x289xf32>
    %11 = arith.mulf %10, %10 : vector<16x289xf32>
    %12 = vector.shape_cast %11 : vector<16x289xf32> to vector<1x16x289xf32>
    %cst_3 = arith.constant dense<0.000000e+00> : vector<1xf32>
    %13 = vector.multi_reduction <add>, %12, %cst_3 [1, 2] : vector<1x16x289xf32> to vector<1xf32>
    %14 = vector.shape_cast %13 : vector<1xf32> to vector<1x1x1xf32>
    %15 = vector.extract %14[0, 0, 0] : f32 from vector<1x1x1xf32>
    %16 = vector.broadcast %15 : f32 to vector<1x1xf32>
    %cst_4 = arith.constant 4.624000e+03 : f32
    %17 = vector.broadcast %cst_4 : f32 to vector<1x1xf32>
    %18 = arith.divf %16, %17 : vector<1x1xf32>
    %19 = vector.broadcast %8 : vector<1x1xf32> to vector<16x289xf32>
    %20 = arith.subf %1, %19 : vector<16x289xf32>
    %cst_5 = arith.constant 9.99999974E-6 : f32
    %21 = vector.broadcast %cst_5 : f32 to vector<1x1xf32>
    %22 = arith.addf %18, %21 : vector<1x1xf32>
    %23 = math.rsqrt %22 : vector<1x1xf32>
    %24 = vector.broadcast %23 : vector<1x1xf32> to vector<16x289xf32>
    %25 = arith.mulf %20, %24 : vector<16x289xf32>
    %c0_6 = arith.constant 0 : index
    %c0_7 = arith.constant 0 : index
    %c0_8 = arith.constant 0 : index
    %26 = vector.load %arg2[%c0_6, %c0_7, %c0_8] : memref<1x16x1xf32, #tpu.memory_space<vmem>>, vector<1x16x1xf32>
    %27 = vector.shape_cast %26 : vector<1x16x1xf32> to vector<16x1xf32>
    %28 = vector.broadcast %27 : vector<16x1xf32> to vector<16x289xf32>
    %29 = arith.mulf %25, %28 : vector<16x289xf32>
    %c0_9 = arith.constant 0 : index
    %c0_10 = arith.constant 0 : index
    %c0_11 = arith.constant 0 : index
    %30 = vector.load %arg3[%c0_9, %c0_10, %c0_11] : memref<1x16x1xf32, #tpu.memory_space<vmem>>, vector<1x16x1xf32>
    %31 = vector.shape_cast %30 : vector<1x16x1xf32> to vector<16x1xf32>
    %32 = vector.broadcast %31 : vector<16x1xf32> to vector<16x289xf32>
    %33 = arith.addf %29, %32 : vector<16x289xf32>
    %c0_12 = arith.constant 0 : index
    %c0_13 = arith.constant 0 : index
    %c0_14 = arith.constant 0 : index
    %34 = vector.load %arg4[%c0_12, %c0_13, %c0_14] : memref<1x16x289xf32, #tpu.memory_space<vmem>>, vector<1x16x289xf32>
    %35 = vector.shape_cast %34 : vector<1x16x289xf32> to vector<16x289xf32>
    %36 = vector.shape_cast %33 : vector<16x289xf32> to vector<1x16x289xf32>
    tpu.vector_store %arg4[%c0_12, %c0_13, %c0_14], %36 {strides = array<i32>} : memref<1x16x289xf32, #tpu.memory_space<vmem>>, vector<1x16x289xf32>,
    return
  }
  func.func @transform_0(%arg0: i32) -> (i32, i32, i32) {
    %c0_i32 = arith.constant 0 : i32
    %c0_i32_0 = arith.constant 0 : i32
    %c0_i32_1 = arith.constant 0 : i32
    return %arg0, %c0_i32, %c0_i32_0 : i32, i32, i32
  }
  func.func @transform_1(%arg0: i32) -> (i32, i32, i32) {
    %c0_i32 = arith.constant 0 : i32
    %c0_i32_0 = arith.constant 0 : i32
    %c0_i32_1 = arith.constant 0 : i32
    %c0_i32_2 = arith.constant 0 : i32
    return %c0_i32, %c0_i32_0, %c0_i32_1 : i32, i32, i32
  }
  func.func @transform_2(%arg0: i32) -> (i32, i32, i32) {
    %c0_i32 = arith.constant 0 : i32
    %c0_i32_0 = arith.constant 0 : i32
    %c0_i32_1 = arith.constant 0 : i32
    %c0_i32_2 = arith.constant 0 : i32
    return %c0_i32, %c0_i32_0, %c0_i32_1 : i32, i32, i32
  }
  func.func @transform_3(%arg0: i32) -> (i32, i32, i32) {
    %c0_i32 = arith.constant 0 : i32
    %c0_i32_0 = arith.constant 0 : i32
    %c0_i32_1 = arith.constant 0 : i32
    return %arg0, %c0_i32, %c0_i32_0 : i32, i32, i32
  }
}

module attributes {stable_mosaic.version = 11 : i64} {
  func.func @_matmul_kernel(%arg0: i32, %arg1: i32, %arg2: i32, %arg3: memref<544x32xf32, #tpu.memory_space<vmem>>, %arg4: memref<32x128xf32, #tpu.memory_space<vmem>>, %arg5: memref<1x128xf32, #tpu.memory_space<vmem>>, %arg6: memref<544x128xf32, #tpu.memory_space<vmem>>) attributes {dimension_semantics = [#tpu.dimension_semantics<parallel>, #tpu.dimension_semantics<parallel>, #tpu.dimension_semantics<arbitrary>], iteration_bounds = array<i64: 1, 1, 1>, scalar_prefetch = 0 : i64, scratch_operands = 0 : i64, tpu.core_type = #tpu.core_type<tc>, window_params = [{transform_indices = @transform_0, window_bounds = array<i64: 544, 32>}, {transform_indices = @transform_1, window_bounds = array<i64: 32, 128>}, {transform_indices = @transform_2, window_bounds = array<i64: 1, 128>}, {transform_indices = @transform_3, window_bounds = array<i64: 544, 128>}]} {
    %c0 = arith.constant 0 : index
    %c0_0 = arith.constant 0 : index
    %0 = vector.load %arg3[%c0, %c0_0] : memref<544x32xf32, #tpu.memory_space<vmem>>, vector<544x32xf32>
    %1 = arith.truncf %0 : vector<544x32xf32> to vector<544x32xbf16>
    %c0_1 = arith.constant 0 : index
    %c0_2 = arith.constant 0 : index
    %2 = vector.load %arg4[%c0_1, %c0_2] : memref<32x128xf32, #tpu.memory_space<vmem>>, vector<32x128xf32>
    %3 = arith.truncf %2 : vector<32x128xf32> to vector<32x128xbf16>
    %cst = arith.constant dense<0.000000e+00> : vector<544x128xf32>
    %4 = tpu.matmul %1, %3, %cst {dimension_numbers = #tpu.dot_dimension_numbers<[1], [0], [0], [1], [0, 0, 1, 1], [], []>} : vector<544x32xbf16>, vector<32x128xbf16>, vector<544x128xf32> -> vector<544x128xf32>
    %c0_i32 = arith.constant 0 : i32
    %5 = arith.cmpi eq, %arg2, %c0_i32 : i32
    %6 = arith.extui %5 : i1 to i32
    %c0_i32_3 = arith.constant 0 : i32
    %7 = arith.cmpi ne, %6, %c0_i32_3 : i32
    scf.if %7 {
      %c0_6 = arith.constant 0 : index
      %c0_7 = arith.constant 0 : index
      %11 = vector.load %arg5[%c0_6, %c0_7] : memref<1x128xf32, #tpu.memory_space<vmem>>, vector<1x128xf32>
      %12 = vector.broadcast %11 : vector<1x128xf32> to vector<544x128xf32>
      %13 = arith.addf %4, %12 : vector<544x128xf32>
      %c0_8 = arith.constant 0 : index
      %c0_9 = arith.constant 0 : index
      %14 = vector.load %arg6[%c0_8, %c0_9] : memref<544x128xf32, #tpu.memory_space<vmem>>, vector<544x128xf32>
      tpu.vector_store %arg6[%c0_8, %c0_9], %13 {strides = array<i32>} : memref<544x128xf32, #tpu.memory_space<vmem>>, vector<544x128xf32>,
    } else {
    }
    %c0_i32_4 = arith.constant 0 : i32
    %8 = arith.cmpi sgt, %arg2, %c0_i32_4 : i32
    %9 = arith.extui %8 : i1 to i32
    %c0_i32_5 = arith.constant 0 : i32
    %10 = arith.cmpi ne, %9, %c0_i32_5 : i32
    scf.if %10 {
      %c0_6 = arith.constant 0 : index
      %c0_7 = arith.constant 0 : index
      %11 = vector.load %arg6[%c0_6, %c0_7] : memref<544x128xf32, #tpu.memory_space<vmem>>, vector<544x128xf32>
      %12 = arith.addf %11, %4 : vector<544x128xf32>
      %c0_8 = arith.constant 0 : index
      %c0_9 = arith.constant 0 : index
      %13 = vector.load %arg6[%c0_8, %c0_9] : memref<544x128xf32, #tpu.memory_space<vmem>>, vector<544x128xf32>
      tpu.vector_store %arg6[%c0_8, %c0_9], %12 {strides = array<i32>} : memref<544x128xf32, #tpu.memory_space<vmem>>, vector<544x128xf32>,
    } else {
    }
    return
  }
  func.func @transform_0(%arg0: i32, %arg1: i32, %arg2: i32) -> (i32, i32) {
    %c0_i32 = arith.constant 0 : i32
    return %arg0, %arg2 : i32, i32
  }
  func.func @transform_1(%arg0: i32, %arg1: i32, %arg2: i32) -> (i32, i32) {
    %c0_i32 = arith.constant 0 : i32
    return %arg2, %arg1 : i32, i32
  }
  func.func @transform_2(%arg0: i32, %arg1: i32, %arg2: i32) -> (i32, i32) {
    %c0_i32 = arith.constant 0 : i32
    %c0_i32_0 = arith.constant 0 : i32
    return %c0_i32, %arg1 : i32, i32
  }
  func.func @transform_3(%arg0: i32, %arg1: i32, %arg2: i32) -> (i32, i32) {
    %c0_i32 = arith.constant 0 : i32
    return %arg0, %arg1 : i32, i32
  }
}

module attributes {stable_mosaic.version = 11 : i64} {
  func.func @_matmul_kernel(%arg0: i32, %arg1: i32, %arg2: i32, %arg3: memref<578x16xf32, #tpu.memory_space<vmem>>, %arg4: memref<16x32xf32, #tpu.memory_space<vmem>>, %arg5: memref<1x32xf32, #tpu.memory_space<vmem>>, %arg6: memref<578x32xf32, #tpu.memory_space<vmem>>) attributes {dimension_semantics = [#tpu.dimension_semantics<parallel>, #tpu.dimension_semantics<parallel>, #tpu.dimension_semantics<arbitrary>], iteration_bounds = array<i64: 1, 1, 1>, scalar_prefetch = 0 : i64, scratch_operands = 0 : i64, tpu.core_type = #tpu.core_type<tc>, window_params = [{transform_indices = @transform_0, window_bounds = array<i64: 578, 16>}, {transform_indices = @transform_1, window_bounds = array<i64: 16, 32>}, {transform_indices = @transform_2, window_bounds = array<i64: 1, 32>}, {transform_indices = @transform_3, window_bounds = array<i64: 578, 32>}]} {
    %c0 = arith.constant 0 : index
    %c0_0 = arith.constant 0 : index
    %0 = vector.load %arg3[%c0, %c0_0] : memref<578x16xf32, #tpu.memory_space<vmem>>, vector<578x16xf32>
    %1 = arith.truncf %0 : vector<578x16xf32> to vector<578x16xbf16>
    %c0_1 = arith.constant 0 : index
    %c0_2 = arith.constant 0 : index
    %2 = vector.load %arg4[%c0_1, %c0_2] : memref<16x32xf32, #tpu.memory_space<vmem>>, vector<16x32xf32>
    %3 = arith.truncf %2 : vector<16x32xf32> to vector<16x32xbf16>
    %cst = arith.constant dense<0.000000e+00> : vector<578x32xf32>
    %4 = tpu.matmul %1, %3, %cst {dimension_numbers = #tpu.dot_dimension_numbers<[1], [0], [0], [1], [0, 0, 1, 1], [], []>} : vector<578x16xbf16>, vector<16x32xbf16>, vector<578x32xf32> -> vector<578x32xf32>
    %c0_i32 = arith.constant 0 : i32
    %5 = arith.cmpi eq, %arg2, %c0_i32 : i32
    %6 = arith.extui %5 : i1 to i32
    %c0_i32_3 = arith.constant 0 : i32
    %7 = arith.cmpi ne, %6, %c0_i32_3 : i32
    scf.if %7 {
      %c0_6 = arith.constant 0 : index
      %c0_7 = arith.constant 0 : index
      %11 = vector.load %arg5[%c0_6, %c0_7] : memref<1x32xf32, #tpu.memory_space<vmem>>, vector<1x32xf32>
      %12 = vector.broadcast %11 : vector<1x32xf32> to vector<578x32xf32>
      %13 = arith.addf %4, %12 : vector<578x32xf32>
      %c0_8 = arith.constant 0 : index
      %c0_9 = arith.constant 0 : index
      %14 = vector.load %arg6[%c0_8, %c0_9] : memref<578x32xf32, #tpu.memory_space<vmem>>, vector<578x32xf32>
      tpu.vector_store %arg6[%c0_8, %c0_9], %13 {strides = array<i32>} : memref<578x32xf32, #tpu.memory_space<vmem>>, vector<578x32xf32>,
    } else {
    }
    %c0_i32_4 = arith.constant 0 : i32
    %8 = arith.cmpi sgt, %arg2, %c0_i32_4 : i32
    %9 = arith.extui %8 : i1 to i32
    %c0_i32_5 = arith.constant 0 : i32
    %10 = arith.cmpi ne, %9, %c0_i32_5 : i32
    scf.if %10 {
      %c0_6 = arith.constant 0 : index
      %c0_7 = arith.constant 0 : index
      %11 = vector.load %arg6[%c0_6, %c0_7] : memref<578x32xf32, #tpu.memory_space<vmem>>, vector<578x32xf32>
      %12 = arith.addf %11, %4 : vector<578x32xf32>
      %c0_8 = arith.constant 0 : index
      %c0_9 = arith.constant 0 : index
      %13 = vector.load %arg6[%c0_8, %c0_9] : memref<578x32xf32, #tpu.memory_space<vmem>>, vector<578x32xf32>
      tpu.vector_store %arg6[%c0_8, %c0_9], %12 {strides = array<i32>} : memref<578x32xf32, #tpu.memory_space<vmem>>, vector<578x32xf32>,
    } else {
    }
    return
  }
  func.func @transform_0(%arg0: i32, %arg1: i32, %arg2: i32) -> (i32, i32) {
    %c0_i32 = arith.constant 0 : i32
    return %arg0, %arg2 : i32, i32
  }
  func.func @transform_1(%arg0: i32, %arg1: i32, %arg2: i32) -> (i32, i32) {
    %c0_i32 = arith.constant 0 : i32
    return %arg2, %arg1 : i32, i32
  }
  func.func @transform_2(%arg0: i32, %arg1: i32, %arg2: i32) -> (i32, i32) {
    %c0_i32 = arith.constant 0 : i32
    %c0_i32_0 = arith.constant 0 : i32
    return %c0_i32, %arg1 : i32, i32
  }
  func.func @transform_3(%arg0: i32, %arg1: i32, %arg2: i32) -> (i32, i32) {
    %c0_i32 = arith.constant 0 : i32
    return %arg0, %arg1 : i32, i32
  }
}

module attributes {stable_mosaic.version = 11 : i64} {
  func.func @_rownorm_kernel(%arg0: i32, %arg1: i32, %arg2: memref<1x34x68xf32, #tpu.memory_space<vmem>>, %arg3: memref<1x1x68xf32, #tpu.memory_space<vmem>>, %arg4: memref<1x1x68xf32, #tpu.memory_space<vmem>>, %arg5: memref<1x34x68xf32, #tpu.memory_space<vmem>>) attributes {dimension_semantics = [#tpu.dimension_semantics<parallel>, #tpu.dimension_semantics<parallel>], iteration_bounds = array<i64: 2, 1>, scalar_prefetch = 0 : i64, scratch_operands = 0 : i64, tpu.core_type = #tpu.core_type<tc>, window_params = [{transform_indices = @transform_0, window_bounds = array<i64: 1, 34, 68>}, {transform_indices = @transform_1, window_bounds = array<i64: 1, 1, 68>}, {transform_indices = @transform_2, window_bounds = array<i64: 1, 1, 68>}, {transform_indices = @transform_3, window_bounds = array<i64: 1, 34, 68>}]} {
    %c0 = arith.constant 0 : index
    %c0_0 = arith.constant 0 : index
    %c0_1 = arith.constant 0 : index
    %0 = vector.load %arg2[%c0, %c0_0, %c0_1] : memref<1x34x68xf32, #tpu.memory_space<vmem>>, vector<1x34x68xf32>
    %1 = vector.shape_cast %0 : vector<1x34x68xf32> to vector<34x68xf32>
    %cst = arith.constant dense<0.000000e+00> : vector<34xf32>
    %2 = vector.multi_reduction <add>, %1, %cst [1] : vector<34x68xf32> to vector<34xf32>
    %3 = vector.shape_cast %2 : vector<34xf32> to vector<34x1xf32>
    %cst_2 = arith.constant 6.800000e+01 : f32
    %4 = vector.broadcast %cst_2 : f32 to vector<34x1xf32>
    %5 = arith.divf %3, %4 : vector<34x1xf32>
    %6 = vector.broadcast %5 : vector<34x1xf32> to vector<34x68xf32>
    %7 = arith.subf %1, %6 : vector<34x68xf32>
    %8 = arith.mulf %7, %7 : vector<34x68xf32>
    %cst_3 = arith.constant dense<0.000000e+00> : vector<34xf32>
    %9 = vector.multi_reduction <add>, %8, %cst_3 [1] : vector<34x68xf32> to vector<34xf32>
    %10 = vector.shape_cast %9 : vector<34xf32> to vector<34x1xf32>
    %cst_4 = arith.constant 6.800000e+01 : f32
    %11 = vector.broadcast %cst_4 : f32 to vector<34x1xf32>
    %12 = arith.divf %10, %11 : vector<34x1xf32>
    %13 = vector.broadcast %5 : vector<34x1xf32> to vector<34x68xf32>
    %14 = arith.subf %1, %13 : vector<34x68xf32>
    %cst_5 = arith.constant 9.99999974E-6 : f32
    %15 = vector.broadcast %cst_5 : f32 to vector<34x1xf32>
    %16 = arith.addf %12, %15 : vector<34x1xf32>
    %17 = math.rsqrt %16 : vector<34x1xf32>
    %18 = vector.broadcast %17 : vector<34x1xf32> to vector<34x68xf32>
    %19 = arith.mulf %14, %18 : vector<34x68xf32>
    %c0_6 = arith.constant 0 : index
    %c0_7 = arith.constant 0 : index
    %c0_8 = arith.constant 0 : index
    %20 = vector.load %arg3[%c0_6, %c0_7, %c0_8] : memref<1x1x68xf32, #tpu.memory_space<vmem>>, vector<1x1x68xf32>
    %21 = vector.shape_cast %20 : vector<1x1x68xf32> to vector<1x68xf32>
    %22 = vector.broadcast %21 : vector<1x68xf32> to vector<34x68xf32>
    %23 = arith.mulf %19, %22 : vector<34x68xf32>
    %c0_9 = arith.constant 0 : index
    %c0_10 = arith.constant 0 : index
    %c0_11 = arith.constant 0 : index
    %24 = vector.load %arg4[%c0_9, %c0_10, %c0_11] : memref<1x1x68xf32, #tpu.memory_space<vmem>>, vector<1x1x68xf32>
    %25 = vector.shape_cast %24 : vector<1x1x68xf32> to vector<1x68xf32>
    %26 = vector.broadcast %25 : vector<1x68xf32> to vector<34x68xf32>
    %27 = arith.addf %23, %26 : vector<34x68xf32>
    %c0_12 = arith.constant 0 : index
    %c0_13 = arith.constant 0 : index
    %c0_14 = arith.constant 0 : index
    %28 = vector.load %arg5[%c0_12, %c0_13, %c0_14] : memref<1x34x68xf32, #tpu.memory_space<vmem>>, vector<1x34x68xf32>
    %29 = vector.shape_cast %28 : vector<1x34x68xf32> to vector<34x68xf32>
    %30 = vector.shape_cast %27 : vector<34x68xf32> to vector<1x34x68xf32>
    tpu.vector_store %arg5[%c0_12, %c0_13, %c0_14], %30 {strides = array<i32>} : memref<1x34x68xf32, #tpu.memory_space<vmem>>, vector<1x34x68xf32>,
    return
  }
  func.func @transform_0(%arg0: i32, %arg1: i32) -> (i32, i32, i32) {
    %c0_i32 = arith.constant 0 : i32
    %c0_i32_0 = arith.constant 0 : i32
    return %arg0, %arg1, %c0_i32 : i32, i32, i32
  }
  func.func @transform_1(%arg0: i32, %arg1: i32) -> (i32, i32, i32) {
    %c0_i32 = arith.constant 0 : i32
    %c0_i32_0 = arith.constant 0 : i32
    %c0_i32_1 = arith.constant 0 : i32
    return %arg0, %c0_i32, %c0_i32_0 : i32, i32, i32
  }
  func.func @transform_2(%arg0: i32, %arg1: i32) -> (i32, i32, i32) {
    %c0_i32 = arith.constant 0 : i32
    %c0_i32_0 = arith.constant 0 : i32
    %c0_i32_1 = arith.constant 0 : i32
    return %arg0, %c0_i32, %c0_i32_0 : i32, i32, i32
  }
  func.func @transform_3(%arg0: i32, %arg1: i32) -> (i32, i32, i32) {
    %c0_i32 = arith.constant 0 : i32
    %c0_i32_0 = arith.constant 0 : i32
    return %arg0, %arg1, %c0_i32 : i32, i32, i32
  }
}

module attributes {stable_mosaic.version = 11 : i64} {
  func.func @_rownorm_kernel(%arg0: i32, %arg1: i32, %arg2: memref<1x34x136xf32, #tpu.memory_space<vmem>>, %arg3: memref<1x1x136xf32, #tpu.memory_space<vmem>>, %arg4: memref<1x1x136xf32, #tpu.memory_space<vmem>>, %arg5: memref<1x34x136xf32, #tpu.memory_space<vmem>>) attributes {dimension_semantics = [#tpu.dimension_semantics<parallel>, #tpu.dimension_semantics<parallel>], iteration_bounds = array<i64: 2, 1>, scalar_prefetch = 0 : i64, scratch_operands = 0 : i64, tpu.core_type = #tpu.core_type<tc>, window_params = [{transform_indices = @transform_0, window_bounds = array<i64: 1, 34, 136>}, {transform_indices = @transform_1, window_bounds = array<i64: 1, 1, 136>}, {transform_indices = @transform_2, window_bounds = array<i64: 1, 1, 136>}, {transform_indices = @transform_3, window_bounds = array<i64: 1, 34, 136>}]} {
    %c0 = arith.constant 0 : index
    %c0_0 = arith.constant 0 : index
    %c0_1 = arith.constant 0 : index
    %0 = vector.load %arg2[%c0, %c0_0, %c0_1] : memref<1x34x136xf32, #tpu.memory_space<vmem>>, vector<1x34x136xf32>
    %1 = vector.shape_cast %0 : vector<1x34x136xf32> to vector<34x136xf32>
    %cst = arith.constant dense<0.000000e+00> : vector<34xf32>
    %2 = vector.multi_reduction <add>, %1, %cst [1] : vector<34x136xf32> to vector<34xf32>
    %3 = vector.shape_cast %2 : vector<34xf32> to vector<34x1xf32>
    %cst_2 = arith.constant 1.360000e+02 : f32
    %4 = vector.broadcast %cst_2 : f32 to vector<34x1xf32>
    %5 = arith.divf %3, %4 : vector<34x1xf32>
    %6 = vector.broadcast %5 : vector<34x1xf32> to vector<34x136xf32>
    %7 = arith.subf %1, %6 : vector<34x136xf32>
    %8 = arith.mulf %7, %7 : vector<34x136xf32>
    %cst_3 = arith.constant dense<0.000000e+00> : vector<34xf32>
    %9 = vector.multi_reduction <add>, %8, %cst_3 [1] : vector<34x136xf32> to vector<34xf32>
    %10 = vector.shape_cast %9 : vector<34xf32> to vector<34x1xf32>
    %cst_4 = arith.constant 1.360000e+02 : f32
    %11 = vector.broadcast %cst_4 : f32 to vector<34x1xf32>
    %12 = arith.divf %10, %11 : vector<34x1xf32>
    %13 = vector.broadcast %5 : vector<34x1xf32> to vector<34x136xf32>
    %14 = arith.subf %1, %13 : vector<34x136xf32>
    %cst_5 = arith.constant 9.99999974E-6 : f32
    %15 = vector.broadcast %cst_5 : f32 to vector<34x1xf32>
    %16 = arith.addf %12, %15 : vector<34x1xf32>
    %17 = math.rsqrt %16 : vector<34x1xf32>
    %18 = vector.broadcast %17 : vector<34x1xf32> to vector<34x136xf32>
    %19 = arith.mulf %14, %18 : vector<34x136xf32>
    %c0_6 = arith.constant 0 : index
    %c0_7 = arith.constant 0 : index
    %c0_8 = arith.constant 0 : index
    %20 = vector.load %arg3[%c0_6, %c0_7, %c0_8] : memref<1x1x136xf32, #tpu.memory_space<vmem>>, vector<1x1x136xf32>
    %21 = vector.shape_cast %20 : vector<1x1x136xf32> to vector<1x136xf32>
    %22 = vector.broadcast %21 : vector<1x136xf32> to vector<34x136xf32>
    %23 = arith.mulf %19, %22 : vector<34x136xf32>
    %c0_9 = arith.constant 0 : index
    %c0_10 = arith.constant 0 : index
    %c0_11 = arith.constant 0 : index
    %24 = vector.load %arg4[%c0_9, %c0_10, %c0_11] : memref<1x1x136xf32, #tpu.memory_space<vmem>>, vector<1x1x136xf32>
    %25 = vector.shape_cast %24 : vector<1x1x136xf32> to vector<1x136xf32>
    %26 = vector.broadcast %25 : vector<1x136xf32> to vector<34x136xf32>
    %27 = arith.addf %23, %26 : vector<34x136xf32>
    %c0_12 = arith.constant 0 : index
    %c0_13 = arith.constant 0 : index
    %c0_14 = arith.constant 0 : index
    %28 = vector.load %arg5[%c0_12, %c0_13, %c0_14] : memref<1x34x136xf32, #tpu.memory_space<vmem>>, vector<1x34x136xf32>
    %29 = vector.shape_cast %28 : vector<1x34x136xf32> to vector<34x136xf32>
    %30 = vector.shape_cast %27 : vector<34x136xf32> to vector<1x34x136xf32>
    tpu.vector_store %arg5[%c0_12, %c0_13, %c0_14], %30 {strides = array<i32>} : memref<1x34x136xf32, #tpu.memory_space<vmem>>, vector<1x34x136xf32>,
    return
  }
  func.func @transform_0(%arg0: i32, %arg1: i32) -> (i32, i32, i32) {
    %c0_i32 = arith.constant 0 : i32
    %c0_i32_0 = arith.constant 0 : i32
    return %arg0, %arg1, %c0_i32 : i32, i32, i32
  }
  func.func @transform_1(%arg0: i32, %arg1: i32) -> (i32, i32, i32) {
    %c0_i32 = arith.constant 0 : i32
    %c0_i32_0 = arith.constant 0 : i32
    %c0_i32_1 = arith.constant 0 : i32
    return %arg0, %c0_i32, %c0_i32_0 : i32, i32, i32
  }
  func.func @transform_2(%arg0: i32, %arg1: i32) -> (i32, i32, i32) {
    %c0_i32 = arith.constant 0 : i32
    %c0_i32_0 = arith.constant 0 : i32
    %c0_i32_1 = arith.constant 0 : i32
    return %arg0, %c0_i32, %c0_i32_0 : i32, i32, i32
  }
  func.func @transform_3(%arg0: i32, %arg1: i32) -> (i32, i32, i32) {
    %c0_i32 = arith.constant 0 : i32
    %c0_i32_0 = arith.constant 0 : i32
    return %arg0, %arg1, %c0_i32 : i32, i32, i32
  }
}

module attributes {stable_mosaic.version = 11 : i64} {
  func.func @_attn_kernel(%arg0: i32, %arg1: memref<2x17x68xf32, #tpu.memory_space<vmem>>, %arg2: memref<2x17x68xf32, #tpu.memory_space<vmem>>, %arg3: memref<2x17x136xf32, #tpu.memory_space<vmem>>, %arg4: memref<2x17x136xf32, #tpu.memory_space<vmem>>) attributes {dimension_semantics = [#tpu.dimension_semantics<parallel>], iteration_bounds = array<i64: 2>, scalar_prefetch = 0 : i64, scratch_operands = 0 : i64, tpu.core_type = #tpu.core_type<tc>, window_params = [{transform_indices = @transform_0, window_bounds = array<i64: 2, 17, 68>}, {transform_indices = @transform_1, window_bounds = array<i64: 2, 17, 68>}, {transform_indices = @transform_2, window_bounds = array<i64: 2, 17, 136>}, {transform_indices = @transform_3, window_bounds = array<i64: 2, 17, 136>}]} {
    %c0 = arith.constant 0 : index
    %c0_0 = arith.constant 0 : index
    %c0_1 = arith.constant 0 : index
    %0 = vector.load %arg1[%c0, %c0_0, %c0_1] : memref<2x17x68xf32, #tpu.memory_space<vmem>>, vector<2x17x68xf32>
    %1 = arith.truncf %0 : vector<2x17x68xf32> to vector<2x17x68xbf16>
    %c0_2 = arith.constant 0 : index
    %c0_3 = arith.constant 0 : index
    %c0_4 = arith.constant 0 : index
    %2 = vector.load %arg2[%c0_2, %c0_3, %c0_4] : memref<2x17x68xf32, #tpu.memory_space<vmem>>, vector<2x17x68xf32>
    %3 = arith.truncf %2 : vector<2x17x68xf32> to vector<2x17x68xbf16>
    %c0_5 = arith.constant 0 : index
    %c0_6 = arith.constant 0 : index
    %c0_7 = arith.constant 0 : index
    %4 = vector.load %arg3[%c0_5, %c0_6, %c0_7] : memref<2x17x136xf32, #tpu.memory_space<vmem>>, vector<2x17x136xf32>
    %5 = arith.truncf %4 : vector<2x17x136xf32> to vector<2x17x136xbf16>
    "tpu.trace_start"() <{level = 10 : i32, message = "hqd,hkd->hqk"}> : () -> ()
    %cst = arith.constant dense<0.000000e+00> : vector<2x17x17xf32>
    %6 = tpu.matmul %1, %3, %cst {dimension_numbers = #tpu.dot_dimension_numbers<[2], [2], [1], [1], [0, 0, 0, 1, 1, 1], [0], [0]>} : vector<2x17x68xbf16>, vector<2x17x68xbf16>, vector<2x17x17xf32> -> vector<2x17x17xf32>
    "tpu.trace_stop"() : () -> ()
    %cst_8 = arith.constant 0.12126781 : f32
    %7 = vector.broadcast %cst_8 : f32 to vector<2x17x17xf32>
    %8 = arith.mulf %6, %7 : vector<2x17x17xf32>
    %cst_9 = arith.constant dense<0xFF800000> : vector<2x17xf32>
    %9 = vector.multi_reduction <maximumf>, %8, %cst_9 [2] : vector<2x17x17xf32> to vector<2x17xf32>
    %10 = vector.shape_cast %9 : vector<2x17xf32> to vector<2x17x1xf32>
    %11 = vector.broadcast %10 : vector<2x17x1xf32> to vector<2x17x17xf32>
    %12 = arith.subf %8, %11 : vector<2x17x17xf32>
    %13 = math.exp %12 : vector<2x17x17xf32>
    %cst_10 = arith.constant dense<0.000000e+00> : vector<2x17xf32>
    %14 = vector.multi_reduction <add>, %13, %cst_10 [2] : vector<2x17x17xf32> to vector<2x17xf32>
    %15 = vector.shape_cast %14 : vector<2x17xf32> to vector<2x17x1xf32>
    %16 = tpu.reciprocal %15 {approx = true} : vector<2x17x1xf32> -> vector<2x17x1xf32>
    %17 = vector.broadcast %16 : vector<2x17x1xf32> to vector<2x17x17xf32>
    %18 = arith.mulf %13, %17 : vector<2x17x17xf32>
    %19 = arith.truncf %18 : vector<2x17x17xf32> to vector<2x17x17xbf16>
    "tpu.trace_start"() <{level = 10 : i32, message = "hqk,hkd->hqd"}> : () -> ()
    %cst_11 = arith.constant dense<0.000000e+00> : vector<2x17x136xf32>
    %20 = tpu.matmul %19, %5, %cst_11 {dimension_numbers = #tpu.dot_dimension_numbers<[2], [1], [1], [2], [0, 0, 0, 1, 1, 2], [0], [0]>} : vector<2x17x17xbf16>, vector<2x17x136xbf16>, vector<2x17x136xf32> -> vector<2x17x136xf32>
    "tpu.trace_stop"() : () -> ()
    %c0_12 = arith.constant 0 : index
    %c0_13 = arith.constant 0 : index
    %c0_14 = arith.constant 0 : index
    %21 = vector.load %arg4[%c0_12, %c0_13, %c0_14] : memref<2x17x136xf32, #tpu.memory_space<vmem>>, vector<2x17x136xf32>
    tpu.vector_store %arg4[%c0_12, %c0_13, %c0_14], %20 {strides = array<i32>} : memref<2x17x136xf32, #tpu.memory_space<vmem>>, vector<2x17x136xf32>,
    return
  }
  func.func @transform_0(%arg0: i32) -> (i32, i32, i32) {
    %c0_i32 = arith.constant 0 : i32
    %c0_i32_0 = arith.constant 0 : i32
    %c0_i32_1 = arith.constant 0 : i32
    return %arg0, %c0_i32, %c0_i32_0 : i32, i32, i32
  }
  func.func @transform_1(%arg0: i32) -> (i32, i32, i32) {
    %c0_i32 = arith.constant 0 : i32
    %c0_i32_0 = arith.constant 0 : i32
    %c0_i32_1 = arith.constant 0 : i32
    return %arg0, %c0_i32, %c0_i32_0 : i32, i32, i32
  }
  func.func @transform_2(%arg0: i32) -> (i32, i32, i32) {
    %c0_i32 = arith.constant 0 : i32
    %c0_i32_0 = arith.constant 0 : i32
    %c0_i32_1 = arith.constant 0 : i32
    return %arg0, %c0_i32, %c0_i32_0 : i32, i32, i32
  }
  func.func @transform_3(%arg0: i32) -> (i32, i32, i32) {
    %c0_i32 = arith.constant 0 : i32
    %c0_i32_0 = arith.constant 0 : i32
    %c0_i32_1 = arith.constant 0 : i32
    return %arg0, %c0_i32, %c0_i32_0 : i32, i32, i32
  }
}

module attributes {stable_mosaic.version = 11 : i64} {
  func.func @_matmul_kernel(%arg0: i32, %arg1: i32, %arg2: i32, %arg3: memref<578x16xf32, #tpu.memory_space<vmem>>, %arg4: memref<16x16xf32, #tpu.memory_space<vmem>>, %arg5: memref<1x16xf32, #tpu.memory_space<vmem>>, %arg6: memref<578x16xf32, #tpu.memory_space<vmem>>) attributes {dimension_semantics = [#tpu.dimension_semantics<parallel>, #tpu.dimension_semantics<parallel>, #tpu.dimension_semantics<arbitrary>], iteration_bounds = array<i64: 1, 1, 1>, scalar_prefetch = 0 : i64, scratch_operands = 0 : i64, tpu.core_type = #tpu.core_type<tc>, window_params = [{transform_indices = @transform_0, window_bounds = array<i64: 578, 16>}, {transform_indices = @transform_1, window_bounds = array<i64: 16, 16>}, {transform_indices = @transform_2, window_bounds = array<i64: 1, 16>}, {transform_indices = @transform_3, window_bounds = array<i64: 578, 16>}]} {
    %c0 = arith.constant 0 : index
    %c0_0 = arith.constant 0 : index
    %0 = vector.load %arg3[%c0, %c0_0] : memref<578x16xf32, #tpu.memory_space<vmem>>, vector<578x16xf32>
    %1 = arith.truncf %0 : vector<578x16xf32> to vector<578x16xbf16>
    %c0_1 = arith.constant 0 : index
    %c0_2 = arith.constant 0 : index
    %2 = vector.load %arg4[%c0_1, %c0_2] : memref<16x16xf32, #tpu.memory_space<vmem>>, vector<16x16xf32>
    %3 = arith.truncf %2 : vector<16x16xf32> to vector<16x16xbf16>
    %cst = arith.constant dense<0.000000e+00> : vector<578x16xf32>
    %4 = tpu.matmul %1, %3, %cst {dimension_numbers = #tpu.dot_dimension_numbers<[1], [0], [0], [1], [0, 0, 1, 1], [], []>} : vector<578x16xbf16>, vector<16x16xbf16>, vector<578x16xf32> -> vector<578x16xf32>
    %c0_i32 = arith.constant 0 : i32
    %5 = arith.cmpi eq, %arg2, %c0_i32 : i32
    %6 = arith.extui %5 : i1 to i32
    %c0_i32_3 = arith.constant 0 : i32
    %7 = arith.cmpi ne, %6, %c0_i32_3 : i32
    scf.if %7 {
      %c0_6 = arith.constant 0 : index
      %c0_7 = arith.constant 0 : index
      %11 = vector.load %arg5[%c0_6, %c0_7] : memref<1x16xf32, #tpu.memory_space<vmem>>, vector<1x16xf32>
      %12 = vector.broadcast %11 : vector<1x16xf32> to vector<578x16xf32>
      %13 = arith.addf %4, %12 : vector<578x16xf32>
      %c0_8 = arith.constant 0 : index
      %c0_9 = arith.constant 0 : index
      %14 = vector.load %arg6[%c0_8, %c0_9] : memref<578x16xf32, #tpu.memory_space<vmem>>, vector<578x16xf32>
      tpu.vector_store %arg6[%c0_8, %c0_9], %13 {strides = array<i32>} : memref<578x16xf32, #tpu.memory_space<vmem>>, vector<578x16xf32>,
    } else {
    }
    %c0_i32_4 = arith.constant 0 : i32
    %8 = arith.cmpi sgt, %arg2, %c0_i32_4 : i32
    %9 = arith.extui %8 : i1 to i32
    %c0_i32_5 = arith.constant 0 : i32
    %10 = arith.cmpi ne, %9, %c0_i32_5 : i32
    scf.if %10 {
      %c0_6 = arith.constant 0 : index
      %c0_7 = arith.constant 0 : index
      %11 = vector.load %arg6[%c0_6, %c0_7] : memref<578x16xf32, #tpu.memory_space<vmem>>, vector<578x16xf32>
      %12 = arith.addf %11, %4 : vector<578x16xf32>
      %c0_8 = arith.constant 0 : index
      %c0_9 = arith.constant 0 : index
      %13 = vector.load %arg6[%c0_8, %c0_9] : memref<578x16xf32, #tpu.memory_space<vmem>>, vector<578x16xf32>
      tpu.vector_store %arg6[%c0_8, %c0_9], %12 {strides = array<i32>} : memref<578x16xf32, #tpu.memory_space<vmem>>, vector<578x16xf32>,
    } else {
    }
    return
  }
  func.func @transform_0(%arg0: i32, %arg1: i32, %arg2: i32) -> (i32, i32) {
    %c0_i32 = arith.constant 0 : i32
    return %arg0, %arg2 : i32, i32
  }
  func.func @transform_1(%arg0: i32, %arg1: i32, %arg2: i32) -> (i32, i32) {
    %c0_i32 = arith.constant 0 : i32
    return %arg2, %arg1 : i32, i32
  }
  func.func @transform_2(%arg0: i32, %arg1: i32, %arg2: i32) -> (i32, i32) {
    %c0_i32 = arith.constant 0 : i32
    %c0_i32_0 = arith.constant 0 : i32
    return %c0_i32, %arg1 : i32, i32
  }
  func.func @transform_3(%arg0: i32, %arg1: i32, %arg2: i32) -> (i32, i32) {
    %c0_i32 = arith.constant 0 : i32
    return %arg0, %arg1 : i32, i32
  }
}

module attributes {stable_mosaic.version = 11 : i64} {
  func.func @_sublane_norm_kernel(%arg0: i32, %arg1: i32, %arg2: memref<1x272x17xf32, #tpu.memory_space<vmem>>, %arg3: memref<1x272x1xf32, #tpu.memory_space<vmem>>, %arg4: memref<1x272x1xf32, #tpu.memory_space<vmem>>, %arg5: memref<1x272x17xf32, #tpu.memory_space<vmem>>) attributes {dimension_semantics = [#tpu.dimension_semantics<parallel>, #tpu.dimension_semantics<parallel>], iteration_bounds = array<i64: 2, 1>, scalar_prefetch = 0 : i64, scratch_operands = 0 : i64, tpu.core_type = #tpu.core_type<tc>, window_params = [{transform_indices = @transform_0, window_bounds = array<i64: 1, 272, 17>}, {pipeline_mode = #tpu.pipeline_mode<synchronous>, transform_indices = @transform_1, window_bounds = array<i64: 1, 272, 1>}, {pipeline_mode = #tpu.pipeline_mode<synchronous>, transform_indices = @transform_2, window_bounds = array<i64: 1, 272, 1>}, {transform_indices = @transform_3, window_bounds = array<i64: 1, 272, 17>}]} {
    %c0 = arith.constant 0 : index
    %c0_0 = arith.constant 0 : index
    %c0_1 = arith.constant 0 : index
    %0 = vector.load %arg2[%c0, %c0_0, %c0_1] : memref<1x272x17xf32, #tpu.memory_space<vmem>>, vector<1x272x17xf32>
    %1 = vector.shape_cast %0 : vector<1x272x17xf32> to vector<272x17xf32>
    %cst = arith.constant dense<0.000000e+00> : vector<17xf32>
    %2 = vector.multi_reduction <add>, %1, %cst [0] : vector<272x17xf32> to vector<17xf32>
    %3 = vector.shape_cast %2 : vector<17xf32> to vector<1x17xf32>
    %cst_2 = arith.constant 2.720000e+02 : f32
    %4 = vector.broadcast %cst_2 : f32 to vector<1x17xf32>
    %5 = arith.divf %3, %4 : vector<1x17xf32>
    %6 = vector.broadcast %5 : vector<1x17xf32> to vector<272x17xf32>
    %7 = arith.subf %1, %6 : vector<272x17xf32>
    %8 = arith.mulf %7, %7 : vector<272x17xf32>
    %cst_3 = arith.constant dense<0.000000e+00> : vector<17xf32>
    %9 = vector.multi_reduction <add>, %8, %cst_3 [0] : vector<272x17xf32> to vector<17xf32>
    %10 = vector.shape_cast %9 : vector<17xf32> to vector<1x17xf32>
    %cst_4 = arith.constant 2.720000e+02 : f32
    %11 = vector.broadcast %cst_4 : f32 to vector<1x17xf32>
    %12 = arith.divf %10, %11 : vector<1x17xf32>
    %13 = vector.broadcast %5 : vector<1x17xf32> to vector<272x17xf32>
    %14 = arith.subf %1, %13 : vector<272x17xf32>
    %cst_5 = arith.constant 9.99999974E-6 : f32
    %15 = vector.broadcast %cst_5 : f32 to vector<1x17xf32>
    %16 = arith.addf %12, %15 : vector<1x17xf32>
    %17 = math.rsqrt %16 : vector<1x17xf32>
    %18 = vector.broadcast %17 : vector<1x17xf32> to vector<272x17xf32>
    %19 = arith.mulf %14, %18 : vector<272x17xf32>
    %c0_6 = arith.constant 0 : index
    %c0_7 = arith.constant 0 : index
    %c0_8 = arith.constant 0 : index
    %20 = vector.load %arg3[%c0_6, %c0_7, %c0_8] : memref<1x272x1xf32, #tpu.memory_space<vmem>>, vector<1x272x1xf32>
    %21 = vector.shape_cast %20 : vector<1x272x1xf32> to vector<272x1xf32>
    %22 = vector.broadcast %21 : vector<272x1xf32> to vector<272x17xf32>
    %23 = arith.mulf %19, %22 : vector<272x17xf32>
    %c0_9 = arith.constant 0 : index
    %c0_10 = arith.constant 0 : index
    %c0_11 = arith.constant 0 : index
    %24 = vector.load %arg4[%c0_9, %c0_10, %c0_11] : memref<1x272x1xf32, #tpu.memory_space<vmem>>, vector<1x272x1xf32>
    %25 = vector.shape_cast %24 : vector<1x272x1xf32> to vector<272x1xf32>
    %26 = vector.broadcast %25 : vector<272x1xf32> to vector<272x17xf32>
    %27 = arith.addf %23, %26 : vector<272x17xf32>
    %c0_12 = arith.constant 0 : index
    %c0_13 = arith.constant 0 : index
    %c0_14 = arith.constant 0 : index
    %28 = vector.load %arg5[%c0_12, %c0_13, %c0_14] : memref<1x272x17xf32, #tpu.memory_space<vmem>>, vector<1x272x17xf32>
    %29 = vector.shape_cast %28 : vector<1x272x17xf32> to vector<272x17xf32>
    %30 = vector.shape_cast %27 : vector<272x17xf32> to vector<1x272x17xf32>
    tpu.vector_store %arg5[%c0_12, %c0_13, %c0_14], %30 {strides = array<i32>} : memref<1x272x17xf32, #tpu.memory_space<vmem>>, vector<1x272x17xf32>,
    return
  }
  func.func @transform_0(%arg0: i32, %arg1: i32) -> (i32, i32, i32) {
    %c0_i32 = arith.constant 0 : i32
    %c0_i32_0 = arith.constant 0 : i32
    return %arg0, %c0_i32, %arg1 : i32, i32, i32
  }
  func.func @transform_1(%arg0: i32, %arg1: i32) -> (i32, i32, i32) {
    %c0_i32 = arith.constant 0 : i32
    %c0_i32_0 = arith.constant 0 : i32
    %c0_i32_1 = arith.constant 0 : i32
    %c0_i32_2 = arith.constant 0 : i32
    return %c0_i32, %c0_i32_0, %c0_i32_1 : i32, i32, i32
  }
  func.func @transform_2(%arg0: i32, %arg1: i32) -> (i32, i32, i32) {
    %c0_i32 = arith.constant 0 : i32
    %c0_i32_0 = arith.constant 0 : i32
    %c0_i32_1 = arith.constant 0 : i32
    %c0_i32_2 = arith.constant 0 : i32
    return %c0_i32, %c0_i32_0, %c0_i32_1 : i32, i32, i32
  }
  func.func @transform_3(%arg0: i32, %arg1: i32) -> (i32, i32, i32) {
    %c0_i32 = arith.constant 0 : i32
    %c0_i32_0 = arith.constant 0 : i32
    return %arg0, %c0_i32, %arg1 : i32, i32, i32
  }
}

module attributes {stable_mosaic.version = 11 : i64} {
  func.func @_matmul_kernel(%arg0: i32, %arg1: i32, %arg2: i32, %arg3: memref<2x32xf32, #tpu.memory_space<vmem>>, %arg4: memref<32x272xf32, #tpu.memory_space<vmem>>, %arg5: memref<1x272xf32, #tpu.memory_space<vmem>>, %arg6: memref<2x272xf32, #tpu.memory_space<vmem>>) attributes {dimension_semantics = [#tpu.dimension_semantics<parallel>, #tpu.dimension_semantics<parallel>, #tpu.dimension_semantics<arbitrary>], iteration_bounds = array<i64: 1, 1, 1>, scalar_prefetch = 0 : i64, scratch_operands = 0 : i64, tpu.core_type = #tpu.core_type<tc>, window_params = [{transform_indices = @transform_0, window_bounds = array<i64: 2, 32>}, {transform_indices = @transform_1, window_bounds = array<i64: 32, 272>}, {transform_indices = @transform_2, window_bounds = array<i64: 1, 272>}, {transform_indices = @transform_3, window_bounds = array<i64: 2, 272>}]} {
    %c0 = arith.constant 0 : index
    %c0_0 = arith.constant 0 : index
    %0 = vector.load %arg3[%c0, %c0_0] : memref<2x32xf32, #tpu.memory_space<vmem>>, vector<2x32xf32>
    %1 = arith.truncf %0 : vector<2x32xf32> to vector<2x32xbf16>
    %c0_1 = arith.constant 0 : index
    %c0_2 = arith.constant 0 : index
    %2 = vector.load %arg4[%c0_1, %c0_2] : memref<32x272xf32, #tpu.memory_space<vmem>>, vector<32x272xf32>
    %3 = arith.truncf %2 : vector<32x272xf32> to vector<32x272xbf16>
    %cst = arith.constant dense<0.000000e+00> : vector<2x272xf32>
    %4 = tpu.matmul %1, %3, %cst {dimension_numbers = #tpu.dot_dimension_numbers<[1], [0], [0], [1], [0, 0, 1, 1], [], []>} : vector<2x32xbf16>, vector<32x272xbf16>, vector<2x272xf32> -> vector<2x272xf32>
    %c0_i32 = arith.constant 0 : i32
    %5 = arith.cmpi eq, %arg2, %c0_i32 : i32
    %6 = arith.extui %5 : i1 to i32
    %c0_i32_3 = arith.constant 0 : i32
    %7 = arith.cmpi ne, %6, %c0_i32_3 : i32
    scf.if %7 {
      %c0_6 = arith.constant 0 : index
      %c0_7 = arith.constant 0 : index
      %11 = vector.load %arg5[%c0_6, %c0_7] : memref<1x272xf32, #tpu.memory_space<vmem>>, vector<1x272xf32>
      %12 = vector.broadcast %11 : vector<1x272xf32> to vector<2x272xf32>
      %13 = arith.addf %4, %12 : vector<2x272xf32>
      %c0_8 = arith.constant 0 : index
      %c0_9 = arith.constant 0 : index
      %14 = vector.load %arg6[%c0_8, %c0_9] : memref<2x272xf32, #tpu.memory_space<vmem>>, vector<2x272xf32>
      tpu.vector_store %arg6[%c0_8, %c0_9], %13 {strides = array<i32>} : memref<2x272xf32, #tpu.memory_space<vmem>>, vector<2x272xf32>,
    } else {
    }
    %c0_i32_4 = arith.constant 0 : i32
    %8 = arith.cmpi sgt, %arg2, %c0_i32_4 : i32
    %9 = arith.extui %8 : i1 to i32
    %c0_i32_5 = arith.constant 0 : i32
    %10 = arith.cmpi ne, %9, %c0_i32_5 : i32
    scf.if %10 {
      %c0_6 = arith.constant 0 : index
      %c0_7 = arith.constant 0 : index
      %11 = vector.load %arg6[%c0_6, %c0_7] : memref<2x272xf32, #tpu.memory_space<vmem>>, vector<2x272xf32>
      %12 = arith.addf %11, %4 : vector<2x272xf32>
      %c0_8 = arith.constant 0 : index
      %c0_9 = arith.constant 0 : index
      %13 = vector.load %arg6[%c0_8, %c0_9] : memref<2x272xf32, #tpu.memory_space<vmem>>, vector<2x272xf32>
      tpu.vector_store %arg6[%c0_8, %c0_9], %12 {strides = array<i32>} : memref<2x272xf32, #tpu.memory_space<vmem>>, vector<2x272xf32>,
    } else {
    }
    return
  }
  func.func @transform_0(%arg0: i32, %arg1: i32, %arg2: i32) -> (i32, i32) {
    %c0_i32 = arith.constant 0 : i32
    return %arg0, %arg2 : i32, i32
  }
  func.func @transform_1(%arg0: i32, %arg1: i32, %arg2: i32) -> (i32, i32) {
    %c0_i32 = arith.constant 0 : i32
    return %arg2, %arg1 : i32, i32
  }
  func.func @transform_2(%arg0: i32, %arg1: i32, %arg2: i32) -> (i32, i32) {
    %c0_i32 = arith.constant 0 : i32
    %c0_i32_0 = arith.constant 0 : i32
    return %c0_i32, %arg1 : i32, i32
  }
  func.func @transform_3(%arg0: i32, %arg1: i32, %arg2: i32) -> (i32, i32) {
    %c0_i32 = arith.constant 0 : i32
    return %arg0, %arg1 : i32, i32
  }
}

module attributes {stable_mosaic.version = 11 : i64} {
  func.func @_gate_kernel(%arg0: i32, %arg1: i32, %arg2: memref<1x16x17x17xf32, #tpu.memory_space<vmem>>, %arg3: memref<1x16x17x1xf32, #tpu.memory_space<vmem>>, %arg4: memref<1x16x17x1xf32, #tpu.memory_space<vmem>>, %arg5: memref<1x16x17x1xf32, #tpu.memory_space<vmem>>, %arg6: memref<1x16x17x1xf32, #tpu.memory_space<vmem>>, %arg7: memref<1x16x17x17xf32, #tpu.memory_space<vmem>>) attributes {dimension_semantics = [#tpu.dimension_semantics<parallel>, #tpu.dimension_semantics<parallel>], iteration_bounds = array<i64: 2, 1>, scalar_prefetch = 0 : i64, scratch_operands = 0 : i64, tpu.core_type = #tpu.core_type<tc>, window_params = [{transform_indices = @transform_0, window_bounds = array<i64: 1, 16, 17, 17>}, {transform_indices = @transform_1, window_bounds = array<i64: 1, 16, 17, 1>}, {transform_indices = @transform_2, window_bounds = array<i64: 1, 16, 17, 1>}, {pipeline_mode = #tpu.pipeline_mode<synchronous>, transform_indices = @transform_3, window_bounds = array<i64: 1, 16, 17, 1>}, {pipeline_mode = #tpu.pipeline_mode<synchronous>, transform_indices = @transform_4, window_bounds = array<i64: 1, 16, 17, 1>}, {transform_indices = @transform_5, window_bounds = array<i64: 1, 16, 17, 17>}]} {
    %c0 = arith.constant 0 : index
    %c0_0 = arith.constant 0 : index
    %c0_1 = arith.constant 0 : index
    %c0_2 = arith.constant 0 : index
    %0 = vector.load %arg5[%c0, %c0_0, %c0_1, %c0_2] : memref<1x16x17x1xf32, #tpu.memory_space<vmem>>, vector<1x16x17x1xf32>
    %c0_3 = arith.constant 0 : index
    %c0_4 = arith.constant 0 : index
    %c0_5 = arith.constant 0 : index
    %c0_6 = arith.constant 0 : index
    %1 = vector.load %arg3[%c0_3, %c0_4, %c0_5, %c0_6] : memref<1x16x17x1xf32, #tpu.memory_space<vmem>>, vector<1x16x17x1xf32>
    %2 = arith.mulf %0, %1 : vector<1x16x17x1xf32>
    %3 = arith.negf %2 : vector<1x16x17x1xf32>
    %4 = math.exp %3 : vector<1x16x17x1xf32>
    %cst = arith.constant 1.000000e+00 : f32
    %5 = vector.broadcast %cst : f32 to vector<1x16x17x1xf32>
    %6 = arith.addf %5, %4 : vector<1x16x17x1xf32>
    %7 = arith.divf %5, %6 : vector<1x16x17x1xf32>
    %c0_7 = arith.constant 0 : index
    %c0_8 = arith.constant 0 : index
    %c0_9 = arith.constant 0 : index
    %c0_10 = arith.constant 0 : index
    %8 = vector.load %arg2[%c0_7, %c0_8, %c0_9, %c0_10] : memref<1x16x17x17xf32, #tpu.memory_space<vmem>>, vector<1x16x17x17xf32>
    %9 = vector.broadcast %7 : vector<1x16x17x1xf32> to vector<1x16x17x17xf32>
    %10 = arith.mulf %8, %9 : vector<1x16x17x17xf32>
    %c0_11 = arith.constant 0 : index
    %c0_12 = arith.constant 0 : index
    %c0_13 = arith.constant 0 : index
    %c0_14 = arith.constant 0 : index
    %11 = vector.load %arg6[%c0_11, %c0_12, %c0_13, %c0_14] : memref<1x16x17x1xf32, #tpu.memory_space<vmem>>, vector<1x16x17x1xf32>
    %c0_15 = arith.constant 0 : index
    %c0_16 = arith.constant 0 : index
    %c0_17 = arith.constant 0 : index
    %c0_18 = arith.constant 0 : index
    %12 = vector.load %arg4[%c0_15, %c0_16, %c0_17, %c0_18] : memref<1x16x17x1xf32, #tpu.memory_space<vmem>>, vector<1x16x17x1xf32>
    %13 = arith.mulf %11, %12 : vector<1x16x17x1xf32>
    %14 = vector.broadcast %13 : vector<1x16x17x1xf32> to vector<1x16x17x17xf32>
    %15 = arith.addf %10, %14 : vector<1x16x17x17xf32>
    %c0_19 = arith.constant 0 : index
    %c0_20 = arith.constant 0 : index
    %c0_21 = arith.constant 0 : index
    %c0_22 = arith.constant 0 : index
    %16 = vector.load %arg7[%c0_19, %c0_20, %c0_21, %c0_22] : memref<1x16x17x17xf32, #tpu.memory_space<vmem>>, vector<1x16x17x17xf32>
    tpu.vector_store %arg7[%c0_19, %c0_20, %c0_21, %c0_22], %15 {strides = array<i32>} : memref<1x16x17x17xf32, #tpu.memory_space<vmem>>, vector<1x16x17x17xf32>,
    return
  }
  func.func @transform_0(%arg0: i32, %arg1: i32) -> (i32, i32, i32, i32) {
    %c0_i32 = arith.constant 0 : i32
    %c0_i32_0 = arith.constant 0 : i32
    %c0_i32_1 = arith.constant 0 : i32
    return %arg0, %c0_i32, %c0_i32_0, %arg1 : i32, i32, i32, i32
  }
  func.func @transform_1(%arg0: i32, %arg1: i32) -> (i32, i32, i32, i32) {
    %c0_i32 = arith.constant 0 : i32
    %c0_i32_0 = arith.constant 0 : i32
    %c0_i32_1 = arith.constant 0 : i32
    %c0_i32_2 = arith.constant 0 : i32
    return %arg0, %c0_i32, %c0_i32_0, %c0_i32_1 : i32, i32, i32, i32
  }
  func.func @transform_2(%arg0: i32, %arg1: i32) -> (i32, i32, i32, i32) {
    %c0_i32 = arith.constant 0 : i32
    %c0_i32_0 = arith.constant 0 : i32
    %c0_i32_1 = arith.constant 0 : i32
    %c0_i32_2 = arith.constant 0 : i32
    return %arg0, %c0_i32, %c0_i32_0, %c0_i32_1 : i32, i32, i32, i32
  }
  func.func @transform_3(%arg0: i32, %arg1: i32) -> (i32, i32, i32, i32) {
    %c0_i32 = arith.constant 0 : i32
    %c0_i32_0 = arith.constant 0 : i32
    %c0_i32_1 = arith.constant 0 : i32
    %c0_i32_2 = arith.constant 0 : i32
    %c0_i32_3 = arith.constant 0 : i32
    return %c0_i32, %c0_i32_0, %c0_i32_1, %c0_i32_2 : i32, i32, i32, i32
  }
  func.func @transform_4(%arg0: i32, %arg1: i32) -> (i32, i32, i32, i32) {
    %c0_i32 = arith.constant 0 : i32
    %c0_i32_0 = arith.constant 0 : i32
    %c0_i32_1 = arith.constant 0 : i32
    %c0_i32_2 = arith.constant 0 : i32
    %c0_i32_3 = arith.constant 0 : i32
    return %c0_i32, %c0_i32_0, %c0_i32_1, %c0_i32_2 : i32, i32, i32, i32
  }
  func.func @transform_5(%arg0: i32, %arg1: i32) -> (i32, i32, i32, i32) {
    %c0_i32 = arith.constant 0 : i32
    %c0_i32_0 = arith.constant 0 : i32
    %c0_i32_1 = arith.constant 0 : i32
    return %arg0, %c0_i32, %c0_i32_0, %arg1 : i32, i32, i32, i32
  }
}

module attributes {stable_mosaic.version = 11 : i64} {
  func.func @_matmul_kernel(%arg0: i32, %arg1: i32, %arg2: i32, %arg3: memref<34x34xf32, #tpu.memory_space<vmem>>, %arg4: memref<34x32xf32, #tpu.memory_space<vmem>>, %arg5: memref<1x32xf32, #tpu.memory_space<vmem>>, %arg6: memref<34x32xf32, #tpu.memory_space<vmem>>) attributes {dimension_semantics = [#tpu.dimension_semantics<parallel>, #tpu.dimension_semantics<parallel>, #tpu.dimension_semantics<arbitrary>], iteration_bounds = array<i64: 1, 1, 1>, scalar_prefetch = 0 : i64, scratch_operands = 0 : i64, tpu.core_type = #tpu.core_type<tc>, window_params = [{transform_indices = @transform_0, window_bounds = array<i64: 34, 34>}, {transform_indices = @transform_1, window_bounds = array<i64: 34, 32>}, {transform_indices = @transform_2, window_bounds = array<i64: 1, 32>}, {transform_indices = @transform_3, window_bounds = array<i64: 34, 32>}]} {
    %c0 = arith.constant 0 : index
    %c0_0 = arith.constant 0 : index
    %0 = vector.load %arg3[%c0, %c0_0] : memref<34x34xf32, #tpu.memory_space<vmem>>, vector<34x34xf32>
    %c0_1 = arith.constant 0 : index
    %c0_2 = arith.constant 0 : index
    %1 = vector.load %arg4[%c0_1, %c0_2] : memref<34x32xf32, #tpu.memory_space<vmem>>, vector<34x32xf32>
    %cst = arith.constant dense<0.000000e+00> : vector<34x32xf32>
    %2 = tpu.matmul %0, %1, %cst {dimension_numbers = #tpu.dot_dimension_numbers<[1], [0], [0], [1], [0, 0, 1, 1], [], []>} : vector<34x34xf32>, vector<34x32xf32>, vector<34x32xf32> -> vector<34x32xf32>
    %c0_i32 = arith.constant 0 : i32
    %3 = arith.cmpi eq, %arg2, %c0_i32 : i32
    %4 = arith.extui %3 : i1 to i32
    %c0_i32_3 = arith.constant 0 : i32
    %5 = arith.cmpi ne, %4, %c0_i32_3 : i32
    scf.if %5 {
      %c0_6 = arith.constant 0 : index
      %c0_7 = arith.constant 0 : index
      %9 = vector.load %arg5[%c0_6, %c0_7] : memref<1x32xf32, #tpu.memory_space<vmem>>, vector<1x32xf32>
      %10 = vector.broadcast %9 : vector<1x32xf32> to vector<34x32xf32>
      %11 = arith.addf %2, %10 : vector<34x32xf32>
      %c0_8 = arith.constant 0 : index
      %c0_9 = arith.constant 0 : index
      %12 = vector.load %arg6[%c0_8, %c0_9] : memref<34x32xf32, #tpu.memory_space<vmem>>, vector<34x32xf32>
      tpu.vector_store %arg6[%c0_8, %c0_9], %11 {strides = array<i32>} : memref<34x32xf32, #tpu.memory_space<vmem>>, vector<34x32xf32>,
    } else {
    }
    %c0_i32_4 = arith.constant 0 : i32
    %6 = arith.cmpi sgt, %arg2, %c0_i32_4 : i32
    %7 = arith.extui %6 : i1 to i32
    %c0_i32_5 = arith.constant 0 : i32
    %8 = arith.cmpi ne, %7, %c0_i32_5 : i32
    scf.if %8 {
      %c0_6 = arith.constant 0 : index
      %c0_7 = arith.constant 0 : index
      %9 = vector.load %arg6[%c0_6, %c0_7] : memref<34x32xf32, #tpu.memory_space<vmem>>, vector<34x32xf32>
      %10 = arith.addf %9, %2 : vector<34x32xf32>
      %c0_8 = arith.constant 0 : index
      %c0_9 = arith.constant 0 : index
      %11 = vector.load %arg6[%c0_8, %c0_9] : memref<34x32xf32, #tpu.memory_space<vmem>>, vector<34x32xf32>
      tpu.vector_store %arg6[%c0_8, %c0_9], %10 {strides = array<i32>} : memref<34x32xf32, #tpu.memory_space<vmem>>, vector<34x32xf32>,
    } else {
    }
    return
  }
  func.func @transform_0(%arg0: i32, %arg1: i32, %arg2: i32) -> (i32, i32) {
    %c0_i32 = arith.constant 0 : i32
    return %arg0, %arg2 : i32, i32
  }
  func.func @transform_1(%arg0: i32, %arg1: i32, %arg2: i32) -> (i32, i32) {
    %c0_i32 = arith.constant 0 : i32
    return %arg2, %arg1 : i32, i32
  }
  func.func @transform_2(%arg0: i32, %arg1: i32, %arg2: i32) -> (i32, i32) {
    %c0_i32 = arith.constant 0 : i32
    %c0_i32_0 = arith.constant 0 : i32
    return %c0_i32, %arg1 : i32, i32
  }
  func.func @transform_3(%arg0: i32, %arg1: i32, %arg2: i32) -> (i32, i32) {
    %c0_i32 = arith.constant 0 : i32
    return %arg0, %arg1 : i32, i32
  }
}

</mosaic_0001>

<bundles_post_ra>
// kernel: _lambda_.30
= control target key start
LH: loop header
LB: loop body
LE: loop exit
PB: predicated region body
PF: predicated region fallthrough
CT: control target
= control target key end

     0   :  { %s323_s9 = smov 0   ;;  %s351_s0 = inlined_call_operand.vmem [shape: f32[2,1,256], index: 0, kind: input, shape index: {}]   ;;  %s352_s1 = inlined_call_operand.vmem [shape: f32[2,1,256], index: 1, kind: output, shape index: {0}]   ;;  %s353_s2 = inlined_call_operand.vmem [shape: f32[2,1,1], index: 2, kind: output, shape index: {1}]  }
   0x1 LB: > { %s275_s10 = sadd.s32 4294967295, %s305_s9   ;;  %p279_p0 = scmp.ge.s32.totalorder %s305_s9, 1  ;;  %s305_s9 = sphi %s323_s9, %s13_s9  }
   0x2   : > { %p114_p1 = scmp.lt.s32.totalorder %s305_s9, 3 }
   0x4   : > { %p115_p2 = pnand %p279_p0, %p114_p1 }
   0x5   : > { %p137_p3 = scmp.lt.s32.totalorder (!%p115_p2), %s275_s10, 1 }
   0x6   : > { %118 = sbr.rel (%p115_p2) target bundleno = 227 (0xe3), region = 24 }
   0xb   : > { %s355_s10 = smov (!%p137_p3, %s275_s10), 1  ;;  %vm155_vm0 = vcmask 1040384   ;;  %v307_v14 = vmov 256.0   ;;  %v189_v29 = vlaneseq  ;;  %vm195_vm6 = vcmask 0  }
   0xc   : > { %s280_s11 = sshll.u32 %s355_s10, 1  ;;  %295 = vrcp.f32 %v307_v14  ;;  %s147_s21 = scalar_lea.vmem %s353_s2, %s355_s10 }
   0xd   : > { %s140_s14 = scalar_lea.vmem %s351_s0, %s280_s11  ;;  %s144_s18 = scalar_lea.vmem %s352_s1, %s280_s11  ;;  %vm191_vm5 = vcmp.lt.s32.totalorder %v189_v29, 256 }
   0xe   : > { %v148_v0 = vld [vmem:[%s140_s14] sm:$0x3] }
   0xf   : > { %v149_v1 = vmul.f32 %v148_v0, %v148_v0 }
  0x11   : > { %v151_v2 = vperm.slane %v149_v1, 0  ;;  %v152_v3 = vperm.slane %v149_v1, 1 }
  0x12   : > { %v296_v15 = vpop.eup %295 }
  0x13   : > { %v156_v4 = vsel %vm155_vm0, %v151_v2, 0.0  ;;  %v157_v5 = vsel %vm155_vm0, %v152_v3, 0.0  ;;  %v170_v16 = vmul.f32 256.0, %v296_v15  ;;  %vm174_vm1 = vweird.f32 %v296_v15 }
  0x14   : > { %v158_v6 = vadd.f32 %v157_v5, %v156_v4 }
  0x15   : > { %v171_v17 = vsub.f32 1.0, %v170_v16 }
  0x16   : > { %159 = vadd.xlane.f32.xlu0 %v158_v6 }
  0x17   : > { %v172_v18 = vmul.f32 %v296_v15, %v171_v17 }
  0x19   : > { %v173_v19 = vadd.f32 %v296_v15, %v172_v18 }
  0x1b   : > { %v175_v20 = vsel %vm174_vm1, %v296_v15, %v173_v19 }
  0x89   : > { %v160_v7 = vpop.xlane.xlu0 %159 }
  0x8a   : > { %v161_v8 = vrot.slane %v160_v7, 4 }
  0x8c   : > { %v162_v9 = vadd.f32 %v161_v8, %v160_v7 }
  0x8e   : > { %v163_v10 = vrot.slane %v162_v9, 2 }
  0x90   : > { %v164_v11 = vadd.f32 %v163_v10, %v162_v9 }
  0x92   : > { %v165_v12 = vrot.slane %v164_v11, 1 }
  0x94   : > { %v166_v13 = vadd.f32 %v165_v12, %v164_v11 }
  0x96   : > { %284 = vpush %v166_v13 }
  0xc7   : > { %s285_s15 = spop %284 }
  0xc8   : > { %v168_v21 = vstv %s285_s15 }
  0xc9   : > { %v176_v22 = vmul.f32 %v175_v20, %v168_v21 }
  0xcb   : > { %v177_v23 = vadd.f32 1e-08, %v176_v22 }
  0xcd   : > { %297 = vrsqrt.f32 %v177_v23  ;;  %vm184_vm3 = vweird.f32 %v177_v23 }
  0xd3   : > { %v298_v24 = vpop.eup %297 }
  0xd4   : > { %v179_v25 = vmul.f32 %v298_v24, %v177_v23  ;;  %vm185_vm2 = vweird.f32 %v298_v24 }
  0xd5   : > { %vm186_vm4 = vmor %vm184_vm3, %vm185_vm2 }
  0xd6   : > { %v180_v26 = vmul.f32 %v298_v24, %v179_v25 }
  0xd8   : > { %v181_v27 = vmul.f32 0.5, %v180_v26 }
  0xda   : > { %v182_v28 = vsub.f32 1.5, %v181_v27 }
  0xdc   : > { %v183_v30 = vmul.f32 %v298_v24, %v182_v28 }
  0xde   : > { %v187_v31 = vsel %vm186_vm4, %v298_v24, %v183_v30 }
  0xdf   : > { %v188_v32 = vmul.f32 %v187_v31, %v148_v0  ;;  %v194_v33 = vmul.f32 %v187_v31, %v177_v23 }
  0xe1   : > { %193 = vst.msk [vmem:[%s144_s18] sm:$0x3] %vm191_vm5, %v188_v32 }
  0xe2   : > { %196 = vst.msk [vmem:[%s147_s21] sm:$0x1] %vm195_vm6, %v194_v33 }
  0xe3 PF: > { %s13_s9 = sadd.s32 1, %s305_s9  }
  0xe4   : > { %p10_p4 = scmp.ge.s32.totalorder %s13_s9, 4  }
  0xe6   :  { %12 = sbr.rel (!%p10_p4) target bundleno = 1 (0x1), region = 66 }

// kernel: _lambda_.31
= control target key start
LH: loop header
LB: loop body
LE: loop exit
PB: predicated region body
PF: predicated region fallthrough
CT: control target
= control target key end

     0   :  { %vm23_vm0 = vcmask 261120   ;;  %vm84_vm1 = vcmask 277504   ;;  %vm89_vm2 = vcmask 271360   ;;  %s204_s1 = inlined_call_operand.vmem [shape: f32[32,34], index: 1, kind: input, shape index: {}]   ;;  %s205_s0 = inlined_call_operand.vmem [shape: f32[34,32], index: 0, kind: input, shape index: {}]   ;;  %s206_s2 = inlined_call_operand.vmem [shape: f32[1,34], index: 2, kind: input, shape index: {}]   ;;  %s207_s3 = inlined_call_operand.vmem [shape: f32[34,34], index: 3, kind: output, shape index: {}]  }
   0x1   :  { %v22_v0 = vld [vmem:[%s204_s1 + $0x18] sm:$0xff]  ;;  %v21_v1 = vld [vmem:[%s204_s1 + $0x10] sm:$0xff]  ;;  %v20_v2 = vld [vmem:[%s204_s1 + $0x8] sm:$0xff] }
   0x2   :  { %123 = vmatpush.msra.mxu3 %v22_v0  ;;  %122 = vmatpush.msra.mxu2 %v22_v0  ;;  %v19_v3 = vld [vmem:[%s204_s1] sm:$0xff]  ;;  %v17_v4 = vld [vmem:[%s205_s0 + $0x18] sm:$0xff]  ;;  %v16_v5 = vld [vmem:[%s205_s0 + $0x10] sm:$0xff] }
   0x3   :  { %51 = vmatpush.msra.mxu0 %v22_v0  ;;  %121 = vmatpush.msra.mxu1 %v22_v0  ;;  %v14_v6 = vld [vmem:[%s205_s0] sm:$0xff]  ;;  %v15_v7 = vld [vmem:[%s205_s0 + $0x8] sm:$0xff] }
   0x4   :  { %126 = vmatpush.msra.mxu3 %v21_v1  ;;  %125 = vmatpush.msra.mxu2 %v21_v1  ;;  %v18_v8 = vld [vmem:[%s205_s0 + $0x20] sm:$0x3] }
   0x5   :  { %52 = vmatpush.msra.mxu0 %v21_v1  ;;  %124 = vmatpush.msra.mxu1 %v21_v1  ;;  %v133_v9 = vld [vmem:[%s206_s2] ss:$0 sm:$0xff] }
   0x6   :  { %129 = vmatpush.msra.mxu3 %v20_v2  ;;  %128 = vmatpush.msra.mxu2 %v20_v2 }
   0x7   :  { %53 = vmatpush.msra.mxu0 %v20_v2  ;;  %127 = vmatpush.msra.mxu1 %v20_v2 }
   0x8   :  { %132 = vmatpush.msra.mxu3 %v19_v3  ;;  %131 = vmatpush.msra.mxu2 %v19_v3 }
   0x9   :  { %119 = vmatmul.msk.f32.vlgmr.msra.gmra.mxu3 %vm23_vm0, %v17_v4  ;;  %118 = vmatmul.msk.f32.vlgmr.msra.gmra.mxu2 %vm23_vm0, %v16_v5 }
   0xa   :  { %54 = vmatpush.msra.mxu0 %v19_v3  ;;  %130 = vmatpush.msra.mxu1 %v19_v3 }
   0xb   :  { %116 = vmatmul.msk.f32.vlgmr.msra.gmra.mxu0 %vm23_vm0, %v14_v6  ;;  %117 = vmatmul.msk.f32.vlgmr.msra.gmra.mxu1 %vm23_vm0, %v15_v7 }
  0x11   :  { %120 = vmatmul.msk.f32.gmra.mxu3 %vm23_vm0, %v18_v8 }
  0x88   :  { %v56_v10 = vpop.f32.mrf.mxu0  ;;  %v59_v11 = vpop.f32.mrf.mxu1 }
  0x89   :  { %v79_v12 = vadd.f32 %v133_v9, %v56_v10  ;;  %v80_v13 = vadd.f32 %v133_v9, %v59_v11 }
  0x8b   :  { %85 = vst.msk [vmem:[%s207_s3] sm:$0xff] %vm84_vm1, %v79_v12 }
  0x8c   :  { %v65_v14 = vpop.f32.mrf.mxu3  ;;  %86 = vst.msk [vmem:[%s207_s3 + $0x8] sm:$0xff] %vm84_vm1, %v80_v13  ;;  %v62_v15 = vpop.f32.mrf.mxu2 }
  0x8d   :  { %v82_v16 = vadd.f32 %v133_v9, %v65_v14  ;;  %v81_v17 = vadd.f32 %v133_v9, %v62_v15 }
  0x8f   :  { %88 = vst.msk [vmem:[%s207_s3 + $0x18] sm:$0xff] %vm84_vm1, %v82_v16 }
  0x90   :  { %87 = vst.msk [vmem:[%s207_s3 + $0x10] sm:$0xff] %vm84_vm1, %v81_v17 }
  0x94   :  { %v68_v18 = vpop.f32.mrf.mxu3 }
  0x95   :  { %v83_v19 = vadd.f32 %v133_v9, %v68_v18 }
  0x97   :  { %90 = vst.msk [vmem:[%s207_s3 + $0x20] sm:$0x3] %vm89_vm2, %v83_v19 }

// kernel: _lambda_.35
= control target key start
LH: loop header
LB: loop body
LE: loop exit
PB: predicated region body
PF: predicated region fallthrough
CT: control target
= control target key end

     0   :  { %s548_s12 = smov 0   ;;  %s550_s13 = smov 0   ;;  %s636_s0 = inlined_call_operand.vmem [shape: f32[2,16,289], index: 0, kind: input, shape index: {}]   ;;  %s637_s1 = inlined_call_operand.vmem [shape: f32[1,16,1], index: 1, kind: input, shape index: {}]   ;;  %s638_s2 = inlined_call_operand.vmem [shape: f32[1,16,1], index: 2, kind: input, shape index: {}]   ;;  %s639_s3 = inlined_call_operand.vmem [shape: f32[2,16,289], index: 3, kind: output, shape index: {}]  }
   0x1   :  { %s552_s14 = smov 0  }
   0x2 LB: > { %s25_s15 = sadd.s32 1, %s520_s13  ;;  %p460_p0 = scmp.ge.s32.totalorder %s524_s14, 1  ;;  %s524_s14 = sphi %s552_s14, %s13_s14   ;;  %s520_s13 = sphi %s550_s13, %s641_s13   ;;  %s516_s12 = sphi %s548_s12, %s640_s12  }
   0x3   : > { %p27_p1 = scmp.ge.s32.totalorder %s25_s15, 2  ;;  %p158_p2 = scmp.lt.s32.totalorder %s524_s14, 3 }
   0x5   : > { %s643_s15 = smov (%p27_p1, %s25_s15), 0  ;;  %p159_p3 = pnand %p460_p0, %p158_p2 }
   0x6   : > { %p191_p4 = scmp.lt.s32.totalorder (!%p159_p3), %s516_s12, 1 }
   0x7   : > { %162 = sbr.rel (%p159_p3) target bundleno = 144 (0x90), region = 32 }
   0xc   : > { %v345_v0 = vld [vmem:[%s638_s2] sm:$0xff]  ;;  %v526_v2 = vmov 0   ;;  %v346_v3 = vld [vmem:[%s638_s2 + $0x8] sm:$0xff]  ;;  %s645_s12 = smov (!%p191_p4, %s516_s12), 1  ;;  %vm230_vm0 = vcmask 269312   ;;  %v527_v7 = vmov 16.0  }
   0xd   : > { %v327_v1 = vld [vmem:[%s637_s1] sm:$0xff]  ;;  %493 = vset.pattern.permute.xlu1 %v526_v2  ;;  %492 = vset.pattern.permute.xlu0 %v526_v2  ;;  %v328_v4 = vld [vmem:[%s637_s1 + $0x8] sm:$0xff]  ;;  %s465_s24 = smul.u32 48, %s645_s12  ;;  %494 = vrcp.f32 %v527_v7 }
   0xe   : > { %349 = vperm.xlu1 %493, %v345_v0   ;;  %331 = vperm.xlu0 %492, %v327_v1  }
   0xf   : > { %s198_s27 = scalar_lea.vmem %s636_s0, %s465_s24  ;;  %s208_s30 = scalar_lea.vmem %s639_s3, %s465_s24 }
  0x10   : > { %v212_v5 = vld [vmem:[%s198_s27 + $0x10] sm:$0xff]  ;;  %v215_v6 = vld [vmem:[%s198_s27 + $0x28] sm:$0xff]  ;;  %v210_v10 = vld [vmem:[%s198_s27] sm:$0xff] }
  0x11   : > { %v231_v8 = vsel %vm230_vm0, %v212_v5, 0.0  ;;  %v232_v9 = vsel %vm230_vm0, %v215_v6, 0.0  ;;  %v211_v11 = vld [vmem:[%s198_s27 + $0x8] sm:$0xff]  ;;  %v213_v12 = vld [vmem:[%s198_s27 + $0x18] sm:$0xff]  ;;  %v214_v14 = vld [vmem:[%s198_s27 + $0x20] sm:$0xff] }
  0x12   : > { %v233_v13 = vadd.f32 %v232_v9, %v231_v8  ;;  %v216_v15 = vadd.f32 %v213_v12, %v210_v10  ;;  %v223_v16 = vadd.f32 %v214_v14, %v211_v11 }
  0x13   : > { %v495_v19 = vpop.eup %494 }
  0x14   : > { %v234_v17 = vrot.slane %v233_v13, 4  ;;  %v217_v18 = vrot.slane %v216_v15, 4  ;;  %v224_v20 = vrot.slane %v223_v16, 4  ;;  %v241_v23 = vmul.f32 16.0, %v495_v19 }
  0x15   : > { %vm245_vm1 = vweird.f32 %v495_v19 }
  0x16   : > { %354 = vperm.xlu1 %493, %v346_v3   ;;  %336 = vperm.xlu0 %492, %v328_v4   ;;  %v235_v21 = vadd.f32 %v234_v17, %v233_v13  ;;  %v218_v22 = vadd.f32 %v217_v18, %v216_v15  ;;  %v225_v24 = vadd.f32 %v224_v20, %v223_v16  ;;  %v242_v27 = vsub.f32 1.0, %v241_v23 }
  0x18   : > { %v236_v25 = vrot.slane %v235_v21, 2  ;;  %v219_v26 = vrot.slane %v218_v22, 2  ;;  %v226_v28 = vrot.slane %v225_v24, 2  ;;  %v243_v31 = vmul.f32 %v495_v19, %v242_v27 }
  0x1a   : > { %v237_v29 = vadd.f32 %v236_v25, %v235_v21  ;;  %v220_v30 = vadd.f32 %v219_v26, %v218_v22  ;;  %v227_v32 = vadd.f32 %v226_v28, %v225_v24  ;;  %v244_v35 = vadd.f32 %v495_v19, %v243_v31 }
  0x1c   : > { %v238_v33 = vrot.slane %v237_v29, 1  ;;  %v221_v34 = vrot.slane %v220_v30, 1  ;;  %v228_v36 = vrot.slane %v227_v32, 1  ;;  %v246_v39 = vsel %vm245_vm1, %v495_v19, %v244_v35 }
  0x1e   : > { %v239_v37 = vadd.f32 %v238_v33, %v237_v29  ;;  %v222_v38 = vadd.f32 %v221_v34, %v220_v30  ;;  %v229_v40 = vadd.f32 %v228_v36, %v227_v32 }
  0x20   : > { %v249_v41 = vmul.f32 %v246_v39, %v239_v37  ;;  %v247_v42 = vmul.f32 %v246_v39, %v222_v38  ;;  %v248_v43 = vmul.f32 %v246_v39, %v229_v40 }
  0x22   : > { %v588_v44 = vsub.f32 %v212_v5, %v249_v41  ;;  %v590_v45 = vsub.f32 %v215_v6, %v249_v41  ;;  %v592_v46 = vsub.f32 %v210_v10, %v247_v42  ;;  %v594_v47 = vsub.f32 %v213_v12, %v247_v42 }
  0x23   : > { %v596_v48 = vsub.f32 %v211_v11, %v248_v43  ;;  %v598_v49 = vsub.f32 %v214_v14, %v248_v43 }
  0x24   : > { %v258_v50 = vmul.f32 %v588_v44, %v588_v44  ;;  %v261_v51 = vmul.f32 %v590_v45, %v590_v45  ;;  %v256_v52 = vmul.f32 %v592_v46, %v592_v46  ;;  %v259_v53 = vmul.f32 %v594_v47, %v594_v47 }
  0x25   : > { %v257_v54 = vmul.f32 %v596_v48, %v596_v48  ;;  %v260_v55 = vmul.f32 %v598_v49, %v598_v49 }
  0x26   : > { %v276_v56 = vsel %vm230_vm0, %v258_v50, 0.0  ;;  %v277_v57 = vsel %vm230_vm0, %v261_v51, 0.0  ;;  %v262_v58 = vadd.f32 %v259_v53, %v256_v52 }
  0x27   : > { %v278_v59 = vadd.f32 %v277_v57, %v276_v56  ;;  %v269_v60 = vadd.f32 %v260_v55, %v257_v54 }
  0x28   : > { %v263_v61 = vrot.slane %v262_v58, 4 }
  0x29   : > { %v279_v62 = vrot.slane %v278_v59, 4  ;;  %v270_v63 = vrot.slane %v269_v60, 4 }
  0x2a   : > { %v264_v0 = vadd.f32 %v263_v61, %v262_v58 }
  0x2b   : > { %v271_v1 = vadd.f32 %v270_v63, %v269_v60  ;;  %v280_v2 = vadd.f32 %v279_v62, %v278_v59 }
  0x2c   : > { %v265_v3 = vrot.slane %v264_v0, 2 }
  0x2d   : > { %v272_v4 = vrot.slane %v271_v1, 2  ;;  %v281_v5 = vrot.slane %v280_v2, 2 }
  0x2e   : > { %v266_v6 = vadd.f32 %v265_v3, %v264_v0 }
  0x2f   : > { %v273_v7 = vadd.f32 %v272_v4, %v271_v1  ;;  %v282_v8 = vadd.f32 %v281_v5, %v280_v2 }
  0x30   : > { %v267_v9 = vrot.slane %v266_v6, 1 }
  0x31   : > { %v274_v10 = vrot.slane %v273_v7, 1  ;;  %v283_v11 = vrot.slane %v282_v8, 1 }
  0x32   : > { %v268_v12 = vadd.f32 %v267_v9, %v266_v6 }
  0x33   : > { %v275_v13 = vadd.f32 %v274_v10, %v273_v7  ;;  %v284_v14 = vadd.f32 %v283_v11, %v282_v8 }
  0x34   : > { %v285_v15 = vmul.f32 %v268_v12, %v246_v39 }
  0x35   : > { %v286_v16 = vmul.f32 %v275_v13, %v246_v39  ;;  %v287_v17 = vmul.f32 %v284_v14, %v246_v39 }
  0x36   : > { %v288_v18 = vadd.f32 1e-05, %v285_v15 }
  0x37   : > { %v289_v19 = vadd.f32 1e-05, %v286_v16  ;;  %v290_v20 = vadd.f32 1e-05, %v287_v17 }
  0x38   : > { %496 = vrsqrt.f32 %v288_v18  ;;  %vm297_vm2 = vweird.f32 %v288_v18 }
  0x39   : > { %498 = vrsqrt.f32 %v289_v19  ;;  %vm307_vm4 = vweird.f32 %v289_v19  ;;  %vm317_vm6 = vweird.f32 %v290_v20 }
  0x3a   : > { %500 = vrsqrt.f32 %v290_v20 }
  0x3e   : > { %v497_v21 = vpop.eup %496 }
  0x3f   : > { %v499_v22 = vpop.eup %498  ;;  %v292_v24 = vmul.f32 %v497_v21, %v288_v18  ;;  %vm298_vm3 = vweird.f32 %v497_v21 }
  0x40   : > { %v501_v23 = vpop.eup %500  ;;  %v302_v25 = vmul.f32 %v499_v22, %v289_v19  ;;  %vm308_vm5 = vweird.f32 %v499_v22  ;;  %vm299_vm8 = vmor %vm297_vm2, %vm298_vm3 }
  0x41   : > { %v312_v26 = vmul.f32 %v501_v23, %v290_v20  ;;  %v293_v27 = vmul.f32 %v497_v21, %v292_v24  ;;  %vm318_vm7 = vweird.f32 %v501_v23  ;;  %vm309_vm9 = vmor %vm307_vm4, %vm308_vm5 }
  0x42   : > { %v303_v28 = vmul.f32 %v499_v22, %v302_v25  ;;  %vm319_vm10 = vmor %vm317_vm6, %vm318_vm7 }
  0x43   : > { %v313_v29 = vmul.f32 %v501_v23, %v312_v26  ;;  %v294_v30 = vmul.f32 0.5, %v293_v27 }
  0x44   : > { %v304_v31 = vmul.f32 0.5, %v303_v28 }
  0x45   : > { %v314_v32 = vmul.f32 0.5, %v313_v29  ;;  %v295_v33 = vsub.f32 1.5, %v294_v30 }
  0x46   : > { %v305_v34 = vsub.f32 1.5, %v304_v31 }
  0x47   : > { %v315_v35 = vsub.f32 1.5, %v314_v32  ;;  %v296_v36 = vmul.f32 %v497_v21, %v295_v33 }
  0x48   : > { %v306_v37 = vmul.f32 %v499_v22, %v305_v34 }
  0x49   : > { %v316_v38 = vmul.f32 %v501_v23, %v315_v35  ;;  %v300_v39 = vsel %vm299_vm8, %v497_v21, %v296_v36 }
  0x4a   : > { %v310_v40 = vsel %vm309_vm9, %v499_v22, %v306_v37  ;;  %v321_v42 = vmul.f32 %v300_v39, %v592_v46  ;;  %v324_v46 = vmul.f32 %v300_v39, %v594_v47 }
  0x4b   : > { %v320_v41 = vsel %vm319_vm10, %v501_v23, %v316_v38  ;;  %v322_v43 = vmul.f32 %v310_v40, %v596_v48  ;;  %v325_v48 = vmul.f32 %v310_v40, %v598_v49 }
  0x4c   : > { %v323_v50 = vmul.f32 %v320_v41, %v588_v44  ;;  %v326_v44 = vmul.f32 %v320_v41, %v590_v45 }
  0x80   : > { %v350_v51 = vpop.permute.xlu1 %349  ;;  %v332_v52 = vpop.permute.xlu0 %331 }
  0x81   : > { %v339_v53 = vmul.f32 %v332_v52, %v321_v42  ;;  %v340_v54 = vmul.f32 %v332_v52, %v322_v43  ;;  %v341_v55 = vmul.f32 %v332_v52, %v323_v50 }
  0x83   : > { %v357_v56 = vadd.f32 %v350_v51, %v339_v53  ;;  %v358_v57 = vadd.f32 %v350_v51, %v340_v54  ;;  %v359_v58 = vadd.f32 %v350_v51, %v341_v55 }
  0x85   : > { %363 = vst [vmem:[%s208_s30] sm:$0xff] %v357_v56 }
  0x86   : > { %364 = vst [vmem:[%s208_s30 + $0x8] sm:$0xff] %v358_v57 }
  0x87   : > { %365 = vst.msk [vmem:[%s208_s30 + $0x10] sm:$0xff] %vm230_vm0, %v359_v58 }
  0x88   : > { %v337_v59 = vpop.permute.xlu0 %336  ;;  %v355_v63 = vpop.permute.xlu1 %354 }
  0x89   : > { %v342_v60 = vmul.f32 %v337_v59, %v324_v46  ;;  %v343_v61 = vmul.f32 %v337_v59, %v325_v48  ;;  %v344_v62 = vmul.f32 %v337_v59, %v326_v44 }
  0x8b   : > { %v360_v0 = vadd.f32 %v355_v63, %v342_v60  ;;  %v361_v1 = vadd.f32 %v355_v63, %v343_v61  ;;  %v362_v2 = vadd.f32 %v355_v63, %v344_v62 }
  0x8d   : > { %366 = vst [vmem:[%s208_s30 + $0x18] sm:$0xff] %v360_v0 }
  0x8e   : > { %367 = vst [vmem:[%s208_s30 + $0x20] sm:$0xff] %v361_v1 }
  0x8f   : > { %368 = vst.msk [vmem:[%s208_s30 + $0x28] sm:$0xff] %vm230_vm0, %v362_v2 }
  0x90 PF: > { %s13_s14 = sadd.s32 1, %s524_s14   ;;  %s640_s12 = smov %s520_s13 }
  0x91   : > { %p10_p5 = scmp.ge.s32.totalorder %s13_s14, 4   ;;  %s641_s13 = smov %s643_s15 }
  0x93   :  { %12 = sbr.rel (!%p10_p5) target bundleno = 2 (0x2), region = 62 }

// kernel: _lambda_.32
= control target key start
LH: loop header
LB: loop body
LE: loop exit
PB: predicated region body
PF: predicated region fallthrough
CT: control target
= control target key end

     0   :  { %s408_s12 = smov 0   ;;  %s450_s0 = inlined_call_operand.vmem [shape: f32[2,16,289], index: 0, kind: input, shape index: {}]   ;;  %s451_s1 = inlined_call_operand.vmem [shape: f32[1,16,1], index: 1, kind: input, shape index: {}]   ;;  %s452_s2 = inlined_call_operand.vmem [shape: f32[1,16,1], index: 2, kind: input, shape index: {}]   ;;  %s453_s3 = inlined_call_operand.vmem [shape: f32[2,16,289], index: 3, kind: output, shape index: {}]  }
   0x1 LB: > { %s347_s13 = sadd.s32 4294967295, %s384_s12   ;;  %p351_p0 = scmp.ge.s32.totalorder %s384_s12, 1  ;;  %s384_s12 = sphi %s408_s12, %s13_s12  }
   0x2   : > { %p137_p1 = scmp.lt.s32.totalorder %s384_s12, 3 }
   0x4   : > { %p138_p2 = pnand %p351_p0, %p137_p1 }
   0x5   : > { %p161_p3 = scmp.lt.s32.totalorder (!%p138_p2), %s347_s13, 1 }
   0x6   : > { %141 = sbr.rel (%p138_p2) target bundleno = 434 (0x1b2), region = 32 }
   0xb   : > { %s455_s13 = smov (!%p161_p3, %s347_s13), 1  ;;  %vm178_vm0 = vcmask 269312   ;;  %v386_v20 = vmov 4624.0   ;;  %v250_v23 = vld [vmem:[%s451_s1] sm:$0xff]  ;;  %v387_v26 = vmov 0   ;;  %v251_v28 = vld [vmem:[%s451_s1 + $0x8] sm:$0xff] }
   0xc   : > { %s356_s14 = smul.u32 48, %s455_s13  ;;  %374 = vrcp.f32 %v386_v20  ;;  %v268_v24 = vld [vmem:[%s452_s2] sm:$0xff]  ;;  %371 = vset.pattern.permute.xlu1 %v387_v26  ;;  %372 = vset.pattern.permute.xlu2 %v387_v26  ;;  %v269_v29 = vld [vmem:[%s452_s2 + $0x8] sm:$0xff] }
   0xd   : > { %254 = vperm.xlu1 %371, %v250_v23   ;;  %272 = vperm.xlu2 %372, %v268_v24  }
   0xe   : > { %s165_s17 = scalar_lea.vmem %s450_s0, %s356_s14  ;;  %373 = vset.pattern.permute.xlu0 %v387_v26  ;;  %s170_s30 = scalar_lea.vmem %s453_s3, %s356_s14 }
   0xf   : > { %v171_v0 = vld [vmem:[%s165_s17] sm:$0xff]  ;;  %v172_v1 = vld [vmem:[%s165_s17 + $0x8] sm:$0xff]  ;;  %v173_v2 = vld [vmem:[%s165_s17 + $0x10] sm:$0xff] }
  0x10   : > { %v177_v3 = vadd.f32 %v172_v1, %v171_v0  ;;  %v179_v4 = vsel %vm178_vm0, %v173_v2, 0.0  ;;  %v174_v5 = vld [vmem:[%s165_s17 + $0x18] sm:$0xff]  ;;  %v176_v6 = vld [vmem:[%s165_s17 + $0x28] sm:$0xff]  ;;  %v175_v8 = vld [vmem:[%s165_s17 + $0x20] sm:$0xff] }
  0x11   : > { %v183_v10 = vsel %vm178_vm0, %v176_v6, 0.0 }
  0x12   : > { %v180_v7 = vadd.f32 %v179_v4, %v177_v3  ;;  %v375_v21 = vpop.eup %374 }
  0x13   : > { %v196_v22 = vmul.f32 4624.0, %v375_v21  ;;  %vm200_vm1 = vweird.f32 %v375_v21 }
  0x14   : > { %v181_v9 = vadd.f32 %v180_v7, %v174_v5 }
  0x15   : > { %v197_v25 = vsub.f32 1.0, %v196_v22  ;;  %259 = vperm.xlu1 %371, %v251_v28   ;;  %277 = vperm.xlu2 %372, %v269_v29  }
  0x16   : > { %v182_v11 = vadd.f32 %v181_v9, %v175_v8 }
  0x17   : > { %v198_v27 = vmul.f32 %v375_v21, %v197_v25 }
  0x18   : > { %v184_v12 = vadd.f32 %v183_v10, %v182_v11 }
  0x19   : > { %v199_v30 = vadd.f32 %v375_v21, %v198_v27 }
  0x1a   : > { %185 = vadd.xlane.f32.xlu0 %v184_v12 }
  0x1b   : > { %v201_v31 = vsel %vm200_vm1, %v375_v21, %v199_v30 }
  0x67   : > { %v273_v4 = vpop.permute.xlu2 %272 }
  0x6f   : > { %v278_v24 = vpop.permute.xlu2 %277 }
  0x8d   : > { %v186_v13 = vpop.xlane.xlu0 %185 }
  0x8e   : > { %v187_v14 = vrot.slane %v186_v13, 4 }
  0x90   : > { %v188_v15 = vadd.f32 %v187_v14, %v186_v13 }
  0x92   : > { %v189_v16 = vrot.slane %v188_v15, 2 }
  0x94   : > { %v190_v17 = vadd.f32 %v189_v16, %v188_v15 }
  0x96   : > { %v191_v18 = vrot.slane %v190_v17, 1 }
  0x98   : > { %v192_v19 = vadd.f32 %v191_v18, %v190_v17 }
  0x9a   : > { %357 = vpush %v192_v19 }
  0xcb   : > { %s358_s26 = spop %357 }
  0xcc   : > { %v194_v32 = vstv %s358_s26 }
  0xcd   : > { %v202_v33 = vmul.f32 %v201_v31, %v194_v32 }
  0xcf   : > { %v203_v34 = vsub.f32 %v171_v0, %v202_v33  ;;  %v204_v35 = vsub.f32 %v172_v1, %v202_v33  ;;  %v205_v36 = vsub.f32 %v173_v2, %v202_v33  ;;  %v206_v37 = vsub.f32 %v174_v5, %v202_v33  ;;  %v255_v2 = vpop.permute.xlu1 %254 }
  0xd0   : > { %v208_v41 = vsub.f32 %v176_v6, %v202_v33  ;;  %v207_v42 = vsub.f32 %v175_v8, %v202_v33 }
  0xd1   : > { %v209_v38 = vmul.f32 %v203_v34, %v203_v34  ;;  %v210_v39 = vmul.f32 %v204_v35, %v204_v35  ;;  %v211_v40 = vmul.f32 %v205_v36, %v205_v36  ;;  %v212_v45 = vmul.f32 %v206_v37, %v206_v37 }
  0xd2   : > { %v214_v47 = vmul.f32 %v208_v41, %v208_v41  ;;  %v213_v48 = vmul.f32 %v207_v42, %v207_v42 }
  0xd3   : > { %v215_v43 = vadd.f32 %v210_v39, %v209_v38  ;;  %v216_v44 = vsel %vm178_vm0, %v211_v40, 0.0 }
  0xd4   : > { %v220_v51 = vsel %vm178_vm0, %v214_v47, 0.0 }
  0xd5   : > { %v217_v46 = vadd.f32 %v216_v44, %v215_v43 }
  0xd7   : > { %v218_v49 = vadd.f32 %v217_v46, %v212_v45  ;;  %v260_v12 = vpop.permute.xlu1 %259 }
  0xd9   : > { %v219_v50 = vadd.f32 %v218_v49, %v213_v48 }
  0xdb   : > { %v221_v52 = vadd.f32 %v220_v51, %v219_v50 }
  0xdd   : > { %222 = vadd.xlane.f32.xlu0 %v221_v52 }
 0x150   : > { %v223_v53 = vpop.xlane.xlu0 %222 }
 0x151   : > { %v224_v54 = vrot.slane %v223_v53, 4 }
 0x153   : > { %v225_v55 = vadd.f32 %v224_v54, %v223_v53 }
 0x155   : > { %v226_v56 = vrot.slane %v225_v55, 2 }
 0x157   : > { %v227_v57 = vadd.f32 %v226_v56, %v225_v55 }
 0x159   : > { %v228_v58 = vrot.slane %v227_v57, 1 }
 0x15b   : > { %v229_v59 = vadd.f32 %v228_v58, %v227_v57 }
 0x15d   : > { %359 = vpush %v229_v59 }
 0x18e   : > { %s360_s27 = spop %359 }
 0x18f   : > { %v231_v60 = vstv %s360_s27 }
 0x190   : > { %v232_v61 = vmul.f32 %v231_v60, %v201_v31 }
 0x192   : > { %v233_v62 = vadd.f32 1e-05, %v232_v61 }
 0x194   : > { %376 = vrsqrt.f32 %v233_v62  ;;  %vm240_vm3 = vweird.f32 %v233_v62 }
 0x19a   : > { %v377_v63 = vpop.eup %376 }
 0x19b   : > { %v235_v0 = vmul.f32 %v377_v63, %v233_v62  ;;  %vm241_vm2 = vweird.f32 %v377_v63 }
 0x19c   : > { %vm242_vm4 = vmor %vm240_vm3, %vm241_vm2 }
 0x19d   : > { %v236_v1 = vmul.f32 %v377_v63, %v235_v0 }
 0x19f   : > { %v237_v3 = vmul.f32 0.5, %v236_v1 }
 0x1a1   : > { %v238_v5 = vsub.f32 1.5, %v237_v3 }
 0x1a3   : > { %v239_v6 = vmul.f32 %v377_v63, %v238_v5 }
 0x1a5   : > { %v243_v7 = vsel %vm242_vm4, %v377_v63, %v239_v6 }
 0x1a6   : > { %v244_v8 = vmul.f32 %v243_v7, %v203_v34  ;;  %v245_v9 = vmul.f32 %v243_v7, %v204_v35  ;;  %v246_v10 = vmul.f32 %v243_v7, %v205_v36  ;;  %v247_v11 = vmul.f32 %v243_v7, %v206_v37 }
 0x1a7   : > { %v248_v13 = vmul.f32 %v243_v7, %v207_v42  ;;  %v249_v14 = vmul.f32 %v243_v7, %v208_v41 }
 0x1a8   : > { %v262_v15 = vmul.f32 %v255_v2, %v244_v8  ;;  %v263_v16 = vmul.f32 %v255_v2, %v245_v9  ;;  %v264_v17 = vmul.f32 %v255_v2, %v246_v10  ;;  %v265_v18 = vmul.f32 %v260_v12, %v247_v11 }
 0x1a9   : > { %v266_v19 = vmul.f32 %v260_v12, %v248_v13  ;;  %v267_v20 = vmul.f32 %v260_v12, %v249_v14 }
 0x1aa   : > { %v280_v21 = vadd.f32 %v273_v4, %v262_v15  ;;  %v281_v22 = vadd.f32 %v273_v4, %v263_v16  ;;  %v282_v23 = vadd.f32 %v273_v4, %v264_v17  ;;  %v283_v25 = vadd.f32 %v278_v24, %v265_v18 }
 0x1ab   : > { %v284_v26 = vadd.f32 %v278_v24, %v266_v19  ;;  %v285_v27 = vadd.f32 %v278_v24, %v267_v20 }
 0x1ac   : > { %286 = vst [vmem:[%s170_s30] sm:$0xff] %v280_v21 }
 0x1ad   : > { %287 = vst [vmem:[%s170_s30 + $0x8] sm:$0xff] %v281_v22 }
 0x1ae   : > { %288 = vst.msk [vmem:[%s170_s30 + $0x10] sm:$0xff] %vm178_vm0, %v282_v23 }
 0x1af   : > { %289 = vst [vmem:[%s170_s30 + $0x18] sm:$0xff] %v283_v25 }
 0x1b0   : > { %290 = vst [vmem:[%s170_s30 + $0x20] sm:$0xff] %v284_v26 }
 0x1b1   : > { %291 = vst.msk [vmem:[%s170_s30 + $0x28] sm:$0xff] %vm178_vm0, %v285_v27 }
 0x1b2 PF: > { %s13_s12 = sadd.s32 1, %s384_s12  }
 0x1b3   : > { %p10_p4 = scmp.ge.s32.totalorder %s13_s12, 4  }
 0x1b5   :  { %12 = sbr.rel (!%p10_p4) target bundleno = 1 (0x1), region = 62 }

// kernel: custom-call.3
= control target key start
LH: loop header
LB: loop body
LE: loop exit
PB: predicated region body
PF: predicated region fallthrough
CT: control target
= control target key end

     0   :  { %s6_s0 = inlined_call_operand.vmem [shape: f32[34,16], index: 0, kind: output, shape index: {}]  }

// kernel: custom-call.2
= control target key start
LH: loop header
LB: loop body
LE: loop exit
PB: predicated region body
PF: predicated region fallthrough
CT: control target
= control target key end

     0   :  { %s6_s0 = inlined_call_operand.vmem [shape: bf16[34,16], index: 0, kind: output, shape index: {}]  }

// kernel: _lambda_.36
= control target key start
LH: loop header
LB: loop body
LE: loop exit
PB: predicated region body
PF: predicated region fallthrough
CT: control target
= control target key end

     0   :  { %vm123_vm0 = vcmask 261120   ;;  %s1349_s1 = inlined_call_operand.vmem [shape: f32[32,128], index: 1, kind: input, shape index: {}]   ;;  %s1350_s0 = inlined_call_operand.vmem [shape: f32[544,32], index: 0, kind: input, shape index: {}]   ;;  %s1351_s2 = inlined_call_operand.vmem [shape: f32[1,128], index: 2, kind: input, shape index: {}]   ;;  %s1352_s3 = inlined_call_operand.vmem [shape: f32[544,128], index: 3, kind: output, shape index: {}]  }
   0x1   :  { %v119_v0 = vld [vmem:[%s1349_s1 + $0x10] sm:$0xff]  ;;  %v120_v1 = vld [vmem:[%s1349_s1 + $0x18] sm:$0xff]  ;;  %v117_v2 = vld [vmem:[%s1349_s1] sm:$0xff] }
   0x2   :  { %v122_v3 = vpack.c.bf16 %v120_v1, %v119_v0  ;;  %v118_v4 = vld [vmem:[%s1349_s1 + $0x8] sm:$0xff]  ;;  %v15_v5 = vld [vmem:[%s1350_s0] sm:$0xff]  ;;  %v33_v8 = vld [vmem:[%s1350_s0 + $0x90] sm:$0xff] }
   0x3   :  { %v121_v6 = vpack.c.bf16 %v118_v4, %v117_v2  ;;  %v16_v7 = vld [vmem:[%s1350_s0 + $0x8] sm:$0xff]  ;;  %v34_v9 = vld [vmem:[%s1350_s0 + $0x98] sm:$0xff]  ;;  %v51_v10 = vld [vmem:[%s1350_s0 + $0x120] sm:$0xff] }
   0x4   :  { %232 = vmatpush.bf16.msra.mxu0 %v122_v3  ;;  %795 = vmatpush.bf16.msra.mxu1 %v122_v3  ;;  %v52_v11 = vld [vmem:[%s1350_s0 + $0x128] sm:$0xff]  ;;  %v69_v12 = vld [vmem:[%s1350_s0 + $0x1b0] sm:$0xff]  ;;  %v70_v13 = vld [vmem:[%s1350_s0 + $0x1b8] sm:$0xff]  ;;  %v83_v14 = vpack.c.bf16 %v16_v7, %v15_v5  ;;  %v92_v15 = vpack.c.bf16 %v34_v9, %v33_v8 }
   0x5   :  { %796 = vmatpush.bf16.msra.mxu2 %v122_v3  ;;  %797 = vmatpush.bf16.msra.mxu3 %v122_v3  ;;  %v101_v16 = vpack.c.bf16 %v52_v11, %v51_v10  ;;  %v110_v17 = vpack.c.bf16 %v70_v13, %v69_v12  ;;  %v17_v18 = vld [vmem:[%s1350_s0 + $0x10] sm:$0xff]  ;;  %v18_v19 = vld [vmem:[%s1350_s0 + $0x18] sm:$0xff]  ;;  %v35_v20 = vld [vmem:[%s1350_s0 + $0xa0] sm:$0xff] }
   0x6   :  { %v36_v21 = vld [vmem:[%s1350_s0 + $0xa8] sm:$0xff]  ;;  %v53_v22 = vld [vmem:[%s1350_s0 + $0x130] sm:$0xff]  ;;  %v54_v23 = vld [vmem:[%s1350_s0 + $0x138] sm:$0xff]  ;;  %v84_v26 = vpack.c.bf16 %v18_v19, %v17_v18 }
   0x7   :  { %v71_v24 = vld [vmem:[%s1350_s0 + $0x1c0] sm:$0xff]  ;;  %v72_v25 = vld [vmem:[%s1350_s0 + $0x1c8] sm:$0xff]  ;;  %v93_v27 = vpack.c.bf16 %v36_v21, %v35_v20  ;;  %v102_v28 = vpack.c.bf16 %v54_v23, %v53_v22  ;;  %v37_v32 = vld [vmem:[%s1350_s0 + $0xb0] sm:$0xff] }
   0x8   :  { %233 = vmatpush.bf16.msra.mxu0 %v121_v6  ;;  %798 = vmatpush.bf16.msra.mxu1 %v121_v6  ;;  %v111_v29 = vpack.c.bf16 %v72_v25, %v71_v24  ;;  %v19_v30 = vld [vmem:[%s1350_s0 + $0x20] sm:$0xff]  ;;  %v20_v31 = vld [vmem:[%s1350_s0 + $0x28] sm:$0xff]  ;;  %v38_v33 = vld [vmem:[%s1350_s0 + $0xb8] sm:$0xff] }
   0x9   :  { %799 = vmatpush.bf16.msra.mxu2 %v121_v6  ;;  %800 = vmatpush.bf16.msra.mxu3 %v121_v6  ;;  %v55_v34 = vld [vmem:[%s1350_s0 + $0x140] sm:$0xff]  ;;  %v56_v35 = vld [vmem:[%s1350_s0 + $0x148] sm:$0xff]  ;;  %v73_v36 = vld [vmem:[%s1350_s0 + $0x1d0] sm:$0xff]  ;;  %v85_v38 = vpack.c.bf16 %v20_v31, %v19_v30  ;;  %v94_v39 = vpack.c.bf16 %v38_v33, %v37_v32 }
   0xa   :  { %v74_v37 = vld [vmem:[%s1350_s0 + $0x1d8] sm:$0xff]  ;;  %v103_v40 = vpack.c.bf16 %v56_v35, %v55_v34  ;;  %v21_v42 = vld [vmem:[%s1350_s0 + $0x30] sm:$0xff]  ;;  %v39_v44 = vld [vmem:[%s1350_s0 + $0xc0] sm:$0xff] }
   0xb   :  { %761 = vmatmul.msk.bf16.vlgmr.msra.gmra.mxu0 %vm123_vm0, %v83_v14  ;;  %770 = vmatmul.msk.bf16.vlgmr.msra.gmra.mxu1 %vm123_vm0, %v92_v15  ;;  %v112_v41 = vpack.c.bf16 %v74_v37, %v73_v36  ;;  %v22_v43 = vld [vmem:[%s1350_s0 + $0x38] sm:$0xff]  ;;  %v40_v45 = vld [vmem:[%s1350_s0 + $0xc8] sm:$0xff]  ;;  %v57_v46 = vld [vmem:[%s1350_s0 + $0x150] sm:$0xff] }
   0xc   :  { %779 = vmatmul.msk.bf16.vlgmr.msra.gmra.mxu2 %vm123_vm0, %v101_v16  ;;  %788 = vmatmul.msk.bf16.vlgmr.msra.gmra.mxu3 %vm123_vm0, %v110_v17  ;;  %v58_v47 = vld [vmem:[%s1350_s0 + $0x158] sm:$0xff]  ;;  %v75_v48 = vld [vmem:[%s1350_s0 + $0x1e0] sm:$0xff]  ;;  %v76_v49 = vld [vmem:[%s1350_s0 + $0x1e8] sm:$0xff]  ;;  %v86_v50 = vpack.c.bf16 %v22_v43, %v21_v42  ;;  %v95_v51 = vpack.c.bf16 %v40_v45, %v39_v44 }
   0xd   :  { %v104_v52 = vpack.c.bf16 %v58_v47, %v57_v46  ;;  %v113_v53 = vpack.c.bf16 %v76_v49, %v75_v48  ;;  %v23_v54 = vld [vmem:[%s1350_s0 + $0x40] sm:$0xff]  ;;  %v24_v55 = vld [vmem:[%s1350_s0 + $0x48] sm:$0xff]  ;;  %v41_v56 = vld [vmem:[%s1350_s0 + $0xd0] sm:$0xff] }
   0xe   :  { %v42_v57 = vld [vmem:[%s1350_s0 + $0xd8] sm:$0xff]  ;;  %v59_v58 = vld [vmem:[%s1350_s0 + $0x160] sm:$0xff]  ;;  %v60_v59 = vld [vmem:[%s1350_s0 + $0x168] sm:$0xff]  ;;  %v87_v62 = vpack.c.bf16 %v24_v55, %v23_v54 }
   0xf   :  { %v77_v60 = vld [vmem:[%s1350_s0 + $0x1f0] sm:$0xff]  ;;  %v78_v61 = vld [vmem:[%s1350_s0 + $0x1f8] sm:$0xff]  ;;  %v96_v63 = vpack.c.bf16 %v42_v57, %v41_v56  ;;  %v105_v0 = vpack.c.bf16 %v60_v59, %v59_v58  ;;  %v43_v4 = vld [vmem:[%s1350_s0 + $0xe0] sm:$0xff] }
  0x10   :  { %v114_v1 = vpack.c.bf16 %v78_v61, %v77_v60  ;;  %v25_v2 = vld [vmem:[%s1350_s0 + $0x50] sm:$0xff]  ;;  %v26_v3 = vld [vmem:[%s1350_s0 + $0x58] sm:$0xff]  ;;  %v44_v5 = vld [vmem:[%s1350_s0 + $0xe8] sm:$0xff] }
  0x11   :  { %v61_v6 = vld [vmem:[%s1350_s0 + $0x170] sm:$0xff]  ;;  %v62_v7 = vld [vmem:[%s1350_s0 + $0x178] sm:$0xff]  ;;  %v79_v8 = vld [vmem:[%s1350_s0 + $0x200] sm:$0xff]  ;;  %v88_v10 = vpack.c.bf16 %v26_v3, %v25_v2  ;;  %v97_v11 = vpack.c.bf16 %v44_v5, %v43_v4 }
  0x12   :  { %v80_v9 = vld [vmem:[%s1350_s0 + $0x208] sm:$0xff]  ;;  %v106_v12 = vpack.c.bf16 %v62_v7, %v61_v6  ;;  %v27_v14 = vld [vmem:[%s1350_s0 + $0x60] sm:$0xff]  ;;  %v45_v16 = vld [vmem:[%s1350_s0 + $0xf0] sm:$0xff] }
  0x13   :  { %v115_v13 = vpack.c.bf16 %v80_v9, %v79_v8  ;;  %v28_v15 = vld [vmem:[%s1350_s0 + $0x68] sm:$0xff]  ;;  %v46_v17 = vld [vmem:[%s1350_s0 + $0xf8] sm:$0xff]  ;;  %v63_v18 = vld [vmem:[%s1350_s0 + $0x180] sm:$0xff] }
  0x14   :  { %v64_v19 = vld [vmem:[%s1350_s0 + $0x188] sm:$0xff]  ;;  %v81_v20 = vld [vmem:[%s1350_s0 + $0x210] sm:$0xff]  ;;  %v82_v21 = vld [vmem:[%s1350_s0 + $0x218] sm:$0xff]  ;;  %v89_v22 = vpack.c.bf16 %v28_v15, %v27_v14  ;;  %v98_v23 = vpack.c.bf16 %v46_v17, %v45_v16 }
  0x15   :  { %v107_v24 = vpack.c.bf16 %v64_v19, %v63_v18  ;;  %v116_v25 = vpack.c.bf16 %v82_v21, %v81_v20  ;;  %v65_v30 = vld [vmem:[%s1350_s0 + $0x190] sm:$0xff]  ;;  %v66_v31 = vld [vmem:[%s1350_s0 + $0x198] sm:$0xff]  ;;  %v31_v35 = vld [vmem:[%s1350_s0 + $0x80] sm:$0xff] }
  0x16   :  { %v108_v34 = vpack.c.bf16 %v66_v31, %v65_v30  ;;  %v32_v36 = vld [vmem:[%s1350_s0 + $0x88] sm:$0xff]  ;;  %v49_v37 = vld [vmem:[%s1350_s0 + $0x110] sm:$0xff] }
  0x17   :  { %v91_v42 = vpack.c.bf16 %v32_v36, %v31_v35 }
  0x1b   :  { %762 = vmatmul.msk.bf16.gmra.mxu0 %vm123_vm0, %v84_v26  ;;  %771 = vmatmul.msk.bf16.gmra.mxu1 %vm123_vm0, %v93_v27  ;;  %v29_v26 = vld [vmem:[%s1350_s0 + $0x70] sm:$0xff]  ;;  %v30_v27 = vld [vmem:[%s1350_s0 + $0x78] sm:$0xff] }
  0x1c   :  { %780 = vmatmul.msk.bf16.gmra.mxu2 %vm123_vm0, %v102_v28  ;;  %789 = vmatmul.msk.bf16.gmra.mxu3 %vm123_vm0, %v111_v29  ;;  %v47_v28 = vld [vmem:[%s1350_s0 + $0x100] sm:$0xff]  ;;  %v48_v29 = vld [vmem:[%s1350_s0 + $0x108] sm:$0xff]  ;;  %v90_v32 = vpack.c.bf16 %v30_v27, %v29_v26 }
  0x1d   :  { %v99_v33 = vpack.c.bf16 %v48_v29, %v47_v28 }
  0x2b   :  { %763 = vmatmul.msk.bf16.gmra.mxu0 %vm123_vm0, %v85_v38  ;;  %772 = vmatmul.msk.bf16.gmra.mxu1 %vm123_vm0, %v94_v39  ;;  %v50_v38 = vld [vmem:[%s1350_s0 + $0x118] sm:$0xff]  ;;  %v1066_v39 = vld [vmem:[%s1351_s2] ss:$0 sm:$0xff] }
  0x2c   :  { %781 = vmatmul.msk.bf16.gmra.mxu2 %vm123_vm0, %v103_v40  ;;  %790 = vmatmul.msk.bf16.gmra.mxu3 %vm123_vm0, %v112_v41  ;;  %v67_v40 = vld [vmem:[%s1350_s0 + $0x1a0] sm:$0xff]  ;;  %v68_v41 = vld [vmem:[%s1350_s0 + $0x1a8] sm:$0xff]  ;;  %v100_v43 = vpack.c.bf16 %v50_v38, %v49_v37 }
  0x2d   :  { %v109_v46 = vpack.c.bf16 %v68_v41, %v67_v40 }
  0x3b   :  { %764 = vmatmul.msk.bf16.gmra.mxu0 %vm123_vm0, %v86_v50  ;;  %773 = vmatmul.msk.bf16.gmra.mxu1 %vm123_vm0, %v95_v51 }
  0x3c   :  { %782 = vmatmul.msk.bf16.gmra.mxu2 %vm123_vm0, %v104_v52  ;;  %791 = vmatmul.msk.bf16.gmra.mxu3 %vm123_vm0, %v113_v53 }
  0x4b   :  { %765 = vmatmul.msk.bf16.gmra.mxu0 %vm123_vm0, %v87_v62  ;;  %774 = vmatmul.msk.bf16.gmra.mxu1 %vm123_vm0, %v96_v63 }
  0x4c   :  { %783 = vmatmul.msk.bf16.gmra.mxu2 %vm123_vm0, %v105_v0  ;;  %792 = vmatmul.msk.bf16.gmra.mxu3 %vm123_vm0, %v114_v1 }
  0x5b   :  { %766 = vmatmul.msk.bf16.gmra.mxu0 %vm123_vm0, %v88_v10  ;;  %775 = vmatmul.msk.bf16.gmra.mxu1 %vm123_vm0, %v97_v11 }
  0x5c   :  { %784 = vmatmul.msk.bf16.gmra.mxu2 %vm123_vm0, %v106_v12  ;;  %793 = vmatmul.msk.bf16.gmra.mxu3 %vm123_vm0, %v115_v13 }
  0x6b   :  { %767 = vmatmul.msk.bf16.gmra.mxu0 %vm123_vm0, %v89_v22  ;;  %776 = vmatmul.msk.bf16.gmra.mxu1 %vm123_vm0, %v98_v23 }
  0x6c   :  { %785 = vmatmul.msk.bf16.gmra.mxu2 %vm123_vm0, %v107_v24  ;;  %794 = vmatmul.msk.bf16.gmra.mxu3 %vm123_vm0, %v116_v25 }
  0x7b   :  { %768 = vmatmul.msk.bf16.gmra.mxu0 %vm123_vm0, %v90_v32  ;;  %777 = vmatmul.msk.bf16.gmra.mxu1 %vm123_vm0, %v99_v33 }
  0x7c   :  { %786 = vmatmul.msk.bf16.gmra.mxu2 %vm123_vm0, %v108_v34 }
  0x88   :  { %v235_v44 = vpop.f32.mrf.mxu0  ;;  %v280_v45 = vpop.f32.mrf.mxu1 }
  0x89   :  { %v413_v47 = vadd.f32 %v1066_v39, %v235_v44  ;;  %v431_v48 = vadd.f32 %v1066_v39, %v280_v45 }
  0x8b   :  { %481 = vst [vmem:[%s1352_s3] sm:$0xff] %v413_v47  ;;  %769 = vmatmul.msk.bf16.gmra.mxu0 %vm123_vm0, %v91_v42  ;;  %778 = vmatmul.msk.bf16.gmra.mxu1 %vm123_vm0, %v100_v43 }
  0x8c   :  { %499 = vst [vmem:[%s1352_s3 + $0x90] sm:$0xff] %v431_v48  ;;  %787 = vmatmul.msk.bf16.gmra.mxu2 %vm123_vm0, %v109_v46 }
  0x8f   :  { %v325_v49 = vpop.f32.mrf.mxu2  ;;  %v370_v50 = vpop.f32.mrf.mxu3 }
  0x90   :  { %v449_v51 = vadd.f32 %v1066_v39, %v325_v49  ;;  %v237_v52 = vpop.f32.mrf.mxu0  ;;  %v282_v53 = vpop.f32.mrf.mxu1  ;;  %v467_v56 = vadd.f32 %v1066_v39, %v370_v50 }
  0x91   :  { %v414_v54 = vadd.f32 %v1066_v39, %v237_v52  ;;  %v432_v55 = vadd.f32 %v1066_v39, %v282_v53 }
  0x92   :  { %517 = vst [vmem:[%s1352_s3 + $0x120] sm:$0xff] %v449_v51 }
  0x93   :  { %482 = vst [vmem:[%s1352_s3 + $0x8] sm:$0xff] %v414_v54 }
  0x94   :  { %500 = vst [vmem:[%s1352_s3 + $0x98] sm:$0xff] %v432_v55 }
  0x95   :  { %535 = vst [vmem:[%s1352_s3 + $0x1b0] sm:$0xff] %v467_v56 }
  0x97   :  { %v327_v57 = vpop.f32.mrf.mxu2  ;;  %v372_v58 = vpop.f32.mrf.mxu3 }
  0x98   :  { %v450_v59 = vadd.f32 %v1066_v39, %v327_v57  ;;  %v240_v60 = vpop.f32.mrf.mxu0  ;;  %v285_v61 = vpop.f32.mrf.mxu1  ;;  %v468_v0 = vadd.f32 %v1066_v39, %v372_v58 }
  0x99   :  { %v415_v62 = vadd.f32 %v1066_v39, %v240_v60  ;;  %v433_v63 = vadd.f32 %v1066_v39, %v285_v61 }
  0x9a   :  { %518 = vst [vmem:[%s1352_s3 + $0x128] sm:$0xff] %v450_v59 }
  0x9b   :  { %483 = vst [vmem:[%s1352_s3 + $0x10] sm:$0xff] %v415_v62 }
  0x9c   :  { %501 = vst [vmem:[%s1352_s3 + $0xa0] sm:$0xff] %v433_v63 }
  0x9d   :  { %536 = vst [vmem:[%s1352_s3 + $0x1b8] sm:$0xff] %v468_v0 }
  0x9f   :  { %v330_v1 = vpop.f32.mrf.mxu2  ;;  %v375_v2 = vpop.f32.mrf.mxu3 }
  0xa0   :  { %v451_v3 = vadd.f32 %v1066_v39, %v330_v1  ;;  %v242_v4 = vpop.f32.mrf.mxu0  ;;  %v287_v5 = vpop.f32.mrf.mxu1  ;;  %v469_v8 = vadd.f32 %v1066_v39, %v375_v2 }
  0xa1   :  { %v416_v6 = vadd.f32 %v1066_v39, %v242_v4  ;;  %v434_v7 = vadd.f32 %v1066_v39, %v287_v5 }
  0xa2   :  { %519 = vst [vmem:[%s1352_s3 + $0x130] sm:$0xff] %v451_v3 }
  0xa3   :  { %484 = vst [vmem:[%s1352_s3 + $0x18] sm:$0xff] %v416_v6 }
  0xa4   :  { %502 = vst [vmem:[%s1352_s3 + $0xa8] sm:$0xff] %v434_v7 }
  0xa5   :  { %537 = vst [vmem:[%s1352_s3 + $0x1c0] sm:$0xff] %v469_v8 }
  0xa7   :  { %v332_v9 = vpop.f32.mrf.mxu2  ;;  %v377_v10 = vpop.f32.mrf.mxu3 }
  0xa8   :  { %v452_v11 = vadd.f32 %v1066_v39, %v332_v9  ;;  %v245_v12 = vpop.f32.mrf.mxu0  ;;  %v290_v13 = vpop.f32.mrf.mxu1  ;;  %v470_v16 = vadd.f32 %v1066_v39, %v377_v10 }
  0xa9   :  { %v417_v14 = vadd.f32 %v1066_v39, %v245_v12  ;;  %v435_v15 = vadd.f32 %v1066_v39, %v290_v13 }
  0xaa   :  { %520 = vst [vmem:[%s1352_s3 + $0x138] sm:$0xff] %v452_v11 }
  0xab   :  { %485 = vst [vmem:[%s1352_s3 + $0x20] sm:$0xff] %v417_v14 }
  0xac   :  { %503 = vst [vmem:[%s1352_s3 + $0xb0] sm:$0xff] %v435_v15 }
  0xad   :  { %538 = vst [vmem:[%s1352_s3 + $0x1c8] sm:$0xff] %v470_v16 }
  0xaf   :  { %v335_v17 = vpop.f32.mrf.mxu2  ;;  %v380_v18 = vpop.f32.mrf.mxu3 }
  0xb0   :  { %v453_v19 = vadd.f32 %v1066_v39, %v335_v17  ;;  %v247_v20 = vpop.f32.mrf.mxu0  ;;  %v292_v21 = vpop.f32.mrf.mxu1  ;;  %v471_v24 = vadd.f32 %v1066_v39, %v380_v18 }
  0xb1   :  { %v418_v22 = vadd.f32 %v1066_v39, %v247_v20  ;;  %v436_v23 = vadd.f32 %v1066_v39, %v292_v21 }
  0xb2   :  { %521 = vst [vmem:[%s1352_s3 + $0x140] sm:$0xff] %v453_v19 }
  0xb3   :  { %486 = vst [vmem:[%s1352_s3 + $0x28] sm:$0xff] %v418_v22 }
  0xb4   :  { %504 = vst [vmem:[%s1352_s3 + $0xb8] sm:$0xff] %v436_v23 }
  0xb5   :  { %539 = vst [vmem:[%s1352_s3 + $0x1d0] sm:$0xff] %v471_v24 }
  0xb7   :  { %v337_v25 = vpop.f32.mrf.mxu2  ;;  %v382_v26 = vpop.f32.mrf.mxu3 }
  0xb8   :  { %v454_v27 = vadd.f32 %v1066_v39, %v337_v25  ;;  %v250_v28 = vpop.f32.mrf.mxu0  ;;  %v295_v29 = vpop.f32.mrf.mxu1  ;;  %v472_v32 = vadd.f32 %v1066_v39, %v382_v26 }
  0xb9   :  { %v419_v30 = vadd.f32 %v1066_v39, %v250_v28  ;;  %v437_v31 = vadd.f32 %v1066_v39, %v295_v29 }
  0xba   :  { %522 = vst [vmem:[%s1352_s3 + $0x148] sm:$0xff] %v454_v27 }
  0xbb   :  { %487 = vst [vmem:[%s1352_s3 + $0x30] sm:$0xff] %v419_v30 }
  0xbc   :  { %505 = vst [vmem:[%s1352_s3 + $0xc0] sm:$0xff] %v437_v31 }
  0xbd   :  { %540 = vst [vmem:[%s1352_s3 + $0x1d8] sm:$0xff] %v472_v32 }
  0xbf   :  { %v340_v33 = vpop.f32.mrf.mxu2  ;;  %v385_v34 = vpop.f32.mrf.mxu3 }
  0xc0   :  { %v455_v35 = vadd.f32 %v1066_v39, %v340_v33  ;;  %v252_v36 = vpop.f32.mrf.mxu0  ;;  %v297_v37 = vpop.f32.mrf.mxu1  ;;  %v473_v41 = vadd.f32 %v1066_v39, %v385_v34 }
  0xc1   :  { %v420_v38 = vadd.f32 %v1066_v39, %v252_v36  ;;  %v438_v40 = vadd.f32 %v1066_v39, %v297_v37 }
  0xc2   :  { %523 = vst [vmem:[%s1352_s3 + $0x150] sm:$0xff] %v455_v35 }
  0xc3   :  { %488 = vst [vmem:[%s1352_s3 + $0x38] sm:$0xff] %v420_v38 }
  0xc4   :  { %506 = vst [vmem:[%s1352_s3 + $0xc8] sm:$0xff] %v438_v40 }
  0xc5   :  { %541 = vst [vmem:[%s1352_s3 + $0x1e0] sm:$0xff] %v473_v41 }
  0xc7   :  { %v342_v42 = vpop.f32.mrf.mxu2  ;;  %v387_v43 = vpop.f32.mrf.mxu3 }
  0xc8   :  { %v456_v44 = vadd.f32 %v1066_v39, %v342_v42  ;;  %v255_v45 = vpop.f32.mrf.mxu0  ;;  %v300_v46 = vpop.f32.mrf.mxu1  ;;  %v474_v49 = vadd.f32 %v1066_v39, %v387_v43 }
  0xc9   :  { %v421_v47 = vadd.f32 %v1066_v39, %v255_v45  ;;  %v439_v48 = vadd.f32 %v1066_v39, %v300_v46 }
  0xca   :  { %524 = vst [vmem:[%s1352_s3 + $0x158] sm:$0xff] %v456_v44 }
  0xcb   :  { %489 = vst [vmem:[%s1352_s3 + $0x40] sm:$0xff] %v421_v47 }
  0xcc   :  { %507 = vst [vmem:[%s1352_s3 + $0xd0] sm:$0xff] %v439_v48 }
  0xcd   :  { %542 = vst [vmem:[%s1352_s3 + $0x1e8] sm:$0xff] %v474_v49 }
  0xcf   :  { %v345_v50 = vpop.f32.mrf.mxu2  ;;  %v390_v51 = vpop.f32.mrf.mxu3 }
  0xd0   :  { %v457_v52 = vadd.f32 %v1066_v39, %v345_v50  ;;  %v257_v53 = vpop.f32.mrf.mxu0  ;;  %v302_v54 = vpop.f32.mrf.mxu1  ;;  %v475_v57 = vadd.f32 %v1066_v39, %v390_v51 }
  0xd1   :  { %v422_v55 = vadd.f32 %v1066_v39, %v257_v53  ;;  %v440_v56 = vadd.f32 %v1066_v39, %v302_v54 }
  0xd2   :  { %525 = vst [vmem:[%s1352_s3 + $0x160] sm:$0xff] %v457_v52 }
  0xd3   :  { %490 = vst [vmem:[%s1352_s3 + $0x48] sm:$0xff] %v422_v55 }
  0xd4   :  { %508 = vst [vmem:[%s1352_s3 + $0xd8] sm:$0xff] %v440_v56 }
  0xd5   :  { %543 = vst [vmem:[%s1352_s3 + $0x1f0] sm:$0xff] %v475_v57 }
  0xd7   :  { %v347_v58 = vpop.f32.mrf.mxu2  ;;  %v392_v59 = vpop.f32.mrf.mxu3 }
  0xd8   :  { %v458_v60 = vadd.f32 %v1066_v39, %v347_v58  ;;  %v260_v61 = vpop.f32.mrf.mxu0  ;;  %v305_v62 = vpop.f32.mrf.mxu1  ;;  %v476_v1 = vadd.f32 %v1066_v39, %v392_v59 }
  0xd9   :  { %v423_v63 = vadd.f32 %v1066_v39, %v260_v61  ;;  %v441_v0 = vadd.f32 %v1066_v39, %v305_v62 }
  0xda   :  { %526 = vst [vmem:[%s1352_s3 + $0x168] sm:$0xff] %v458_v60 }
  0xdb   :  { %491 = vst [vmem:[%s1352_s3 + $0x50] sm:$0xff] %v423_v63 }
  0xdc   :  { %509 = vst [vmem:[%s1352_s3 + $0xe0] sm:$0xff] %v441_v0 }
  0xdd   :  { %544 = vst [vmem:[%s1352_s3 + $0x1f8] sm:$0xff] %v476_v1 }
  0xdf   :  { %v350_v2 = vpop.f32.mrf.mxu2  ;;  %v395_v3 = vpop.f32.mrf.mxu3 }
  0xe0   :  { %v459_v4 = vadd.f32 %v1066_v39, %v350_v2  ;;  %v262_v5 = vpop.f32.mrf.mxu0  ;;  %v307_v6 = vpop.f32.mrf.mxu1  ;;  %v477_v9 = vadd.f32 %v1066_v39, %v395_v3 }
  0xe1   :  { %v424_v7 = vadd.f32 %v1066_v39, %v262_v5  ;;  %v442_v8 = vadd.f32 %v1066_v39, %v307_v6 }
  0xe2   :  { %527 = vst [vmem:[%s1352_s3 + $0x170] sm:$0xff] %v459_v4 }
  0xe3   :  { %492 = vst [vmem:[%s1352_s3 + $0x58] sm:$0xff] %v424_v7 }
  0xe4   :  { %510 = vst [vmem:[%s1352_s3 + $0xe8] sm:$0xff] %v442_v8 }
  0xe5   :  { %545 = vst [vmem:[%s1352_s3 + $0x200] sm:$0xff] %v477_v9 }
  0xe7   :  { %v352_v10 = vpop.f32.mrf.mxu2  ;;  %v397_v11 = vpop.f32.mrf.mxu3 }
  0xe8   :  { %v460_v12 = vadd.f32 %v1066_v39, %v352_v10  ;;  %v265_v13 = vpop.f32.mrf.mxu0  ;;  %v310_v14 = vpop.f32.mrf.mxu1  ;;  %v478_v17 = vadd.f32 %v1066_v39, %v397_v11 }
  0xe9   :  { %v425_v15 = vadd.f32 %v1066_v39, %v265_v13  ;;  %v443_v16 = vadd.f32 %v1066_v39, %v310_v14 }
  0xea   :  { %528 = vst [vmem:[%s1352_s3 + $0x178] sm:$0xff] %v460_v12 }
  0xeb   :  { %493 = vst [vmem:[%s1352_s3 + $0x60] sm:$0xff] %v425_v15 }
  0xec   :  { %511 = vst [vmem:[%s1352_s3 + $0xf0] sm:$0xff] %v443_v16 }
  0xed   :  { %546 = vst [vmem:[%s1352_s3 + $0x208] sm:$0xff] %v478_v17 }
  0xef   :  { %v355_v18 = vpop.f32.mrf.mxu2  ;;  %v400_v19 = vpop.f32.mrf.mxu3 }
  0xf0   :  { %v461_v20 = vadd.f32 %v1066_v39, %v355_v18  ;;  %v267_v21 = vpop.f32.mrf.mxu0  ;;  %v312_v22 = vpop.f32.mrf.mxu1  ;;  %v479_v25 = vadd.f32 %v1066_v39, %v400_v19 }
  0xf1   :  { %v426_v23 = vadd.f32 %v1066_v39, %v267_v21  ;;  %v444_v24 = vadd.f32 %v1066_v39, %v312_v22 }
  0xf2   :  { %529 = vst [vmem:[%s1352_s3 + $0x180] sm:$0xff] %v461_v20 }
  0xf3   :  { %494 = vst [vmem:[%s1352_s3 + $0x68] sm:$0xff] %v426_v23 }
  0xf4   :  { %512 = vst [vmem:[%s1352_s3 + $0xf8] sm:$0xff] %v444_v24 }
  0xf5   :  { %547 = vst [vmem:[%s1352_s3 + $0x210] sm:$0xff] %v479_v25 }
  0xf7   :  { %v357_v26 = vpop.f32.mrf.mxu2  ;;  %v402_v27 = vpop.f32.mrf.mxu3 }
  0xf8   :  { %v462_v28 = vadd.f32 %v1066_v39, %v357_v26  ;;  %v270_v29 = vpop.f32.mrf.mxu0  ;;  %v315_v30 = vpop.f32.mrf.mxu1  ;;  %v480_v33 = vadd.f32 %v1066_v39, %v402_v27 }
  0xf9   :  { %v427_v31 = vadd.f32 %v1066_v39, %v270_v29  ;;  %v445_v32 = vadd.f32 %v1066_v39, %v315_v30 }
  0xfa   :  { %530 = vst [vmem:[%s1352_s3 + $0x188] sm:$0xff] %v462_v28 }
  0xfb   :  { %495 = vst [vmem:[%s1352_s3 + $0x70] sm:$0xff] %v427_v31 }
  0xfc   :  { %513 = vst [vmem:[%s1352_s3 + $0x100] sm:$0xff] %v445_v32 }
  0xfd   :  { %548 = vst [vmem:[%s1352_s3 + $0x218] sm:$0xff] %v480_v33 }
  0xff   :  { %v360_v34 = vpop.f32.mrf.mxu2 }
 0x100   :  { %v463_v35 = vadd.f32 %v1066_v39, %v360_v34  ;;  %v272_v36 = vpop.f32.mrf.mxu0  ;;  %v317_v37 = vpop.f32.mrf.mxu1 }
 0x101   :  { %v428_v38 = vadd.f32 %v1066_v39, %v272_v36  ;;  %v446_v40 = vadd.f32 %v1066_v39, %v317_v37 }
 0x102   :  { %531 = vst [vmem:[%s1352_s3 + $0x190] sm:$0xff] %v463_v35 }
 0x103   :  { %496 = vst [vmem:[%s1352_s3 + $0x78] sm:$0xff] %v428_v38 }
 0x104   :  { %514 = vst [vmem:[%s1352_s3 + $0x108] sm:$0xff] %v446_v40 }
 0x107   :  { %v362_v41 = vpop.f32.mrf.mxu2 }
 0x108   :  { %v464_v42 = vadd.f32 %v1066_v39, %v362_v41  ;;  %v275_v43 = vpop.f32.mrf.mxu0  ;;  %v320_v44 = vpop.f32.mrf.mxu1 }
 0x109   :  { %v429_v45 = vadd.f32 %v1066_v39, %v275_v43  ;;  %v447_v46 = vadd.f32 %v1066_v39, %v320_v44 }
 0x10a   :  { %532 = vst [vmem:[%s1352_s3 + $0x198] sm:$0xff] %v464_v42 }
 0x10b   :  { %497 = vst [vmem:[%s1352_s3 + $0x80] sm:$0xff] %v429_v45 }
 0x10c   :  { %515 = vst [vmem:[%s1352_s3 + $0x110] sm:$0xff] %v447_v46 }
 0x10f   :  { %v365_v47 = vpop.f32.mrf.mxu2 }
 0x110   :  { %v465_v48 = vadd.f32 %v1066_v39, %v365_v47  ;;  %v277_v49 = vpop.f32.mrf.mxu0  ;;  %v322_v50 = vpop.f32.mrf.mxu1 }
 0x111   :  { %v430_v51 = vadd.f32 %v1066_v39, %v277_v49  ;;  %v448_v52 = vadd.f32 %v1066_v39, %v322_v50 }
 0x112   :  { %533 = vst [vmem:[%s1352_s3 + $0x1a0] sm:$0xff] %v465_v48 }
 0x113   :  { %498 = vst [vmem:[%s1352_s3 + $0x88] sm:$0xff] %v430_v51 }
 0x114   :  { %516 = vst [vmem:[%s1352_s3 + $0x118] sm:$0xff] %v448_v52 }
 0x117   :  { %v367_v53 = vpop.f32.mrf.mxu2 }
 0x118   :  { %v466_v54 = vadd.f32 %v1066_v39, %v367_v53 }
 0x11a   :  { %534 = vst [vmem:[%s1352_s3 + $0x1a8] sm:$0xff] %v466_v54 }

// kernel: _lambda_.39
= control target key start
LH: loop header
LB: loop body
LE: loop exit
PB: predicated region body
PF: predicated region fallthrough
CT: control target
= control target key end

     0   :  { %vm128_vm0 = vcmask 130048   ;;  %vm514_vm1 = vcmask 261120   ;;  %vm587_vm2 = vcmask 254976   ;;  %s1510_s1 = inlined_call_operand.vmem [shape: f32[16,32], index: 1, kind: input, shape index: {}]   ;;  %s1511_s0 = inlined_call_operand.vmem [shape: f32[578,16], index: 0, kind: input, shape index: {}]   ;;  %s1512_s2 = inlined_call_operand.vmem [shape: f32[1,32], index: 2, kind: input, shape index: {}]   ;;  %s1513_s3 = inlined_call_operand.vmem [shape: f32[578,32], index: 3, kind: output, shape index: {}]  }
   0x1   :  { %v125_v0 = vld [vmem:[%s1510_s1] sm:$0xff]  ;;  %v126_v1 = vld [vmem:[%s1510_s1 + $0x8] sm:$0xff]  ;;  %v17_v15 = vld [vmem:[%s1511_s0 + $0x10] sm:$0xff] }
   0x2   :  { %v15_v2 = vld [vmem:[%s1511_s0] sm:$0xff]  ;;  %v127_v3 = vpack.c.bf16 %v126_v1, %v125_v0  ;;  %v16_v4 = vld [vmem:[%s1511_s0 + $0x8] sm:$0xff]  ;;  %v18_v16 = vld [vmem:[%s1511_s0 + $0x18] sm:$0xff] }
   0x3   :  { %v35_v5 = vld [vmem:[%s1511_s0 + $0xa0] sm:$0xff]  ;;  %v36_v6 = vld [vmem:[%s1511_s0 + $0xa8] sm:$0xff]  ;;  %v88_v7 = vpack.c.bf16 %v16_v4, %v15_v2  ;;  %v37_v17 = vld [vmem:[%s1511_s0 + $0xb0] sm:$0xff]  ;;  %v89_v21 = vpack.c.bf16 %v18_v16, %v17_v15 }
   0x4   :  { %v98_v8 = vpack.c.bf16 %v36_v6, %v35_v5  ;;  %v55_v9 = vld [vmem:[%s1511_s0 + $0x140] sm:$0xff]  ;;  %v56_v10 = vld [vmem:[%s1511_s0 + $0x148] sm:$0xff]  ;;  %247 = vmatpush.bf16.msra.mxu0 %v127_v3  ;;  %855 = vmatpush.bf16.msra.mxu1 %v127_v3  ;;  %v38_v18 = vld [vmem:[%s1511_s0 + $0xb8] sm:$0xff] }
   0x5   :  { %v108_v11 = vpack.c.bf16 %v56_v10, %v55_v9  ;;  %856 = vmatpush.bf16.msra.mxu2 %v127_v3  ;;  %857 = vmatpush.bf16.msra.mxu3 %v127_v3  ;;  %v75_v12 = vld [vmem:[%s1511_s0 + $0x1e0] sm:$0xff]  ;;  %v76_v13 = vld [vmem:[%s1511_s0 + $0x1e8] sm:$0xff]  ;;  %v57_v19 = vld [vmem:[%s1511_s0 + $0x150] sm:$0xff]  ;;  %v99_v22 = vpack.c.bf16 %v38_v18, %v37_v17 }
   0x6   :  { %v118_v14 = vpack.c.bf16 %v76_v13, %v75_v12  ;;  %v58_v20 = vld [vmem:[%s1511_s0 + $0x158] sm:$0xff]  ;;  %v77_v24 = vld [vmem:[%s1511_s0 + $0x1f0] sm:$0xff]  ;;  %v19_v27 = vld [vmem:[%s1511_s0 + $0x20] sm:$0xff] }
   0x7   :  { %818 = vmatmul.msk.bf16.vlgmr.msra.gmra.mxu0 %vm128_vm0, %v88_v7  ;;  %828 = vmatmul.msk.bf16.vlgmr.msra.gmra.mxu1 %vm128_vm0, %v98_v8  ;;  %v109_v23 = vpack.c.bf16 %v58_v20, %v57_v19  ;;  %v78_v25 = vld [vmem:[%s1511_s0 + $0x1f8] sm:$0xff]  ;;  %v20_v28 = vld [vmem:[%s1511_s0 + $0x28] sm:$0xff]  ;;  %v39_v29 = vld [vmem:[%s1511_s0 + $0xc0] sm:$0xff] }
   0x8   :  { %838 = vmatmul.msk.bf16.vlgmr.msra.gmra.mxu2 %vm128_vm0, %v108_v11  ;;  %848 = vmatmul.msk.bf16.vlgmr.msra.gmra.mxu3 %vm128_vm0, %v118_v14  ;;  %v119_v26 = vpack.c.bf16 %v78_v25, %v77_v24  ;;  %v40_v30 = vld [vmem:[%s1511_s0 + $0xc8] sm:$0xff]  ;;  %v59_v31 = vld [vmem:[%s1511_s0 + $0x160] sm:$0xff]  ;;  %v90_v33 = vpack.c.bf16 %v20_v28, %v19_v27  ;;  %v21_v39 = vld [vmem:[%s1511_s0 + $0x30] sm:$0xff] }
   0x9   :  { %v60_v32 = vld [vmem:[%s1511_s0 + $0x168] sm:$0xff]  ;;  %v100_v34 = vpack.c.bf16 %v40_v30, %v39_v29  ;;  %v79_v36 = vld [vmem:[%s1511_s0 + $0x200] sm:$0xff]  ;;  %v22_v40 = vld [vmem:[%s1511_s0 + $0x38] sm:$0xff] }
   0xa   :  { %v110_v35 = vpack.c.bf16 %v60_v32, %v59_v31  ;;  %v80_v37 = vld [vmem:[%s1511_s0 + $0x208] sm:$0xff]  ;;  %v41_v41 = vld [vmem:[%s1511_s0 + $0xd0] sm:$0xff]  ;;  %v42_v42 = vld [vmem:[%s1511_s0 + $0xd8] sm:$0xff]  ;;  %v91_v45 = vpack.c.bf16 %v22_v40, %v21_v39 }
   0xb   :  { %v120_v38 = vpack.c.bf16 %v80_v37, %v79_v36  ;;  %v61_v43 = vld [vmem:[%s1511_s0 + $0x170] sm:$0xff]  ;;  %v62_v44 = vld [vmem:[%s1511_s0 + $0x178] sm:$0xff]  ;;  %v101_v46 = vpack.c.bf16 %v42_v42, %v41_v41  ;;  %v23_v51 = vld [vmem:[%s1511_s0 + $0x40] sm:$0xff] }
   0xc   :  { %v111_v47 = vpack.c.bf16 %v62_v44, %v61_v43  ;;  %v81_v48 = vld [vmem:[%s1511_s0 + $0x210] sm:$0xff]  ;;  %v82_v49 = vld [vmem:[%s1511_s0 + $0x218] sm:$0xff]  ;;  %v24_v52 = vld [vmem:[%s1511_s0 + $0x48] sm:$0xff] }
   0xd   :  { %v121_v50 = vpack.c.bf16 %v82_v49, %v81_v48  ;;  %v43_v53 = vld [vmem:[%s1511_s0 + $0xe0] sm:$0xff]  ;;  %v44_v54 = vld [vmem:[%s1511_s0 + $0xe8] sm:$0xff]  ;;  %v92_v57 = vpack.c.bf16 %v24_v52, %v23_v51  ;;  %v25_v63 = vld [vmem:[%s1511_s0 + $0x50] sm:$0xff] }
   0xe   :  { %v63_v55 = vld [vmem:[%s1511_s0 + $0x180] sm:$0xff]  ;;  %v64_v56 = vld [vmem:[%s1511_s0 + $0x188] sm:$0xff]  ;;  %v102_v58 = vpack.c.bf16 %v44_v54, %v43_v53  ;;  %v26_v0 = vld [vmem:[%s1511_s0 + $0x58] sm:$0xff] }
   0xf   :  { %v112_v59 = vpack.c.bf16 %v64_v56, %v63_v55  ;;  %v83_v60 = vld [vmem:[%s1511_s0 + $0x220] sm:$0xff]  ;;  %v84_v61 = vld [vmem:[%s1511_s0 + $0x228] sm:$0xff]  ;;  %v45_v1 = vld [vmem:[%s1511_s0 + $0xf0] sm:$0xff]  ;;  %v93_v5 = vpack.c.bf16 %v26_v0, %v25_v63 }
  0x10   :  { %v122_v62 = vpack.c.bf16 %v84_v61, %v83_v60  ;;  %v46_v2 = vld [vmem:[%s1511_s0 + $0xf8] sm:$0xff]  ;;  %v65_v3 = vld [vmem:[%s1511_s0 + $0x190] sm:$0xff]  ;;  %v27_v11 = vld [vmem:[%s1511_s0 + $0x60] sm:$0xff] }
  0x11   :  { %v66_v4 = vld [vmem:[%s1511_s0 + $0x198] sm:$0xff]  ;;  %v103_v6 = vpack.c.bf16 %v46_v2, %v45_v1  ;;  %v85_v8 = vld [vmem:[%s1511_s0 + $0x230] sm:$0xff]  ;;  %v28_v12 = vld [vmem:[%s1511_s0 + $0x68] sm:$0xff] }
  0x12   :  { %v113_v7 = vpack.c.bf16 %v66_v4, %v65_v3  ;;  %v86_v9 = vld [vmem:[%s1511_s0 + $0x238] sm:$0xff]  ;;  %v47_v13 = vld [vmem:[%s1511_s0 + $0x100] sm:$0xff]  ;;  %v48_v14 = vld [vmem:[%s1511_s0 + $0x108] sm:$0xff]  ;;  %v94_v17 = vpack.c.bf16 %v28_v12, %v27_v11 }
  0x13   :  { %v123_v10 = vpack.c.bf16 %v86_v9, %v85_v8  ;;  %v67_v15 = vld [vmem:[%s1511_s0 + $0x1a0] sm:$0xff]  ;;  %v68_v16 = vld [vmem:[%s1511_s0 + $0x1a8] sm:$0xff]  ;;  %v104_v18 = vpack.c.bf16 %v48_v14, %v47_v13  ;;  %v29_v20 = vld [vmem:[%s1511_s0 + $0x70] sm:$0xff] }
  0x14   :  { %v114_v19 = vpack.c.bf16 %v68_v16, %v67_v15  ;;  %v87_v24 = vld [vmem:[%s1511_s0 + $0x240] sm:$0x3]  ;;  %v69_v25 = vld [vmem:[%s1511_s0 + $0x1b0] sm:$0xff]  ;;  %v32_v32 = vld [vmem:[%s1511_s0 + $0x88] sm:$0xff] }
  0x15   :  { %v124_v27 = vpack.c.bf16 %v87_v24, %v87_v24  ;;  %v31_v31 = vld [vmem:[%s1511_s0 + $0x80] sm:$0xff]  ;;  %v72_v37 = vld [vmem:[%s1511_s0 + $0x1c8] sm:$0xff]  ;;  %v33_v51 = vld [vmem:[%s1511_s0 + $0x90] sm:$0xff] }
  0x16   :  { %v71_v36 = vld [vmem:[%s1511_s0 + $0x1c0] sm:$0xff]  ;;  %v34_v52 = vld [vmem:[%s1511_s0 + $0x98] sm:$0xff]  ;;  %v53_v53 = vld [vmem:[%s1511_s0 + $0x130] sm:$0xff] }
  0x17   :  { %819 = vmatmul.msk.bf16.gmra.mxu0 %vm128_vm0, %v89_v21  ;;  %829 = vmatmul.msk.bf16.gmra.mxu1 %vm128_vm0, %v99_v22  ;;  %v30_v21 = vld [vmem:[%s1511_s0 + $0x78] sm:$0xff]  ;;  %v49_v22 = vld [vmem:[%s1511_s0 + $0x110] sm:$0xff]  ;;  %v116_v42 = vpack.c.bf16 %v72_v37, %v71_v36 }
  0x18   :  { %839 = vmatmul.msk.bf16.gmra.mxu2 %vm128_vm0, %v109_v23  ;;  %849 = vmatmul.msk.bf16.gmra.mxu3 %vm128_vm0, %v119_v26  ;;  %v50_v23 = vld [vmem:[%s1511_s0 + $0x118] sm:$0xff]  ;;  %v95_v28 = vpack.c.bf16 %v30_v21, %v29_v20  ;;  %v73_v55 = vld [vmem:[%s1511_s0 + $0x1d0] sm:$0xff] }
  0x19   :  { %v70_v26 = vld [vmem:[%s1511_s0 + $0x1b8] sm:$0xff]  ;;  %v105_v29 = vpack.c.bf16 %v50_v23, %v49_v22 }
  0x1a   :  { %v115_v30 = vpack.c.bf16 %v70_v26, %v69_v25  ;;  %v54_v54 = vld [vmem:[%s1511_s0 + $0x138] sm:$0xff] }
  0x1b   :  { %v74_v56 = vld [vmem:[%s1511_s0 + $0x1d8] sm:$0xff] }
  0x1c   :  { %v117_v63 = vpack.c.bf16 %v74_v56, %v73_v55 }
  0x27   :  { %820 = vmatmul.msk.bf16.gmra.mxu0 %vm128_vm0, %v90_v33  ;;  %830 = vmatmul.msk.bf16.gmra.mxu1 %vm128_vm0, %v100_v34  ;;  %v51_v33 = vld [vmem:[%s1511_s0 + $0x120] sm:$0xff]  ;;  %v52_v34 = vld [vmem:[%s1511_s0 + $0x128] sm:$0xff] }
  0x28   :  { %840 = vmatmul.msk.bf16.gmra.mxu2 %vm128_vm0, %v110_v35  ;;  %850 = vmatmul.msk.bf16.gmra.mxu3 %vm128_vm0, %v120_v38  ;;  %v1114_v35 = vld [vmem:[%s1512_s2] ss:$0 sm:$0xff]  ;;  %v96_v38 = vpack.c.bf16 %v32_v32, %v31_v31  ;;  %v106_v39 = vpack.c.bf16 %v52_v34, %v51_v33 }
  0x37   :  { %821 = vmatmul.msk.bf16.gmra.mxu0 %vm128_vm0, %v91_v45  ;;  %831 = vmatmul.msk.bf16.gmra.mxu1 %vm128_vm0, %v101_v46 }
  0x38   :  { %841 = vmatmul.msk.bf16.gmra.mxu2 %vm128_vm0, %v111_v47  ;;  %851 = vmatmul.msk.bf16.gmra.mxu3 %vm128_vm0, %v121_v50 }
  0x47   :  { %822 = vmatmul.msk.bf16.gmra.mxu0 %vm128_vm0, %v92_v57  ;;  %832 = vmatmul.msk.bf16.gmra.mxu1 %vm128_vm0, %v102_v58  ;;  %v97_v58 = vpack.c.bf16 %v34_v52, %v33_v51 }
  0x48   :  { %842 = vmatmul.msk.bf16.gmra.mxu2 %vm128_vm0, %v112_v59  ;;  %852 = vmatmul.msk.bf16.gmra.mxu3 %vm128_vm0, %v122_v62  ;;  %v107_v59 = vpack.c.bf16 %v54_v54, %v53_v53 }
  0x57   :  { %823 = vmatmul.msk.bf16.gmra.mxu0 %vm128_vm0, %v93_v5  ;;  %833 = vmatmul.msk.bf16.gmra.mxu1 %vm128_vm0, %v103_v6 }
  0x58   :  { %843 = vmatmul.msk.bf16.gmra.mxu2 %vm128_vm0, %v113_v7  ;;  %853 = vmatmul.msk.bf16.gmra.mxu3 %vm128_vm0, %v123_v10 }
  0x67   :  { %824 = vmatmul.msk.bf16.gmra.mxu0 %vm128_vm0, %v94_v17  ;;  %834 = vmatmul.msk.bf16.gmra.mxu1 %vm128_vm0, %v104_v18 }
  0x68   :  { %844 = vmatmul.msk.bf16.gmra.mxu2 %vm128_vm0, %v114_v19  ;;  %854 = vmatmul.msk.bf16.gmra.mxu3 %vm128_vm0, %v124_v27 }
  0x77   :  { %825 = vmatmul.msk.bf16.gmra.mxu0 %vm128_vm0, %v95_v28  ;;  %835 = vmatmul.msk.bf16.gmra.mxu1 %vm128_vm0, %v105_v29 }
  0x78   :  { %845 = vmatmul.msk.bf16.gmra.mxu2 %vm128_vm0, %v115_v30 }
  0x84   :  { %v249_v40 = vpop.f32.mrf.mxu0  ;;  %v299_v41 = vpop.f32.mrf.mxu1 }
  0x85   :  { %v441_v43 = vadd.f32 %v1114_v35, %v249_v40  ;;  %v461_v44 = vadd.f32 %v1114_v35, %v299_v41 }
  0x87   :  { %515 = vst.msk [vmem:[%s1513_s3] sm:$0xff] %vm514_vm1, %v441_v43  ;;  %826 = vmatmul.msk.bf16.gmra.mxu0 %vm128_vm0, %v96_v38  ;;  %836 = vmatmul.msk.bf16.gmra.mxu1 %vm128_vm0, %v106_v39 }
  0x88   :  { %535 = vst.msk [vmem:[%s1513_s3 + $0xa0] sm:$0xff] %vm514_vm1, %v461_v44  ;;  %846 = vmatmul.msk.bf16.gmra.mxu2 %vm128_vm0, %v116_v42 }
  0x8b   :  { %v349_v45 = vpop.f32.mrf.mxu2  ;;  %v399_v2 = vpop.f32.mrf.mxu3 }
  0x8c   :  { %v481_v46 = vadd.f32 %v1114_v35, %v349_v45  ;;  %v251_v47 = vpop.f32.mrf.mxu0  ;;  %v301_v48 = vpop.f32.mrf.mxu1  ;;  %v501_v3 = vadd.f32 %v1114_v35, %v399_v2 }
  0x8d   :  { %v442_v49 = vadd.f32 %v1114_v35, %v251_v47  ;;  %v462_v50 = vadd.f32 %v1114_v35, %v301_v48 }
  0x8e   :  { %555 = vst.msk [vmem:[%s1513_s3 + $0x140] sm:$0xff] %vm514_vm1, %v481_v46 }
  0x8f   :  { %516 = vst.msk [vmem:[%s1513_s3 + $0x8] sm:$0xff] %vm514_vm1, %v442_v49 }
  0x90   :  { %536 = vst.msk [vmem:[%s1513_s3 + $0xa8] sm:$0xff] %vm514_vm1, %v462_v50 }
  0x91   :  { %575 = vst.msk [vmem:[%s1513_s3 + $0x1e0] sm:$0xff] %vm514_vm1, %v501_v3 }
  0x93   :  { %v351_v57 = vpop.f32.mrf.mxu2  ;;  %v401_v10 = vpop.f32.mrf.mxu3 }
  0x94   :  { %v482_v60 = vadd.f32 %v1114_v35, %v351_v57  ;;  %v254_v61 = vpop.f32.mrf.mxu0  ;;  %v304_v62 = vpop.f32.mrf.mxu1  ;;  %v502_v11 = vadd.f32 %v1114_v35, %v401_v10 }
  0x95   :  { %v443_v0 = vadd.f32 %v1114_v35, %v254_v61  ;;  %v463_v1 = vadd.f32 %v1114_v35, %v304_v62 }
  0x96   :  { %556 = vst.msk [vmem:[%s1513_s3 + $0x148] sm:$0xff] %vm514_vm1, %v482_v60 }
  0x97   :  { %517 = vst.msk [vmem:[%s1513_s3 + $0x10] sm:$0xff] %vm514_vm1, %v443_v0  ;;  %827 = vmatmul.msk.bf16.gmra.mxu0 %vm128_vm0, %v97_v58  ;;  %837 = vmatmul.msk.bf16.gmra.mxu1 %vm128_vm0, %v107_v59 }
  0x98   :  { %537 = vst.msk [vmem:[%s1513_s3 + $0xb0] sm:$0xff] %vm514_vm1, %v463_v1  ;;  %847 = vmatmul.msk.bf16.gmra.mxu2 %vm128_vm0, %v117_v63 }
  0x99   :  { %576 = vst.msk [vmem:[%s1513_s3 + $0x1e8] sm:$0xff] %vm514_vm1, %v502_v11 }
  0x9b   :  { %v354_v4 = vpop.f32.mrf.mxu2  ;;  %v404_v18 = vpop.f32.mrf.mxu3 }
  0x9c   :  { %v483_v5 = vadd.f32 %v1114_v35, %v354_v4  ;;  %v256_v6 = vpop.f32.mrf.mxu0  ;;  %v306_v7 = vpop.f32.mrf.mxu1  ;;  %v503_v19 = vadd.f32 %v1114_v35, %v404_v18 }
  0x9d   :  { %v444_v8 = vadd.f32 %v1114_v35, %v256_v6  ;;  %v464_v9 = vadd.f32 %v1114_v35, %v306_v7 }
  0x9e   :  { %557 = vst.msk [vmem:[%s1513_s3 + $0x150] sm:$0xff] %vm514_vm1, %v483_v5 }
  0x9f   :  { %518 = vst.msk [vmem:[%s1513_s3 + $0x18] sm:$0xff] %vm514_vm1, %v444_v8 }
  0xa0   :  { %538 = vst.msk [vmem:[%s1513_s3 + $0xb8] sm:$0xff] %vm514_vm1, %v464_v9 }
  0xa1   :  { %577 = vst.msk [vmem:[%s1513_s3 + $0x1f0] sm:$0xff] %vm514_vm1, %v503_v19 }
  0xa3   :  { %v356_v12 = vpop.f32.mrf.mxu2  ;;  %v406_v26 = vpop.f32.mrf.mxu3 }
  0xa4   :  { %v484_v13 = vadd.f32 %v1114_v35, %v356_v12  ;;  %v259_v14 = vpop.f32.mrf.mxu0  ;;  %v309_v15 = vpop.f32.mrf.mxu1  ;;  %v504_v27 = vadd.f32 %v1114_v35, %v406_v26 }
  0xa5   :  { %v445_v16 = vadd.f32 %v1114_v35, %v259_v14  ;;  %v465_v17 = vadd.f32 %v1114_v35, %v309_v15 }
  0xa6   :  { %558 = vst.msk [vmem:[%s1513_s3 + $0x158] sm:$0xff] %vm514_vm1, %v484_v13 }
  0xa7   :  { %519 = vst.msk [vmem:[%s1513_s3 + $0x20] sm:$0xff] %vm514_vm1, %v445_v16 }
  0xa8   :  { %539 = vst.msk [vmem:[%s1513_s3 + $0xc0] sm:$0xff] %vm514_vm1, %v465_v17 }
  0xa9   :  { %578 = vst.msk [vmem:[%s1513_s3 + $0x1f8] sm:$0xff] %vm514_vm1, %v504_v27 }
  0xab   :  { %v359_v20 = vpop.f32.mrf.mxu2  ;;  %v409_v34 = vpop.f32.mrf.mxu3 }
  0xac   :  { %v485_v21 = vadd.f32 %v1114_v35, %v359_v20  ;;  %v261_v22 = vpop.f32.mrf.mxu0  ;;  %v311_v23 = vpop.f32.mrf.mxu1  ;;  %v505_v36 = vadd.f32 %v1114_v35, %v409_v34 }
  0xad   :  { %v446_v24 = vadd.f32 %v1114_v35, %v261_v22  ;;  %v466_v25 = vadd.f32 %v1114_v35, %v311_v23 }
  0xae   :  { %559 = vst.msk [vmem:[%s1513_s3 + $0x160] sm:$0xff] %vm514_vm1, %v485_v21 }
  0xaf   :  { %520 = vst.msk [vmem:[%s1513_s3 + $0x28] sm:$0xff] %vm514_vm1, %v446_v24 }
  0xb0   :  { %540 = vst.msk [vmem:[%s1513_s3 + $0xc8] sm:$0xff] %vm514_vm1, %v466_v25 }
  0xb1   :  { %579 = vst.msk [vmem:[%s1513_s3 + $0x200] sm:$0xff] %vm514_vm1, %v505_v36 }
  0xb3   :  { %v361_v28 = vpop.f32.mrf.mxu2  ;;  %v411_v43 = vpop.f32.mrf.mxu3 }
  0xb4   :  { %v486_v29 = vadd.f32 %v1114_v35, %v361_v28  ;;  %v264_v30 = vpop.f32.mrf.mxu0  ;;  %v314_v31 = vpop.f32.mrf.mxu1  ;;  %v506_v44 = vadd.f32 %v1114_v35, %v411_v43 }
  0xb5   :  { %v447_v32 = vadd.f32 %v1114_v35, %v264_v30  ;;  %v467_v33 = vadd.f32 %v1114_v35, %v314_v31 }
  0xb6   :  { %560 = vst.msk [vmem:[%s1513_s3 + $0x168] sm:$0xff] %vm514_vm1, %v486_v29 }
  0xb7   :  { %521 = vst.msk [vmem:[%s1513_s3 + $0x30] sm:$0xff] %vm514_vm1, %v447_v32 }
  0xb8   :  { %541 = vst.msk [vmem:[%s1513_s3 + $0xd0] sm:$0xff] %vm514_vm1, %v467_v33 }
  0xb9   :  { %580 = vst.msk [vmem:[%s1513_s3 + $0x208] sm:$0xff] %vm514_vm1, %v506_v44 }
  0xbb   :  { %v364_v37 = vpop.f32.mrf.mxu2  ;;  %v414_v51 = vpop.f32.mrf.mxu3 }
  0xbc   :  { %v487_v38 = vadd.f32 %v1114_v35, %v364_v37  ;;  %v266_v39 = vpop.f32.mrf.mxu0  ;;  %v316_v40 = vpop.f32.mrf.mxu1  ;;  %v507_v52 = vadd.f32 %v1114_v35, %v414_v51 }
  0xbd   :  { %v448_v41 = vadd.f32 %v1114_v35, %v266_v39  ;;  %v468_v42 = vadd.f32 %v1114_v35, %v316_v40 }
  0xbe   :  { %561 = vst.msk [vmem:[%s1513_s3 + $0x170] sm:$0xff] %vm514_vm1, %v487_v38 }
  0xbf   :  { %522 = vst.msk [vmem:[%s1513_s3 + $0x38] sm:$0xff] %vm514_vm1, %v448_v41 }
  0xc0   :  { %542 = vst.msk [vmem:[%s1513_s3 + $0xd8] sm:$0xff] %vm514_vm1, %v468_v42 }
  0xc1   :  { %581 = vst.msk [vmem:[%s1513_s3 + $0x210] sm:$0xff] %vm514_vm1, %v507_v52 }
  0xc3   :  { %v366_v45 = vpop.f32.mrf.mxu2  ;;  %v416_v59 = vpop.f32.mrf.mxu3 }
  0xc4   :  { %v488_v46 = vadd.f32 %v1114_v35, %v366_v45  ;;  %v269_v47 = vpop.f32.mrf.mxu0  ;;  %v319_v48 = vpop.f32.mrf.mxu1  ;;  %v508_v60 = vadd.f32 %v1114_v35, %v416_v59 }
  0xc5   :  { %v449_v49 = vadd.f32 %v1114_v35, %v269_v47  ;;  %v469_v50 = vadd.f32 %v1114_v35, %v319_v48 }
  0xc6   :  { %562 = vst.msk [vmem:[%s1513_s3 + $0x178] sm:$0xff] %vm514_vm1, %v488_v46 }
  0xc7   :  { %523 = vst.msk [vmem:[%s1513_s3 + $0x40] sm:$0xff] %vm514_vm1, %v449_v49 }
  0xc8   :  { %543 = vst.msk [vmem:[%s1513_s3 + $0xe0] sm:$0xff] %vm514_vm1, %v469_v50 }
  0xc9   :  { %582 = vst.msk [vmem:[%s1513_s3 + $0x218] sm:$0xff] %vm514_vm1, %v508_v60 }
  0xcb   :  { %v369_v53 = vpop.f32.mrf.mxu2  ;;  %v419_v3 = vpop.f32.mrf.mxu3 }
  0xcc   :  { %v489_v54 = vadd.f32 %v1114_v35, %v369_v53  ;;  %v271_v55 = vpop.f32.mrf.mxu0  ;;  %v321_v56 = vpop.f32.mrf.mxu1  ;;  %v509_v4 = vadd.f32 %v1114_v35, %v419_v3 }
  0xcd   :  { %v450_v57 = vadd.f32 %v1114_v35, %v271_v55  ;;  %v470_v58 = vadd.f32 %v1114_v35, %v321_v56 }
  0xce   :  { %563 = vst.msk [vmem:[%s1513_s3 + $0x180] sm:$0xff] %vm514_vm1, %v489_v54 }
  0xcf   :  { %524 = vst.msk [vmem:[%s1513_s3 + $0x48] sm:$0xff] %vm514_vm1, %v450_v57 }
  0xd0   :  { %544 = vst.msk [vmem:[%s1513_s3 + $0xe8] sm:$0xff] %vm514_vm1, %v470_v58 }
  0xd1   :  { %583 = vst.msk [vmem:[%s1513_s3 + $0x220] sm:$0xff] %vm514_vm1, %v509_v4 }
  0xd3   :  { %v371_v61 = vpop.f32.mrf.mxu2  ;;  %v421_v11 = vpop.f32.mrf.mxu3 }
  0xd4   :  { %v490_v62 = vadd.f32 %v1114_v35, %v371_v61  ;;  %v274_v63 = vpop.f32.mrf.mxu0  ;;  %v324_v0 = vpop.f32.mrf.mxu1  ;;  %v510_v12 = vadd.f32 %v1114_v35, %v421_v11 }
  0xd5   :  { %v451_v1 = vadd.f32 %v1114_v35, %v274_v63  ;;  %v471_v2 = vadd.f32 %v1114_v35, %v324_v0 }
  0xd6   :  { %564 = vst.msk [vmem:[%s1513_s3 + $0x188] sm:$0xff] %vm514_vm1, %v490_v62 }
  0xd7   :  { %525 = vst.msk [vmem:[%s1513_s3 + $0x50] sm:$0xff] %vm514_vm1, %v451_v1 }
  0xd8   :  { %545 = vst.msk [vmem:[%s1513_s3 + $0xf0] sm:$0xff] %vm514_vm1, %v471_v2 }
  0xd9   :  { %584 = vst.msk [vmem:[%s1513_s3 + $0x228] sm:$0xff] %vm514_vm1, %v510_v12 }
  0xdb   :  { %v374_v5 = vpop.f32.mrf.mxu2  ;;  %v424_v19 = vpop.f32.mrf.mxu3 }
  0xdc   :  { %v491_v6 = vadd.f32 %v1114_v35, %v374_v5  ;;  %v276_v7 = vpop.f32.mrf.mxu0  ;;  %v326_v8 = vpop.f32.mrf.mxu1  ;;  %v511_v20 = vadd.f32 %v1114_v35, %v424_v19 }
  0xdd   :  { %v452_v9 = vadd.f32 %v1114_v35, %v276_v7  ;;  %v472_v10 = vadd.f32 %v1114_v35, %v326_v8 }
  0xde   :  { %565 = vst.msk [vmem:[%s1513_s3 + $0x190] sm:$0xff] %vm514_vm1, %v491_v6 }
  0xdf   :  { %526 = vst.msk [vmem:[%s1513_s3 + $0x58] sm:$0xff] %vm514_vm1, %v452_v9 }
  0xe0   :  { %546 = vst.msk [vmem:[%s1513_s3 + $0xf8] sm:$0xff] %vm514_vm1, %v472_v10 }
  0xe1   :  { %585 = vst.msk [vmem:[%s1513_s3 + $0x230] sm:$0xff] %vm514_vm1, %v511_v20 }
  0xe3   :  { %v376_v13 = vpop.f32.mrf.mxu2  ;;  %v426_v27 = vpop.f32.mrf.mxu3 }
  0xe4   :  { %v492_v14 = vadd.f32 %v1114_v35, %v376_v13  ;;  %v279_v15 = vpop.f32.mrf.mxu0  ;;  %v329_v16 = vpop.f32.mrf.mxu1  ;;  %v512_v28 = vadd.f32 %v1114_v35, %v426_v27 }
  0xe5   :  { %v453_v17 = vadd.f32 %v1114_v35, %v279_v15  ;;  %v473_v18 = vadd.f32 %v1114_v35, %v329_v16 }
  0xe6   :  { %566 = vst.msk [vmem:[%s1513_s3 + $0x198] sm:$0xff] %vm514_vm1, %v492_v14 }
  0xe7   :  { %527 = vst.msk [vmem:[%s1513_s3 + $0x60] sm:$0xff] %vm514_vm1, %v453_v17 }
  0xe8   :  { %547 = vst.msk [vmem:[%s1513_s3 + $0x100] sm:$0xff] %vm514_vm1, %v473_v18 }
  0xe9   :  { %586 = vst.msk [vmem:[%s1513_s3 + $0x238] sm:$0xff] %vm514_vm1, %v512_v28 }
  0xeb   :  { %v379_v21 = vpop.f32.mrf.mxu2  ;;  %v429_v36 = vpop.f32.mrf.mxu3 }
  0xec   :  { %v493_v22 = vadd.f32 %v1114_v35, %v379_v21  ;;  %v281_v23 = vpop.f32.mrf.mxu0  ;;  %v331_v24 = vpop.f32.mrf.mxu1  ;;  %v513_v37 = vadd.f32 %v1114_v35, %v429_v36 }
  0xed   :  { %v454_v25 = vadd.f32 %v1114_v35, %v281_v23  ;;  %v474_v26 = vadd.f32 %v1114_v35, %v331_v24 }
  0xee   :  { %567 = vst.msk [vmem:[%s1513_s3 + $0x1a0] sm:$0xff] %vm514_vm1, %v493_v22 }
  0xef   :  { %528 = vst.msk [vmem:[%s1513_s3 + $0x68] sm:$0xff] %vm514_vm1, %v454_v25 }
  0xf0   :  { %548 = vst.msk [vmem:[%s1513_s3 + $0x108] sm:$0xff] %vm514_vm1, %v474_v26 }
  0xf1   :  { %588 = vst.msk [vmem:[%s1513_s3 + $0x240] sm:$0x3] %vm587_vm2, %v513_v37 }
  0xf3   :  { %v381_v29 = vpop.f32.mrf.mxu2  ;;  %v431_v44 = vpop.f32.mrf.mxu3 }
  0xf4   :  { %v494_v30 = vadd.f32 %v1114_v35, %v381_v29  ;;  %v284_v31 = vpop.f32.mrf.mxu0  ;;  %v334_v32 = vpop.f32.mrf.mxu1 }
  0xf5   :  { %v455_v33 = vadd.f32 %v1114_v35, %v284_v31  ;;  %v475_v34 = vadd.f32 %v1114_v35, %v334_v32 }
  0xf6   :  { %568 = vst.msk [vmem:[%s1513_s3 + $0x1a8] sm:$0xff] %vm514_vm1, %v494_v30 }
  0xf7   :  { %529 = vst.msk [vmem:[%s1513_s3 + $0x70] sm:$0xff] %vm514_vm1, %v455_v33 }
  0xf8   :  { %549 = vst.msk [vmem:[%s1513_s3 + $0x110] sm:$0xff] %vm514_vm1, %v475_v34 }
  0xfb   :  { %v384_v38 = vpop.f32.mrf.mxu2 }
  0xfc   :  { %v495_v39 = vadd.f32 %v1114_v35, %v384_v38  ;;  %v286_v40 = vpop.f32.mrf.mxu0  ;;  %v336_v41 = vpop.f32.mrf.mxu1 }
  0xfd   :  { %v456_v42 = vadd.f32 %v1114_v35, %v286_v40  ;;  %v476_v43 = vadd.f32 %v1114_v35, %v336_v41 }
  0xfe   :  { %569 = vst.msk [vmem:[%s1513_s3 + $0x1b0] sm:$0xff] %vm514_vm1, %v495_v39 }
  0xff   :  { %530 = vst.msk [vmem:[%s1513_s3 + $0x78] sm:$0xff] %vm514_vm1, %v456_v42 }
 0x100   :  { %550 = vst.msk [vmem:[%s1513_s3 + $0x118] sm:$0xff] %vm514_vm1, %v476_v43 }
 0x103   :  { %v386_v45 = vpop.f32.mrf.mxu2 }
 0x104   :  { %v496_v46 = vadd.f32 %v1114_v35, %v386_v45  ;;  %v289_v47 = vpop.f32.mrf.mxu0  ;;  %v339_v48 = vpop.f32.mrf.mxu1 }
 0x105   :  { %v457_v49 = vadd.f32 %v1114_v35, %v289_v47  ;;  %v477_v50 = vadd.f32 %v1114_v35, %v339_v48 }
 0x106   :  { %570 = vst.msk [vmem:[%s1513_s3 + $0x1b8] sm:$0xff] %vm514_vm1, %v496_v46 }
 0x107   :  { %531 = vst.msk [vmem:[%s1513_s3 + $0x80] sm:$0xff] %vm514_vm1, %v457_v49 }
 0x108   :  { %551 = vst.msk [vmem:[%s1513_s3 + $0x120] sm:$0xff] %vm514_vm1, %v477_v50 }
 0x10b   :  { %v389_v51 = vpop.f32.mrf.mxu2 }
 0x10c   :  { %v497_v52 = vadd.f32 %v1114_v35, %v389_v51  ;;  %v291_v53 = vpop.f32.mrf.mxu0  ;;  %v341_v54 = vpop.f32.mrf.mxu1 }
 0x10d   :  { %v458_v55 = vadd.f32 %v1114_v35, %v291_v53  ;;  %v478_v56 = vadd.f32 %v1114_v35, %v341_v54 }
 0x10e   :  { %571 = vst.msk [vmem:[%s1513_s3 + $0x1c0] sm:$0xff] %vm514_vm1, %v497_v52 }
 0x10f   :  { %532 = vst.msk [vmem:[%s1513_s3 + $0x88] sm:$0xff] %vm514_vm1, %v458_v55 }
 0x110   :  { %552 = vst.msk [vmem:[%s1513_s3 + $0x128] sm:$0xff] %vm514_vm1, %v478_v56 }
 0x113   :  { %v391_v57 = vpop.f32.mrf.mxu2 }
 0x114   :  { %v498_v58 = vadd.f32 %v1114_v35, %v391_v57  ;;  %v294_v59 = vpop.f32.mrf.mxu0  ;;  %v344_v60 = vpop.f32.mrf.mxu1 }
 0x115   :  { %v459_v61 = vadd.f32 %v1114_v35, %v294_v59  ;;  %v479_v62 = vadd.f32 %v1114_v35, %v344_v60 }
 0x116   :  { %572 = vst.msk [vmem:[%s1513_s3 + $0x1c8] sm:$0xff] %vm514_vm1, %v498_v58 }
 0x117   :  { %533 = vst.msk [vmem:[%s1513_s3 + $0x90] sm:$0xff] %vm514_vm1, %v459_v61 }
 0x118   :  { %553 = vst.msk [vmem:[%s1513_s3 + $0x130] sm:$0xff] %vm514_vm1, %v479_v62 }
 0x11b   :  { %v394_v63 = vpop.f32.mrf.mxu2 }
 0x11c   :  { %v499_v0 = vadd.f32 %v1114_v35, %v394_v63  ;;  %v296_v1 = vpop.f32.mrf.mxu0  ;;  %v346_v2 = vpop.f32.mrf.mxu1 }
 0x11d   :  { %v460_v3 = vadd.f32 %v1114_v35, %v296_v1  ;;  %v480_v4 = vadd.f32 %v1114_v35, %v346_v2 }
 0x11e   :  { %573 = vst.msk [vmem:[%s1513_s3 + $0x1d0] sm:$0xff] %vm514_vm1, %v499_v0 }
 0x11f   :  { %534 = vst.msk [vmem:[%s1513_s3 + $0x98] sm:$0xff] %vm514_vm1, %v460_v3 }
 0x120   :  { %554 = vst.msk [vmem:[%s1513_s3 + $0x138] sm:$0xff] %vm514_vm1, %v480_v4 }
 0x123   :  { %v396_v5 = vpop.f32.mrf.mxu2 }
 0x124   :  { %v500_v6 = vadd.f32 %v1114_v35, %v396_v5 }
 0x126   :  { %574 = vst.msk [vmem:[%s1513_s3 + $0x1d8] sm:$0xff] %vm514_vm1, %v500_v6 }

// kernel: _lambda_.40
= control target key start
LH: loop header
LB: loop body
LE: loop exit
PB: predicated region body
PF: predicated region fallthrough
CT: control target
= control target key end

     0   :  { %s584_s12 = smov 0   ;;  %s586_s13 = smov 0   ;;  %s689_s0 = inlined_call_operand.vmem [shape: f32[2,34,68], index: 0, kind: input, shape index: {}]   ;;  %s690_s1 = inlined_call_operand.vmem [shape: f32[2,1,68], index: 1, kind: input, shape index: {}]   ;;  %s691_s2 = inlined_call_operand.vmem [shape: f32[2,1,68], index: 2, kind: input, shape index: {}]   ;;  %s692_s3 = inlined_call_operand.vmem [shape: f32[2,34,68], index: 3, kind: output, shape index: {}]  }
   0x1   :  { %s588_s14 = smov 0  }
   0x2 LB: > { %s25_s15 = sadd.s32 1, %s557_s13  ;;  %p494_p0 = scmp.ge.s32.totalorder %s561_s14, 1  ;;  %s561_s14 = sphi %s588_s14, %s13_s14   ;;  %s557_s13 = sphi %s586_s13, %s694_s13   ;;  %s553_s12 = sphi %s584_s12, %s693_s12  }
   0x3   : > { %p27_p1 = scmp.ge.s32.totalorder %s25_s15, 2  ;;  %p174_p2 = scmp.lt.s32.totalorder %s561_s14, 3 }
   0x5   : > { %s696_s15 = smov (%p27_p1, %s25_s15), 0  ;;  %p175_p3 = pnand %p494_p0, %p174_p2 }
   0x6   : > { %p213_p4 = scmp.lt.s32.totalorder (!%p175_p3), %s553_s12, 1 }
   0x7   : > { %178 = sbr.rel (%p175_p3) target bundleno = 302 (0x12e), region = 32 }
   0xc   : > { %s698_s12 = smov (!%p213_p4, %s553_s12), 1  ;;  %vm243_vm0 = vcmask 556032   ;;  %vm256_vm1 = vcmask 549888   ;;  %v563_v10 = vmov 68.0  }
   0xd   : > { %s499_s16 = smul.u32 40, %s698_s12  ;;  %s224_s19 = scalar_lea.vmem %s690_s1, %s698_s12  ;;  %527 = vrcp.f32 %v563_v10 }
   0xe   : > { %s227_s22 = scalar_lea.vmem %s691_s2, %s698_s12 }
   0xf   : > { %s220_s25 = scalar_lea.vmem %s689_s0, %s499_s16  ;;  %s665_s5 = scalar_lea.vmem %s692_s3, %s499_s16 }
  0x10   : > { %v240_v0 = vld [vmem:[%s220_s25 + $0x10] sm:$0xff]  ;;  %v238_v1 = vld [vmem:[%s220_s25] sm:$0xff]  ;;  %v241_v6 = vld [vmem:[%s220_s25 + $0x18] sm:$0xff] }
  0x11   : > { %v250_v2 = vsel %vm243_vm0, %v240_v0, 0.0  ;;  %v244_v3 = vsel %vm243_vm0, %v238_v1, 0.0  ;;  %v242_v4 = vld [vmem:[%s220_s25 + $0x20] sm:$0x3]  ;;  %v239_v7 = vld [vmem:[%s220_s25 + $0x8] sm:$0xff]  ;;  %v253_v8 = vsel %vm243_vm0, %v241_v6, 0.0 }
  0x12   : > { %251 = vadd.xlane.f32.xlu1 %v250_v2  ;;  %245 = vadd.xlane.f32.xlu0 %v244_v3  ;;  %v257_v5 = vsel %vm256_vm1, %v242_v4, 0.0  ;;  %v247_v9 = vsel %vm243_vm0, %v239_v7, 0.0 }
  0x13   : > { %258 = vadd.xlane.f32.xlu2 %v257_v5  ;;  %v528_v11 = vpop.eup %527 }
  0x14   : > { %v261_v12 = vmul.f32 68.0, %v528_v11  ;;  %vm265_vm2 = vweird.f32 %v528_v11 }
  0x16   : > { %v262_v13 = vsub.f32 1.0, %v261_v12  ;;  %v526_v12 = vld [vmem:[%s227_s22] ss:$0 sm:$0xff] }
  0x18   : > { %v263_v14 = vmul.f32 %v528_v11, %v262_v13 }
  0x1a   : > { %254 = vadd.xlane.f32.xlu1 %v253_v8  ;;  %248 = vadd.xlane.f32.xlu0 %v247_v9  ;;  %v264_v15 = vadd.f32 %v528_v11, %v263_v14 }
  0x1c   : > { %v266_v16 = vsel %vm265_vm2, %v528_v11, %v264_v15 }
  0x85   : > { %v252_v17 = vpop.xlane.xlu1 %251  ;;  %v246_v18 = vpop.xlane.xlu0 %245 }
  0x86   : > { %v269_v19 = vmul.f32 %v266_v16, %v252_v17  ;;  %v267_v20 = vmul.f32 %v266_v16, %v246_v18  ;;  %v259_v25 = vpop.xlane.xlu2 %258 }
  0x87   : > { %v271_v32 = vmul.f32 %v266_v16, %v259_v25 }
  0x88   : > { %v623_v21 = vsub.f32 %v240_v0, %v269_v19  ;;  %v625_v22 = vsub.f32 %v238_v1, %v267_v20 }
  0x89   : > { %v637_v35 = vsub.f32 %v242_v4, %v271_v32 }
  0x8a   : > { %v279_v23 = vmul.f32 %v623_v21, %v623_v21  ;;  %v277_v24 = vmul.f32 %v625_v22, %v625_v22 }
  0x8b   : > { %v281_v40 = vmul.f32 %v637_v35, %v637_v35 }
  0x8c   : > { %v288_v26 = vsel %vm243_vm0, %v279_v23, 0.0  ;;  %v282_v27 = vsel %vm243_vm0, %v277_v24, 0.0 }
  0x8d   : > { %289 = vadd.xlane.f32.xlu1 %v288_v26  ;;  %v255_v28 = vpop.xlane.xlu1 %254  ;;  %283 = vadd.xlane.f32.xlu2 %v282_v27  ;;  %v249_v29 = vpop.xlane.xlu0 %248  ;;  %v294_v41 = vsel %vm256_vm1, %v281_v40, 0.0 }
  0x8e   : > { %v270_v30 = vmul.f32 %v266_v16, %v255_v28  ;;  %v268_v31 = vmul.f32 %v266_v16, %v249_v29 }
  0x90   : > { %v633_v33 = vsub.f32 %v241_v6, %v270_v30  ;;  %v635_v34 = vsub.f32 %v239_v7, %v268_v31  ;;  %v525_v7 = vld [vmem:[%s224_s19] ss:$0 sm:$0xff] }
  0x92   : > { %v280_v36 = vmul.f32 %v633_v33, %v633_v33  ;;  %v278_v37 = vmul.f32 %v635_v34, %v635_v34 }
  0x94   : > { %v291_v38 = vsel %vm243_vm0, %v280_v36, 0.0  ;;  %v285_v39 = vsel %vm243_vm0, %v278_v37, 0.0 }
  0x95   : > { %292 = vadd.xlane.f32.xlu2 %v291_v38  ;;  %286 = vadd.xlane.f32.xlu0 %v285_v39 }
  0x9d   : > { %295 = vadd.xlane.f32.xlu0 %v294_v41 }
 0x100   : > { %v290_v42 = vpop.xlane.xlu1 %289  ;;  %v284_v43 = vpop.xlane.xlu2 %283 }
 0x101   : > { %v299_v44 = vmul.f32 %v290_v42, %v266_v16  ;;  %v297_v45 = vmul.f32 %v284_v43, %v266_v16 }
 0x103   : > { %v304_v46 = vadd.f32 1e-05, %v299_v44  ;;  %v302_v47 = vadd.f32 1e-05, %v297_v45 }
 0x105   : > { %529 = vrsqrt.f32 %v304_v46  ;;  %vm333_vm3 = vweird.f32 %v304_v46  ;;  %vm313_vm7 = vweird.f32 %v302_v47 }
 0x106   : > { %531 = vrsqrt.f32 %v302_v47 }
 0x108   : > { %v293_v48 = vpop.xlane.xlu2 %292  ;;  %v287_v49 = vpop.xlane.xlu0 %286 }
 0x109   : > { %v300_v50 = vmul.f32 %v293_v48, %v266_v16  ;;  %v298_v51 = vmul.f32 %v287_v49, %v266_v16 }
 0x10b   : > { %v530_v52 = vpop.eup %529  ;;  %v305_v53 = vadd.f32 1e-05, %v300_v50  ;;  %v303_v54 = vadd.f32 1e-05, %v298_v51 }
 0x10c   : > { %v532_v55 = vpop.eup %531  ;;  %v328_v56 = vmul.f32 %v530_v52, %v304_v46  ;;  %vm334_vm4 = vweird.f32 %v530_v52 }
 0x10d   : > { %v308_v57 = vmul.f32 %v532_v55, %v302_v47  ;;  %533 = vrsqrt.f32 %v305_v53  ;;  %vm314_vm5 = vweird.f32 %v532_v55  ;;  %vm335_vm6 = vmor %vm333_vm3, %vm334_vm4  ;;  %vm343_vm9 = vweird.f32 %v305_v53 }
 0x10e   : > { %v329_v58 = vmul.f32 %v530_v52, %v328_v56  ;;  %535 = vrsqrt.f32 %v303_v54  ;;  %vm315_vm8 = vmor %vm313_vm7, %vm314_vm5  ;;  %vm323_vm13 = vweird.f32 %v303_v54 }
 0x10f   : > { %v309_v59 = vmul.f32 %v532_v55, %v308_v57 }
 0x110   : > { %v330_v60 = vmul.f32 0.5, %v329_v58  ;;  %v296_v61 = vpop.xlane.xlu0 %295 }
 0x111   : > { %v310_v62 = vmul.f32 0.5, %v309_v59  ;;  %v301_v63 = vmul.f32 %v296_v61, %v266_v16 }
 0x112   : > { %v331_v0 = vsub.f32 1.5, %v330_v60 }
 0x113   : > { %v534_v1 = vpop.eup %533  ;;  %v311_v2 = vsub.f32 1.5, %v310_v62  ;;  %v306_v3 = vadd.f32 1e-05, %v301_v63 }
 0x114   : > { %v536_v4 = vpop.eup %535  ;;  %v332_v5 = vmul.f32 %v530_v52, %v331_v0  ;;  %v338_v6 = vmul.f32 %v534_v1, %v305_v53  ;;  %vm344_vm10 = vweird.f32 %v534_v1 }
 0x115   : > { %v312_v8 = vmul.f32 %v532_v55, %v311_v2  ;;  %v318_v9 = vmul.f32 %v536_v4, %v303_v54  ;;  %537 = vrsqrt.f32 %v306_v3  ;;  %vm324_vm11 = vweird.f32 %v536_v4  ;;  %vm345_vm12 = vmor %vm343_vm9, %vm344_vm10 }
 0x116   : > { %v336_v10 = vsel %vm335_vm6, %v530_v52, %v332_v5  ;;  %v339_v11 = vmul.f32 %v534_v1, %v338_v6  ;;  %vm325_vm14 = vmor %vm323_vm13, %vm324_vm11  ;;  %vm353_vm2 = vweird.f32 %v306_v3 }
 0x117   : > { %v359_v13 = vmul.f32 %v336_v10, %v623_v21  ;;  %v316_v14 = vsel %vm315_vm8, %v532_v55, %v312_v8  ;;  %v319_v15 = vmul.f32 %v536_v4, %v318_v9 }
 0x118   : > { %v357_v16 = vmul.f32 %v316_v14, %v625_v22  ;;  %v340_v17 = vmul.f32 0.5, %v339_v11 }
 0x119   : > { %v368_v18 = vmul.f32 %v525_v7, %v359_v13  ;;  %v320_v19 = vmul.f32 0.5, %v319_v15 }
 0x11a   : > { %v366_v20 = vmul.f32 %v525_v7, %v357_v16  ;;  %v341_v23 = vsub.f32 1.5, %v340_v17 }
 0x11b   : > { %v538_v21 = vpop.eup %537  ;;  %v377_v24 = vadd.f32 %v526_v12, %v368_v18  ;;  %v321_v25 = vsub.f32 1.5, %v320_v19 }
 0x11c   : > { %v375_v22 = vadd.f32 %v526_v12, %v366_v20  ;;  %v342_v26 = vmul.f32 %v534_v1, %v341_v23  ;;  %v348_v27 = vmul.f32 %v538_v21, %v306_v3  ;;  %vm354_vm15 = vweird.f32 %v538_v21 }
 0x11d   : > { %382 = vst.msk [vmem:[%s665_s5 + $0x10] sm:$0xff] %vm243_vm0, %v377_v24  ;;  %v322_v28 = vmul.f32 %v536_v4, %v321_v25  ;;  %vm355_vm3 = vmor %vm353_vm2, %vm354_vm15 }
 0x11e   : > { %380 = vst.msk [vmem:[%s665_s5] sm:$0xff] %vm243_vm0, %v375_v22  ;;  %v346_v29 = vsel %vm345_vm12, %v534_v1, %v342_v26  ;;  %v349_v30 = vmul.f32 %v538_v21, %v348_v27 }
 0x11f   : > { %v360_v31 = vmul.f32 %v346_v29, %v633_v33  ;;  %v326_v32 = vsel %vm325_vm14, %v536_v4, %v322_v28 }
 0x120   : > { %v358_v36 = vmul.f32 %v326_v32, %v635_v34  ;;  %v350_v37 = vmul.f32 0.5, %v349_v30 }
 0x121   : > { %v369_v38 = vmul.f32 %v525_v7, %v360_v31 }
 0x122   : > { %v367_v39 = vmul.f32 %v525_v7, %v358_v36  ;;  %v351_v40 = vsub.f32 1.5, %v350_v37 }
 0x123   : > { %v378_v41 = vadd.f32 %v526_v12, %v369_v38 }
 0x124   : > { %v376_v42 = vadd.f32 %v526_v12, %v367_v39  ;;  %v352_v43 = vmul.f32 %v538_v21, %v351_v40 }
 0x125   : > { %383 = vst.msk [vmem:[%s665_s5 + $0x18] sm:$0xff] %vm243_vm0, %v378_v41 }
 0x126   : > { %381 = vst.msk [vmem:[%s665_s5 + $0x8] sm:$0xff] %vm243_vm0, %v376_v42  ;;  %v356_v44 = vsel %vm355_vm3, %v538_v21, %v352_v43 }
 0x127   : > { %v361_v33 = vmul.f32 %v356_v44, %v637_v35 }
 0x129   : > { %v370_v45 = vmul.f32 %v525_v7, %v361_v33 }
 0x12b   : > { %v379_v34 = vadd.f32 %v526_v12, %v370_v45 }
 0x12d   : > { %384 = vst.msk [vmem:[%s665_s5 + $0x20] sm:$0x3] %vm256_vm1, %v379_v34 }
 0x12e PF: > { %s13_s14 = sadd.s32 1, %s561_s14   ;;  %s693_s12 = smov %s557_s13 }
 0x12f   : > { %p10_p5 = scmp.ge.s32.totalorder %s13_s14, 4   ;;  %s694_s13 = smov %s696_s15 }
 0x131   :  { %12 = sbr.rel (!%p10_p5) target bundleno = 2 (0x2), region = 68 }

// kernel: _lambda_.42
= control target key start
LH: loop header
LB: loop body
LE: loop exit
PB: predicated region body
PF: predicated region fallthrough
CT: control target
= control target key end

     0   :  { %s662_s12 = smov 0   ;;  %s664_s13 = smov 0   ;;  %s845_s0 = inlined_call_operand.vmem [shape: f32[2,34,136], index: 0, kind: input, shape index: {}]   ;;  %s846_s1 = inlined_call_operand.vmem [shape: f32[2,1,136], index: 1, kind: input, shape index: {}]   ;;  %s847_s2 = inlined_call_operand.vmem [shape: f32[2,1,136], index: 2, kind: input, shape index: {}]   ;;  %s848_s3 = inlined_call_operand.vmem [shape: f32[2,34,136], index: 3, kind: output, shape index: {}]  }
   0x1   :  { %s666_s14 = smov 0  }
   0x2 LB: > { %s25_s15 = sadd.s32 1, %s635_s13  ;;  %p572_p0 = scmp.ge.s32.totalorder %s639_s14, 1  ;;  %s639_s14 = sphi %s666_s14, %s13_s14   ;;  %s635_s13 = sphi %s664_s13, %s850_s13   ;;  %s631_s12 = sphi %s662_s12, %s849_s12  }
   0x3   : > { %p27_p1 = scmp.ge.s32.totalorder %s25_s15, 2  ;;  %p177_p2 = scmp.lt.s32.totalorder %s639_s14, 3 }
   0x5   : > { %s852_s15 = smov (%p27_p1, %s25_s15), 0  ;;  %p178_p3 = pnand %p572_p0, %p177_p2 }
   0x6   : > { %p220_p4 = scmp.lt.s32.totalorder (!%p178_p3), %s631_s12, 1 }
   0x7   : > { %181 = sbr.rel (%p178_p3) target bundleno = 308 (0x134), region = 32 }
   0xc   : > { %s854_s12 = smov (!%p220_p4, %s631_s12), 1  ;;  %vm259_vm0 = vcmask 64512   ;;  %vm276_vm1 = vcmask 1041408   ;;  %vm278_vm2 = vcmask 58368   ;;  %v641_v21 = vmov 136.0  }
   0xd   : > { %s579_s16 = smul.u32 80, %s854_s12  ;;  %605 = vrcp.f32 %v641_v21  ;;  %s574_s20 = sshll.u32 %s854_s12, 1 }
   0xe   : > { %s233_s23 = scalar_lea.vmem %s846_s1, %s574_s20  ;;  %s237_s26 = scalar_lea.vmem %s847_s2, %s574_s20 }
   0xf   : > { %s228_s19 = scalar_lea.vmem %s845_s0, %s579_s16  ;;  %s789_s29 = scalar_lea.vmem %s848_s3, %s579_s16 }
  0x10   : > { %v253_v0 = vld [vmem:[%s228_s19 + $0x20] sm:$0xff]  ;;  %v254_v1 = vld [vmem:[%s228_s19 + $0x28] sm:$0xff]  ;;  %v256_v7 = vld [vmem:[%s228_s19 + $0x38] sm:$0xff] }
  0x11   : > { %v249_v2 = vld [vmem:[%s228_s19] sm:$0xff]  ;;  %v268_v3 = vsel %vm259_vm0, %v254_v1, 0.0  ;;  %v250_v4 = vld [vmem:[%s228_s19 + $0x8] sm:$0xff]  ;;  %v252_v10 = vld [vmem:[%s228_s19 + $0x18] sm:$0xff]  ;;  %v272_v15 = vsel %vm259_vm0, %v256_v7, 0.0 }
  0x12   : > { %v269_v5 = vadd.f32 %v268_v3, %v253_v0  ;;  %v260_v6 = vsel %vm259_vm0, %v250_v4, 0.0  ;;  %v257_v8 = vld [vmem:[%s228_s19 + $0x40] sm:$0x3]  ;;  %v258_v11 = vld [vmem:[%s228_s19 + $0x48] sm:$0x3]  ;;  %v255_v14 = vld [vmem:[%s228_s19 + $0x30] sm:$0xff] }
  0x13   : > { %v261_v9 = vadd.f32 %v260_v6, %v249_v2  ;;  %v277_v12 = vsel %vm276_vm1, %v257_v8, 0.0  ;;  %v279_v13 = vsel %vm278_vm2, %v258_v11, 0.0  ;;  %v251_v17 = vld [vmem:[%s228_s19 + $0x10] sm:$0xff]  ;;  %v264_v18 = vsel %vm259_vm0, %v252_v10, 0.0  ;;  %v606_v22 = vpop.eup %605 }
  0x14   : > { %270 = vadd.xlane.f32.xlu1 %v269_v5  ;;  %v280_v16 = vadd.f32 %v279_v13, %v277_v12  ;;  %v273_v19 = vadd.f32 %v272_v15, %v255_v14  ;;  %v265_v20 = vadd.f32 %v264_v18, %v251_v17  ;;  %v284_v23 = vmul.f32 136.0, %v606_v22 }
  0x15   : > { %262 = vadd.xlane.f32.xlu0 %v261_v9  ;;  %vm288_vm3 = vweird.f32 %v606_v22 }
  0x16   : > { %281 = vadd.xlane.f32.xlu2 %v280_v16  ;;  %v285_v24 = vsub.f32 1.0, %v284_v23 }
  0x18   : > { %v286_v25 = vmul.f32 %v606_v22, %v285_v24  ;;  %v406_v24 = vld [vmem:[%s233_s23] sm:$0x3] }
  0x1a   : > { %v287_v26 = vadd.f32 %v606_v22, %v286_v25 }
  0x1c   : > { %274 = vadd.xlane.f32.xlu1 %v273_v19  ;;  %v694_v27 = vsel %vm288_vm3, %v606_v22, %v287_v26 }
  0x1d   : > { %266 = vadd.xlane.f32.xlu0 %v265_v20 }
  0x87   : > { %v271_v28 = vpop.xlane.xlu1 %270 }
  0x88   : > { %v292_v29 = vmul.f32 %v694_v27, %v271_v28  ;;  %v263_v30 = vpop.xlane.xlu0 %262  ;;  %v422_v28 = vld [vmem:[%s237_s26] sm:$0x3] }
  0x89   : > { %v290_v31 = vmul.f32 %v694_v27, %v263_v30  ;;  %v282_v38 = vpop.xlane.xlu2 %281 }
  0x8a   : > { %v698_v32 = vsub.f32 %v253_v0, %v292_v29  ;;  %v700_v33 = vsub.f32 %v254_v1, %v292_v29  ;;  %v294_v45 = vmul.f32 %v694_v27, %v282_v38  ;;  %v767_v38 = vperm.slane %v406_v24, 1 }
  0x8b   : > { %v702_v34 = vsub.f32 %v249_v2, %v290_v31  ;;  %v704_v35 = vsub.f32 %v250_v4, %v290_v31 }
  0x8c   : > { %v309_v36 = vmul.f32 %v698_v32, %v698_v32  ;;  %v310_v37 = vmul.f32 %v700_v33, %v700_v33  ;;  %v727_v54 = vsub.f32 %v257_v8, %v294_v45  ;;  %v729_v55 = vsub.f32 %v258_v11, %v294_v45 }
  0x8d   : > { %v305_v39 = vmul.f32 %v702_v34, %v702_v34  ;;  %v306_v40 = vmul.f32 %v704_v35, %v704_v35 }
  0x8e   : > { %v323_v41 = vsel %vm259_vm0, %v310_v37, 0.0  ;;  %v313_v63 = vmul.f32 %v727_v54, %v727_v54  ;;  %v314_v0 = vmul.f32 %v729_v55, %v729_v55  ;;  %v765_v37 = vperm.slane %v406_v24, 0 }
  0x8f   : > { %v275_v42 = vpop.xlane.xlu1 %274  ;;  %v324_v43 = vadd.f32 %v323_v41, %v309_v36  ;;  %v315_v44 = vsel %vm259_vm0, %v306_v40, 0.0 }
  0x90   : > { %v293_v46 = vmul.f32 %v694_v27, %v275_v42  ;;  %v267_v47 = vpop.xlane.xlu0 %266  ;;  %v316_v48 = vadd.f32 %v315_v44, %v305_v39  ;;  %v331_v2 = vsel %vm276_vm1, %v313_v63, 0.0  ;;  %v332_v3 = vsel %vm278_vm2, %v314_v0, 0.0 }
  0x91   : > { %v291_v49 = vmul.f32 %v694_v27, %v267_v47  ;;  %325 = vadd.xlane.f32.xlu1 %v324_v43  ;;  %v333_v4 = vadd.f32 %v332_v3, %v331_v2  ;;  %v771_v42 = vperm.slane %v422_v28, 0 }
  0x92   : > { %v719_v50 = vsub.f32 %v255_v14, %v293_v46  ;;  %v721_v51 = vsub.f32 %v256_v7, %v293_v46  ;;  %317 = vadd.xlane.f32.xlu2 %v316_v48 }
  0x93   : > { %v723_v52 = vsub.f32 %v251_v17, %v291_v49  ;;  %v725_v53 = vsub.f32 %v252_v10, %v291_v49 }
  0x94   : > { %v311_v56 = vmul.f32 %v719_v50, %v719_v50  ;;  %v312_v57 = vmul.f32 %v721_v51, %v721_v51 }
  0x95   : > { %v307_v58 = vmul.f32 %v723_v52, %v723_v52  ;;  %v308_v59 = vmul.f32 %v725_v53, %v725_v53 }
  0x96   : > { %v327_v60 = vsel %vm259_vm0, %v312_v57, 0.0 }
  0x97   : > { %v328_v61 = vadd.f32 %v327_v60, %v311_v56  ;;  %v319_v62 = vsel %vm259_vm0, %v308_v59, 0.0 }
  0x98   : > { %v320_v1 = vadd.f32 %v319_v62, %v307_v58 }
  0x9a   : > { %329 = vadd.xlane.f32.xlu2 %v328_v61  ;;  %321 = vadd.xlane.f32.xlu0 %v320_v1 }
  0xa2   : > { %334 = vadd.xlane.f32.xlu0 %v333_v4 }
 0x104   : > { %v326_v5 = vpop.xlane.xlu1 %325 }
 0x105   : > { %v338_v6 = vmul.f32 %v326_v5, %v694_v27  ;;  %v318_v7 = vpop.xlane.xlu2 %317 }
 0x106   : > { %v336_v8 = vmul.f32 %v318_v7, %v694_v27 }
 0x107   : > { %v343_v9 = vadd.f32 1e-05, %v338_v6 }
 0x108   : > { %v341_v10 = vadd.f32 1e-05, %v336_v8 }
 0x109   : > { %607 = vrsqrt.f32 %v343_v9  ;;  %vm372_vm4 = vweird.f32 %v343_v9 }
 0x10a   : > { %609 = vrsqrt.f32 %v341_v10  ;;  %vm352_vm8 = vweird.f32 %v341_v10 }
 0x10d   : > { %v330_v11 = vpop.xlane.xlu2 %329  ;;  %v322_v12 = vpop.xlane.xlu0 %321 }
 0x10e   : > { %v339_v13 = vmul.f32 %v330_v11, %v694_v27  ;;  %v337_v14 = vmul.f32 %v322_v12, %v694_v27 }
 0x10f   : > { %v608_v15 = vpop.eup %607 }
 0x110   : > { %v610_v16 = vpop.eup %609  ;;  %v367_v17 = vmul.f32 %v608_v15, %v343_v9  ;;  %v752_v18 = vadd.f32 1e-05, %v339_v13  ;;  %v754_v19 = vadd.f32 1e-05, %v337_v14  ;;  %vm373_vm5 = vweird.f32 %v608_v15 }
 0x111   : > { %v347_v20 = vmul.f32 %v610_v16, %v341_v10  ;;  %vm353_vm6 = vweird.f32 %v610_v16  ;;  %vm374_vm7 = vmor %vm372_vm4, %vm373_vm5 }
 0x112   : > { %v368_v21 = vmul.f32 %v608_v15, %v367_v17  ;;  %611 = vrsqrt.f32 %v752_v18  ;;  %vm354_vm9 = vmor %vm352_vm8, %vm353_vm6  ;;  %vm382_vm10 = vweird.f32 %v752_v18  ;;  %vm362_vm14 = vweird.f32 %v754_v19 }
 0x113   : > { %v348_v22 = vmul.f32 %v610_v16, %v347_v20  ;;  %613 = vrsqrt.f32 %v754_v19 }
 0x114   : > { %v369_v23 = vmul.f32 0.5, %v368_v21 }
 0x115   : > { %v349_v25 = vmul.f32 0.5, %v348_v22  ;;  %v335_v26 = vpop.xlane.xlu0 %334 }
 0x116   : > { %v370_v29 = vsub.f32 1.5, %v369_v23  ;;  %v340_v30 = vmul.f32 %v335_v26, %v694_v27  ;;  %v774_v27 = vperm.slane %v422_v28, 1 }
 0x117   : > { %v350_v31 = vsub.f32 1.5, %v349_v25 }
 0x118   : > { %v612_v36 = vpop.eup %611  ;;  %v371_v39 = vmul.f32 %v608_v15, %v370_v29  ;;  %v769_v40 = vadd.f32 1e-05, %v340_v30 }
 0x119   : > { %v614_v41 = vpop.eup %613  ;;  %v351_v43 = vmul.f32 %v610_v16, %v350_v31  ;;  %v377_v44 = vmul.f32 %v612_v36, %v752_v18  ;;  %vm383_vm11 = vweird.f32 %v612_v36 }
 0x11a   : > { %v375_v45 = vsel %vm374_vm7, %v608_v15, %v371_v39  ;;  %v357_v46 = vmul.f32 %v614_v41, %v754_v19  ;;  %615 = vrsqrt.f32 %v769_v40  ;;  %vm363_vm12 = vweird.f32 %v614_v41  ;;  %vm384_vm13 = vmor %vm382_vm10, %vm383_vm11 }
 0x11b   : > { %v400_v47 = vmul.f32 %v375_v45, %v698_v32  ;;  %v401_v48 = vmul.f32 %v375_v45, %v700_v33  ;;  %v355_v49 = vsel %vm354_vm9, %v610_v16, %v351_v43  ;;  %v378_v56 = vmul.f32 %v612_v36, %v377_v44  ;;  %vm364_vm15 = vmor %vm362_vm14, %vm363_vm12 }
 0x11c   : > { %v396_v57 = vmul.f32 %v355_v49, %v702_v34  ;;  %v397_v58 = vmul.f32 %v355_v49, %v704_v35  ;;  %v358_v59 = vmul.f32 %v614_v41, %v357_v46  ;;  %vm392_vm3 = vweird.f32 %v769_v40 }
 0x11d   : > { %v416_v60 = vmul.f32 %v765_v37, %v400_v47  ;;  %v417_v61 = vmul.f32 %v767_v38, %v401_v48  ;;  %v379_v62 = vmul.f32 0.5, %v378_v56 }
 0x11e   : > { %v412_v32 = vmul.f32 %v765_v37, %v396_v57  ;;  %v413_v33 = vmul.f32 %v767_v38, %v397_v58  ;;  %v359_v34 = vmul.f32 0.5, %v358_v59 }
 0x11f   : > { %v432_v35 = vadd.f32 %v771_v42, %v416_v60  ;;  %v433_v63 = vadd.f32 %v774_v27, %v417_v61  ;;  %v380_v0 = vsub.f32 1.5, %v379_v62 }
 0x120   : > { %v616_v1 = vpop.eup %615  ;;  %v428_v2 = vadd.f32 %v771_v42, %v412_v32  ;;  %v429_v3 = vadd.f32 %v774_v27, %v413_v33  ;;  %v360_v4 = vsub.f32 1.5, %v359_v34 }
 0x121   : > { %442 = vst [vmem:[%s789_s29 + $0x20] sm:$0xff] %v432_v35  ;;  %v381_v5 = vmul.f32 %v612_v36, %v380_v0  ;;  %v387_v6 = vmul.f32 %v616_v1, %v769_v40  ;;  %vm393_vm1 = vweird.f32 %v616_v1 }
 0x122   : > { %443 = vst.msk [vmem:[%s789_s29 + $0x28] sm:$0xff] %vm259_vm0, %v433_v63  ;;  %v361_v7 = vmul.f32 %v614_v41, %v360_v4  ;;  %vm394_vm4 = vmor %vm392_vm3, %vm393_vm1 }
 0x123   : > { %438 = vst [vmem:[%s789_s29] sm:$0xff] %v428_v2  ;;  %v385_v8 = vsel %vm384_vm13, %v612_v36, %v381_v5  ;;  %v388_v9 = vmul.f32 %v616_v1, %v387_v6 }
 0x124   : > { %439 = vst.msk [vmem:[%s789_s29 + $0x8] sm:$0xff] %vm259_vm0, %v429_v3  ;;  %v402_v10 = vmul.f32 %v385_v8, %v719_v50  ;;  %v403_v11 = vmul.f32 %v385_v8, %v721_v51  ;;  %v365_v12 = vsel %vm364_vm15, %v614_v41, %v361_v7 }
 0x125   : > { %v398_v13 = vmul.f32 %v365_v12, %v723_v52  ;;  %v399_v14 = vmul.f32 %v365_v12, %v725_v53  ;;  %v389_v15 = vmul.f32 0.5, %v388_v9 }
 0x126   : > { %v418_v16 = vmul.f32 %v765_v37, %v402_v10  ;;  %v419_v17 = vmul.f32 %v767_v38, %v403_v11 }
 0x127   : > { %v414_v18 = vmul.f32 %v765_v37, %v398_v13  ;;  %v415_v19 = vmul.f32 %v767_v38, %v399_v14  ;;  %v390_v50 = vsub.f32 1.5, %v389_v15 }
 0x128   : > { %v434_v51 = vadd.f32 %v771_v42, %v418_v16  ;;  %v435_v52 = vadd.f32 %v774_v27, %v419_v17 }
 0x129   : > { %v430_v53 = vadd.f32 %v771_v42, %v414_v18  ;;  %v431_v20 = vadd.f32 %v774_v27, %v415_v19  ;;  %v391_v21 = vmul.f32 %v616_v1, %v390_v50 }
 0x12a   : > { %444 = vst [vmem:[%s789_s29 + $0x30] sm:$0xff] %v434_v51 }
 0x12b   : > { %445 = vst.msk [vmem:[%s789_s29 + $0x38] sm:$0xff] %vm259_vm0, %v435_v52  ;;  %v395_v22 = vsel %vm394_vm4, %v616_v1, %v391_v21 }
 0x12c   : > { %440 = vst [vmem:[%s789_s29 + $0x10] sm:$0xff] %v430_v53  ;;  %v404_v23 = vmul.f32 %v395_v22, %v727_v54  ;;  %v405_v24 = vmul.f32 %v395_v22, %v729_v55 }
 0x12d   : > { %441 = vst.msk [vmem:[%s789_s29 + $0x18] sm:$0xff] %vm259_vm0, %v431_v20 }
 0x12e   : > { %v420_v25 = vmul.f32 %v765_v37, %v404_v23  ;;  %v421_v26 = vmul.f32 %v767_v38, %v405_v24 }
 0x130   : > { %v436_v28 = vadd.f32 %v771_v42, %v420_v25  ;;  %v437_v29 = vadd.f32 %v774_v27, %v421_v26 }
 0x132   : > { %446 = vst [vmem:[%s789_s29 + $0x40] sm:$0x3] %v436_v28 }
 0x133   : > { %447 = vst.msk [vmem:[%s789_s29 + $0x48] sm:$0x3] %vm278_vm2, %v437_v29 }
 0x134 PF: > { %s13_s14 = sadd.s32 1, %s639_s14   ;;  %s849_s12 = smov %s635_s13 }
 0x135   : > { %p10_p5 = scmp.ge.s32.totalorder %s13_s14, 4   ;;  %s850_s13 = smov %s852_s15 }
 0x137   :  { %12 = sbr.rel (!%p10_p5) target bundleno = 2 (0x2), region = 68 }

// kernel: _lambda_.43
= control target key start
LH: loop header
LB: loop body
LE: loop exit
PB: predicated region body
PF: predicated region fallthrough
CT: control target
= control target key end

     0   :  { %s781_s12 = smov 0   ;;  %s892_s0 = inlined_call_operand.vmem [shape: f32[4,17,68], index: 0, kind: input, shape index: {}]   ;;  %s893_s1 = inlined_call_operand.vmem [shape: f32[4,17,68], index: 1, kind: input, shape index: {}]   ;;  %s894_s2 = inlined_call_operand.vmem [shape: f32[4,17,136], index: 2, kind: input, shape index: {}]   ;;  %s895_s3 = inlined_call_operand.vmem [shape: f32[4,17,136], index: 3, kind: output, shape index: {}]  }
   0x1 LB: > { %s686_s13 = sadd.s32 4294967295, %s758_s12   ;;  %p690_p0 = scmp.ge.s32.totalorder %s758_s12, 1  ;;  %s758_s12 = sphi %s781_s12, %s13_s12  }
   0x2   : > { %p163_p1 = scmp.lt.s32.totalorder %s758_s12, 3 }
   0x4   : > { %p164_p2 = pnand %p690_p0, %p163_p1 }
   0x5   : > { %s691_s14 = sshll.u32 (!%p164_p2), %s686_s13, 1 }
   0x6   : > { %167 = sbr.rel (%p164_p2) target bundleno = 615 (0x267), region = 32  ;;  %p202_p3 = scmp.lt.s32.totalorder (!%p164_p2), %s691_s14, 3 }
   0xb   : > { %s897_s14 = smov (!%p202_p3, %s691_s14), 3  ;;  %vm288_vm0 = vcmask 556032   ;;  %vm371_vm1 = vcmask 138240   ;;  %vm378_vm2 = vcmask 131072   ;;  %vm474_vm3 = vcmask 1040384  }
   0xc   : > { %s717_s15 = smul.u32 24, %s897_s14  ;;  %vm596_vm4 = vcmask 57344   ;;  %vm591_vm5 = vcmask 64512  }
   0xd   : > { %s718_s22 = smul.u32 48, %s897_s14 }
   0xe   : > { %s213_s18 = scalar_lea.vmem %s893_s1, %s717_s15  ;;  %s798_s21 = scalar_lea.vmem %s892_s0, %s717_s15 }
   0xf   : > { %v244_v0 = vld [vmem:[%s213_s18 + $0x10] sm:$0x1]  ;;  %v247_v1 = vld [vmem:[%s213_s18 + $0x28] sm:$0x1]  ;;  %v242_v2 = vld [vmem:[%s213_s18] sm:$0xff]  ;;  %s850_s25 = scalar_lea.vmem %s894_s2, %s718_s22  ;;  %s227_s28 = scalar_lea.vmem %s895_s3, %s718_s22 }
  0x10   : > { %v250_v3 = vpack.c.bf16 %v244_v0, %v244_v0  ;;  %v253_v4 = vpack.c.bf16 %v247_v1, %v247_v1  ;;  %v243_v5 = vld [vmem:[%s213_s18 + $0x8] sm:$0xff]  ;;  %v248_v6 = vpack.c.bf16 %v242_v2, %v242_v2  ;;  %v245_v7 = vld [vmem:[%s213_s18 + $0x18] sm:$0xff]  ;;  %v246_v8 = vld [vmem:[%s213_s18 + $0x20] sm:$0xff] }
  0x11   : > { %v249_v9 = vpack.c.bf16 %v243_v5, %v243_v5  ;;  %v251_v10 = vpack.c.bf16 %v245_v7, %v245_v7  ;;  %v252_v11 = vpack.c.bf16 %v246_v8, %v246_v8  ;;  %v230_v22 = vld [vmem:[%s798_s21] sm:$0xff]  ;;  %v231_v23 = vld [vmem:[%s798_s21 + $0x8] sm:$0xff]  ;;  %v233_v24 = vld [vmem:[%s798_s21 + $0x18] sm:$0xff] }
  0x12   : > { %v285_v12 = vunpack.c.l.b16 %v250_v3  ;;  %v332_v13 = vunpack.c.l.b16 %v253_v4  ;;  %v283_v14 = vunpack.c.l.b16 %v248_v6  ;;  %v234_v25 = vld [vmem:[%s798_s21 + $0x20] sm:$0xff]  ;;  %v236_v28 = vpack.c.bf16 %v230_v22, %v230_v22  ;;  %v232_v40 = vld [vmem:[%s798_s21 + $0x10] sm:$0x1]  ;;  %v235_v41 = vld [vmem:[%s798_s21 + $0x28] sm:$0x1] }
  0x13   : > { %v284_v15 = vunpack.c.l.b16 %v249_v9  ;;  %v330_v18 = vunpack.c.l.b16 %v251_v10  ;;  %v331_v19 = vunpack.c.l.b16 %v252_v11  ;;  %v237_v29 = vpack.c.bf16 %v231_v23, %v231_v23 }
  0x14   : > { %v287_v16 = vpack.c.b16 %v285_v12, %v285_v12  ;;  %v334_v17 = vpack.c.b16 %v332_v13, %v332_v13  ;;  %v239_v30 = vpack.c.bf16 %v233_v24, %v233_v24  ;;  %v240_v31 = vpack.c.bf16 %v234_v25, %v234_v25 }
  0x15   : > { %v286_v26 = vpack.c.b16 %v284_v15, %v283_v14  ;;  %v333_v27 = vpack.c.b16 %v331_v19, %v330_v18  ;;  %v275_v34 = vunpack.c.l.b16 %v236_v28  ;;  %v276_v35 = vunpack.c.l.b16 %v237_v29 }
  0x16   : > { %v299_v20 = vsel %vm288_vm0, %v287_v16, 0  ;;  %v345_v21 = vsel %vm288_vm0, %v334_v17, 0  ;;  %v322_v36 = vunpack.c.l.b16 %v239_v30  ;;  %v323_v37 = vunpack.c.l.b16 %v240_v31 }
  0x17   : > { %307 = vmatpush.bf16.xpose.msra.mxu0 %v299_v20  ;;  %353 = vmatpush.bf16.xpose.msra.mxu1 %v345_v21  ;;  %v296_v32 = vsel %vm288_vm0, %v286_v26, 0  ;;  %v342_v33 = vsel %vm288_vm0, %v333_v27, 0  ;;  %v278_v38 = vpack.c.b16 %v276_v35, %v275_v34  ;;  %v238_v42 = vpack.c.bf16 %v232_v40, %v232_v40  ;;  %v258_v34 = vld [vmem:[%s850_s25 + $0x20] sm:$0x1]  ;;  %v259_v35 = vld [vmem:[%s850_s25 + $0x28] sm:$0x1] }
  0x18   : > { %v325_v39 = vpack.c.b16 %v323_v37, %v322_v36  ;;  %v241_v43 = vpack.c.bf16 %v235_v41, %v235_v41  ;;  %v268_v36 = vpack.c.bf16 %v259_v35, %v258_v34  ;;  %v760_v41 = vmov 0  }
  0x19   : > { %v277_v44 = vunpack.c.l.b16 %v238_v42  ;;  %v476_v42 = vsel %vm474_vm3, 65535, %v760_v41 }
  0x1a   : > { %v324_v45 = vunpack.c.l.b16 %v241_v43  ;;  %v460_v37 = vunpack.c.l.b16 %v268_v36  ;;  %v254_v43 = vld [vmem:[%s850_s25] sm:$0xff] }
  0x1b   : > { %v279_v46 = vpack.c.b16 %v277_v44, %v277_v44  ;;  %v255_v44 = vld [vmem:[%s850_s25 + $0x8] sm:$0xff] }
  0x1c   : > { %v326_v47 = vpack.c.b16 %v324_v45, %v324_v45  ;;  %v256_v45 = vld [vmem:[%s850_s25 + $0x10] sm:$0xff] }
  0x1f   : > { %308 = vmatpush.bf16.xpose.msra.mxu0 %v296_v32  ;;  %354 = vmatpush.bf16.xpose.msra.mxu1 %v342_v33 }
  0x26   : > { %699 = vmatmul.msk.bf16.vlgmr.msra.gmra.mxu0 %vm288_vm0, %v278_v38  ;;  %701 = vmatmul.msk.bf16.vlgmr.msra.gmra.mxu1 %vm288_vm0, %v325_v39  ;;  %v461_v38 = vunpack.c.h.b16 %v268_v36  ;;  %v464_v39 = vpack.c.b16 %v460_v37, %v460_v37 }
  0x28   : > { %v465_v40 = vpack.c.b16 %v461_v38, %v461_v38 }
  0x36   : > { %700 = vmatmul.msk.bf16.gmra.mxu0 %vm288_vm0, %v279_v46  ;;  %702 = vmatmul.msk.bf16.gmra.mxu1 %vm288_vm0, %v326_v47  ;;  %v478_v46 = vand.u32 %v476_v42, %v464_v39  ;;  %v481_v47 = vand.u32 %v476_v42, %v465_v40 }
  0x38   : > { %713 = vmatpush.bf16.msra.mxu2 %v478_v46  ;;  %715 = vmatpush.bf16.msra.mxu3 %v481_v47 }
  0x39   : > { %489 = vmatpush.bf16.msrb.mxu0 %v478_v46  ;;  %507 = vmatpush.bf16.msrb.mxu1 %v481_v47 }
  0xa3   : > { %v310_v48 = vpop.f32.mrf.mxu0  ;;  %v356_v49 = vpop.f32.mrf.mxu1 }
  0xa4   : > { %v365_v50 = vmul.f32 0.12126781, %v310_v48  ;;  %v368_v0 = vmul.f32 0.12126781, %v356_v49  ;;  %v257_v48 = vld [vmem:[%s850_s25 + $0x18] sm:$0xff]  ;;  %v266_v49 = vpack.c.bf16 %v255_v44, %v254_v43 }
  0xa6   : > { %v372_v51 = vsel %vm371_vm1, %v365_v50, -inf  ;;  %v382_v3 = vsel %vm371_vm1, %v368_v0, -inf }
  0xa7   : > { %373 = vmax.xlane.f32.xlu2 %v372_v51  ;;  %v456_v51 = vunpack.c.l.b16 %v266_v49 }
  0xab   : > { %v312_v52 = vpop.f32.mrf.mxu0  ;;  %v358_v53 = vpop.f32.mrf.mxu1 }
  0xac   : > { %v366_v54 = vmul.f32 0.12126781, %v312_v52  ;;  %v369_v55 = vmul.f32 0.12126781, %v358_v53  ;;  %v457_v52 = vunpack.c.h.b16 %v266_v49 }
  0xae   : > { %v385_v56 = vsel %vm371_vm1, %v369_v55, -inf  ;;  %v375_v57 = vsel %vm371_vm1, %v366_v54, -inf }
  0xaf   : > { %386 = vmax.xlane.f32.xlu1 %v385_v56  ;;  %376 = vmax.xlane.f32.xlu2 %v375_v57  ;;  %v264_v57 = vld [vmem:[%s850_s25 + $0x50] sm:$0x1] }
  0xb3   : > { %v315_v58 = vpop.f32.mrf.mxu0  ;;  %v361_v59 = vpop.f32.mrf.mxu1 }
  0xb4   : > { %v367_v60 = vmul.f32 0.12126781, %v315_v58  ;;  %v370_v61 = vmul.f32 0.12126781, %v361_v59  ;;  %v265_v58 = vld [vmem:[%s850_s25 + $0x58] sm:$0x1] }
  0xb5   : > { %v271_v59 = vpack.c.bf16 %v265_v58, %v264_v57 }
  0xb6   : > { %v388_v62 = vsel %vm378_vm2, %v370_v61, -inf  ;;  %v379_v63 = vsel %vm378_vm2, %v367_v60, -inf }
  0xb7   : > { %389 = vmax.xlane.f32.xlu1 %v388_v62  ;;  %380 = vmax.xlane.f32.xlu0 %v379_v63 }
  0xbb   : > { %v317_v1 = vpop.f32.mrf.mxu0  ;;  %v363_v2 = vpop.f32.mrf.mxu1 }
  0xbc   : > { %v261_v1 = vld [vmem:[%s850_s25 + $0x38] sm:$0xff]  ;;  %v262_v2 = vld [vmem:[%s850_s25 + $0x40] sm:$0xff] }
  0xbf   : > { %383 = vmax.xlane.f32.xlu0 %v382_v3 }
 0x11a   : > { %v374_v4 = vpop.xlane.xlu2 %373 }
 0x11b   : > { %v391_v22 = vsub.f32 %v365_v50, %v374_v4  ;;  %v267_v50 = vpack.c.bf16 %v257_v48, %v256_v45 }
 0x11d   : > { %v397_v27 = vmul.f32 1.442695, %v391_v22  ;;  %v458_v53 = vunpack.c.l.b16 %v267_v50 }
 0x122   : > { %v387_v5 = vpop.xlane.xlu1 %386  ;;  %v377_v6 = vpop.xlane.xlu2 %376 }
 0x123   : > { %v395_v7 = vsub.f32 %v369_v55, %v387_v5  ;;  %v392_v9 = vsub.f32 %v366_v54, %v377_v6  ;;  %v459_v54 = vunpack.c.h.b16 %v267_v50  ;;  %v462_v55 = vpack.c.b16 %v458_v53, %v456_v51  ;;  %v263_v5 = vld [vmem:[%s850_s25 + $0x48] sm:$0xff] }
 0x125   : > { %v405_v8 = vmul.f32 1.442695, %v395_v7  ;;  %v399_v10 = vmul.f32 1.442695, %v392_v9  ;;  %v463_v56 = vpack.c.b16 %v459_v54, %v457_v52  ;;  %714 = vmatpush.bf16.msra.mxu2 %v462_v55  ;;  %490 = vmatpush.bf16.msrb.mxu0 %v462_v55  ;;  %v270_v7 = vpack.c.bf16 %v263_v5, %v262_v2 }
 0x127   : > { %728 = vpow2.f32 %v405_v8  ;;  %716 = vmatpush.bf16.msra.mxu3 %v463_v56  ;;  %508 = vmatpush.bf16.msrb.mxu1 %v463_v56 }
 0x128   : > { %730 = vpow2.f32 %v399_v10  ;;  %v532_v10 = vunpack.c.l.b16 %v270_v7 }
 0x12a   : > { %v381_v11 = vpop.xlane.xlu0 %380  ;;  %v390_v12 = vpop.xlane.xlu1 %389 }
 0x12b   : > { %v393_v13 = vsub.f32 %v367_v60, %v381_v11  ;;  %v396_v16 = vsub.f32 %v370_v61, %v390_v12  ;;  %v534_v60 = vunpack.c.l.b16 %v271_v59  ;;  %v535_v61 = vunpack.c.h.b16 %v271_v59 }
 0x12c   : > { %v533_v11 = vunpack.c.h.b16 %v270_v7 }
 0x12d   : > { %v820_v14 = vpop.eup %728  ;;  %v401_v15 = vmul.f32 1.442695, %v393_v13  ;;  %v407_v18 = vmul.f32 1.442695, %v396_v16  ;;  %v538_v62 = vpack.c.b16 %v534_v60, %v534_v60  ;;  %v539_v63 = vpack.c.b16 %v535_v61, %v535_v61 }
 0x12e   : > { %v421_v17 = vsel %vm371_vm1, %v820_v14, 0.0  ;;  %v824_v20 = vpop.eup %730 }
 0x12f   : > { %422 = vadd.xlane.f32.xlu2 %v421_v17  ;;  %732 = vpow2.f32 %v401_v15  ;;  %v412_v25 = vsel %vm371_vm1, %v824_v20, 0.0  ;;  %v549_v3 = vand.u32 %v538_v62, %v476_v42  ;;  %v552_v4 = vand.u32 %v539_v63, %v476_v42 }
 0x130   : > { %734 = vpow2.f32 %v407_v18 }
 0x131   : > { %560 = vmatpush.bf16.msrb.mxu2 %v549_v3  ;;  %578 = vmatpush.bf16.msrb.mxu3 %v552_v4 }
 0x132   : > { %v384_v19 = vpop.xlane.xlu0 %383 }
 0x133   : > { %v394_v21 = vsub.f32 %v368_v0, %v384_v19  ;;  %v260_v0 = vld [vmem:[%s850_s25 + $0x30] sm:$0xff] }
 0x134   : > { %v269_v6 = vpack.c.bf16 %v261_v1, %v260_v0 }
 0x135   : > { %v403_v23 = vmul.f32 1.442695, %v394_v21  ;;  %v826_v24 = vpop.eup %732 }
 0x136   : > { %v415_v26 = vsel %vm378_vm2, %v826_v24, 0.0  ;;  %v832_v28 = vpop.eup %734  ;;  %v530_v8 = vunpack.c.l.b16 %v269_v6  ;;  %v531_v9 = vunpack.c.h.b16 %v269_v6 }
 0x137   : > { %736 = vpow2.f32 %v403_v23  ;;  %413 = vadd.xlane.f32.xlu2 %v412_v25  ;;  %416 = vadd.xlane.f32.xlu0 %v415_v26  ;;  %v424_v31 = vsel %vm378_vm2, %v832_v28, 0.0 }
 0x138   : > { %738 = vpow2.f32 %v397_v27  ;;  %v536_v12 = vpack.c.b16 %v532_v10, %v530_v8  ;;  %v537_v13 = vpack.c.b16 %v533_v11, %v531_v9 }
 0x13a   : > { %561 = vmatpush.bf16.msrb.mxu2 %v536_v12  ;;  %579 = vmatpush.bf16.msrb.mxu3 %v537_v13 }
 0x13d   : > { %v834_v29 = vpop.eup %736 }
 0x13e   : > { %v418_v30 = vsel %vm371_vm1, %v834_v29, 0.0  ;;  %v840_v32 = vpop.eup %738 }
 0x13f   : > { %419 = vadd.xlane.f32.xlu1 %v418_v30  ;;  %425 = vadd.xlane.f32.xlu0 %v424_v31  ;;  %v409_v33 = vsel %vm371_vm1, %v840_v32, 0.0 }
 0x147   : > { %410 = vadd.xlane.f32.xlu1 %v409_v33 }
 0x1a2   : > { %v423_v15 = vpop.xlane.xlu2 %422 }
 0x1aa   : > { %v417_v16 = vpop.xlane.xlu0 %416  ;;  %v414_v18 = vpop.xlane.xlu2 %413 }
 0x1ab   : > { %740 = vrcp.f32 %v417_v16 }
 0x1b1   : > { %v741_v17 = vpop.eup %740 }
 0x1b2   : > { %v420_v19 = vpop.xlane.xlu1 %419  ;;  %v435_v21 = vmul.f32 %v741_v17, %v826_v24  ;;  %v426_v37 = vpop.xlane.xlu0 %425 }
 0x1b3   : > { %742 = vrcp.f32 %v420_v19 }
 0x1b4   : > { %744 = vrcp.f32 %v414_v18  ;;  %v441_v22 = vpack.c.bf16 %v435_v21, %v435_v21 }
 0x1b5   : > { %746 = vrcp.f32 %v423_v15 }
 0x1b6   : > { %v450_v23 = vunpack.c.l.b16 %v441_v22 }
 0x1b8   : > { %v452_v25 = vpack.c.b16 %v450_v23, %v450_v23 }
 0x1b9   : > { %v743_v26 = vpop.eup %742 }
 0x1ba   : > { %v411_v27 = vpop.xlane.xlu1 %410  ;;  %v745_v30 = vpop.eup %744  ;;  %704 = vmatmul.msk.bf16.vlgmr.msra.gmra.mxu2 %vm371_vm1, %v452_v25  ;;  %706 = vmatmul.msk.bf16.vlgmr.msra.gmra.mxu3 %vm371_vm1, %v452_v25  ;;  %v436_v33 = vmul.f32 %v743_v26, %v834_v29 }
 0x1bb   : > { %748 = vrcp.f32 %v411_v27  ;;  %v747_v31 = vpop.eup %746  ;;  %v434_v34 = vmul.f32 %v745_v30, %v824_v20 }
 0x1bc   : > { %v437_v24 = vmul.f32 %v747_v31, %v820_v14  ;;  %v442_v36 = vpack.c.bf16 %v436_v33, %v436_v33  ;;  %750 = vrcp.f32 %v426_v37 }
 0x1bd   : > { %v440_v38 = vpack.c.bf16 %v434_v34, %v434_v34 }
 0x1be   : > { %v443_v40 = vpack.c.bf16 %v437_v24, %v437_v24  ;;  %v522_v42 = vunpack.c.l.b16 %v442_v36 }
 0x1bf   : > { %v449_v43 = vunpack.c.l.b16 %v440_v38 }
 0x1c0   : > { %v523_v45 = vunpack.c.l.b16 %v443_v40 }
 0x1c1   : > { %v749_v35 = vpop.eup %748 }
 0x1c2   : > { %v433_v39 = vmul.f32 %v749_v35, %v840_v32  ;;  %v525_v29 = vpack.c.b16 %v523_v45, %v522_v42  ;;  %v751_v47 = vpop.eup %750 }
 0x1c3   : > { %v438_v14 = vmul.f32 %v751_v47, %v832_v28 }
 0x1c4   : > { %v439_v41 = vpack.c.bf16 %v433_v39, %v433_v39 }
 0x1c5   : > { %v444_v20 = vpack.c.bf16 %v438_v14, %v438_v14 }
 0x1c6   : > { %v448_v44 = vunpack.c.l.b16 %v439_v41 }
 0x1c7   : > { %v524_v32 = vunpack.c.l.b16 %v444_v20 }
 0x1c8   : > { %v451_v46 = vpack.c.b16 %v449_v43, %v448_v44 }
 0x1c9   : > { %v526_v48 = vpack.c.b16 %v524_v32, %v524_v32 }
 0x1ca   : > { %703 = vmatmul.msk.bf16.vlgmr.msrb.gmra.mxu0 %vm371_vm1, %v451_v46  ;;  %705 = vmatmul.msk.bf16.vlgmr.msrb.gmra.mxu1 %vm371_vm1, %v451_v46 }
 0x1cb   : > { %707 = vmatmul.msk.bf16.vlgmr.msrb.gmra.mxu2 %vm371_vm1, %v525_v29  ;;  %709 = vmatmul.msk.bf16.vlgmr.msrb.gmra.mxu3 %vm371_vm1, %v525_v29 }
 0x1db   : > { %708 = vmatmul.msk.bf16.gmra.mxu2 %vm371_vm1, %v526_v48  ;;  %710 = vmatmul.msk.bf16.gmra.mxu3 %vm371_vm1, %v526_v48 }
 0x23d   : > { %v497_v49 = vpop.f32.mrf.mxu2  ;;  %v515_v50 = vpop.f32.mrf.mxu3 }
 0x23e   : > { %595 = vst [vmem:[%s227_s28 + $0x20] sm:$0x1] %v497_v49 }
 0x23f   : > { %597 = vst.msk [vmem:[%s227_s28 + $0x28] sm:$0x1] %vm596_vm4, %v515_v50 }
 0x245   : > { %v499_v51 = vpop.f32.mrf.mxu2  ;;  %v517_v28 = vpop.f32.mrf.mxu3 }
 0x247   : > { %v492_v52 = vpop.f32.mrf.mxu0  ;;  %v510_v53 = vpop.f32.mrf.mxu1 }
 0x248   : > { %590 = vst [vmem:[%s227_s28] sm:$0xff] %v492_v52 }
 0x249   : > { %592 = vst.msk [vmem:[%s227_s28 + $0x8] sm:$0xff] %vm591_vm5, %v510_v53 }
 0x24e   : > { %v563_v54 = vpop.f32.mrf.mxu2  ;;  %v581_v55 = vpop.f32.mrf.mxu3 }
 0x24f   : > { %598 = vst [vmem:[%s227_s28 + $0x30] sm:$0xff] %v563_v54  ;;  %v494_v56 = vpop.f32.mrf.mxu0  ;;  %v512_v57 = vpop.f32.mrf.mxu1 }
 0x250   : > { %599 = vst.msk [vmem:[%s227_s28 + $0x38] sm:$0xff] %vm591_vm5, %v581_v55 }
 0x251   : > { %593 = vst [vmem:[%s227_s28 + $0x10] sm:$0xff] %v494_v56 }
 0x252   : > { %594 = vst.msk [vmem:[%s227_s28 + $0x18] sm:$0xff] %vm591_vm5, %v512_v57 }
 0x256   : > { %v565_v58 = vpop.f32.mrf.mxu2  ;;  %v583_v59 = vpop.f32.mrf.mxu3 }
 0x257   : > { %600 = vst [vmem:[%s227_s28 + $0x40] sm:$0xff] %v565_v58 }
 0x258   : > { %601 = vst.msk [vmem:[%s227_s28 + $0x48] sm:$0xff] %vm591_vm5, %v583_v59 }
 0x25e   : > { %v568_v60 = vpop.f32.mrf.mxu2  ;;  %v586_v61 = vpop.f32.mrf.mxu3 }
 0x25f   : > { %602 = vst [vmem:[%s227_s28 + $0x50] sm:$0x1] %v568_v60 }
 0x260   : > { %603 = vst.msk [vmem:[%s227_s28 + $0x58] sm:$0x1] %vm596_vm4, %v586_v61 }
 0x266   : > { %v570_v62 = vpop.f32.mrf.mxu2  ;;  %v588_v63 = vpop.f32.mrf.mxu3 }
 0x267 PF: > { %s13_s12 = sadd.s32 1, %s758_s12  }
 0x268   : > { %p10_p4 = scmp.ge.s32.totalorder %s13_s12, 4  }
 0x26a   :  { %12 = sbr.rel (!%p10_p4) target bundleno = 1 (0x1), region = 68 }

// kernel: _lambda_.44
= control target key start
LH: loop header
LB: loop body
LE: loop exit
PB: predicated region body
PF: predicated region fallthrough
CT: control target
= control target key end

     0   :  { %vm128_vm0 = vcmask 130048   ;;  %vm586_vm1 = vcmask 123904   ;;  %s1508_s1 = inlined_call_operand.vmem [shape: f32[16,16], index: 1, kind: input, shape index: {}]   ;;  %s1509_s0 = inlined_call_operand.vmem [shape: f32[578,16], index: 0, kind: input, shape index: {}]   ;;  %s1510_s2 = inlined_call_operand.vmem [shape: f32[1,16], index: 2, kind: input, shape index: {}]   ;;  %s1511_s3 = inlined_call_operand.vmem [shape: f32[578,16], index: 3, kind: output, shape index: {}]  }
   0x1   :  { %v125_v0 = vld [vmem:[%s1508_s1] sm:$0xff]  ;;  %v126_v1 = vld [vmem:[%s1508_s1 + $0x8] sm:$0xff]  ;;  %v17_v15 = vld [vmem:[%s1509_s0 + $0x10] sm:$0xff] }
   0x2   :  { %v15_v2 = vld [vmem:[%s1509_s0] sm:$0xff]  ;;  %v127_v3 = vpack.c.bf16 %v126_v1, %v125_v0  ;;  %v16_v4 = vld [vmem:[%s1509_s0 + $0x8] sm:$0xff]  ;;  %v18_v16 = vld [vmem:[%s1509_s0 + $0x18] sm:$0xff] }
   0x3   :  { %v35_v5 = vld [vmem:[%s1509_s0 + $0xa0] sm:$0xff]  ;;  %v36_v6 = vld [vmem:[%s1509_s0 + $0xa8] sm:$0xff]  ;;  %v88_v7 = vpack.c.bf16 %v16_v4, %v15_v2  ;;  %v37_v17 = vld [vmem:[%s1509_s0 + $0xb0] sm:$0xff]  ;;  %v89_v21 = vpack.c.bf16 %v18_v16, %v17_v15 }
   0x4   :  { %v98_v8 = vpack.c.bf16 %v36_v6, %v35_v5  ;;  %v55_v9 = vld [vmem:[%s1509_s0 + $0x140] sm:$0xff]  ;;  %v56_v10 = vld [vmem:[%s1509_s0 + $0x148] sm:$0xff]  ;;  %247 = vmatpush.bf16.msra.mxu0 %v127_v3  ;;  %853 = vmatpush.bf16.msra.mxu1 %v127_v3  ;;  %v38_v18 = vld [vmem:[%s1509_s0 + $0xb8] sm:$0xff] }
   0x5   :  { %v108_v11 = vpack.c.bf16 %v56_v10, %v55_v9  ;;  %854 = vmatpush.bf16.msra.mxu2 %v127_v3  ;;  %855 = vmatpush.bf16.msra.mxu3 %v127_v3  ;;  %v75_v12 = vld [vmem:[%s1509_s0 + $0x1e0] sm:$0xff]  ;;  %v76_v13 = vld [vmem:[%s1509_s0 + $0x1e8] sm:$0xff]  ;;  %v57_v19 = vld [vmem:[%s1509_s0 + $0x150] sm:$0xff]  ;;  %v99_v22 = vpack.c.bf16 %v38_v18, %v37_v17 }
   0x6   :  { %v118_v14 = vpack.c.bf16 %v76_v13, %v75_v12  ;;  %v58_v20 = vld [vmem:[%s1509_s0 + $0x158] sm:$0xff]  ;;  %v77_v24 = vld [vmem:[%s1509_s0 + $0x1f0] sm:$0xff]  ;;  %v19_v27 = vld [vmem:[%s1509_s0 + $0x20] sm:$0xff] }
   0x7   :  { %816 = vmatmul.msk.bf16.vlgmr.msra.gmra.mxu0 %vm128_vm0, %v88_v7  ;;  %826 = vmatmul.msk.bf16.vlgmr.msra.gmra.mxu1 %vm128_vm0, %v98_v8  ;;  %v109_v23 = vpack.c.bf16 %v58_v20, %v57_v19  ;;  %v78_v25 = vld [vmem:[%s1509_s0 + $0x1f8] sm:$0xff]  ;;  %v20_v28 = vld [vmem:[%s1509_s0 + $0x28] sm:$0xff]  ;;  %v39_v29 = vld [vmem:[%s1509_s0 + $0xc0] sm:$0xff] }
   0x8   :  { %836 = vmatmul.msk.bf16.vlgmr.msra.gmra.mxu2 %vm128_vm0, %v108_v11  ;;  %846 = vmatmul.msk.bf16.vlgmr.msra.gmra.mxu3 %vm128_vm0, %v118_v14  ;;  %v119_v26 = vpack.c.bf16 %v78_v25, %v77_v24  ;;  %v40_v30 = vld [vmem:[%s1509_s0 + $0xc8] sm:$0xff]  ;;  %v59_v31 = vld [vmem:[%s1509_s0 + $0x160] sm:$0xff]  ;;  %v90_v33 = vpack.c.bf16 %v20_v28, %v19_v27  ;;  %v21_v39 = vld [vmem:[%s1509_s0 + $0x30] sm:$0xff] }
   0x9   :  { %v60_v32 = vld [vmem:[%s1509_s0 + $0x168] sm:$0xff]  ;;  %v100_v34 = vpack.c.bf16 %v40_v30, %v39_v29  ;;  %v79_v36 = vld [vmem:[%s1509_s0 + $0x200] sm:$0xff]  ;;  %v22_v40 = vld [vmem:[%s1509_s0 + $0x38] sm:$0xff] }
   0xa   :  { %v110_v35 = vpack.c.bf16 %v60_v32, %v59_v31  ;;  %v80_v37 = vld [vmem:[%s1509_s0 + $0x208] sm:$0xff]  ;;  %v41_v41 = vld [vmem:[%s1509_s0 + $0xd0] sm:$0xff]  ;;  %v42_v42 = vld [vmem:[%s1509_s0 + $0xd8] sm:$0xff]  ;;  %v91_v45 = vpack.c.bf16 %v22_v40, %v21_v39 }
   0xb   :  { %v120_v38 = vpack.c.bf16 %v80_v37, %v79_v36  ;;  %v61_v43 = vld [vmem:[%s1509_s0 + $0x170] sm:$0xff]  ;;  %v62_v44 = vld [vmem:[%s1509_s0 + $0x178] sm:$0xff]  ;;  %v101_v46 = vpack.c.bf16 %v42_v42, %v41_v41  ;;  %v23_v51 = vld [vmem:[%s1509_s0 + $0x40] sm:$0xff] }
   0xc   :  { %v111_v47 = vpack.c.bf16 %v62_v44, %v61_v43  ;;  %v81_v48 = vld [vmem:[%s1509_s0 + $0x210] sm:$0xff]  ;;  %v82_v49 = vld [vmem:[%s1509_s0 + $0x218] sm:$0xff]  ;;  %v24_v52 = vld [vmem:[%s1509_s0 + $0x48] sm:$0xff] }
   0xd   :  { %v121_v50 = vpack.c.bf16 %v82_v49, %v81_v48  ;;  %v43_v53 = vld [vmem:[%s1509_s0 + $0xe0] sm:$0xff]  ;;  %v44_v54 = vld [vmem:[%s1509_s0 + $0xe8] sm:$0xff]  ;;  %v92_v57 = vpack.c.bf16 %v24_v52, %v23_v51  ;;  %v25_v63 = vld [vmem:[%s1509_s0 + $0x50] sm:$0xff] }
   0xe   :  { %v63_v55 = vld [vmem:[%s1509_s0 + $0x180] sm:$0xff]  ;;  %v64_v56 = vld [vmem:[%s1509_s0 + $0x188] sm:$0xff]  ;;  %v102_v58 = vpack.c.bf16 %v44_v54, %v43_v53  ;;  %v26_v0 = vld [vmem:[%s1509_s0 + $0x58] sm:$0xff] }
   0xf   :  { %v112_v59 = vpack.c.bf16 %v64_v56, %v63_v55  ;;  %v83_v60 = vld [vmem:[%s1509_s0 + $0x220] sm:$0xff]  ;;  %v84_v61 = vld [vmem:[%s1509_s0 + $0x228] sm:$0xff]  ;;  %v45_v1 = vld [vmem:[%s1509_s0 + $0xf0] sm:$0xff]  ;;  %v93_v5 = vpack.c.bf16 %v26_v0, %v25_v63 }
  0x10   :  { %v122_v62 = vpack.c.bf16 %v84_v61, %v83_v60  ;;  %v46_v2 = vld [vmem:[%s1509_s0 + $0xf8] sm:$0xff]  ;;  %v65_v3 = vld [vmem:[%s1509_s0 + $0x190] sm:$0xff]  ;;  %v27_v11 = vld [vmem:[%s1509_s0 + $0x60] sm:$0xff] }
  0x11   :  { %v66_v4 = vld [vmem:[%s1509_s0 + $0x198] sm:$0xff]  ;;  %v103_v6 = vpack.c.bf16 %v46_v2, %v45_v1  ;;  %v85_v8 = vld [vmem:[%s1509_s0 + $0x230] sm:$0xff]  ;;  %v28_v12 = vld [vmem:[%s1509_s0 + $0x68] sm:$0xff] }
  0x12   :  { %v113_v7 = vpack.c.bf16 %v66_v4, %v65_v3  ;;  %v86_v9 = vld [vmem:[%s1509_s0 + $0x238] sm:$0xff]  ;;  %v47_v13 = vld [vmem:[%s1509_s0 + $0x100] sm:$0xff]  ;;  %v48_v14 = vld [vmem:[%s1509_s0 + $0x108] sm:$0xff]  ;;  %v94_v17 = vpack.c.bf16 %v28_v12, %v27_v11 }
  0x13   :  { %v123_v10 = vpack.c.bf16 %v86_v9, %v85_v8  ;;  %v67_v15 = vld [vmem:[%s1509_s0 + $0x1a0] sm:$0xff]  ;;  %v68_v16 = vld [vmem:[%s1509_s0 + $0x1a8] sm:$0xff]  ;;  %v104_v18 = vpack.c.bf16 %v48_v14, %v47_v13  ;;  %v29_v20 = vld [vmem:[%s1509_s0 + $0x70] sm:$0xff] }
  0x14   :  { %v114_v19 = vpack.c.bf16 %v68_v16, %v67_v15  ;;  %v87_v24 = vld [vmem:[%s1509_s0 + $0x240] sm:$0x3]  ;;  %v69_v25 = vld [vmem:[%s1509_s0 + $0x1b0] sm:$0xff]  ;;  %v32_v32 = vld [vmem:[%s1509_s0 + $0x88] sm:$0xff] }
  0x15   :  { %v124_v27 = vpack.c.bf16 %v87_v24, %v87_v24  ;;  %v31_v31 = vld [vmem:[%s1509_s0 + $0x80] sm:$0xff]  ;;  %v72_v37 = vld [vmem:[%s1509_s0 + $0x1c8] sm:$0xff]  ;;  %v33_v51 = vld [vmem:[%s1509_s0 + $0x90] sm:$0xff] }
  0x16   :  { %v71_v36 = vld [vmem:[%s1509_s0 + $0x1c0] sm:$0xff]  ;;  %v34_v52 = vld [vmem:[%s1509_s0 + $0x98] sm:$0xff]  ;;  %v53_v53 = vld [vmem:[%s1509_s0 + $0x130] sm:$0xff] }
  0x17   :  { %817 = vmatmul.msk.bf16.gmra.mxu0 %vm128_vm0, %v89_v21  ;;  %827 = vmatmul.msk.bf16.gmra.mxu1 %vm128_vm0, %v99_v22  ;;  %v30_v21 = vld [vmem:[%s1509_s0 + $0x78] sm:$0xff]  ;;  %v49_v22 = vld [vmem:[%s1509_s0 + $0x110] sm:$0xff]  ;;  %v116_v42 = vpack.c.bf16 %v72_v37, %v71_v36 }
  0x18   :  { %837 = vmatmul.msk.bf16.gmra.mxu2 %vm128_vm0, %v109_v23  ;;  %847 = vmatmul.msk.bf16.gmra.mxu3 %vm128_vm0, %v119_v26  ;;  %v50_v23 = vld [vmem:[%s1509_s0 + $0x118] sm:$0xff]  ;;  %v95_v28 = vpack.c.bf16 %v30_v21, %v29_v20  ;;  %v73_v55 = vld [vmem:[%s1509_s0 + $0x1d0] sm:$0xff] }
  0x19   :  { %v70_v26 = vld [vmem:[%s1509_s0 + $0x1b8] sm:$0xff]  ;;  %v105_v29 = vpack.c.bf16 %v50_v23, %v49_v22 }
  0x1a   :  { %v115_v30 = vpack.c.bf16 %v70_v26, %v69_v25  ;;  %v54_v54 = vld [vmem:[%s1509_s0 + $0x138] sm:$0xff] }
  0x1b   :  { %v74_v56 = vld [vmem:[%s1509_s0 + $0x1d8] sm:$0xff] }
  0x1c   :  { %v117_v63 = vpack.c.bf16 %v74_v56, %v73_v55 }
  0x27   :  { %818 = vmatmul.msk.bf16.gmra.mxu0 %vm128_vm0, %v90_v33  ;;  %828 = vmatmul.msk.bf16.gmra.mxu1 %vm128_vm0, %v100_v34  ;;  %v51_v33 = vld [vmem:[%s1509_s0 + $0x120] sm:$0xff]  ;;  %v52_v34 = vld [vmem:[%s1509_s0 + $0x128] sm:$0xff] }
  0x28   :  { %838 = vmatmul.msk.bf16.gmra.mxu2 %vm128_vm0, %v110_v35  ;;  %848 = vmatmul.msk.bf16.gmra.mxu3 %vm128_vm0, %v120_v38  ;;  %v1112_v35 = vld [vmem:[%s1510_s2] ss:$0 sm:$0xff]  ;;  %v96_v38 = vpack.c.bf16 %v32_v32, %v31_v31  ;;  %v106_v39 = vpack.c.bf16 %v52_v34, %v51_v33 }
  0x37   :  { %819 = vmatmul.msk.bf16.gmra.mxu0 %vm128_vm0, %v91_v45  ;;  %829 = vmatmul.msk.bf16.gmra.mxu1 %vm128_vm0, %v101_v46 }
  0x38   :  { %839 = vmatmul.msk.bf16.gmra.mxu2 %vm128_vm0, %v111_v47  ;;  %849 = vmatmul.msk.bf16.gmra.mxu3 %vm128_vm0, %v121_v50 }
  0x47   :  { %820 = vmatmul.msk.bf16.gmra.mxu0 %vm128_vm0, %v92_v57  ;;  %830 = vmatmul.msk.bf16.gmra.mxu1 %vm128_vm0, %v102_v58  ;;  %v97_v58 = vpack.c.bf16 %v34_v52, %v33_v51 }
  0x48   :  { %840 = vmatmul.msk.bf16.gmra.mxu2 %vm128_vm0, %v112_v59  ;;  %850 = vmatmul.msk.bf16.gmra.mxu3 %vm128_vm0, %v122_v62  ;;  %v107_v59 = vpack.c.bf16 %v54_v54, %v53_v53 }
  0x57   :  { %821 = vmatmul.msk.bf16.gmra.mxu0 %vm128_vm0, %v93_v5  ;;  %831 = vmatmul.msk.bf16.gmra.mxu1 %vm128_vm0, %v103_v6 }
  0x58   :  { %841 = vmatmul.msk.bf16.gmra.mxu2 %vm128_vm0, %v113_v7  ;;  %851 = vmatmul.msk.bf16.gmra.mxu3 %vm128_vm0, %v123_v10 }
  0x67   :  { %822 = vmatmul.msk.bf16.gmra.mxu0 %vm128_vm0, %v94_v17  ;;  %832 = vmatmul.msk.bf16.gmra.mxu1 %vm128_vm0, %v104_v18 }
  0x68   :  { %842 = vmatmul.msk.bf16.gmra.mxu2 %vm128_vm0, %v114_v19  ;;  %852 = vmatmul.msk.bf16.gmra.mxu3 %vm128_vm0, %v124_v27 }
  0x77   :  { %823 = vmatmul.msk.bf16.gmra.mxu0 %vm128_vm0, %v95_v28  ;;  %833 = vmatmul.msk.bf16.gmra.mxu1 %vm128_vm0, %v105_v29 }
  0x78   :  { %843 = vmatmul.msk.bf16.gmra.mxu2 %vm128_vm0, %v115_v30 }
  0x84   :  { %v249_v40 = vpop.f32.mrf.mxu0  ;;  %v299_v41 = vpop.f32.mrf.mxu1 }
  0x85   :  { %v441_v43 = vadd.f32 %v1112_v35, %v249_v40  ;;  %v461_v44 = vadd.f32 %v1112_v35, %v299_v41 }
  0x87   :  { %514 = vst.msk [vmem:[%s1511_s3] sm:$0xff] %vm128_vm0, %v441_v43  ;;  %824 = vmatmul.msk.bf16.gmra.mxu0 %vm128_vm0, %v96_v38  ;;  %834 = vmatmul.msk.bf16.gmra.mxu1 %vm128_vm0, %v106_v39 }
  0x88   :  { %534 = vst.msk [vmem:[%s1511_s3 + $0xa0] sm:$0xff] %vm128_vm0, %v461_v44  ;;  %844 = vmatmul.msk.bf16.gmra.mxu2 %vm128_vm0, %v116_v42 }
  0x8b   :  { %v349_v45 = vpop.f32.mrf.mxu2  ;;  %v399_v2 = vpop.f32.mrf.mxu3 }
  0x8c   :  { %v481_v46 = vadd.f32 %v1112_v35, %v349_v45  ;;  %v251_v47 = vpop.f32.mrf.mxu0  ;;  %v301_v48 = vpop.f32.mrf.mxu1  ;;  %v501_v3 = vadd.f32 %v1112_v35, %v399_v2 }
  0x8d   :  { %v442_v49 = vadd.f32 %v1112_v35, %v251_v47  ;;  %v462_v50 = vadd.f32 %v1112_v35, %v301_v48 }
  0x8e   :  { %554 = vst.msk [vmem:[%s1511_s3 + $0x140] sm:$0xff] %vm128_vm0, %v481_v46 }
  0x8f   :  { %515 = vst.msk [vmem:[%s1511_s3 + $0x8] sm:$0xff] %vm128_vm0, %v442_v49 }
  0x90   :  { %535 = vst.msk [vmem:[%s1511_s3 + $0xa8] sm:$0xff] %vm128_vm0, %v462_v50 }
  0x91   :  { %574 = vst.msk [vmem:[%s1511_s3 + $0x1e0] sm:$0xff] %vm128_vm0, %v501_v3 }
  0x93   :  { %v351_v57 = vpop.f32.mrf.mxu2  ;;  %v401_v10 = vpop.f32.mrf.mxu3 }
  0x94   :  { %v482_v60 = vadd.f32 %v1112_v35, %v351_v57  ;;  %v254_v61 = vpop.f32.mrf.mxu0  ;;  %v304_v62 = vpop.f32.mrf.mxu1  ;;  %v502_v11 = vadd.f32 %v1112_v35, %v401_v10 }
  0x95   :  { %v443_v0 = vadd.f32 %v1112_v35, %v254_v61  ;;  %v463_v1 = vadd.f32 %v1112_v35, %v304_v62 }
  0x96   :  { %555 = vst.msk [vmem:[%s1511_s3 + $0x148] sm:$0xff] %vm128_vm0, %v482_v60 }
  0x97   :  { %516 = vst.msk [vmem:[%s1511_s3 + $0x10] sm:$0xff] %vm128_vm0, %v443_v0  ;;  %825 = vmatmul.msk.bf16.gmra.mxu0 %vm128_vm0, %v97_v58  ;;  %835 = vmatmul.msk.bf16.gmra.mxu1 %vm128_vm0, %v107_v59 }
  0x98   :  { %536 = vst.msk [vmem:[%s1511_s3 + $0xb0] sm:$0xff] %vm128_vm0, %v463_v1  ;;  %845 = vmatmul.msk.bf16.gmra.mxu2 %vm128_vm0, %v117_v63 }
  0x99   :  { %575 = vst.msk [vmem:[%s1511_s3 + $0x1e8] sm:$0xff] %vm128_vm0, %v502_v11 }
  0x9b   :  { %v354_v4 = vpop.f32.mrf.mxu2  ;;  %v404_v18 = vpop.f32.mrf.mxu3 }
  0x9c   :  { %v483_v5 = vadd.f32 %v1112_v35, %v354_v4  ;;  %v256_v6 = vpop.f32.mrf.mxu0  ;;  %v306_v7 = vpop.f32.mrf.mxu1  ;;  %v503_v19 = vadd.f32 %v1112_v35, %v404_v18 }
  0x9d   :  { %v444_v8 = vadd.f32 %v1112_v35, %v256_v6  ;;  %v464_v9 = vadd.f32 %v1112_v35, %v306_v7 }
  0x9e   :  { %556 = vst.msk [vmem:[%s1511_s3 + $0x150] sm:$0xff] %vm128_vm0, %v483_v5 }
  0x9f   :  { %517 = vst.msk [vmem:[%s1511_s3 + $0x18] sm:$0xff] %vm128_vm0, %v444_v8 }
  0xa0   :  { %537 = vst.msk [vmem:[%s1511_s3 + $0xb8] sm:$0xff] %vm128_vm0, %v464_v9 }
  0xa1   :  { %576 = vst.msk [vmem:[%s1511_s3 + $0x1f0] sm:$0xff] %vm128_vm0, %v503_v19 }
  0xa3   :  { %v356_v12 = vpop.f32.mrf.mxu2  ;;  %v406_v26 = vpop.f32.mrf.mxu3 }
  0xa4   :  { %v484_v13 = vadd.f32 %v1112_v35, %v356_v12  ;;  %v259_v14 = vpop.f32.mrf.mxu0  ;;  %v309_v15 = vpop.f32.mrf.mxu1  ;;  %v504_v27 = vadd.f32 %v1112_v35, %v406_v26 }
  0xa5   :  { %v445_v16 = vadd.f32 %v1112_v35, %v259_v14  ;;  %v465_v17 = vadd.f32 %v1112_v35, %v309_v15 }
  0xa6   :  { %557 = vst.msk [vmem:[%s1511_s3 + $0x158] sm:$0xff] %vm128_vm0, %v484_v13 }
  0xa7   :  { %518 = vst.msk [vmem:[%s1511_s3 + $0x20] sm:$0xff] %vm128_vm0, %v445_v16 }
  0xa8   :  { %538 = vst.msk [vmem:[%s1511_s3 + $0xc0] sm:$0xff] %vm128_vm0, %v465_v17 }
  0xa9   :  { %577 = vst.msk [vmem:[%s1511_s3 + $0x1f8] sm:$0xff] %vm128_vm0, %v504_v27 }
  0xab   :  { %v359_v20 = vpop.f32.mrf.mxu2  ;;  %v409_v34 = vpop.f32.mrf.mxu3 }
  0xac   :  { %v485_v21 = vadd.f32 %v1112_v35, %v359_v20  ;;  %v261_v22 = vpop.f32.mrf.mxu0  ;;  %v311_v23 = vpop.f32.mrf.mxu1  ;;  %v505_v36 = vadd.f32 %v1112_v35, %v409_v34 }
  0xad   :  { %v446_v24 = vadd.f32 %v1112_v35, %v261_v22  ;;  %v466_v25 = vadd.f32 %v1112_v35, %v311_v23 }
  0xae   :  { %558 = vst.msk [vmem:[%s1511_s3 + $0x160] sm:$0xff] %vm128_vm0, %v485_v21 }
  0xaf   :  { %519 = vst.msk [vmem:[%s1511_s3 + $0x28] sm:$0xff] %vm128_vm0, %v446_v24 }
  0xb0   :  { %539 = vst.msk [vmem:[%s1511_s3 + $0xc8] sm:$0xff] %vm128_vm0, %v466_v25 }
  0xb1   :  { %578 = vst.msk [vmem:[%s1511_s3 + $0x200] sm:$0xff] %vm128_vm0, %v505_v36 }
  0xb3   :  { %v361_v28 = vpop.f32.mrf.mxu2  ;;  %v411_v43 = vpop.f32.mrf.mxu3 }
  0xb4   :  { %v486_v29 = vadd.f32 %v1112_v35, %v361_v28  ;;  %v264_v30 = vpop.f32.mrf.mxu0  ;;  %v314_v31 = vpop.f32.mrf.mxu1  ;;  %v506_v44 = vadd.f32 %v1112_v35, %v411_v43 }
  0xb5   :  { %v447_v32 = vadd.f32 %v1112_v35, %v264_v30  ;;  %v467_v33 = vadd.f32 %v1112_v35, %v314_v31 }
  0xb6   :  { %559 = vst.msk [vmem:[%s1511_s3 + $0x168] sm:$0xff] %vm128_vm0, %v486_v29 }
  0xb7   :  { %520 = vst.msk [vmem:[%s1511_s3 + $0x30] sm:$0xff] %vm128_vm0, %v447_v32 }
  0xb8   :  { %540 = vst.msk [vmem:[%s1511_s3 + $0xd0] sm:$0xff] %vm128_vm0, %v467_v33 }
  0xb9   :  { %579 = vst.msk [vmem:[%s1511_s3 + $0x208] sm:$0xff] %vm128_vm0, %v506_v44 }
  0xbb   :  { %v364_v37 = vpop.f32.mrf.mxu2  ;;  %v414_v51 = vpop.f32.mrf.mxu3 }
  0xbc   :  { %v487_v38 = vadd.f32 %v1112_v35, %v364_v37  ;;  %v266_v39 = vpop.f32.mrf.mxu0  ;;  %v316_v40 = vpop.f32.mrf.mxu1  ;;  %v507_v52 = vadd.f32 %v1112_v35, %v414_v51 }
  0xbd   :  { %v448_v41 = vadd.f32 %v1112_v35, %v266_v39  ;;  %v468_v42 = vadd.f32 %v1112_v35, %v316_v40 }
  0xbe   :  { %560 = vst.msk [vmem:[%s1511_s3 + $0x170] sm:$0xff] %vm128_vm0, %v487_v38 }
  0xbf   :  { %521 = vst.msk [vmem:[%s1511_s3 + $0x38] sm:$0xff] %vm128_vm0, %v448_v41 }
  0xc0   :  { %541 = vst.msk [vmem:[%s1511_s3 + $0xd8] sm:$0xff] %vm128_vm0, %v468_v42 }
  0xc1   :  { %580 = vst.msk [vmem:[%s1511_s3 + $0x210] sm:$0xff] %vm128_vm0, %v507_v52 }
  0xc3   :  { %v366_v45 = vpop.f32.mrf.mxu2  ;;  %v416_v59 = vpop.f32.mrf.mxu3 }
  0xc4   :  { %v488_v46 = vadd.f32 %v1112_v35, %v366_v45  ;;  %v269_v47 = vpop.f32.mrf.mxu0  ;;  %v319_v48 = vpop.f32.mrf.mxu1  ;;  %v508_v60 = vadd.f32 %v1112_v35, %v416_v59 }
  0xc5   :  { %v449_v49 = vadd.f32 %v1112_v35, %v269_v47  ;;  %v469_v50 = vadd.f32 %v1112_v35, %v319_v48 }
  0xc6   :  { %561 = vst.msk [vmem:[%s1511_s3 + $0x178] sm:$0xff] %vm128_vm0, %v488_v46 }
  0xc7   :  { %522 = vst.msk [vmem:[%s1511_s3 + $0x40] sm:$0xff] %vm128_vm0, %v449_v49 }
  0xc8   :  { %542 = vst.msk [vmem:[%s1511_s3 + $0xe0] sm:$0xff] %vm128_vm0, %v469_v50 }
  0xc9   :  { %581 = vst.msk [vmem:[%s1511_s3 + $0x218] sm:$0xff] %vm128_vm0, %v508_v60 }
  0xcb   :  { %v369_v53 = vpop.f32.mrf.mxu2  ;;  %v419_v3 = vpop.f32.mrf.mxu3 }
  0xcc   :  { %v489_v54 = vadd.f32 %v1112_v35, %v369_v53  ;;  %v271_v55 = vpop.f32.mrf.mxu0  ;;  %v321_v56 = vpop.f32.mrf.mxu1  ;;  %v509_v4 = vadd.f32 %v1112_v35, %v419_v3 }
  0xcd   :  { %v450_v57 = vadd.f32 %v1112_v35, %v271_v55  ;;  %v470_v58 = vadd.f32 %v1112_v35, %v321_v56 }
  0xce   :  { %562 = vst.msk [vmem:[%s1511_s3 + $0x180] sm:$0xff] %vm128_vm0, %v489_v54 }
  0xcf   :  { %523 = vst.msk [vmem:[%s1511_s3 + $0x48] sm:$0xff] %vm128_vm0, %v450_v57 }
  0xd0   :  { %543 = vst.msk [vmem:[%s1511_s3 + $0xe8] sm:$0xff] %vm128_vm0, %v470_v58 }
  0xd1   :  { %582 = vst.msk [vmem:[%s1511_s3 + $0x220] sm:$0xff] %vm128_vm0, %v509_v4 }
  0xd3   :  { %v371_v61 = vpop.f32.mrf.mxu2  ;;  %v421_v11 = vpop.f32.mrf.mxu3 }
  0xd4   :  { %v490_v62 = vadd.f32 %v1112_v35, %v371_v61  ;;  %v274_v63 = vpop.f32.mrf.mxu0  ;;  %v324_v0 = vpop.f32.mrf.mxu1  ;;  %v510_v12 = vadd.f32 %v1112_v35, %v421_v11 }
  0xd5   :  { %v451_v1 = vadd.f32 %v1112_v35, %v274_v63  ;;  %v471_v2 = vadd.f32 %v1112_v35, %v324_v0 }
  0xd6   :  { %563 = vst.msk [vmem:[%s1511_s3 + $0x188] sm:$0xff] %vm128_vm0, %v490_v62 }
  0xd7   :  { %524 = vst.msk [vmem:[%s1511_s3 + $0x50] sm:$0xff] %vm128_vm0, %v451_v1 }
  0xd8   :  { %544 = vst.msk [vmem:[%s1511_s3 + $0xf0] sm:$0xff] %vm128_vm0, %v471_v2 }
  0xd9   :  { %583 = vst.msk [vmem:[%s1511_s3 + $0x228] sm:$0xff] %vm128_vm0, %v510_v12 }
  0xdb   :  { %v374_v5 = vpop.f32.mrf.mxu2  ;;  %v424_v19 = vpop.f32.mrf.mxu3 }
  0xdc   :  { %v491_v6 = vadd.f32 %v1112_v35, %v374_v5  ;;  %v276_v7 = vpop.f32.mrf.mxu0  ;;  %v326_v8 = vpop.f32.mrf.mxu1  ;;  %v511_v20 = vadd.f32 %v1112_v35, %v424_v19 }
  0xdd   :  { %v452_v9 = vadd.f32 %v1112_v35, %v276_v7  ;;  %v472_v10 = vadd.f32 %v1112_v35, %v326_v8 }
  0xde   :  { %564 = vst.msk [vmem:[%s1511_s3 + $0x190] sm:$0xff] %vm128_vm0, %v491_v6 }
  0xdf   :  { %525 = vst.msk [vmem:[%s1511_s3 + $0x58] sm:$0xff] %vm128_vm0, %v452_v9 }
  0xe0   :  { %545 = vst.msk [vmem:[%s1511_s3 + $0xf8] sm:$0xff] %vm128_vm0, %v472_v10 }
  0xe1   :  { %584 = vst.msk [vmem:[%s1511_s3 + $0x230] sm:$0xff] %vm128_vm0, %v511_v20 }
  0xe3   :  { %v376_v13 = vpop.f32.mrf.mxu2  ;;  %v426_v27 = vpop.f32.mrf.mxu3 }
  0xe4   :  { %v492_v14 = vadd.f32 %v1112_v35, %v376_v13  ;;  %v279_v15 = vpop.f32.mrf.mxu0  ;;  %v329_v16 = vpop.f32.mrf.mxu1  ;;  %v512_v28 = vadd.f32 %v1112_v35, %v426_v27 }
  0xe5   :  { %v453_v17 = vadd.f32 %v1112_v35, %v279_v15  ;;  %v473_v18 = vadd.f32 %v1112_v35, %v329_v16 }
  0xe6   :  { %565 = vst.msk [vmem:[%s1511_s3 + $0x198] sm:$0xff] %vm128_vm0, %v492_v14 }
  0xe7   :  { %526 = vst.msk [vmem:[%s1511_s3 + $0x60] sm:$0xff] %vm128_vm0, %v453_v17 }
  0xe8   :  { %546 = vst.msk [vmem:[%s1511_s3 + $0x100] sm:$0xff] %vm128_vm0, %v473_v18 }
  0xe9   :  { %585 = vst.msk [vmem:[%s1511_s3 + $0x238] sm:$0xff] %vm128_vm0, %v512_v28 }
  0xeb   :  { %v379_v21 = vpop.f32.mrf.mxu2  ;;  %v429_v36 = vpop.f32.mrf.mxu3 }
  0xec   :  { %v493_v22 = vadd.f32 %v1112_v35, %v379_v21  ;;  %v281_v23 = vpop.f32.mrf.mxu0  ;;  %v331_v24 = vpop.f32.mrf.mxu1  ;;  %v513_v37 = vadd.f32 %v1112_v35, %v429_v36 }
  0xed   :  { %v454_v25 = vadd.f32 %v1112_v35, %v281_v23  ;;  %v474_v26 = vadd.f32 %v1112_v35, %v331_v24 }
  0xee   :  { %566 = vst.msk [vmem:[%s1511_s3 + $0x1a0] sm:$0xff] %vm128_vm0, %v493_v22 }
  0xef   :  { %527 = vst.msk [vmem:[%s1511_s3 + $0x68] sm:$0xff] %vm128_vm0, %v454_v25 }
  0xf0   :  { %547 = vst.msk [vmem:[%s1511_s3 + $0x108] sm:$0xff] %vm128_vm0, %v474_v26 }
  0xf1   :  { %587 = vst.msk [vmem:[%s1511_s3 + $0x240] sm:$0x3] %vm586_vm1, %v513_v37 }
  0xf3   :  { %v381_v29 = vpop.f32.mrf.mxu2  ;;  %v431_v44 = vpop.f32.mrf.mxu3 }
  0xf4   :  { %v494_v30 = vadd.f32 %v1112_v35, %v381_v29  ;;  %v284_v31 = vpop.f32.mrf.mxu0  ;;  %v334_v32 = vpop.f32.mrf.mxu1 }
  0xf5   :  { %v455_v33 = vadd.f32 %v1112_v35, %v284_v31  ;;  %v475_v34 = vadd.f32 %v1112_v35, %v334_v32 }
  0xf6   :  { %567 = vst.msk [vmem:[%s1511_s3 + $0x1a8] sm:$0xff] %vm128_vm0, %v494_v30 }
  0xf7   :  { %528 = vst.msk [vmem:[%s1511_s3 + $0x70] sm:$0xff] %vm128_vm0, %v455_v33 }
  0xf8   :  { %548 = vst.msk [vmem:[%s1511_s3 + $0x110] sm:$0xff] %vm128_vm0, %v475_v34 }
  0xfb   :  { %v384_v38 = vpop.f32.mrf.mxu2 }
  0xfc   :  { %v495_v39 = vadd.f32 %v1112_v35, %v384_v38  ;;  %v286_v40 = vpop.f32.mrf.mxu0  ;;  %v336_v41 = vpop.f32.mrf.mxu1 }
  0xfd   :  { %v456_v42 = vadd.f32 %v1112_v35, %v286_v40  ;;  %v476_v43 = vadd.f32 %v1112_v35, %v336_v41 }
  0xfe   :  { %568 = vst.msk [vmem:[%s1511_s3 + $0x1b0] sm:$0xff] %vm128_vm0, %v495_v39 }
  0xff   :  { %529 = vst.msk [vmem:[%s1511_s3 + $0x78] sm:$0xff] %vm128_vm0, %v456_v42 }
 0x100   :  { %549 = vst.msk [vmem:[%s1511_s3 + $0x118] sm:$0xff] %vm128_vm0, %v476_v43 }
 0x103   :  { %v386_v45 = vpop.f32.mrf.mxu2 }
 0x104   :  { %v496_v46 = vadd.f32 %v1112_v35, %v386_v45  ;;  %v289_v47 = vpop.f32.mrf.mxu0  ;;  %v339_v48 = vpop.f32.mrf.mxu1 }
 0x105   :  { %v457_v49 = vadd.f32 %v1112_v35, %v289_v47  ;;  %v477_v50 = vadd.f32 %v1112_v35, %v339_v48 }
 0x106   :  { %569 = vst.msk [vmem:[%s1511_s3 + $0x1b8] sm:$0xff] %vm128_vm0, %v496_v46 }
 0x107   :  { %530 = vst.msk [vmem:[%s1511_s3 + $0x80] sm:$0xff] %vm128_vm0, %v457_v49 }
 0x108   :  { %550 = vst.msk [vmem:[%s1511_s3 + $0x120] sm:$0xff] %vm128_vm0, %v477_v50 }
 0x10b   :  { %v389_v51 = vpop.f32.mrf.mxu2 }
 0x10c   :  { %v497_v52 = vadd.f32 %v1112_v35, %v389_v51  ;;  %v291_v53 = vpop.f32.mrf.mxu0  ;;  %v341_v54 = vpop.f32.mrf.mxu1 }
 0x10d   :  { %v458_v55 = vadd.f32 %v1112_v35, %v291_v53  ;;  %v478_v56 = vadd.f32 %v1112_v35, %v341_v54 }
 0x10e   :  { %570 = vst.msk [vmem:[%s1511_s3 + $0x1c0] sm:$0xff] %vm128_vm0, %v497_v52 }
 0x10f   :  { %531 = vst.msk [vmem:[%s1511_s3 + $0x88] sm:$0xff] %vm128_vm0, %v458_v55 }
 0x110   :  { %551 = vst.msk [vmem:[%s1511_s3 + $0x128] sm:$0xff] %vm128_vm0, %v478_v56 }
 0x113   :  { %v391_v57 = vpop.f32.mrf.mxu2 }
 0x114   :  { %v498_v58 = vadd.f32 %v1112_v35, %v391_v57  ;;  %v294_v59 = vpop.f32.mrf.mxu0  ;;  %v344_v60 = vpop.f32.mrf.mxu1 }
 0x115   :  { %v459_v61 = vadd.f32 %v1112_v35, %v294_v59  ;;  %v479_v62 = vadd.f32 %v1112_v35, %v344_v60 }
 0x116   :  { %571 = vst.msk [vmem:[%s1511_s3 + $0x1c8] sm:$0xff] %vm128_vm0, %v498_v58 }
 0x117   :  { %532 = vst.msk [vmem:[%s1511_s3 + $0x90] sm:$0xff] %vm128_vm0, %v459_v61 }
 0x118   :  { %552 = vst.msk [vmem:[%s1511_s3 + $0x130] sm:$0xff] %vm128_vm0, %v479_v62 }
 0x11b   :  { %v394_v63 = vpop.f32.mrf.mxu2 }
 0x11c   :  { %v499_v0 = vadd.f32 %v1112_v35, %v394_v63  ;;  %v296_v1 = vpop.f32.mrf.mxu0  ;;  %v346_v2 = vpop.f32.mrf.mxu1 }
 0x11d   :  { %v460_v3 = vadd.f32 %v1112_v35, %v296_v1  ;;  %v480_v4 = vadd.f32 %v1112_v35, %v346_v2 }
 0x11e   :  { %572 = vst.msk [vmem:[%s1511_s3 + $0x1d0] sm:$0xff] %vm128_vm0, %v499_v0 }
 0x11f   :  { %533 = vst.msk [vmem:[%s1511_s3 + $0x98] sm:$0xff] %vm128_vm0, %v460_v3 }
 0x120   :  { %553 = vst.msk [vmem:[%s1511_s3 + $0x138] sm:$0xff] %vm128_vm0, %v480_v4 }
 0x123   :  { %v396_v5 = vpop.f32.mrf.mxu2 }
 0x124   :  { %v500_v6 = vadd.f32 %v1112_v35, %v396_v5 }
 0x126   :  { %573 = vst.msk [vmem:[%s1511_s3 + $0x1d8] sm:$0xff] %vm128_vm0, %v500_v6 }

// kernel: _lambda_.33
= control target key start
LH: loop header
LB: loop body
LE: loop exit
PB: predicated region body
PF: predicated region fallthrough
CT: control target
= control target key end

     0   :  { %vm35_vm0 = vcmask 261120   ;;  %vm98_vm1 = vcmask 1041408   ;;  %vm103_vm2 = vcmask 1043458   ;;  %vm105_vm4 = vcmask 128004   ;;  %s201_s1 = inlined_call_operand.vmem [shape: f32[32,272], index: 1, kind: input, shape index: {}]   ;;  %s202_s0 = inlined_call_operand.vmem [shape: f32[2,32], index: 0, kind: input, shape index: {}]   ;;  %s203_s2 = inlined_call_operand.vmem [shape: f32[1,272], index: 2, kind: input, shape index: {}]   ;;  %s204_s3 = inlined_call_operand.vmem [shape: f32[2,272], index: 3, kind: output, shape index: {}]  }
   0x1   :  { %v23_v0 = vld [vmem:[%s201_s1 + $0x30] sm:$0xff]  ;;  %v26_v1 = vld [vmem:[%s201_s1 + $0x48] sm:$0xff]  ;;  %v24_v2 = vld [vmem:[%s201_s1 + $0x38] sm:$0xff]  ;;  %vm100_vm5 = vcmask 1043456  }
   0x2   :  { %v32_v3 = vpack.c.bf16 %v26_v1, %v23_v0  ;;  %v27_v4 = vld [vmem:[%s201_s1 + $0x50] sm:$0xff]  ;;  %v25_v5 = vld [vmem:[%s201_s1 + $0x40] sm:$0xff]  ;;  %v28_v6 = vld [vmem:[%s201_s1 + $0x58] sm:$0xff] }
   0x3   :  { %v33_v7 = vpack.c.bf16 %v27_v4, %v24_v2  ;;  %v34_v8 = vpack.c.bf16 %v28_v6, %v25_v5  ;;  %v17_v9 = vld [vmem:[%s201_s1] sm:$0xff]  ;;  %v20_v10 = vld [vmem:[%s201_s1 + $0x18] sm:$0xff]  ;;  %v18_v11 = vld [vmem:[%s201_s1 + $0x8] sm:$0xff] }
   0x4   :  { %45 = vmatpush.bf16.msra.mxu0 %v32_v3  ;;  %v29_v12 = vpack.c.bf16 %v20_v10, %v17_v9  ;;  %v21_v13 = vld [vmem:[%s201_s1 + $0x20] sm:$0xff]  ;;  %v19_v14 = vld [vmem:[%s201_s1 + $0x10] sm:$0xff]  ;;  %v22_v15 = vld [vmem:[%s201_s1 + $0x28] sm:$0xff] }
   0x5   :  { %58 = vmatpush.bf16.msra.mxu1 %v33_v7  ;;  %71 = vmatpush.bf16.msra.mxu2 %v34_v8  ;;  %v30_v16 = vpack.c.bf16 %v21_v13, %v18_v11  ;;  %v31_v17 = vpack.c.bf16 %v22_v15, %v19_v14  ;;  %v15_v18 = vld [vmem:[%s202_s0] sm:$0x3]  ;;  %vm104_vm3 = vmor %vm103_vm2, %vm98_vm1 }
   0x6   :  { %v16_v19 = vpack.c.bf16 %v15_v18, %v15_v18  ;;  %v82_v20 = vld [vmem:[%s203_s2] sm:$0x7]  ;;  %vm106_vm6 = vmor %vm105_vm4, %vm104_vm3 }
   0x7   :  { %v85_v21 = vperm.slane %v82_v20, 1  ;;  %v84_v23 = vperm.slane %v82_v20, 0  ;;  %v86_v26 = vperm.slane %v82_v20, 2 }
   0x8   :  { %46 = vmatpush.bf16.msra.mxu0 %v29_v12 }
   0x9   :  { %59 = vmatpush.bf16.msra.mxu1 %v30_v16  ;;  %72 = vmatpush.bf16.msra.mxu2 %v31_v17 }
   0xb   :  { %133 = vmatmul.msk.bf16.vlgmr.msra.gmra.mxu0 %vm35_vm0, %v16_v19 }
   0xc   :  { %134 = vmatmul.msk.bf16.vlgmr.msra.gmra.mxu1 %vm35_vm0, %v16_v19  ;;  %135 = vmatmul.msk.bf16.vlgmr.msra.gmra.mxu2 %vm35_vm0, %v16_v19 }
  0x88   :  { %v48_v22 = vpop.f32.mrf.mxu0 }
  0x89   :  { %v61_v24 = vpop.f32.mrf.mxu1  ;;  %v90_v27 = vadd.f32 %v84_v23, %v48_v22 }
  0x8a   :  { %v91_v25 = vadd.f32 %v85_v21, %v61_v24 }
  0x8c   :  { %v96_v28 = vrot.slane %v91_v25, 6 }
  0x8e   :  { %v99_v32 = vsel %vm98_vm1, %v90_v27, %v96_v28 }
  0x8f   :  { %v74_v29 = vpop.f32.mrf.mxu2 }
  0x90   :  { %v92_v30 = vadd.f32 %v86_v26, %v74_v29  ;;  %v50_v31 = vpop.f32.mrf.mxu0 }
  0x91   :  { %v63_v33 = vpop.f32.mrf.mxu1 }
  0x92   :  { %v97_v34 = vrot.slane %v92_v30, 4 }
  0x94   :  { %v101_v35 = vsel %vm100_vm5, %v99_v32, %v97_v34 }
  0x95   :  { %107 = vst.msk [vmem:[%s204_s3] sm:$0x3f] %vm106_vm6, %v101_v35 }
  0x97   :  { %v76_v36 = vpop.f32.mrf.mxu2 }

// kernel: _lambda_.45
= control target key start
LH: loop header
LB: loop body
LE: loop exit
PB: predicated region body
PF: predicated region fallthrough
CT: control target
= control target key end

     0   :  { %s1187_s12 = smov 0   ;;  %s1189_s13 = smov 0   ;;  %s2075_s0 = inlined_call_operand.vmem [shape: f32[2,272,17], index: 0, kind: input, shape index: {}]   ;;  %s2076_s1 = inlined_call_operand.vmem [shape: f32[1,272,1], index: 1, kind: input, shape index: {}]   ;;  %s2077_s2 = inlined_call_operand.vmem [shape: f32[1,272,1], index: 2, kind: input, shape index: {}]   ;;  %s2078_s3 = inlined_call_operand.vmem [shape: f32[2,272,17], index: 3, kind: output, shape index: {}]  }
   0x1   :  { %s1191_s14 = smov 0  }
   0x2 LB: > { %s25_s15 = sadd.s32 1, %s1159_s13  ;;  %p1102_p0 = scmp.ge.s32.totalorder %s1163_s14, 1  ;;  %s1163_s14 = sphi %s1191_s14, %s13_s14   ;;  %s1159_s13 = sphi %s1189_s13, %s2132_s13   ;;  %s1155_s12 = sphi %s1187_s12, %s2131_s12  }
   0x3   : > { %p27_p1 = scmp.ge.s32.totalorder %s25_s15, 2  ;;  %p156_p2 = scmp.lt.s32.totalorder %s1163_s14, 3 }
   0x5   : > { %s2134_s15 = smov (%p27_p1, %s25_s15), 0  ;;  %p157_p3 = pnand %p1102_p0, %p156_p2 }
   0x7   : > { %160 = sbr.rel (%p157_p3) target bundleno = 310 (0x136), region = 32 }
   0xc   : > { %v509_v0 = vld [vmem:[%s2076_s1 + $0x20] sm:$0xff]  ;;  %v507_v1 = vld [vmem:[%s2076_s1 + $0x10] sm:$0xff]  ;;  %p186_p4 = scmp.lt.s32.totalorder %s1155_s12, 1  ;;  %v1165_v3 = vmov 0   ;;  %vm236_vm0 = vcmask 138240   ;;  %v510_v4 = vld [vmem:[%s2076_s1 + $0x28] sm:$0xff] }
   0xd   : > { %v505_v2 = vld [vmem:[%s2076_s1] sm:$0xff]  ;;  %1136 = vset.pattern.permute.xlu2 %v1165_v3  ;;  %1135 = vset.pattern.permute.xlu1 %v1165_v3  ;;  %v508_v8 = vld [vmem:[%s2076_s1 + $0x18] sm:$0xff]  ;;  %v506_v9 = vld [vmem:[%s2076_s1 + $0x8] sm:$0xff] }
   0xe   : > { %1134 = vset.pattern.permute.xlu0 %v1165_v3  ;;  %561 = vperm.xlu2 %1136, %v509_v0   ;;  %s2136_s12 = smov (!%p186_p4, %s1155_s12), 1  ;;  %v513_v23 = vld [vmem:[%s2076_s1 + $0x40] sm:$0xff]  ;;  %v512_v26 = vld [vmem:[%s2076_s1 + $0x38] sm:$0xff]  ;;  %v511_v27 = vld [vmem:[%s2076_s1 + $0x30] sm:$0xff] }
   0xf   : > { %551 = vperm.xlu1 %1135, %v507_v1   ;;  %541 = vperm.xlu0 %1134, %v505_v2   ;;  %s1107_s22 = smul.u32 272, %s2136_s12  ;;  %v516_v38 = vld [vmem:[%s2076_s1 + $0x58] sm:$0xff]  ;;  %v515_v41 = vld [vmem:[%s2076_s1 + $0x50] sm:$0xff]  ;;  %v514_v42 = vld [vmem:[%s2076_s1 + $0x48] sm:$0xff] }
  0x10   : > { %v519_v53 = vld [vmem:[%s2076_s1 + $0x70] sm:$0xff]  ;;  %v518_v56 = vld [vmem:[%s2076_s1 + $0x68] sm:$0xff]  ;;  %v517_v57 = vld [vmem:[%s2076_s1 + $0x60] sm:$0xff] }
  0x11   : > { %s1225_s27 = scalar_lea.vmem %s2075_s0, %s1107_s22  ;;  %s1908_s28 = scalar_lea.vmem %s2078_s3, %s1107_s22 }
  0x12   : > { %v1228_v5 = vld [vmem:[%s1225_s27] sm:$0xff]  ;;  %v1231_v6 = vld [vmem:[%s1225_s27 + $0x8] sm:$0xff]  ;;  %v1234_v7 = vld [vmem:[%s1225_s27 + $0x10] sm:$0xff] }
  0x13   : > { %v1243_v10 = vld [vmem:[%s1225_s27 + $0x18] sm:$0xff]  ;;  %v237_v11 = vsel %vm236_vm0, %v1228_v5, 0.0  ;;  %v238_v12 = vsel %vm236_vm0, %v1231_v6, 0.0  ;;  %v240_v13 = vsel %vm236_vm0, %v1234_v7, 0.0  ;;  %v1252_v14 = vld [vmem:[%s1225_s27 + $0x20] sm:$0xff]  ;;  %v1257_v17 = vld [vmem:[%s1225_s27 + $0x28] sm:$0xff] }
  0x14   : > { %v239_v15 = vadd.f32 %v238_v12, %v237_v11  ;;  %v242_v16 = vsel %vm236_vm0, %v1243_v10, 0.0  ;;  %v244_v19 = vsel %vm236_vm0, %v1252_v14, 0.0  ;;  %v1262_v20 = vld [vmem:[%s1225_s27 + $0x30] sm:$0xff]  ;;  %v246_v22 = vsel %vm236_vm0, %v1257_v17, 0.0  ;;  %v1270_v24 = vld [vmem:[%s1225_s27 + $0x38] sm:$0xff]  ;;  %v1281_v29 = vld [vmem:[%s1225_s27 + $0x40] sm:$0xff] }
  0x15   : > { %v248_v28 = vsel %vm236_vm0, %v1262_v20, 0.0  ;;  %v250_v31 = vsel %vm236_vm0, %v1270_v24, 0.0  ;;  %v1286_v32 = vld [vmem:[%s1225_s27 + $0x48] sm:$0xff]  ;;  %v252_v34 = vsel %vm236_vm0, %v1281_v29, 0.0  ;;  %v1291_v35 = vld [vmem:[%s1225_s27 + $0x50] sm:$0xff]  ;;  %v1299_v39 = vld [vmem:[%s1225_s27 + $0x58] sm:$0xff] }
  0x16   : > { %566 = vperm.xlu2 %1136, %v510_v4   ;;  %v241_v18 = vadd.f32 %v240_v13, %v239_v15  ;;  %v254_v37 = vsel %vm236_vm0, %v1286_v32, 0.0  ;;  %v256_v43 = vsel %vm236_vm0, %v1291_v35, 0.0  ;;  %v1310_v44 = vld [vmem:[%s1225_s27 + $0x60] sm:$0xff]  ;;  %v258_v46 = vsel %vm236_vm0, %v1299_v39, 0.0  ;;  %v1315_v47 = vld [vmem:[%s1225_s27 + $0x68] sm:$0xff]  ;;  %v1320_v50 = vld [vmem:[%s1225_s27 + $0x70] sm:$0xff] }
  0x17   : > { %556 = vperm.xlu1 %1135, %v508_v8   ;;  %546 = vperm.xlu0 %1134, %v506_v9   ;;  %v260_v49 = vsel %vm236_vm0, %v1310_v44, 0.0  ;;  %v262_v52 = vsel %vm236_vm0, %v1315_v47, 0.0  ;;  %v1328_v54 = vld [vmem:[%s1225_s27 + $0x78] sm:$0xff]  ;;  %v264_v58 = vsel %vm236_vm0, %v1320_v50, 0.0  ;;  %v1339_v59 = vld [vmem:[%s1225_s27 + $0x80] sm:$0xff]  ;;  %v1344_v62 = vld [vmem:[%s1225_s27 + $0x88] sm:$0xff] }
  0x18   : > { %v243_v21 = vadd.f32 %v242_v16, %v241_v18  ;;  %v266_v61 = vsel %vm236_vm0, %v1328_v54, 0.0  ;;  %v268_v0 = vsel %vm236_vm0, %v1339_v59, 0.0  ;;  %v1349_v1 = vld [vmem:[%s1225_s27 + $0x90] sm:$0xff]  ;;  %v270_v3 = vsel %vm236_vm0, %v1344_v62, 0.0  ;;  %v522_v4 = vld [vmem:[%s2076_s1 + $0x88] sm:$0xff]  ;;  %v1357_v8 = vld [vmem:[%s1225_s27 + $0x98] sm:$0xff] }
  0x19   : > { %v521_v11 = vld [vmem:[%s2076_s1 + $0x80] sm:$0xff]  ;;  %v520_v12 = vld [vmem:[%s2076_s1 + $0x78] sm:$0xff]  ;;  %v272_v13 = vsel %vm236_vm0, %v1349_v1, 0.0  ;;  %v274_v18 = vsel %vm236_vm0, %v1357_v8, 0.0 }
  0x1a   : > { %v245_v25 = vadd.f32 %v244_v19, %v243_v21  ;;  %v1368_v15 = vld [vmem:[%s1225_s27 + $0xa0] sm:$0xff]  ;;  %v1373_v19 = vld [vmem:[%s1225_s27 + $0xa8] sm:$0xff] }
  0x1c   : > { %v247_v30 = vadd.f32 %v246_v22, %v245_v25  ;;  %v276_v22 = vsel %vm236_vm0, %v1368_v15, 0.0 }
  0x1e   : > { %581 = vperm.xlu2 %1136, %v513_v23   ;;  %v249_v33 = vadd.f32 %v248_v28, %v247_v30  ;;  %v1378_v23 = vld [vmem:[%s1225_s27 + $0xb0] sm:$0xff]  ;;  %v1386_v28 = vld [vmem:[%s1225_s27 + $0xb8] sm:$0xff] }
  0x1f   : > { %576 = vperm.xlu1 %1135, %v512_v26   ;;  %571 = vperm.xlu0 %1134, %v511_v27   ;;  %v278_v26 = vsel %vm236_vm0, %v1373_v19, 0.0  ;;  %v525_v27 = vld [vmem:[%s2076_s1 + $0xa0] sm:$0xff] }
  0x20   : > { %v251_v36 = vadd.f32 %v250_v31, %v249_v33  ;;  %v524_v31 = vld [vmem:[%s2076_s1 + $0x98] sm:$0xff]  ;;  %v523_v33 = vld [vmem:[%s2076_s1 + $0x90] sm:$0xff] }
  0x22   : > { %v253_v40 = vadd.f32 %v252_v34, %v251_v36  ;;  %v280_v34 = vsel %vm236_vm0, %v1378_v23, 0.0  ;;  %v1397_v36 = vld [vmem:[%s1225_s27 + $0xc0] sm:$0xff] }
  0x24   : > { %v255_v45 = vadd.f32 %v254_v37, %v253_v40  ;;  %v1402_v40 = vld [vmem:[%s1225_s27 + $0xc8] sm:$0xff] }
  0x26   : > { %596 = vperm.xlu2 %1136, %v516_v38   ;;  %v257_v48 = vadd.f32 %v256_v43, %v255_v45  ;;  %v282_v38 = vsel %vm236_vm0, %v1386_v28, 0.0  ;;  %v1407_v43 = vld [vmem:[%s1225_s27 + $0xd0] sm:$0xff] }
  0x27   : > { %591 = vperm.xlu1 %1135, %v515_v41   ;;  %586 = vperm.xlu0 %1134, %v514_v42   ;;  %v284_v42 = vsel %vm236_vm0, %v1397_v36, 0.0 }
  0x28   : > { %v259_v51 = vadd.f32 %v258_v46, %v257_v48  ;;  %v286_v46 = vsel %vm236_vm0, %v1402_v40, 0.0  ;;  %v528_v48 = vld [vmem:[%s2076_s1 + $0xb8] sm:$0xff] }
  0x2a   : > { %v261_v55 = vadd.f32 %v260_v49, %v259_v51  ;;  %v1415_v49 = vld [vmem:[%s1225_s27 + $0xd8] sm:$0xff] }
  0x2c   : > { %v263_v60 = vadd.f32 %v262_v52, %v261_v55  ;;  %v527_v52 = vld [vmem:[%s2076_s1 + $0xb0] sm:$0xff]  ;;  %v288_v55 = vsel %vm236_vm0, %v1407_v43, 0.0 }
  0x2e   : > { %611 = vperm.xlu2 %1136, %v519_v53   ;;  %v265_v63 = vadd.f32 %v264_v58, %v263_v60  ;;  %v526_v53 = vld [vmem:[%s2076_s1 + $0xa8] sm:$0xff]  ;;  %v290_v58 = vsel %vm236_vm0, %v1415_v49, 0.0 }
  0x2f   : > { %606 = vperm.xlu1 %1135, %v518_v56   ;;  %601 = vperm.xlu0 %1134, %v517_v57   ;;  %v1426_v56 = vld [vmem:[%s1225_s27 + $0xe0] sm:$0xff]  ;;  %v231_v60 = vld [vmem:[%s1225_s27 + $0xe8] sm:$0xff] }
  0x30   : > { %v267_v2 = vadd.f32 %v266_v61, %v265_v63  ;;  %v292_v63 = vsel %vm236_vm0, %v1426_v56, 0.0 }
  0x32   : > { %v269_v9 = vadd.f32 %v268_v0, %v267_v2  ;;  %v232_v0 = vld [vmem:[%s1225_s27 + $0xf0] sm:$0xff] }
  0x34   : > { %v271_v16 = vadd.f32 %v270_v3, %v269_v9  ;;  %v294_v3 = vsel %vm236_vm0, %v231_v60, 0.0  ;;  %v233_v9 = vld [vmem:[%s1225_s27 + $0xf8] sm:$0xff] }
  0x36   : > { %626 = vperm.xlu2 %1136, %v522_v4   ;;  %v273_v21 = vadd.f32 %v272_v13, %v271_v16  ;;  %v531_v4 = vld [vmem:[%s2076_s1 + $0xd0] sm:$0xff]  ;;  %v529_v13 = vld [vmem:[%s2076_s1 + $0xc0] sm:$0xff]  ;;  %v296_v16 = vsel %vm236_vm0, %v232_v0, 0.0 }
  0x37   : > { %621 = vperm.xlu1 %1135, %v521_v11   ;;  %616 = vperm.xlu0 %1134, %v520_v12   ;;  %v530_v12 = vld [vmem:[%s2076_s1 + $0xc8] sm:$0xff] }
  0x38   : > { %v275_v25 = vadd.f32 %v274_v18, %v273_v21  ;;  %v234_v18 = vld [vmem:[%s1225_s27 + $0x100] sm:$0xff] }
  0x3a   : > { %v277_v30 = vadd.f32 %v276_v22, %v275_v25  ;;  %v298_v22 = vsel %vm236_vm0, %v233_v9, 0.0  ;;  %v1166_v25 = vmov 272.0  }
  0x3b   : > { %1137 = vrcp.f32 %v1166_v25  ;;  %v747_v25 = vld [vmem:[%s2077_s2 + $0x20] sm:$0xff] }
  0x3c   : > { %v279_v37 = vadd.f32 %v278_v26, %v277_v30  ;;  %v235_v26 = vld [vmem:[%s1225_s27 + $0x108] sm:$0xff]  ;;  %v300_v30 = vsel %vm236_vm0, %v234_v18, 0.0 }
  0x3e   : > { %641 = vperm.xlu2 %1136, %v525_v27   ;;  %v281_v41 = vadd.f32 %v280_v34, %v279_v37  ;;  %v534_v34 = vld [vmem:[%s2076_s1 + $0xe8] sm:$0xff] }
  0x3f   : > { %636 = vperm.xlu1 %1135, %v524_v31   ;;  %631 = vperm.xlu0 %1134, %v523_v33   ;;  %v302_v33 = vsel %vm236_vm0, %v235_v26, 0.0 }
  0x40   : > { %v283_v45 = vadd.f32 %v282_v38, %v281_v41  ;;  %v533_v41 = vld [vmem:[%s2076_s1 + $0xe0] sm:$0xff] }
  0x41   : > { %v1138_v38 = vpop.eup %1137 }
  0x42   : > { %v285_v51 = vadd.f32 %v284_v42, %v283_v45  ;;  %v532_v42 = vld [vmem:[%s2076_s1 + $0xd8] sm:$0xff]  ;;  %vm315_vm1 = vweird.f32 %v1138_v38 }
  0x44   : > { %v287_v57 = vadd.f32 %v286_v46, %v285_v51 }
  0x46   : > { %656 = vperm.xlu2 %1136, %v528_v48   ;;  %v289_v61 = vadd.f32 %v288_v55, %v287_v57  ;;  %v311_v48 = vmul.f32 272.0, %v1138_v38  ;;  %v536_v57 = vld [vmem:[%s2076_s1 + $0xf8] sm:$0xff] }
  0x47   : > { %651 = vperm.xlu1 %1135, %v527_v52   ;;  %646 = vperm.xlu0 %1134, %v526_v53   ;;  %v537_v52 = vld [vmem:[%s2076_s1 + $0x100] sm:$0xff] }
  0x48   : > { %v291_v2 = vadd.f32 %v290_v58, %v289_v61  ;;  %v312_v55 = vsub.f32 1.0, %v311_v48  ;;  %v535_v58 = vld [vmem:[%s2076_s1 + $0xf0] sm:$0xff]  ;;  %v748_v48 = vld [vmem:[%s2077_s2 + $0x28] sm:$0xff] }
  0x4a   : > { %v293_v11 = vadd.f32 %v292_v63, %v291_v2  ;;  %v313_v63 = vmul.f32 %v1138_v38, %v312_v55 }
  0x4c   : > { %v295_v21 = vadd.f32 %v294_v3, %v293_v11  ;;  %v744_v3 = vld [vmem:[%s2077_s2 + $0x8] sm:$0xff]  ;;  %v743_v11 = vld [vmem:[%s2077_s2] sm:$0xff] }
  0x4e   : > { %671 = vperm.xlu2 %1136, %v531_v4   ;;  %v297_v27 = vadd.f32 %v296_v16, %v295_v21  ;;  %v314_v4 = vadd.f32 %v1138_v38, %v313_v63 }
  0x4f   : > { %666 = vperm.xlu1 %1135, %v530_v12   ;;  %661 = vperm.xlu0 %1134, %v529_v13   ;;  %v538_v12 = vld [vmem:[%s2076_s1 + $0x108] sm:$0xff] }
  0x50   : > { %v299_v31 = vadd.f32 %v298_v22, %v297_v27  ;;  %v1478_v16 = vsel %vm315_vm1, %v1138_v38, %v314_v4 }
  0x52   : > { %v301_v37 = vadd.f32 %v300_v30, %v299_v31  ;;  %v746_v31 = vld [vmem:[%s2077_s2 + $0x18] sm:$0xff] }
  0x54   : > { %v303_v45 = vadd.f32 %v302_v33, %v301_v37 }
  0x56   : > { %686 = vperm.xlu2 %1136, %v534_v34   ;;  %v304_v46 = vrot.slane %v303_v45, 4 }
  0x57   : > { %681 = vperm.xlu1 %1135, %v533_v41   ;;  %676 = vperm.xlu0 %1134, %v532_v42  }
  0x58   : > { %v305_v51 = vadd.f32 %v304_v46, %v303_v45  ;;  %v749_v45 = vld [vmem:[%s2077_s2 + $0x30] sm:$0xff] }
  0x5a   : > { %v306_v53 = vrot.slane %v305_v51, 2 }
  0x5c   : > { %v307_v61 = vadd.f32 %v306_v53, %v305_v51 }
  0x5e   : > { %701 = vperm.xlu2 %1136, %v537_v52   ;;  %v308_v2 = vrot.slane %v307_v61, 1 }
  0x5f   : > { %696 = vperm.xlu1 %1135, %v536_v57   ;;  %691 = vperm.xlu0 %1134, %v535_v58  }
  0x60   : > { %v309_v13 = vadd.f32 %v308_v2, %v307_v61 }
  0x62   : > { %v1483_v22 = vmul.f32 %v1478_v16, %v309_v13 }
  0x64   : > { %v1489_v27 = vsub.f32 %v231_v60, %v1483_v22  ;;  %v1492_v30 = vsub.f32 %v232_v0, %v1483_v22  ;;  %v1498_v33 = vsub.f32 %v233_v9, %v1483_v22  ;;  %v1501_v34 = vsub.f32 %v234_v18, %v1483_v22  ;;  %v745_v60 = vld [vmem:[%s2077_s2 + $0x10] sm:$0xff] }
  0x65   : > { %v1504_v37 = vsub.f32 %v235_v26, %v1483_v22  ;;  %v1511_v0 = vsub.f32 %v1228_v5, %v1483_v22  ;;  %v1515_v38 = vsub.f32 %v1231_v6, %v1483_v22  ;;  %v1519_v9 = vsub.f32 %v1234_v7, %v1483_v22 }
  0x66   : > { %784 = vperm.xlu2 %1136, %v744_v3   ;;  %2089 = vst [vmem:[#allocation2_spill] sm:$0xff] %v1498_v33  ;;  %v1523_v18 = vsub.f32 %v1243_v10, %v1483_v22  ;;  %v1529_v5 = vsub.f32 %v1252_v14, %v1483_v22  ;;  %v750_v10 = vld [vmem:[%s2077_s2 + $0x38] sm:$0xff]  ;;  %v1542_v42 = vsub.f32 %v1257_v17, %v1483_v22 }
  0x67   : > { %779 = vperm.xlu1 %1135, %v743_v11   ;;  %706 = vperm.xlu0 %1134, %v538_v12   ;;  %v352_v6 = vmul.f32 %v1511_v0, %v1511_v0  ;;  %v353_v7 = vmul.f32 %v1515_v38, %v1515_v38  ;;  %v354_v41 = vmul.f32 %v1519_v9, %v1519_v9  ;;  %v753_v11 = vld [vmem:[%s2077_s2 + $0x50] sm:$0xff] }
  0x68   : > { %v1480_v21 = vpop.permute.xlu2 %561  ;;  %v355_v14 = vmul.f32 %v1523_v18, %v1523_v18  ;;  %v1551_v46 = vsub.f32 %v1262_v20, %v1483_v22  ;;  %v356_v51 = vmul.f32 %v1529_v5, %v1529_v5  ;;  %v1563_v20 = vsub.f32 %v1270_v24, %v1483_v22 }
  0x69   : > { %v386_v17 = vsel %vm236_vm0, %v352_v6, 0.0  ;;  %v387_v52 = vsel %vm236_vm0, %v353_v7, 0.0  ;;  %v389_v53 = vsel %vm236_vm0, %v354_v41, 0.0  ;;  %v357_v57 = vmul.f32 %v1542_v42, %v1542_v42 }
  0x6a   : > { %v388_v55 = vadd.f32 %v387_v52, %v386_v17  ;;  %v391_v58 = vsel %vm236_vm0, %v355_v14, 0.0  ;;  %v1572_v2 = vsub.f32 %v1281_v29, %v1483_v22  ;;  %v358_v3 = vmul.f32 %v1551_v46, %v1551_v46 }
  0x6b   : > { %v393_v4 = vsel %vm236_vm0, %v356_v51, 0.0  ;;  %v1582_v12 = vsub.f32 %v1286_v32, %v1483_v22  ;;  %v359_v13 = vmul.f32 %v1563_v20, %v1563_v20  ;;  %v395_v29 = vsel %vm236_vm0, %v357_v57, 0.0  ;;  %v756_v57 = vld [vmem:[%s2077_s2 + $0x68] sm:$0xff] }
  0x6c   : > { %v390_v63 = vadd.f32 %v389_v53, %v388_v55  ;;  %v1595_v6 = vsub.f32 %v1291_v35, %v1483_v22  ;;  %v360_v32 = vmul.f32 %v1572_v2, %v1572_v2  ;;  %v397_v7 = vsel %vm236_vm0, %v358_v3, 0.0  ;;  %v755_v3 = vld [vmem:[%s2077_s2 + $0x60] sm:$0xff] }
  0x6d   : > { %v361_v14 = vmul.f32 %v1582_v12, %v1582_v12  ;;  %v1615_v52 = vsub.f32 %v1310_v44, %v1483_v22 }
  0x6e   : > { %799 = vperm.xlu2 %1136, %v747_v25   ;;  %v392_v24 = vadd.f32 %v391_v58, %v390_v63  ;;  %v752_v25 = vld [vmem:[%s2077_s2 + $0x48] sm:$0xff]  ;;  %v401_v53 = vsel %vm236_vm0, %v360_v32, 0.0  ;;  %v1625_v58 = vsub.f32 %v1315_v47, %v1483_v22 }
  0x6f   : > { %794 = vperm.xlu1 %1135, %v746_v31   ;;  %789 = vperm.xlu0 %1134, %v745_v60   ;;  %v751_v60 = vld [vmem:[%s2077_s2 + $0x40] sm:$0xff]  ;;  %v403_v44 = vsel %vm236_vm0, %v361_v14, 0.0  ;;  %v364_v47 = vmul.f32 %v1615_v52, %v1615_v52  ;;  %v1658_v14 = vsub.f32 %v1339_v59, %v1483_v22 }
  0x70   : > { %v1525_v26 = vpop.permute.xlu2 %566  ;;  %v394_v31 = vadd.f32 %v393_v4, %v392_v24  ;;  %v754_v24 = vld [vmem:[%s2077_s2 + $0x58] sm:$0xff] }
  0x72   : > { %v396_v41 = vadd.f32 %v395_v29, %v394_v31  ;;  %v365_v31 = vmul.f32 %v1625_v58, %v1625_v58 }
  0x74   : > { %v411_v59 = vsel %vm236_vm0, %v365_v31, 0.0 }
  0x76   : > { %814 = vperm.xlu2 %1136, %v750_v10   ;;  %v1602_v10 = vsub.f32 %v1299_v39, %v1483_v22  ;;  %v362_v39 = vmul.f32 %v1595_v6, %v1595_v6 }
  0x77   : > { %809 = vperm.xlu1 %1135, %v749_v45   ;;  %804 = vperm.xlu0 %1134, %v748_v48   ;;  %v399_v45 = vsel %vm236_vm0, %v359_v13, 0.0  ;;  %v398_v48 = vadd.f32 %v397_v7, %v396_v41 }
  0x78   : > { %v1568_v61 = vpop.permute.xlu2 %581  ;;  %v363_v63 = vmul.f32 %v1602_v10, %v1602_v10  ;;  %v405_v13 = vsel %vm236_vm0, %v362_v39, 0.0  ;;  %v759_v39 = vld [vmem:[%s2077_s2 + $0x80] sm:$0xff] }
  0x79   : > { %v400_v55 = vadd.f32 %v399_v45, %v398_v48  ;;  %v409_v45 = vsel %vm236_vm0, %v364_v47, 0.0  ;;  %v1688_v47 = vsub.f32 %v1357_v8, %v1483_v22 }
  0x7b   : > { %v402_v4 = vadd.f32 %v401_v53, %v400_v55  ;;  %v1668_v53 = vsub.f32 %v1344_v62, %v1483_v22  ;;  %v368_v62 = vmul.f32 %v1658_v14, %v1658_v14 }
  0x7d   : > { %v404_v29 = vadd.f32 %v403_v44, %v402_v4  ;;  %2091 = vst [vmem:[#allocation4_spill] sm:$0xff] %v1668_v53  ;;  %v757_v44 = vld [vmem:[%s2077_s2 + $0x70] sm:$0xff] }
  0x7e   : > { %829 = vperm.xlu2 %1136, %v753_v11   ;;  %v1638_v11 = vsub.f32 %v1320_v50, %v1483_v22 }
  0x7f   : > { %824 = vperm.xlu1 %1135, %v752_v25   ;;  %819 = vperm.xlu0 %1134, %v751_v60   ;;  %v1645_v25 = vsub.f32 %v1328_v54, %v1483_v22  ;;  %v407_v60 = vsel %vm236_vm0, %v363_v63, 0.0  ;;  %v406_v32 = vadd.f32 %v405_v13, %v404_v29  ;;  %v369_v13 = vmul.f32 %v1668_v53, %v1668_v53 }
  0x80   : > { %v1607_v35 = vpop.permute.xlu2 %596  ;;  %v366_v54 = vmul.f32 %v1638_v11, %v1638_v11 }
  0x81   : > { %v1609_v51 = vpop.permute.xlu1 %551  ;;  %v1611_v17 = vpop.permute.xlu0 %541  ;;  %v408_v48 = vadd.f32 %v407_v60, %v406_v32  ;;  %v367_v55 = vmul.f32 %v1645_v25, %v1645_v25 }
  0x82   : > { %v413_v4 = vsel %vm236_vm0, %v366_v54, 0.0  ;;  %v1701_v54 = vsub.f32 %v1368_v15, %v1483_v22  ;;  %v419_v15 = vsel %vm236_vm0, %v369_v13, 0.0  ;;  %v1731_v13 = vsub.f32 %v1386_v28, %v1483_v22 }
  0x83   : > { %v410_v63 = vadd.f32 %v409_v45, %v408_v48  ;;  %v415_v29 = vsel %vm236_vm0, %v367_v55, 0.0  ;;  %v417_v45 = vsel %vm236_vm0, %v368_v62, 0.0  ;;  %v1711_v55 = vsub.f32 %v1373_v19, %v1483_v22 }
  0x84   : > { %2094 = vst [vmem:[#allocation7_spill] sm:$0xff] %v1701_v54  ;;  %v1724_v62 = vsub.f32 %v1378_v23, %v1483_v22  ;;  %v372_v19 = vmul.f32 %v1701_v54, %v1701_v54 }
  0x85   : > { %2095 = vst [vmem:[#allocation8_spill] sm:$0xff] %v1711_v55 }
  0x86   : > { %844 = vperm.xlu2 %1136, %v756_v57   ;;  %v758_v57 = vld [vmem:[%s2077_s2 + $0x78] sm:$0xff]  ;;  %2096 = vst [vmem:[#allocation9_spill] sm:$0xff] %v1731_v13  ;;  %v374_v28 = vmul.f32 %v1724_v62, %v1724_v62 }
  0x87   : > { %839 = vperm.xlu1 %1135, %v755_v3   ;;  %834 = vperm.xlu0 %1134, %v754_v24   ;;  %v1681_v3 = vsub.f32 %v1349_v1, %v1483_v22  ;;  %v412_v24 = vadd.f32 %v411_v59, %v410_v63  ;;  %v371_v59 = vmul.f32 %v1688_v47, %v1688_v47 }
  0x88   : > { %v1650_v50 = vpop.permute.xlu2 %611 }
  0x89   : > { %2090 = vst [vmem:[#allocation3_spill] sm:$0xff] %v1650_v50  ;;  %v1652_v7 = vpop.permute.xlu1 %556  ;;  %v1654_v41 = vpop.permute.xlu0 %546  ;;  %v414_v31 = vadd.f32 %v413_v4, %v412_v24  ;;  %v370_v8 = vmul.f32 %v1681_v3, %v1681_v3 }
  0x8a   : > { %2092 = vst [vmem:[#allocation5_spill] sm:$0xff] %v1681_v3 }
  0x8b   : > { %v416_v48 = vadd.f32 %v415_v29, %v414_v31  ;;  %v421_v4 = vsel %vm236_vm0, %v370_v8, 0.0  ;;  %v373_v29 = vmul.f32 %v1711_v55, %v1711_v55  ;;  %v423_v31 = vsel %vm236_vm0, %v371_v59, 0.0  ;;  %v765_v59 = vld [vmem:[%s2077_s2 + $0xb0] sm:$0xff] }
  0x8c   : > { %v1744_v8 = vsub.f32 %v1397_v36, %v1483_v22 }
  0x8d   : > { %v418_v63 = vadd.f32 %v417_v45, %v416_v48  ;;  %v427_v36 = vsel %vm236_vm0, %v373_v29, 0.0 }
  0x8e   : > { %859 = vperm.xlu2 %1136, %v759_v39   ;;  %v762_v39 = vld [vmem:[%s2077_s2 + $0x98] sm:$0xff]  ;;  %2098 = vst [vmem:[#allocation11_spill] sm:$0xff] %v1744_v8 }
  0x8f   : > { %854 = vperm.xlu1 %1135, %v758_v57   ;;  %849 = vperm.xlu0 %1134, %v757_v44   ;;  %v761_v57 = vld [vmem:[%s2077_s2 + $0x90] sm:$0xff]  ;;  %v760_v44 = vld [vmem:[%s2077_s2 + $0x88] sm:$0xff]  ;;  %v420_v24 = vadd.f32 %v419_v15, %v418_v63  ;;  %v375_v63 = vmul.f32 %v1731_v13, %v1731_v13 }
  0x90   : > { %v1693_v1 = vpop.permute.xlu2 %626 }
  0x91   : > { %2093 = vst [vmem:[#allocation6_spill] sm:$0xff] %v1693_v1  ;;  %v1695_v60 = vpop.permute.xlu1 %576  ;;  %v1697_v32 = vpop.permute.xlu0 %571  ;;  %v422_v45 = vadd.f32 %v421_v4, %v420_v24  ;;  %v1767_v24 = vsub.f32 %v1407_v43, %v1483_v22 }
  0x93   : > { %v424_v15 = vadd.f32 %v423_v31, %v422_v45  ;;  %2099 = vst [vmem:[#allocation12_spill] sm:$0xff] %v1767_v24  ;;  %v429_v31 = vsel %vm236_vm0, %v374_v28, 0.0  ;;  %v1774_v45 = vsub.f32 %v1415_v49, %v1483_v22  ;;  %v1787_v28 = vsub.f32 %v1426_v56, %v1483_v22  ;;  %v767_v56 = vld [vmem:[%s2077_s2 + $0xc0] sm:$0xff] }
  0x94   : > { %v378_v49 = vmul.f32 %v1767_v24, %v1767_v24 }
  0x95   : > { %2100 = vst [vmem:[#allocation13_spill] sm:$0xff] %v1774_v45 }
  0x96   : > { %874 = vperm.xlu2 %1136, %v762_v39   ;;  %v425_v39 = vsel %vm236_vm0, %v372_v19, 0.0  ;;  %v763_v19 = vld [vmem:[%s2077_s2 + $0xa0] sm:$0xff]  ;;  %2102 = vst [vmem:[#allocation15_spill] sm:$0xff] %v1787_v28 }
  0x97   : > { %869 = vperm.xlu1 %1135, %v761_v57   ;;  %864 = vperm.xlu0 %1134, %v760_v44   ;;  %v1754_v57 = vsub.f32 %v1402_v40, %v1483_v22  ;;  %v764_v44 = vld [vmem:[%s2077_s2 + $0xa8] sm:$0xff]  ;;  %v426_v4 = vadd.f32 %v425_v39, %v424_v15  ;;  %v376_v40 = vmul.f32 %v1744_v8, %v1744_v8  ;;  %v431_v15 = vsel %vm236_vm0, %v375_v63, 0.0 }
  0x98   : > { %v1736_v23 = vpop.permute.xlu2 %641  ;;  %v768_v63 = vld [vmem:[%s2077_s2 + $0xc8] sm:$0xff] }
  0x99   : > { %2097 = vst [vmem:[#allocation10_spill] sm:$0xff] %v1736_v23  ;;  %v1738_v48 = vpop.permute.xlu1 %591  ;;  %v1740_v54 = vpop.permute.xlu0 %586  ;;  %v428_v29 = vadd.f32 %v427_v36, %v426_v4  ;;  %v377_v39 = vmul.f32 %v1754_v57, %v1754_v57 }
  0x9b   : > { %v430_v13 = vadd.f32 %v429_v31, %v428_v29  ;;  %v435_v4 = vsel %vm236_vm0, %v377_v39, 0.0  ;;  %v381_v29 = vmul.f32 %v1489_v27, %v1489_v27 }
  0x9d   : > { %v432_v36 = vadd.f32 %v431_v15, %v430_v13  ;;  %v380_v13 = vmul.f32 %v1787_v28, %v1787_v28 }
  0x9e   : > { %889 = vperm.xlu2 %1136, %v765_v59   ;;  %v433_v59 = vsel %vm236_vm0, %v376_v40, 0.0  ;;  %v437_v40 = vsel %vm236_vm0, %v378_v49, 0.0 }
  0x9f   : > { %884 = vperm.xlu1 %1135, %v764_v44   ;;  %879 = vperm.xlu0 %1134, %v763_v19   ;;  %v379_v44 = vmul.f32 %v1774_v45, %v1774_v45  ;;  %v434_v22 = vadd.f32 %v433_v59, %v432_v36  ;;  %v766_v19 = vld [vmem:[%s2077_s2 + $0xb8] sm:$0xff]  ;;  %v382_v45 = vmul.f32 %v1492_v30, %v1492_v30  ;;  %v441_v49 = vsel %vm236_vm0, %v380_v13, 0.0 }
  0xa0   : > { %v1779_v43 = vpop.permute.xlu2 %656  ;;  %v384_v13 = vmul.f32 %v1501_v34, %v1501_v34 }
  0xa1   : > { %2101 = vst [vmem:[#allocation14_spill] sm:$0xff] %v1779_v43  ;;  %v1781_v23 = vpop.permute.xlu1 %606  ;;  %v1783_v8 = vpop.permute.xlu0 %601  ;;  %v436_v31 = vadd.f32 %v435_v4, %v434_v22  ;;  %v439_v39 = vsel %vm236_vm0, %v379_v44, 0.0  ;;  %v771_v4 = vld [vmem:[%s2077_s2 + $0xe0] sm:$0xff]  ;;  %v383_v44 = vmul.f32 %v1498_v33, %v1498_v33  ;;  %v770_v22 = vld [vmem:[%s2077_s2 + $0xd8] sm:$0xff] }
  0xa2   : > { %v449_v55 = vsel %vm236_vm0, %v384_v13, 0.0 }
  0xa3   : > { %v438_v59 = vadd.f32 %v437_v40, %v436_v31  ;;  %v769_v40 = vld [vmem:[%s2077_s2 + $0xd0] sm:$0xff]  ;;  %v445_v31 = vsel %vm236_vm0, %v382_v45, 0.0  ;;  %v774_v45 = vld [vmem:[%s2077_s2 + $0xf8] sm:$0xff] }
  0xa6   : > { %904 = vperm.xlu2 %1136, %v768_v63   ;;  %v440_v63 = vadd.f32 %v439_v39, %v438_v59  ;;  %v447_v59 = vsel %vm236_vm0, %v383_v44, 0.0  ;;  %v773_v44 = vld [vmem:[%s2077_s2 + $0xf0] sm:$0xff] }
  0xa7   : > { %899 = vperm.xlu1 %1135, %v767_v56   ;;  %894 = vperm.xlu0 %1134, %v766_v19   ;;  %v443_v56 = vsel %vm236_vm0, %v381_v29, 0.0  ;;  %v385_v29 = vmul.f32 %v1504_v37, %v1504_v37 }
  0xa8   : > { %v1810_v15 = vpop.permute.xlu2 %671  ;;  %v442_v19 = vadd.f32 %v441_v49, %v440_v63 }
  0xa9   : > { %2103 = vst [vmem:[#allocation16_spill] sm:$0xff] %v1810_v15  ;;  %v1812_v36 = vpop.permute.xlu1 %621  ;;  %v1814_v24 = vpop.permute.xlu0 %616 }
  0xaa   : > { %v444_v39 = vadd.f32 %v443_v56, %v442_v19 }
  0xac   : > { %v446_v49 = vadd.f32 %v445_v31, %v444_v39 }
  0xae   : > { %919 = vperm.xlu2 %1136, %v771_v4   ;;  %v448_v33 = vadd.f32 %v447_v59, %v446_v49  ;;  %v451_v4 = vsel %vm236_vm0, %v385_v29, 0.0  ;;  %v775_v59 = vld [vmem:[%s2077_s2 + $0x100] sm:$0xff] }
  0xaf   : > { %914 = vperm.xlu1 %1135, %v770_v22   ;;  %909 = vperm.xlu0 %1134, %v769_v40   ;;  %v772_v22 = vld [vmem:[%s2077_s2 + $0xe8] sm:$0xff] }
  0xb0   : > { %v1837_v15 = vpop.permute.xlu2 %686  ;;  %v450_v56 = vadd.f32 %v449_v55, %v448_v33  ;;  %v776_v33 = vld [vmem:[%s2077_s2 + $0x108] sm:$0xff] }
  0xb1   : > { %v1839_v63 = vpop.permute.xlu1 %636  ;;  %v1841_v43 = vpop.permute.xlu0 %631 }
  0xb2   : > { %2104 = vst [vmem:[#allocation17_spill] sm:$0xff] %v1841_v43  ;;  %v452_v19 = vadd.f32 %v451_v4, %v450_v56 }
  0xb4   : > { %v453_v13 = vrot.slane %v452_v19, 4 }
  0xb6   : > { %934 = vperm.xlu2 %1136, %v774_v45   ;;  %v454_v29 = vadd.f32 %v453_v13, %v452_v19 }
  0xb7   : > { %929 = vperm.xlu1 %1135, %v773_v44   ;;  %924 = vperm.xlu0 %1134, %v772_v22  }
  0xb8   : > { %v1854_v40 = vpop.permute.xlu2 %701  ;;  %v455_v55 = vrot.slane %v454_v29, 2 }
  0xb9   : > { %v1856_v31 = vpop.permute.xlu1 %651  ;;  %v1858_v39 = vpop.permute.xlu0 %646 }
  0xba   : > { %2105 = vst [vmem:[#allocation18_spill] sm:$0xff] %v1858_v39  ;;  %v456_v49 = vadd.f32 %v455_v55, %v454_v29 }
  0xbc   : > { %v457_v4 = vrot.slane %v456_v49, 1 }
  0xbe   : > { %v458_v22 = vadd.f32 %v457_v4, %v456_v49 }
  0xbf   : > { %944 = vperm.xlu1 %1135, %v776_v33   ;;  %939 = vperm.xlu0 %1134, %v775_v59  }
  0xc0   : > { %v785_v45 = vpop.permute.xlu2 %784  ;;  %v459_v19 = vmul.f32 %v458_v22, %v1478_v16 }
  0xc1   : > { %v1866_v44 = vpop.permute.xlu1 %666  ;;  %v1868_v56 = vpop.permute.xlu0 %661 }
  0xc2   : > { %2106 = vst [vmem:[#allocation19_spill] sm:$0xff] %v1868_v56  ;;  %v460_v13 = vadd.f32 1e-05, %v459_v19 }
  0xc4   : > { %1139 = vrsqrt.f32 %v460_v13  ;;  %vm467_vm2 = vweird.f32 %v460_v13 }
  0xc8   : > { %v800_v39 = vpop.permute.xlu2 %799 }
  0xc9   : > { %v1871_v1 = vpop.permute.xlu1 %681  ;;  %v1873_v43 = vpop.permute.xlu0 %676 }
  0xca   : > { %2107 = vst [vmem:[#allocation20_spill] sm:$0xff] %v1871_v1  ;;  %v1140_v53 = vpop.eup %1139 }
  0xcb   : > { %2108 = vst [vmem:[#allocation21_spill] sm:$0xff] %v1873_v43  ;;  %v462_v29 = vmul.f32 %v1140_v53, %v460_v13  ;;  %vm468_vm3 = vweird.f32 %v1140_v53 }
  0xcc   : > { %vm469_vm4 = vmor %vm467_vm2, %vm468_vm3 }
  0xcd   : > { %v463_v3 = vmul.f32 %v1140_v53, %v462_v29 }
  0xcf   : > { %v464_v28 = vmul.f32 0.5, %v463_v3 }
  0xd0   : > { %v815_v33 = vpop.permute.xlu2 %814 }
  0xd1   : > { %v1875_v55 = vpop.permute.xlu1 %696  ;;  %v692_v59 = vpop.permute.xlu0 %691  ;;  %v465_v50 = vsub.f32 1.5, %v464_v28 }
  0xd2   : > { %2109 = vst [vmem:[#allocation22_spill] sm:$0xff] %v1875_v55 }
  0xd3   : > { %v466_v49 = vmul.f32 %v1140_v53, %v465_v50 }
  0xd5   : > { %v1877_v19 = vsel %vm469_vm4, %v1140_v53, %v466_v49 }
  0xd6   : > { %v472_v43 = vmul.f32 %v1877_v19, %v1515_v38  ;;  %v475_v56 = vmul.f32 %v1877_v19, %v1529_v5  ;;  %v478_v3 = vmul.f32 %v1877_v19, %v1563_v20  ;;  %v473_v53 = vmul.f32 %v1877_v19, %v1519_v9 }
  0xd7   : > { %v500_v38 = vmul.f32 %v1877_v19, %v1489_v27  ;;  %v471_v49 = vmul.f32 %v1877_v19, %v1511_v0  ;;  %v481_v5 = vmul.f32 %v1877_v19, %v1595_v6  ;;  %v474_v20 = vmul.f32 %v1877_v19, %v1523_v18 }
  0xd8   : > { %v830_v16 = vpop.permute.xlu2 %829  ;;  %v710_v50 = vmul.f32 %v1654_v41, %v472_v43  ;;  %v713_v13 = vmul.f32 %v1480_v21, %v475_v56  ;;  %v716_v1 = vmul.f32 %v1695_v60, %v478_v3  ;;  %v484_v21 = vmul.f32 %v1877_v19, %v1625_v58 }
  0xd9   : > { %v780_v4 = vpop.permute.xlu1 %779  ;;  %v707_v22 = vpop.permute.xlu0 %706  ;;  %v1901_v41 = vmul.f32 %v1837_v15, %v500_v38  ;;  %v487_v27 = vmul.f32 %v1877_v19, %v1658_v14  ;;  %v503_v0 = vmul.f32 %v1877_v19, %v1501_v34  ;;  %v476_v18 = vmul.f32 %v1877_v19, %v1542_v42 }
  0xda   : > { %v948_v9 = vadd.f32 %v785_v45, %v710_v50  ;;  %v711_v6 = vmul.f32 %v1609_v51, %v473_v53  ;;  %v951_v58 = vadd.f32 %v800_v39, %v713_v13  ;;  %v709_v43 = vmul.f32 %v1611_v17, %v471_v49 }
  0xdb   : > { %v477_v15 = vmul.f32 %v1877_v19, %v1551_v46  ;;  %v719_v14 = vmul.f32 %v1738_v48, %v481_v5  ;;  %v1922_v56 = vmul.f32 %v1854_v40, %v503_v0  ;;  %v712_v42 = vmul.f32 %v1652_v7, %v474_v20 }
  0xdc   : > { %982 = vst.msk [vmem:[%s1908_s28 + $0x8] sm:$0xff] %vm236_vm0, %v948_v9  ;;  %v480_v51 = vmul.f32 %v1877_v19, %v1582_v12  ;;  %v722_v39 = vmul.f32 %v1781_v23, %v484_v21  ;;  %v954_v17 = vadd.f32 %v815_v33, %v716_v1  ;;  %v725_v48 = vmul.f32 %v1812_v36, %v487_v27 }
  0xdd   : > { %985 = vst.msk [vmem:[%s1908_s28 + $0x20] sm:$0xff] %vm236_vm0, %v951_v58  ;;  %v490_v40 = vmul.f32 %v1877_v19, %v1688_v47  ;;  %v501_v45 = vmul.f32 %v1877_v19, %v1492_v30  ;;  %v957_v7 = vadd.f32 %v830_v16, %v719_v14  ;;  %v947_v12 = vadd.f32 %v780_v4, %v709_v43 }
  0xde   : > { %988 = vst.msk [vmem:[%s1908_s28 + $0x38] sm:$0xff] %vm236_vm0, %v954_v17  ;;  %v504_v23 = vmul.f32 %v1877_v19, %v1504_v37  ;;  %v479_v36 = vmul.f32 %v1877_v19, %v1572_v2  ;;  %v715_v3 = vmul.f32 %v1697_v32, %v477_v15  ;;  %v714_v16 = vmul.f32 %v1525_v26, %v476_v18  ;;  %v2110_v18 = vld [vmem:[#allocation3_spill] sm:$0xff]  ;;  %v2115_v17 = vld [vmem:[#allocation17_spill] sm:$0xff] }
  0xdf   : > { %v1944_v47 = vmul.f32 %v692_v59, %v501_v45  ;;  %991 = vst.msk [vmem:[%s1908_s28 + $0x50] sm:$0xff] %vm236_vm0, %v957_v7  ;;  %v728_v4 = vmul.f32 %v1839_v63, %v490_v40  ;;  %v718_v32 = vmul.f32 %v1740_v54, %v480_v51  ;;  %v493_v54 = vmul.f32 %v1877_v19, %v1724_v62  ;;  %v2111_v15 = vld [vmem:[#allocation15_spill] sm:$0xff]  ;;  %v2114_v51 = vld [vmem:[#allocation20_spill] sm:$0xff]  ;;  %v2116_v40 = vld [vmem:[#allocation6_spill] sm:$0xff] }
  0xe0   : > { %v845_v55 = vpop.permute.xlu2 %844  ;;  %981 = vst.msk [vmem:[%s1908_s28] sm:$0xff] %vm236_vm0, %v947_v12  ;;  %v1951_v37 = vmul.f32 %v707_v22, %v504_v23  ;;  %v483_v53 = vmul.f32 %v1877_v19, %v1615_v52  ;;  %v499_v14 = vmul.f32 %v1877_v19, %v2111_v15 }
  0xe1   : > { %v795_v29 = vpop.permute.xlu1 %794  ;;  %v790_v28 = vpop.permute.xlu0 %789  ;;  %v960_v1 = vadd.f32 %v845_v55, %v722_v39  ;;  %v731_v62 = vmul.f32 %v1856_v31, %v493_v54  ;;  %v486_v31 = vmul.f32 %v1877_v19, %v1645_v25 }
  0xe2   : > { %v950_v33 = vadd.f32 %v795_v29, %v712_v42  ;;  %v949_v30 = vadd.f32 %v790_v28, %v711_v6  ;;  %v717_v29 = vmul.f32 %v1568_v61, %v479_v36  ;;  %v482_v61 = vmul.f32 %v1877_v19, %v1602_v10 }
  0xe3   : > { %994 = vst.msk [vmem:[%s1908_s28 + $0x68] sm:$0xff] %vm236_vm0, %v960_v1  ;;  %v721_v38 = vmul.f32 %v1783_v8, %v483_v53  ;;  %v496_v10 = vmul.f32 %v1877_v19, %v1754_v57  ;;  %v724_v57 = vmul.f32 %v1814_v24, %v486_v31  ;;  %v2113_v24 = vld [vmem:[#allocation4_spill] sm:$0xff]  ;;  %v737_v39 = vmul.f32 %v2114_v51, %v499_v14 }
  0xe4   : > { %984 = vst.msk [vmem:[%s1908_s28 + $0x18] sm:$0xff] %vm236_vm0, %v950_v33  ;;  %v720_v52 = vmul.f32 %v1607_v35, %v482_v61  ;;  %v485_v35 = vmul.f32 %v1877_v19, %v1638_v11  ;;  %v2117_v33 = vld [vmem:[#allocation2_spill] sm:$0xff]  ;;  %v2123_v61 = vld [vmem:[#allocation11_spill] sm:$0xff] }
  0xe5   : > { %983 = vst.msk [vmem:[%s1908_s28 + $0x10] sm:$0xff] %vm236_vm0, %v949_v30  ;;  %v734_v8 = vmul.f32 %v1866_v44, %v496_v10  ;;  %v488_v44 = vmul.f32 %v1877_v19, %v2113_v24  ;;  %v502_v36 = vmul.f32 %v1877_v19, %v2117_v33  ;;  %v2118_v30 = vld [vmem:[#allocation8_spill] sm:$0xff] }
  0xe6   : > { %v723_v6 = vmul.f32 %v2110_v18, %v485_v35  ;;  %v2127_v35 = vld [vmem:[#allocation13_spill] sm:$0xff] }
  0xe7   : > { %v726_v45 = vmul.f32 %v2116_v40, %v488_v44  ;;  %v2129_v18 = vld [vmem:[#allocation21_spill] sm:$0xff] }
  0xe8   : > { %v860_v60 = vpop.permute.xlu2 %859 }
  0xe9   : > { %v810_v34 = vpop.permute.xlu1 %809  ;;  %v805_v46 = vpop.permute.xlu0 %804  ;;  %v963_v55 = vadd.f32 %v860_v60, %v725_v48 }
  0xea   : > { %v953_v2 = vadd.f32 %v810_v34, %v715_v3  ;;  %v952_v59 = vadd.f32 %v805_v46, %v714_v16  ;;  %v2112_v34 = vld [vmem:[#allocation5_spill] sm:$0xff]  ;;  %v492_v16 = vmul.f32 %v1877_v19, %v2118_v30 }
  0xeb   : > { %997 = vst.msk [vmem:[%s1908_s28 + $0x80] sm:$0xff] %vm236_vm0, %v963_v55  ;;  %v489_v42 = vmul.f32 %v1877_v19, %v2112_v34  ;;  %v2119_v55 = vld [vmem:[#allocation7_spill] sm:$0xff] }
  0xec   : > { %987 = vst.msk [vmem:[%s1908_s28 + $0x30] sm:$0xff] %vm236_vm0, %v953_v2  ;;  %v2120_v2 = vld [vmem:[#allocation22_spill] sm:$0xff] }
  0xed   : > { %986 = vst.msk [vmem:[%s1908_s28 + $0x28] sm:$0xff] %vm236_vm0, %v952_v59  ;;  %v727_v46 = vmul.f32 %v2115_v17, %v489_v42  ;;  %v2121_v59 = vld [vmem:[#allocation18_spill] sm:$0xff] }
  0xf0   : > { %v875_v26 = vpop.permute.xlu2 %874 }
  0xf1   : > { %v966_v22 = vadd.f32 %v875_v26, %v728_v4  ;;  %v825_v28 = vpop.permute.xlu1 %824  ;;  %v820_v50 = vpop.permute.xlu0 %819  ;;  %v491_v4 = vmul.f32 %v1877_v19, %v2119_v55  ;;  %v730_v26 = vmul.f32 %v2121_v59, %v492_v16 }
  0xf2   : > { %v956_v63 = vadd.f32 %v825_v28, %v718_v32  ;;  %v955_v13 = vadd.f32 %v820_v50, %v717_v29  ;;  %v740_v32 = vmul.f32 %v2120_v2, %v502_v36 }
  0xf3   : > { %1000 = vst.msk [vmem:[%s1908_s28 + $0x98] sm:$0xff] %vm236_vm0, %v966_v22  ;;  %v2122_v22 = vld [vmem:[#allocation10_spill] sm:$0xff] }
  0xf4   : > { %990 = vst.msk [vmem:[%s1908_s28 + $0x48] sm:$0xff] %vm236_vm0, %v956_v63  ;;  %v729_v28 = vmul.f32 %v2122_v22, %v491_v4 }
  0xf5   : > { %989 = vst.msk [vmem:[%s1908_s28 + $0x40] sm:$0xff] %vm236_vm0, %v955_v13 }
  0xf8   : > { %v890_v49 = vpop.permute.xlu2 %889 }
  0xf9   : > { %v969_v5 = vadd.f32 %v890_v49, %v731_v62  ;;  %v840_v20 = vpop.permute.xlu1 %839  ;;  %v835_v27 = vpop.permute.xlu0 %834  ;;  %v495_v62 = vmul.f32 %v1877_v19, %v2123_v61 }
  0xfa   : > { %v959_v21 = vadd.f32 %v840_v20, %v721_v38  ;;  %v958_v0 = vadd.f32 %v835_v27, %v720_v52  ;;  %v2124_v38 = vld [vmem:[#allocation9_spill] sm:$0xff]  ;;  %v2125_v52 = vld [vmem:[#allocation19_spill] sm:$0xff]  ;;  %v2126_v20 = vld [vmem:[#allocation14_spill] sm:$0xff] }
  0xfb   : > { %1003 = vst.msk [vmem:[%s1908_s28 + $0xb0] sm:$0xff] %vm236_vm0, %v969_v5  ;;  %v494_v49 = vmul.f32 %v1877_v19, %v2124_v38  ;;  %v733_v5 = vmul.f32 %v2125_v52, %v495_v62 }
  0xfc   : > { %993 = vst.msk [vmem:[%s1908_s28 + $0x60] sm:$0xff] %vm236_vm0, %v959_v21 }
  0xfd   : > { %992 = vst.msk [vmem:[%s1908_s28 + $0x58] sm:$0xff] %vm236_vm0, %v958_v0  ;;  %v732_v21 = vmul.f32 %v2126_v20, %v494_v49 }
 0x100   : > { %v905_v9 = vpop.permute.xlu2 %904 }
 0x101   : > { %v972_v58 = vadd.f32 %v905_v9, %v734_v8  ;;  %v855_v60 = vpop.permute.xlu1 %854  ;;  %v850_v25 = vpop.permute.xlu0 %849  ;;  %v498_v8 = vmul.f32 %v1877_v19, %v2127_v35 }
 0x102   : > { %v962_v43 = vadd.f32 %v855_v60, %v724_v57  ;;  %v961_v11 = vadd.f32 %v850_v25, %v723_v6  ;;  %v2128_v57 = vld [vmem:[#allocation12_spill] sm:$0xff] }
 0x103   : > { %1006 = vst.msk [vmem:[%s1908_s28 + $0xc8] sm:$0xff] %vm236_vm0, %v972_v58  ;;  %v497_v9 = vmul.f32 %v1877_v19, %v2128_v57  ;;  %v736_v6 = vmul.f32 %v2129_v18, %v498_v8  ;;  %v2130_v58 = vld [vmem:[#allocation16_spill] sm:$0xff] }
 0x104   : > { %996 = vst.msk [vmem:[%s1908_s28 + $0x78] sm:$0xff] %vm236_vm0, %v962_v43 }
 0x105   : > { %995 = vst.msk [vmem:[%s1908_s28 + $0x70] sm:$0xff] %vm236_vm0, %v961_v11  ;;  %v735_v60 = vmul.f32 %v2130_v58, %v497_v9 }
 0x108   : > { %v920_v48 = vpop.permute.xlu2 %919 }
 0x109   : > { %v975_v7 = vadd.f32 %v920_v48, %v737_v39  ;;  %v870_v12 = vpop.permute.xlu1 %869  ;;  %v865_v1 = vpop.permute.xlu0 %864 }
 0x10a   : > { %v965_v23 = vadd.f32 %v870_v12, %v727_v46  ;;  %v964_v3 = vadd.f32 %v865_v1, %v726_v45 }
 0x10b   : > { %1009 = vst.msk [vmem:[%s1908_s28 + $0xe0] sm:$0xff] %vm236_vm0, %v975_v7 }
 0x10c   : > { %999 = vst.msk [vmem:[%s1908_s28 + $0x90] sm:$0xff] %vm236_vm0, %v965_v23 }
 0x10d   : > { %998 = vst.msk [vmem:[%s1908_s28 + $0x88] sm:$0xff] %vm236_vm0, %v964_v3 }
 0x110   : > { %v935_v29 = vpop.permute.xlu2 %934 }
 0x111   : > { %v978_v63 = vadd.f32 %v935_v29, %v740_v32  ;;  %v885_v50 = vpop.permute.xlu1 %884  ;;  %v880_v13 = vpop.permute.xlu0 %879 }
 0x112   : > { %v968_v54 = vadd.f32 %v885_v50, %v730_v26  ;;  %v967_v53 = vadd.f32 %v880_v13, %v729_v28 }
 0x113   : > { %1012 = vst.msk [vmem:[%s1908_s28 + $0xf8] sm:$0xff] %vm236_vm0, %v978_v63 }
 0x114   : > { %1002 = vst.msk [vmem:[%s1908_s28 + $0xa8] sm:$0xff] %vm236_vm0, %v968_v54 }
 0x115   : > { %1001 = vst.msk [vmem:[%s1908_s28 + $0xa0] sm:$0xff] %vm236_vm0, %v967_v53 }
 0x119   : > { %v900_v27 = vpop.permute.xlu1 %899  ;;  %v895_v0 = vpop.permute.xlu0 %894 }
 0x11a   : > { %v971_v10 = vadd.f32 %v900_v27, %v733_v5  ;;  %v970_v31 = vadd.f32 %v895_v0, %v732_v21 }
 0x11c   : > { %1005 = vst.msk [vmem:[%s1908_s28 + $0xc0] sm:$0xff] %vm236_vm0, %v971_v10 }
 0x11d   : > { %1004 = vst.msk [vmem:[%s1908_s28 + $0xb8] sm:$0xff] %vm236_vm0, %v970_v31 }
 0x121   : > { %v915_v43 = vpop.permute.xlu1 %914  ;;  %v910_v15 = vpop.permute.xlu0 %909 }
 0x122   : > { %v974_v25 = vadd.f32 %v915_v43, %v736_v6  ;;  %v973_v14 = vadd.f32 %v910_v15, %v735_v60 }
 0x124   : > { %1008 = vst.msk [vmem:[%s1908_s28 + $0xd8] sm:$0xff] %vm236_vm0, %v974_v25 }
 0x125   : > { %1007 = vst.msk [vmem:[%s1908_s28 + $0xd0] sm:$0xff] %vm236_vm0, %v973_v14 }
 0x129   : > { %v930_v11 = vpop.permute.xlu1 %929  ;;  %v925_v19 = vpop.permute.xlu0 %924 }
 0x12a   : > { %v977_v34 = vadd.f32 %v930_v11, %v1944_v47  ;;  %v976_v42 = vadd.f32 %v925_v19, %v1901_v41 }
 0x12c   : > { %1011 = vst.msk [vmem:[%s1908_s28 + $0xf0] sm:$0xff] %vm236_vm0, %v977_v34 }
 0x12d   : > { %1010 = vst.msk [vmem:[%s1908_s28 + $0xe8] sm:$0xff] %vm236_vm0, %v976_v42 }
 0x131   : > { %v945_v24 = vpop.permute.xlu1 %944  ;;  %v940_v51 = vpop.permute.xlu0 %939 }
 0x132   : > { %v980_v44 = vadd.f32 %v945_v24, %v1951_v37  ;;  %v979_v39 = vadd.f32 %v940_v51, %v1922_v56 }
 0x134   : > { %1014 = vst.msk [vmem:[%s1908_s28 + $0x108] sm:$0xff] %vm236_vm0, %v980_v44 }
 0x135   : > { %1013 = vst.msk [vmem:[%s1908_s28 + $0x100] sm:$0xff] %vm236_vm0, %v979_v39 }
 0x136 PF: > { %s13_s14 = sadd.s32 1, %s1163_s14   ;;  %s2131_s12 = smov %s1159_s13 }
 0x137   : > { %p10_p5 = scmp.ge.s32.totalorder %s13_s14, 4   ;;  %s2132_s13 = smov %s2134_s15 }
 0x139   :  { %12 = sbr.rel (!%p10_p5) target bundleno = 2 (0x2), region = 62 }

// kernel: _lambda_.46
= control target key start
LH: loop header
LB: loop body
LE: loop exit
PB: predicated region body
PF: predicated region fallthrough
CT: control target
= control target key end

     0   :  { %s2612_s18 = smov 0   ;;  %s2614_s19 = smov 0   ;;  %s4356_s0 = inlined_call_operand.vmem [shape: f32[2,16,17,17], index: 0, kind: input, shape index: {}]   ;;  %s4357_s1 = inlined_call_operand.vmem [shape: f32[2,16,17,1], index: 1, kind: input, shape index: {}]   ;;  %s4358_s2 = inlined_call_operand.vmem [shape: f32[2,16,17,1], index: 2, kind: input, shape index: {}]   ;;  %s4359_s3 = inlined_call_operand.vmem [shape: f32[1,16,17,1], index: 3, kind: input, shape index: {}]   ;;  %s4360_s4 = inlined_call_operand.vmem [shape: f32[1,16,17,1], index: 4, kind: input, shape index: {}]   ;;  %s4361_s5 = inlined_call_operand.vmem [shape: f32[2,16,17,17], index: 5, kind: output, shape index: {}]  }
   0x1   :  { %s2616_s20 = smov 0  }
   0x2 LB: > { %s27_s21 = sadd.s32 1, %s2575_s19  ;;  %p2281_p0 = scmp.ge.s32.totalorder %s2579_s20, 1  ;;  %s2579_s20 = sphi %s2616_s20, %s15_s20   ;;  %s2575_s19 = sphi %s2614_s19, %s4537_s19   ;;  %s2571_s18 = sphi %s2612_s18, %s4536_s18  }
   0x3   : > { %p29_p1 = scmp.ge.s32.totalorder %s27_s21, 2  ;;  %p226_p2 = scmp.lt.s32.totalorder %s2579_s20, 3 }
   0x5   : > { %s4539_s21 = smov (%p29_p1, %s27_s21), 0  ;;  %p227_p3 = pnand %p2281_p0, %p226_p2 }
   0x6   : > { %p270_p4 = scmp.lt.s32.totalorder (!%p227_p3), %s2571_s18, 1 }
   0x7   : > { %230 = sbr.rel (%p227_p3) target bundleno = 485 (0x1e5), region = 40 }
   0xc   : > { %v2581_v0 = vmov 0   ;;  %s4541_s18 = smov (!%p270_p4, %s2571_s18), 1  ;;  %v300_v1 = vld [vmem:[%s4359_s3 + $0x20] sm:$0xff]  ;;  %v298_v2 = vld [vmem:[%s4359_s3 + $0x10] sm:$0x1]  ;;  %v299_v5 = vld [vmem:[%s4359_s3 + $0x18] sm:$0xff] }
   0xd   : > { %2364 = vset.pattern.permute.xlu2 %v2581_v0  ;;  %2363 = vset.pattern.permute.xlu1 %v2581_v0  ;;  %s2630_s22 = smul.u32 384, %s4541_s18  ;;  %v296_v3 = vld [vmem:[%s4359_s3] sm:$0xff]  ;;  %v301_v4 = vld [vmem:[%s4359_s3 + $0x28] sm:$0x1]  ;;  %v303_v21 = vld [vmem:[%s4359_s3 + $0x38] sm:$0xff] }
   0xe   : > { %2362 = vset.pattern.permute.xlu0 %v2581_v0  ;;  %v297_v6 = vld [vmem:[%s4359_s3 + $0x8] sm:$0xff]  ;;  %v304_v7 = vld [vmem:[%s4359_s3 + $0x40] sm:$0x1]  ;;  %v302_v31 = vld [vmem:[%s4359_s3 + $0x30] sm:$0xff] }
   0xf   : > { %s2648_s8 = scalar_lea.vmem %s4357_s1, %s2630_s22  ;;  %v307_v36 = vld [vmem:[%s4359_s3 + $0x58] sm:$0x1]  ;;  %v306_v41 = vld [vmem:[%s4359_s3 + $0x50] sm:$0xff]  ;;  %v305_v48 = vld [vmem:[%s4359_s3 + $0x48] sm:$0xff]  ;;  %s3875_s18 = scalar_lea.vmem %s4358_s2, %s2630_s22 }
  0x10   : > { %v348_v8 = vld [vmem:[%s2648_s8 + $0x20] sm:$0xff]  ;;  %v346_v9 = vld [vmem:[%s2648_s8 + $0x10] sm:$0x1]  ;;  %v349_v14 = vld [vmem:[%s2648_s8 + $0x28] sm:$0x1]  ;;  %s4077_s9 = scalar_lea.vmem %s4356_s0, %s2630_s22  ;;  %s4099_s17 = scalar_lea.vmem %s4361_s5, %s2630_s22 }
  0x11   : > { %v344_v10 = vld [vmem:[%s2648_s8] sm:$0xff]  ;;  %v396_v11 = vmul.f32 %v348_v8, %v300_v1  ;;  %v394_v12 = vmul.f32 %v346_v9, %v298_v2  ;;  %v347_v15 = vld [vmem:[%s2648_s8 + $0x18] sm:$0xff]  ;;  %v345_v16 = vld [vmem:[%s2648_s8 + $0x8] sm:$0xff]  ;;  %v397_v17 = vmul.f32 %v349_v14, %v301_v4 }
  0x12   : > { %v392_v13 = vmul.f32 %v344_v10, %v296_v3  ;;  %v395_v18 = vmul.f32 %v347_v15, %v299_v5  ;;  %v393_v19 = vmul.f32 %v345_v16, %v297_v6  ;;  %v352_v20 = vld [vmem:[%s2648_s8 + $0x40] sm:$0x1]  ;;  %v351_v22 = vld [vmem:[%s2648_s8 + $0x38] sm:$0xff]  ;;  %v350_v32 = vld [vmem:[%s2648_s8 + $0x30] sm:$0xff] }
  0x13   : > { %v2290_v23 = vmul.f32 -1.442695, %v396_v11  ;;  %v2288_v24 = vmul.f32 -1.442695, %v394_v12  ;;  %v2291_v26 = vmul.f32 -1.442695, %v397_v17  ;;  %v400_v27 = vmul.f32 %v352_v20, %v304_v7 }
  0x14   : > { %v2286_v25 = vmul.f32 -1.442695, %v392_v13  ;;  %v2289_v28 = vmul.f32 -1.442695, %v395_v18  ;;  %v399_v29 = vmul.f32 %v351_v22, %v303_v21  ;;  %v2287_v30 = vmul.f32 -1.442695, %v393_v19 }
  0x15   : > { %2365 = vpow2.f32 %v2290_v23  ;;  %v2294_v33 = vmul.f32 -1.442695, %v400_v27  ;;  %v398_v35 = vmul.f32 %v350_v32, %v302_v31  ;;  %v355_v37 = vld [vmem:[%s2648_s8 + $0x58] sm:$0x1]  ;;  %v354_v42 = vld [vmem:[%s2648_s8 + $0x50] sm:$0xff]  ;;  %v353_v49 = vld [vmem:[%s2648_s8 + $0x48] sm:$0xff] }
  0x16   : > { %2367 = vpow2.f32 %v2288_v24  ;;  %v2293_v34 = vmul.f32 -1.442695, %v399_v29  ;;  %v403_v46 = vmul.f32 %v355_v37, %v307_v36  ;;  %v2694_v53 = vmul.f32 %v354_v42, %v306_v41 }
  0x17   : > { %2369 = vpow2.f32 %v2286_v25  ;;  %v2292_v45 = vmul.f32 -1.442695, %v398_v35  ;;  %v2706_v61 = vmul.f32 %v353_v49, %v305_v48  ;;  %v312_v48 = vld [vmem:[%s4359_s3 + $0x80] sm:$0xff] }
  0x18   : > { %2371 = vpow2.f32 %v2291_v26  ;;  %v2704_v60 = vmul.f32 -1.442695, %v403_v46 }
  0x19   : > { %2373 = vpow2.f32 %v2289_v28 }
  0x1a   : > { %2375 = vpow2.f32 %v2287_v30 }
  0x1b   : > { %v2366_v38 = vpop.eup %2365  ;;  %2377 = vpow2.f32 %v2294_v33 }
  0x1c   : > { %v2368_v39 = vpop.eup %2367  ;;  %v2678_v40 = vadd.f32 1.0, %v2366_v38  ;;  %2379 = vpow2.f32 %v2293_v34 }
  0x1d   : > { %v2370_v43 = vpop.eup %2369  ;;  %v2684_v44 = vadd.f32 1.0, %v2368_v39 }
  0x1e   : > { %v2372_v47 = vpop.eup %2371  ;;  %2381 = vrcp.f32 %v2678_v40  ;;  %v701_v51 = vand.u32 2147483647, %v2678_v40  ;;  %v703_v52 = vand.u32 2147483648, %v2678_v40  ;;  %v2698_v57 = vadd.f32 1.0, %v2370_v43 }
  0x1f   : > { %v2374_v50 = vpop.eup %2373  ;;  %2383 = vrcp.f32 %v2684_v44  ;;  %v671_v55 = vand.u32 2147483647, %v2684_v44  ;;  %v673_v56 = vand.u32 2147483648, %v2684_v44  ;;  %v2700_v58 = vadd.f32 1.0, %v2372_v47 }
  0x20   : > { %v2376_v54 = vpop.eup %2375  ;;  %v2702_v59 = vadd.f32 1.0, %v2374_v50  ;;  %2385 = vpow2.f32 %v2292_v45  ;;  %vm697_vm0 = vweird.f32 %v2678_v40  ;;  %vm667_vm1 = vweird.f32 %v2684_v44 }
  0x21   : > { %v2378_v62 = vpop.eup %2377  ;;  %2387 = vrcp.f32 %v2698_v57  ;;  %v643_v63 = vand.u32 2147483648, %v2698_v57  ;;  %vm2712_vm2 = vcmp.eq.f32.partialorder %v701_v51, 8.507059e+37  ;;  %v704_v2 = vor.u32 1.1754944e-38, %v703_v52 }
  0x22   : > { %v2380_v0 = vpop.eup %2379  ;;  %v641_v3 = vand.u32 2147483647, %v2698_v57  ;;  %2389 = vrcp.f32 %v2700_v58  ;;  %v2718_v4 = vadd.f32 1.0, %v2376_v54  ;;  %vm2720_vm3 = vcmp.eq.f32.partialorder %v671_v55, 8.507059e+37 }
  0x23   : > { %v674_v7 = vor.u32 1.1754944e-38, %v673_v56  ;;  %v718_v8 = vand.u32 2147483648, %v2700_v58  ;;  %2391 = vrcp.f32 %v2702_v59  ;;  %vm637_vm4 = vweird.f32 %v2698_v57 }
  0x24   : > { %v2382_v5 = vpop.eup %2381  ;;  %vm712_vm5 = vweird.f32 %v2700_v58  ;;  %v716_v11 = vand.u32 2147483647, %v2700_v58  ;;  %v2731_v13 = vor.u32 1.1754944e-38, %v643_v63  ;;  %v686_v14 = vand.u32 2147483647, %v2702_v59 }
  0x25   : > { %v2384_v9 = vpop.eup %2383  ;;  %v693_v10 = vmul.f32 %v2382_v5, %v2678_v40  ;;  %v688_v15 = vand.u32 2147483648, %v2702_v59  ;;  %vm698_vm6 = vweird.f32 %v2382_v5  ;;  %vm2735_vm7 = vcmp.eq.f32.partialorder %v641_v3, 8.507059e+37 }
  0x26   : > { %v663_v12 = vmul.f32 %v2384_v9, %v2684_v44  ;;  %v2386_v16 = vpop.eup %2385  ;;  %vm682_vm8 = vweird.f32 %v2702_v59  ;;  %2393 = vrcp.f32 %v2718_v4  ;;  %vm668_vm9 = vweird.f32 %v2384_v9  ;;  %vm2751_vm12 = vmor %vm697_vm0, %vm698_vm6 }
  0x27   : > { %v694_v17 = vsub.f32 1.0, %v693_v10  ;;  %v2388_v19 = vpop.eup %2387  ;;  %v719_v21 = vor.u32 1.1754944e-38, %v718_v8  ;;  %vm652_vm10 = vweird.f32 %v2718_v4  ;;  %vm2743_vm11 = vcmp.eq.f32.partialorder %v716_v11, 8.507059e+37  ;;  %vm2764_vm15 = vmor %vm667_vm1, %vm668_vm9 }
  0x28   : > { %v664_v20 = vsub.f32 1.0, %v663_v12  ;;  %v2390_v22 = vpop.eup %2389  ;;  %v633_v24 = vmul.f32 %v2388_v19, %v2698_v57  ;;  %v689_v26 = vor.u32 1.1754944e-38, %v688_v15  ;;  %v656_v27 = vand.u32 2147483647, %v2718_v4 }
  0x29   : > { %v695_v23 = vmul.f32 %v2382_v5, %v694_v17  ;;  %v2392_v28 = vpop.eup %2391  ;;  %vm638_vm13 = vweird.f32 %v2388_v19  ;;  %v708_v31 = vmul.f32 %v2390_v22, %v2700_v58  ;;  %vm2756_vm14 = vcmp.eq.f32.partialorder %v686_v14, 8.507059e+37  ;;  %v358_v14 = vld [vmem:[%s2648_s8 + $0x70] sm:$0x1] }
  0x2a   : > { %v665_v30 = vmul.f32 %v2384_v9, %v664_v20  ;;  %v658_v33 = vand.u32 2147483648, %v2718_v4  ;;  %v634_v36 = vsub.f32 1.0, %v633_v24  ;;  %vm713_vm0 = vweird.f32 %v2390_v22  ;;  %vm2784_vm1 = vmor %vm637_vm4, %vm638_vm13 }
  0x2b   : > { %v696_v34 = vadd.f32 %v2382_v5, %v695_v23  ;;  %v678_v37 = vmul.f32 %v2392_v28, %v2702_v59  ;;  %v709_v39 = vsub.f32 1.0, %v708_v31  ;;  %vm683_vm6 = vweird.f32 %v2392_v28  ;;  %v308_v23 = vld [vmem:[%s4359_s3 + $0x60] sm:$0xff]  ;;  %v361_v31 = vld [vmem:[%s2648_s8 + $0x88] sm:$0x1] }
  0x2c   : > { %v666_v38 = vadd.f32 %v2384_v9, %v665_v30  ;;  %v2769_v40 = vadd.f32 1.0, %v2378_v62  ;;  %v2771_v41 = vpop.eup %2393  ;;  %v635_v43 = vmul.f32 %v2388_v19, %v634_v36  ;;  %v2775_v45 = vadd.f32 1.0, %v2380_v0  ;;  %vm2804_vm4 = vmor %vm682_vm8, %vm683_vm6  ;;  %v313_v30 = vld [vmem:[%s4359_s3 + $0x88] sm:$0x1] }
  0x2d   : > { %v700_v42 = vsel %vm2751_vm12, %v2382_v5, %v696_v34  ;;  %v679_v44 = vsub.f32 1.0, %v678_v37  ;;  %v710_v49 = vmul.f32 %v2390_v22, %v709_v39  ;;  %v648_v50 = vmul.f32 %v2771_v41, %v2718_v4 }
  0x2e   : > { %v705_v46 = vsel %vm2712_vm2, %v704_v2, %v700_v42  ;;  %v670_v47 = vsel %vm2764_vm15, %v2384_v9, %v666_v38  ;;  %v636_v52 = vadd.f32 %v2388_v19, %v635_v43  ;;  %vm2795_vm2 = vmor %vm712_vm5, %vm713_vm0  ;;  %v2799_v56 = vadd.f32 1.0, %v2386_v16 }
  0x2f   : > { %1422 = vperm.xlu2 %2364, %v705_v46   ;;  %v675_v51 = vsel %vm2720_vm3, %v674_v7, %v670_v47  ;;  %v680_v55 = vmul.f32 %v2392_v28, %v679_v44  ;;  %v711_v57 = vadd.f32 %v2390_v22, %v710_v49  ;;  %v649_v63 = vsub.f32 1.0, %v648_v50  ;;  %v360_v49 = vld [vmem:[%s2648_s8 + $0x80] sm:$0xff]  ;;  %v363_v7 = vld [vmem:[%s2648_s8 + $0x98] sm:$0xff] }
  0x30   : > { %1412 = vperm.xlu1 %2363, %v675_v51   ;;  %vm653_vm3 = vweird.f32 %v2771_v41  ;;  %2395 = vrcp.f32 %v2769_v40  ;;  %v640_v58 = vsel %vm2784_vm1, %v2388_v19, %v636_v52  ;;  %v761_v1 = vand.u32 2147483647, %v2769_v40  ;;  %v309_v19 = vld [vmem:[%s4359_s3 + $0x68] sm:$0xff] }
  0x31   : > { %v681_v0 = vadd.f32 %v2392_v28, %v680_v55  ;;  %v763_v2 = vand.u32 2147483648, %v2769_v40  ;;  %v645_v59 = vsel %vm2735_vm7, %v2731_v13, %v640_v58  ;;  %v715_v3 = vsel %vm2795_vm2, %v2390_v22, %v711_v57  ;;  %vm2825_vm5 = vmor %vm652_vm10, %vm653_vm3  ;;  %v357_v22 = vld [vmem:[%s2648_s8 + $0x68] sm:$0xff] }
  0x32   : > { %v650_v5 = vmul.f32 %v2771_v41, %v649_v63  ;;  %2397 = vrcp.f32 %v2775_v45  ;;  %1402 = vperm.xlu0 %2362, %v645_v59   ;;  %v2296_v8 = vmul.f32 -1.442695, %v2694_v53  ;;  %v2295_v9 = vmul.f32 -1.442695, %v2706_v61  ;;  %v310_v61 = vld [vmem:[%s4359_s3 + $0x70] sm:$0x1] }
  0x33   : > { %v685_v6 = vsel %vm2804_vm4, %v2392_v28, %v681_v0  ;;  %v720_v10 = vsel %vm2743_vm11, %v719_v21, %v715_v3  ;;  %vm2834_vm7 = vcmp.eq.f32.partialorder %v656_v27, 8.507059e+37  ;;  %v659_v13 = vor.u32 1.1754944e-38, %v658_v33  ;;  %v311_v3 = vld [vmem:[%s4359_s3 + $0x78] sm:$0xff] }
  0x34   : > { %v651_v11 = vadd.f32 %v2771_v41, %v650_v5  ;;  %v690_v4 = vsel %vm2756_vm14, %v689_v26, %v685_v6  ;;  %vm757_vm8 = vweird.f32 %v2769_v40  ;;  %vm2841_vm9 = vcmp.eq.f32.partialorder %v761_v1, 8.507059e+37  ;;  %v359_v5 = vld [vmem:[%s2648_s8 + $0x78] sm:$0xff] }
  0x35   : > { %2399 = vrcp.f32 %v2799_v56  ;;  %v764_v17 = vor.u32 1.1754944e-38, %v763_v2  ;;  %v746_v18 = vand.u32 2147483647, %v2775_v45  ;;  %vm742_vm10 = vweird.f32 %v2775_v45 }
  0x36   : > { %v2396_v15 = vpop.eup %2395  ;;  %v655_v16 = vsel %vm2825_vm5, %v2771_v41, %v651_v11  ;;  %2401 = vpow2.f32 %v2704_v60  ;;  %v748_v21 = vand.u32 2147483648, %v2775_v45  ;;  %vm727_vm11 = vweird.f32 %v2799_v56  ;;  %v356_v60 = vld [vmem:[%s2648_s8 + $0x60] sm:$0xff] }
  0x37   : > { %1427 = vperm.xlu2 %2364, %v720_v10   ;;  %v753_v20 = vmul.f32 %v2396_v15, %v2769_v40  ;;  %v660_v25 = vsel %vm2834_vm7, %v659_v13, %v655_v16  ;;  %v731_v26 = vand.u32 2147483647, %v2799_v56  ;;  %2403 = vpow2.f32 %v2296_v8 }
  0x38   : > { %v2398_v24 = vpop.eup %2397  ;;  %1417 = vperm.xlu1 %2363, %v690_v4   ;;  %v406_v27 = vmul.f32 %v358_v14, %v310_v61  ;;  %vm758_vm12 = vweird.f32 %v2396_v15  ;;  %2405 = vpow2.f32 %v2295_v9  ;;  %vm2875_vm13 = vcmp.eq.f32.partialorder %v746_v18, 8.507059e+37 }
  0x39   : > { %v754_v28 = vsub.f32 1.0, %v753_v20  ;;  %v738_v29 = vmul.f32 %v2398_v24, %v2775_v45  ;;  %v405_v34 = vmul.f32 %v357_v22, %v309_v19  ;;  %v404_v35 = vmul.f32 %v356_v60, %v308_v23  ;;  %vm2883_vm15 = vmor %vm757_vm8, %vm758_vm12 }
  0x3a   : > { %v2300_v33 = vmul.f32 -1.442695, %v406_v27  ;;  %1407 = vperm.xlu0 %2362, %v660_v25   ;;  %vm743_vm14 = vweird.f32 %v2398_v24  ;;  %v733_v39 = vand.u32 2147483648, %v2799_v56  ;;  %v749_v43 = vor.u32 1.1754944e-38, %v748_v21 }
  0x3b   : > { %v2400_v36 = vpop.eup %2399  ;;  %v755_v37 = vmul.f32 %v2396_v15, %v754_v28  ;;  %v739_v38 = vsub.f32 1.0, %v738_v29  ;;  %v2299_v46 = vmul.f32 -1.442695, %v405_v34  ;;  %v409_v47 = vmul.f32 %v361_v31, %v313_v30  ;;  %vm2897_vm0 = vmor %vm742_vm10, %vm743_vm14 }
  0x3c   : > { %v2402_v41 = vpop.eup %2401  ;;  %v723_v44 = vmul.f32 %v2400_v36, %v2799_v56  ;;  %2407 = vpow2.f32 %v2300_v33  ;;  %vm728_vm6 = vweird.f32 %v2400_v36  ;;  %v2298_v57 = vmul.f32 -1.442695, %v404_v35 }
  0x3d   : > { %v756_v50 = vadd.f32 %v2396_v15, %v755_v37  ;;  %v740_v51 = vmul.f32 %v2398_v24, %v739_v38  ;;  %v2892_v52 = vadd.f32 1.0, %v2402_v41  ;;  %v2404_v40 = vpop.eup %2403  ;;  %2409 = vpow2.f32 %v2299_v46  ;;  %vm2919_vm2 = vmor %vm727_vm11, %vm728_vm6 }
  0x3e   : > { %v724_v55 = vsub.f32 1.0, %v723_v44  ;;  %v2406_v62 = vpop.eup %2405  ;;  %v408_v0 = vmul.f32 %v360_v49, %v312_v48  ;;  %vm2906_vm1 = vcmp.eq.f32.partialorder %v731_v26, 8.507059e+37  ;;  %v734_v59 = vor.u32 1.1754944e-38, %v733_v39  ;;  %v319_v49 = vld [vmem:[%s4359_s3 + $0xb8] sm:$0x1] }
  0x3f   : > { %v760_v63 = vsel %vm2883_vm15, %v2396_v15, %v756_v50  ;;  %v741_v58 = vadd.f32 %v2398_v24, %v740_v51  ;;  %2411 = vrcp.f32 %v2892_v52  ;;  %v806_v8 = vand.u32 2147483647, %v2892_v52  ;;  %v316_v50 = vld [vmem:[%s4359_s3 + $0xa0] sm:$0x1] }
  0x40   : > { %v765_v45 = vsel %vm2841_vm9, %v764_v17, %v760_v63  ;;  %v725_v1 = vmul.f32 %v2400_v36, %v724_v55  ;;  %v2924_v9 = vadd.f32 1.0, %v2404_v40  ;;  %v2926_v10 = vadd.f32 1.0, %v2406_v62  ;;  %v364_v51 = vld [vmem:[%s2648_s8 + $0xa0] sm:$0x1] }
  0x41   : > { %1442 = vperm.xlu2 %2364, %v765_v45   ;;  %v745_v6 = vsel %vm2897_vm0, %v2398_v24, %v741_v58  ;;  %v808_v13 = vand.u32 2147483648, %v2892_v52  ;;  %2413 = vpow2.f32 %v2298_v57  ;;  %v2303_v56 = vmul.f32 -1.442695, %v409_v47  ;;  %v317_v45 = vld [vmem:[%s4359_s3 + $0xa8] sm:$0xff] }
  0x42   : > { %v750_v11 = vsel %vm2875_vm13, %v749_v43, %v745_v6  ;;  %v726_v12 = vadd.f32 %v2400_v36, %v725_v1  ;;  %v2408_v4 = vpop.eup %2407  ;;  %2415 = vrcp.f32 %v2924_v9  ;;  %v2302_v53 = vmul.f32 -1.442695, %v408_v0  ;;  %v315_v6 = vld [vmem:[%s4359_s3 + $0x98] sm:$0xff] }
  0x43   : > { %1437 = vperm.xlu1 %2363, %v750_v11   ;;  %v407_v61 = vmul.f32 %v359_v5, %v311_v3  ;;  %v2410_v14 = vpop.eup %2409  ;;  %v791_v16 = vand.u32 2147483647, %v2924_v9  ;;  %v793_v17 = vand.u32 2147483648, %v2924_v9  ;;  %2417 = vrcp.f32 %v2926_v10 }
  0x44   : > { %v730_v15 = vsel %vm2919_vm2, %v2400_v36, %v726_v12  ;;  %vm802_vm4 = vweird.f32 %v2892_v52  ;;  %v776_v20 = vand.u32 2147483647, %v2926_v10  ;;  %v778_v21 = vand.u32 2147483648, %v2926_v10 }
  0x45   : > { %v2412_v18 = vpop.eup %2411  ;;  %v735_v19 = vsel %vm2906_vm1, %v734_v59, %v730_v15  ;;  %vm2943_vm3 = vcmp.eq.f32.partialorder %v806_v8, 8.507059e+37  ;;  %v809_v60 = vor.u32 1.1754944e-38, %v808_v13  ;;  %v2947_v24 = vadd.f32 1.0, %v2408_v4 }
  0x46   : > { %1432 = vperm.xlu0 %2362, %v735_v19   ;;  %v798_v22 = vmul.f32 %v2412_v18, %v2892_v52  ;;  %vm787_vm5 = vweird.f32 %v2924_v9  ;;  %vm772_vm7 = vweird.f32 %v2926_v10  ;;  %v2951_v25 = vadd.f32 1.0, %v2410_v14 }
  0x47   : > { %2419 = vpow2.f32 %v2303_v56  ;;  %v2414_v26 = vpop.eup %2413  ;;  %vm803_vm8 = vweird.f32 %v2412_v18  ;;  %vm2953_vm9 = vcmp.eq.f32.partialorder %v791_v16, 8.507059e+37  ;;  %v794_v29 = vor.u32 1.1754944e-38, %v793_v17 }
  0x48   : > { %v799_v27 = vsub.f32 1.0, %v798_v22  ;;  %2421 = vrcp.f32 %v2947_v24  ;;  %v2416_v30 = vpop.eup %2415  ;;  %vm2958_vm10 = vcmp.eq.f32.partialorder %v776_v20, 8.507059e+37  ;;  %v779_v32 = vor.u32 1.1754944e-38, %v778_v21  ;;  %vm2968_vm11 = vmor %vm802_vm4, %vm803_vm8 }
  0x49   : > { %v851_v33 = vand.u32 2147483647, %v2947_v24  ;;  %2423 = vrcp.f32 %v2951_v25  ;;  %v2418_v34 = vpop.eup %2417  ;;  %v783_v36 = vmul.f32 %v2416_v30, %v2924_v9  ;;  %v853_v37 = vand.u32 2147483648, %v2947_v24 }
  0x4a   : > { %v800_v35 = vmul.f32 %v2412_v18, %v799_v27  ;;  %v2301_v38 = vmul.f32 -1.442695, %v407_v61  ;;  %v768_v41 = vmul.f32 %v2418_v34, %v2926_v10  ;;  %vm847_vm12 = vweird.f32 %v2947_v24 }
  0x4b   : > { %vm832_vm13 = vweird.f32 %v2951_v25  ;;  %v836_v42 = vand.u32 2147483647, %v2951_v25  ;;  %v784_v44 = vsub.f32 1.0, %v783_v36  ;;  %vm788_vm14 = vweird.f32 %v2416_v30 }
  0x4c   : > { %v801_v43 = vadd.f32 %v2412_v18, %v800_v35  ;;  %v2976_v46 = vadd.f32 1.0, %v2414_v26  ;;  %v769_v48 = vsub.f32 1.0, %v768_v41  ;;  %vm773_vm15 = vweird.f32 %v2418_v34  ;;  %vm2994_vm6 = vmor %vm787_vm5, %vm788_vm14 }
  0x4d   : > { %v2420_v47 = vpop.eup %2419  ;;  %vm2978_vm0 = vcmp.eq.f32.partialorder %v851_v33, 8.507059e+37  ;;  %2425 = vpow2.f32 %v2302_v53  ;;  %v785_v54 = vmul.f32 %v2416_v30, %v784_v44  ;;  %v854_v55 = vor.u32 1.1754944e-38, %v853_v37  ;;  %vm3006_vm2 = vmor %vm772_vm7, %vm773_vm15 }
  0x4e   : > { %v2422_v52 = vpop.eup %2421  ;;  %v805_v40 = vsel %vm2968_vm11, %v2412_v18, %v801_v43  ;;  %2427 = vrcp.f32 %v2976_v46  ;;  %v770_v58 = vmul.f32 %v2418_v34, %v769_v48  ;;  %vm2999_vm1 = vcmp.eq.f32.partialorder %v836_v42, 8.507059e+37  ;;  %v314_v43 = vld [vmem:[%s4359_s3 + $0x90] sm:$0xff] }
  0x4f   : > { %v2424_v57 = vpop.eup %2423  ;;  %v810_v62 = vsel %vm2943_vm3, %v809_v60, %v805_v40  ;;  %v843_v0 = vmul.f32 %v2422_v52, %v2947_v24  ;;  %v786_v1 = vadd.f32 %v2416_v30, %v785_v54  ;;  %v838_v3 = vand.u32 2147483648, %v2951_v25  ;;  %v362_v48 = vld [vmem:[%s2648_s8 + $0x90] sm:$0xff] }
  0x50   : > { %1457 = vperm.xlu2 %2364, %v810_v62   ;;  %v828_v59 = vmul.f32 %v2424_v57, %v2951_v25  ;;  %v412_v5 = vmul.f32 %v364_v51, %v316_v50  ;;  %v771_v8 = vadd.f32 %v2418_v34, %v770_v58  ;;  %vm848_vm4 = vweird.f32 %v2422_v52  ;;  %v367_v50 = vld [vmem:[%s2648_s8 + $0xb8] sm:$0x1]  ;;  %v366_v62 = vld [vmem:[%s2648_s8 + $0xb0] sm:$0xff] }
  0x51   : > { %v844_v9 = vsub.f32 1.0, %v843_v0  ;;  %vm833_vm3 = vweird.f32 %v2424_v57  ;;  %v790_v10 = vsel %vm2994_vm6, %v2416_v30, %v786_v1  ;;  %v3018_v12 = vadd.f32 1.0, %v2420_v47  ;;  %vm3028_vm5 = vmor %vm847_vm12, %vm848_vm4  ;;  %v365_v1 = vld [vmem:[%s2648_s8 + $0xa8] sm:$0xff] }
  0x52   : > { %v829_v11 = vsub.f32 1.0, %v828_v59  ;;  %2429 = vpow2.f32 %v2301_v38  ;;  %v795_v4 = vsel %vm2953_vm9, %v794_v29, %v790_v10  ;;  %v775_v56 = vsel %vm3006_vm2, %v2418_v34, %v771_v8  ;;  %vm3036_vm7 = vmor %vm832_vm13, %vm833_vm3 }
  0x53   : > { %v2426_v13 = vpop.eup %2425  ;;  %v845_v53 = vmul.f32 %v2422_v52, %v844_v9  ;;  %v411_v61 = vmul.f32 %v363_v7, %v315_v6  ;;  %1452 = vperm.xlu1 %2363, %v795_v4   ;;  %v780_v15 = vsel %vm2958_vm10, %v779_v32, %v775_v56  ;;  %v839_v18 = vor.u32 1.1754944e-38, %v838_v3  ;;  %v322_v6 = vld [vmem:[%s4359_s3 + $0xd0] sm:$0x1] }
  0x54   : > { %v2428_v14 = vpop.eup %2427  ;;  %v830_v17 = vmul.f32 %v2424_v57, %v829_v11  ;;  %2431 = vrcp.f32 %v3018_v12  ;;  %1447 = vperm.xlu0 %2362, %v780_v15   ;;  %vm817_vm8 = vweird.f32 %v2976_v46  ;;  %v821_v22 = vand.u32 2147483647, %v2976_v46  ;;  %v370_v4 = vld [vmem:[%s2648_s8 + $0xd0] sm:$0x1] }
  0x55   : > { %v846_v19 = vadd.f32 %v2422_v52, %v845_v53  ;;  %v813_v21 = vmul.f32 %v2428_v14, %v2976_v46  ;;  %vm818_vm9 = vweird.f32 %v2428_v14  ;;  %v823_v60 = vand.u32 2147483648, %v2976_v46 }
  0x56   : > { %v831_v23 = vadd.f32 %v2424_v57, %v830_v17  ;;  %v3044_v24 = vadd.f32 1.0, %v2426_v13  ;;  %v2306_v27 = vmul.f32 -1.442695, %v412_v5  ;;  %v2305_v28 = vmul.f32 -1.442695, %v411_v61  ;;  %vm3064_vm11 = vmor %vm817_vm8, %vm818_vm9 }
  0x57   : > { %v850_v26 = vsel %vm3028_vm5, %v2422_v52, %v846_v19  ;;  %v814_v25 = vsub.f32 1.0, %v813_v21  ;;  %v896_v32 = vand.u32 2147483647, %v3018_v12  ;;  %v898_v33 = vand.u32 2147483648, %v3018_v12 }
  0x58   : > { %v2430_v29 = vpop.eup %2429  ;;  %v855_v30 = vsel %vm2978_vm0, %v854_v55, %v850_v26  ;;  %v835_v31 = vsel %vm3036_vm7, %v2424_v57, %v831_v23  ;;  %vm3056_vm10 = vcmp.eq.f32.partialorder %v821_v22, 8.507059e+37  ;;  %2433 = vrcp.f32 %v3044_v24  ;;  %v318_v57 = vld [vmem:[%s4359_s3 + $0xb0] sm:$0xff] }
  0x59   : > { %1472 = vperm.xlu2 %2364, %v855_v30   ;;  %v840_v34 = vsel %vm2999_vm1, %v839_v18, %v835_v31  ;;  %v815_v35 = vmul.f32 %v2428_v14, %v814_v25  ;;  %v824_v39 = vor.u32 1.1754944e-38, %v823_v60  ;;  %v881_v41 = vand.u32 2147483647, %v3044_v24 }
  0x5a   : > { %v2432_v37 = vpop.eup %2431  ;;  %v3069_v42 = vadd.f32 1.0, %v2430_v29  ;;  %2435 = vpow2.f32 %v2306_v27  ;;  %v883_v46 = vand.u32 2147483648, %v3044_v24  ;;  %vm892_vm12 = vweird.f32 %v3018_v12 }
  0x5b   : > { %v816_v44 = vadd.f32 %v2428_v14, %v815_v35  ;;  %v888_v47 = vmul.f32 %v2432_v37, %v3018_v12  ;;  %2437 = vpow2.f32 %v2305_v28  ;;  %1467 = vperm.xlu1 %2363, %v840_v34   ;;  %vm3082_vm13 = vcmp.eq.f32.partialorder %v896_v32, 8.507059e+37  ;;  %v369_v34 = vld [vmem:[%s2648_s8 + $0xc8] sm:$0xff] }
  0x5c   : > { %v899_v52 = vor.u32 1.1754944e-38, %v898_v33  ;;  %2439 = vrcp.f32 %v3069_v42  ;;  %vm893_vm14 = vweird.f32 %v2432_v37  ;;  %v866_v55 = vand.u32 2147483647, %v3069_v42  ;;  %v321_v33 = vld [vmem:[%s4359_s3 + $0xc8] sm:$0xff] }
  0x5d   : > { %v820_v40 = vsel %vm3064_vm11, %v2428_v14, %v816_v44  ;;  %v889_v54 = vsub.f32 1.0, %v888_v47  ;;  %vm877_vm15 = vweird.f32 %v3044_v24  ;;  %v410_v58 = vmul.f32 %v362_v48, %v314_v43  ;;  %vm3112_vm1 = vmor %vm892_vm12, %vm893_vm14 }
  0x5e   : > { %v825_v63 = vsel %vm3056_vm10, %v824_v39, %v820_v40  ;;  %v415_v0 = vmul.f32 %v367_v50, %v319_v49  ;;  %v2434_v2 = vpop.eup %2433  ;;  %vm3101_vm0 = vcmp.eq.f32.partialorder %v881_v41, 8.507059e+37  ;;  %v884_v5 = vor.u32 1.1754944e-38, %v883_v46  ;;  %v320_v49 = vld [vmem:[%s4359_s3 + $0xc0] sm:$0xff] }
  0x5f   : > { %1462 = vperm.xlu0 %2362, %v825_v63   ;;  %v890_v59 = vmul.f32 %v2432_v37, %v889_v54  ;;  %vm862_vm6 = vweird.f32 %v3069_v42  ;;  %v873_v9 = vmul.f32 %v2434_v2, %v3044_v24  ;;  %v868_v10 = vand.u32 2147483648, %v3069_v42  ;;  %v368_v50 = vld [vmem:[%s2648_s8 + $0xc0] sm:$0xff] }
  0x60   : > { %v2436_v7 = vpop.eup %2435  ;;  %v2304_v11 = vmul.f32 -1.442695, %v410_v58  ;;  %v414_v13 = vmul.f32 %v366_v62, %v318_v57  ;;  %vm878_vm2 = vweird.f32 %v2434_v2  ;;  %vm3119_vm4 = vcmp.eq.f32.partialorder %v866_v55, 8.507059e+37 }
  0x61   : > { %v2438_v56 = vpop.eup %2437  ;;  %v891_v53 = vadd.f32 %v2432_v37, %v890_v59  ;;  %v3123_v14 = vadd.f32 1.0, %v2436_v7  ;;  %v413_v12 = vmul.f32 %v365_v1, %v317_v45  ;;  %v874_v16 = vsub.f32 1.0, %v873_v9  ;;  %vm3137_vm3 = vmor %vm877_vm15, %vm878_vm2  ;;  %v373_v7 = vld [vmem:[%s2648_s8 + $0xe8] sm:$0x1] }
  0x62   : > { %v2440_v15 = vpop.eup %2439  ;;  %v3125_v17 = vadd.f32 1.0, %v2438_v56  ;;  %2441 = vpow2.f32 %v2304_v11  ;;  %v2309_v18 = vmul.f32 -1.442695, %v415_v0  ;;  %v418_v21 = vmul.f32 %v370_v4, %v322_v6  ;;  %v325_v6 = vld [vmem:[%s4359_s3 + $0xe8] sm:$0x1] }
  0x63   : > { %v895_v19 = vsel %vm3112_vm1, %v2432_v37, %v891_v53  ;;  %v858_v20 = vmul.f32 %v2440_v15, %v3069_v42  ;;  %2443 = vrcp.f32 %v3123_v14  ;;  %v875_v23 = vmul.f32 %v2434_v2, %v874_v16  ;;  %v372_v53 = vld [vmem:[%s2648_s8 + $0xe0] sm:$0xff] }
  0x64   : > { %v900_v22 = vsel %vm3082_vm13, %v899_v52, %v895_v19  ;;  %v941_v60 = vand.u32 2147483647, %v3123_v14  ;;  %v2308_v26 = vmul.f32 -1.442695, %v414_v13  ;;  %vm863_vm5 = vweird.f32 %v2440_v15 }
  0x65   : > { %1487 = vperm.xlu2 %2364, %v900_v22   ;;  %v859_v27 = vsub.f32 1.0, %v858_v20  ;;  %2445 = vrcp.f32 %v3125_v17  ;;  %v2307_v28 = vmul.f32 -1.442695, %v413_v12  ;;  %v876_v29 = vadd.f32 %v2434_v2, %v875_v23  ;;  %vm3154_vm9 = vmor %vm862_vm6, %vm863_vm5 }
  0x66   : > { %v869_v30 = vor.u32 1.1754944e-38, %v868_v10  ;;  %vm937_vm7 = vweird.f32 %v3123_v14  ;;  %v943_v31 = vand.u32 2147483648, %v3123_v14  ;;  %vm922_vm8 = vweird.f32 %v3125_v17 }
  0x67   : > { %v860_v32 = vmul.f32 %v2440_v15, %v859_v27  ;;  %2447 = vpow2.f32 %v2309_v18  ;;  %v2312_v24 = vmul.f32 -1.442695, %v418_v21  ;;  %v880_v36 = vsel %vm3137_vm3, %v2434_v2, %v876_v29 }
  0x68   : > { %v2442_v35 = vpop.eup %2441  ;;  %vm3158_vm10 = vcmp.eq.f32.partialorder %v941_v60, 8.507059e+37  ;;  %v926_v39 = vand.u32 2147483647, %v3125_v17  ;;  %2449 = vpow2.f32 %v2308_v26  ;;  %v885_v43 = vsel %vm3101_vm0, %v884_v5, %v880_v36 }
  0x69   : > { %v2444_v41 = vpop.eup %2443  ;;  %v861_v44 = vadd.f32 %v2440_v15, %v860_v32  ;;  %v3165_v47 = vadd.f32 1.0, %v2442_v35  ;;  %2451 = vpow2.f32 %v2307_v28  ;;  %1482 = vperm.xlu1 %2363, %v885_v43   ;;  %v928_v46 = vand.u32 2147483648, %v3125_v17 }
  0x6a   : > { %v933_v42 = vmul.f32 %v2444_v41, %v3123_v14  ;;  %2453 = vpow2.f32 %v2312_v24  ;;  %v417_v48 = vmul.f32 %v369_v34, %v321_v33  ;;  %vm938_vm11 = vweird.f32 %v2444_v41  ;;  %v371_v14 = vld [vmem:[%s2648_s8 + $0xd8] sm:$0xff] }
  0x6b   : > { %v2446_v51 = vpop.eup %2445  ;;  %v865_v52 = vsel %vm3154_vm9, %v2440_v15, %v861_v44  ;;  %v944_v40 = vor.u32 1.1754944e-38, %v943_v31  ;;  %2455 = vrcp.f32 %v3165_v47  ;;  %v911_v62 = vand.u32 2147483647, %v3165_v47  ;;  %vm3194_vm14 = vmor %vm937_vm7, %vm938_vm11  ;;  %v331_v34 = vld [vmem:[%s4359_s3 + $0x118] sm:$0x1] }
  0x6c   : > { %v870_v54 = vsel %vm3119_vm4, %v869_v30, %v865_v52  ;;  %v934_v55 = vsub.f32 1.0, %v933_v42  ;;  %v918_v57 = vmul.f32 %v2446_v51, %v3125_v17  ;;  %vm3180_vm12 = vcmp.eq.f32.partialorder %v926_v39, 8.507059e+37 }
  0x6d   : > { %v2448_v63 = vpop.eup %2447  ;;  %1477 = vperm.xlu0 %2362, %v870_v54   ;;  %v913_v0 = vand.u32 2147483648, %v3165_v47  ;;  %v2311_v45 = vmul.f32 -1.442695, %v417_v48  ;;  %v416_v1 = vmul.f32 %v368_v50, %v320_v49  ;;  %vm923_vm13 = vweird.f32 %v2446_v51 }
  0x6e   : > { %v2450_v2 = vpop.eup %2449  ;;  %v935_v59 = vmul.f32 %v2444_v41, %v934_v55  ;;  %v919_v3 = vsub.f32 1.0, %v918_v57  ;;  %v3185_v5 = vadd.f32 1.0, %v2448_v63  ;;  %v929_v10 = vor.u32 1.1754944e-38, %v928_v46  ;;  %vm3209_vm6 = vmor %vm922_vm8, %vm923_vm13 }
  0x6f   : > { %v2452_v8 = vpop.eup %2451  ;;  %vm907_vm15 = vweird.f32 %v3165_v47  ;;  %v3199_v11 = vadd.f32 1.0, %v2450_v2  ;;  %2457 = vpow2.f32 %v2311_v45  ;;  %vm3201_vm0 = vcmp.eq.f32.partialorder %v911_v62, 8.507059e+37 }
  0x70   : > { %v2454_v13 = vpop.eup %2453  ;;  %v936_v4 = vadd.f32 %v2444_v41, %v935_v59  ;;  %v920_v56 = vmul.f32 %v2446_v51, %v919_v3  ;;  %2459 = vrcp.f32 %v3185_v5  ;;  %v914_v12 = vor.u32 1.1754944e-38, %v913_v0 }
  0x71   : > { %v2456_v61 = vpop.eup %2455  ;;  %2461 = vrcp.f32 %v3199_v11  ;;  %v2310_v15 = vmul.f32 -1.442695, %v416_v1  ;;  %v421_v16 = vmul.f32 %v373_v7, %v325_v6  ;;  %v986_v21 = vand.u32 2147483647, %v3185_v5 }
  0x72   : > { %v940_v18 = vsel %vm3194_vm14, %v2444_v41, %v936_v4  ;;  %v921_v19 = vadd.f32 %v2446_v51, %v920_v56  ;;  %v903_v20 = vmul.f32 %v2456_v61, %v3165_v47  ;;  %vm908_vm1 = vweird.f32 %v2456_v61 }
  0x73   : > { %v945_v17 = vsel %vm3158_vm10, %v944_v40, %v940_v18  ;;  %vm982_vm2 = vweird.f32 %v3185_v5  ;;  %v988_v22 = vand.u32 2147483648, %v3185_v5  ;;  %v971_v26 = vand.u32 2147483647, %v3199_v11  ;;  %vm3241_vm5 = vmor %vm907_vm15, %vm908_vm1  ;;  %v334_v18 = vld [vmem:[%s4359_s3 + $0x130] sm:$0x1] }
  0x74   : > { %1502 = vperm.xlu2 %2364, %v945_v17   ;;  %v925_v23 = vsel %vm3209_vm6, %v2446_v51, %v921_v19  ;;  %v904_v60 = vsub.f32 1.0, %v903_v20  ;;  %v3225_v25 = vadd.f32 1.0, %v2452_v8  ;;  %v973_v29 = vand.u32 2147483648, %v3199_v11  ;;  %v376_v17 = vld [vmem:[%s2648_s8 + $0x100] sm:$0x1] }
  0x75   : > { %v2458_v27 = vpop.eup %2457  ;;  %v930_v28 = vsel %vm3180_vm12, %v929_v10, %v925_v23  ;;  %v3230_v30 = vadd.f32 1.0, %v2454_v13  ;;  %2463 = vpow2.f32 %v2310_v15  ;;  %vm3232_vm4 = vcmp.eq.f32.partialorder %v986_v21, 8.507059e+37  ;;  %v328_v21 = vld [vmem:[%s4359_s3 + $0x100] sm:$0x1]  ;;  %v382_v19 = vld [vmem:[%s2648_s8 + $0x130] sm:$0x1] }
  0x76   : > { %v2460_v31 = vpop.eup %2459  ;;  %1497 = vperm.xlu1 %2363, %v930_v28   ;;  %v905_v32 = vmul.f32 %v2456_v61, %v904_v60  ;;  %vm967_vm3 = vweird.f32 %v3199_v11  ;;  %2465 = vrcp.f32 %v3225_v25  ;;  %v989_v36 = vor.u32 1.1754944e-38, %v988_v22  ;;  %v375_v28 = vld [vmem:[%s2648_s8 + $0xf8] sm:$0xff] }
  0x77   : > { %v2462_v33 = vpop.eup %2461  ;;  %v978_v35 = vmul.f32 %v2460_v31, %v3185_v5  ;;  %v956_v37 = vand.u32 2147483647, %v3225_v25  ;;  %v958_v38 = vand.u32 2147483648, %v3225_v25  ;;  %vm3249_vm7 = vcmp.eq.f32.partialorder %v971_v26, 8.507059e+37 }
  0x78   : > { %v906_v39 = vadd.f32 %v2456_v61, %v905_v32  ;;  %v963_v41 = vmul.f32 %v2462_v33, %v3199_v11  ;;  %2467 = vrcp.f32 %v3230_v30  ;;  %vm983_vm8 = vweird.f32 %v2460_v31  ;;  %v324_v11 = vld [vmem:[%s4359_s3 + $0xe0] sm:$0xff] }
  0x79   : > { %v979_v44 = vsub.f32 1.0, %v978_v35  ;;  %v974_v47 = vor.u32 1.1754944e-38, %v973_v29  ;;  %vm952_vm9 = vweird.f32 %v3225_v25  ;;  %vm968_vm10 = vweird.f32 %v2462_v33  ;;  %vm3273_vm12 = vmor %vm982_vm2, %vm983_vm8  ;;  %v326_v29 = vld [vmem:[%s4359_s3 + $0xf0] sm:$0xff] }
  0x7a   : > { %v910_v42 = vsel %vm3241_vm5, %v2456_v61, %v906_v39  ;;  %v964_v46 = vsub.f32 1.0, %v963_v41  ;;  %v1031_v48 = vand.u32 2147483647, %v3230_v30  ;;  %vm3260_vm11 = vcmp.eq.f32.partialorder %v956_v37, 8.507059e+37  ;;  %vm3282_vm14 = vmor %vm967_vm3, %vm968_vm10  ;;  %v323_v61 = vld [vmem:[%s4359_s3 + $0xd8] sm:$0xff] }
  0x7b   : > { %v2464_v49 = vpop.eup %2463  ;;  %v915_v50 = vsel %vm3201_vm0, %v914_v12, %v910_v42  ;;  %v980_v51 = vmul.f32 %v2460_v31, %v979_v44  ;;  %v3264_v40 = vor.u32 1.1754944e-38, %v958_v38  ;;  %v3266_v54 = vadd.f32 1.0, %v2458_v27  ;;  %v327_v27 = vld [vmem:[%s4359_s3 + $0xf8] sm:$0xff] }
  0x7c   : > { %v3268_v55 = vpop.eup %2465  ;;  %1492 = vperm.xlu0 %2362, %v915_v50   ;;  %v965_v62 = vmul.f32 %v2462_v33, %v964_v46  ;;  %vm1027_vm13 = vweird.f32 %v3230_v30  ;;  %v1033_v63 = vand.u32 2147483648, %v3230_v30  ;;  %v2315_v58 = vmul.f32 -1.442695, %v421_v16  ;;  %v379_v38 = vld [vmem:[%s2648_s8 + $0x118] sm:$0x1] }
  0x7d   : > { %v981_v0 = vadd.f32 %v2460_v31, %v980_v51  ;;  %v948_v1 = vmul.f32 %v3268_v55, %v3225_v25  ;;  %2469 = vrcp.f32 %v3266_v54  ;;  %v3289_v2 = vadd.f32 1.0, %v2464_v49 }
  0x7e   : > { %v3291_v59 = vpop.eup %2467  ;;  %v966_v3 = vadd.f32 %v2462_v33, %v965_v62  ;;  %vm3293_vm15 = vcmp.eq.f32.partialorder %v1031_v48, 8.507059e+37  ;;  %v1016_v6 = vand.u32 2147483647, %v3266_v54  ;;  %v1018_v7 = vand.u32 2147483648, %v3266_v54 }
  0x7f   : > { %v985_v8 = vsel %vm3273_vm12, %v2460_v31, %v981_v0  ;;  %v949_v9 = vsub.f32 1.0, %v948_v1  ;;  %vm953_vm0 = vweird.f32 %v3268_v55  ;;  %v1023_v10 = vmul.f32 %v3291_v59, %v3230_v30  ;;  %v330_v1 = vld [vmem:[%s4359_s3 + $0x110] sm:$0xff] }
  0x80   : > { %v990_v13 = vsel %vm3232_vm4, %v989_v36, %v985_v8  ;;  %v970_v4 = vsel %vm3282_vm14, %v2462_v33, %v966_v3  ;;  %vm1028_vm6 = vweird.f32 %v3291_v59  ;;  %v1034_v56 = vor.u32 1.1754944e-38, %v1033_v63  ;;  %vm3325_vm1 = vmor %vm952_vm9, %vm953_vm0  ;;  %v374_v33 = vld [vmem:[%s2648_s8 + $0xf0] sm:$0xff]  ;;  %v329_v8 = vld [vmem:[%s4359_s3 + $0x108] sm:$0xff] }
  0x81   : > { %1517 = vperm.xlu2 %2364, %v990_v13   ;;  %v975_v12 = vsel %vm3249_vm7, %v974_v47, %v970_v4  ;;  %v950_v15 = vmul.f32 %v3268_v55, %v949_v9  ;;  %v1024_v16 = vsub.f32 1.0, %v1023_v10  ;;  %2471 = vrcp.f32 %v3289_v2  ;;  %vm3351_vm3 = vmor %vm1027_vm13, %vm1028_vm6  ;;  %v377_v9 = vld [vmem:[%s2648_s8 + $0x108] sm:$0xff] }
  0x82   : > { %1512 = vperm.xlu1 %2363, %v975_v12   ;;  %vm1012_vm2 = vweird.f32 %v3266_v54  ;;  %vm3330_vm4 = vcmp.eq.f32.partialorder %v1016_v6, 8.507059e+37  ;;  %v1019_v20 = vor.u32 1.1754944e-38, %v1018_v7  ;;  %2473 = vpow2.f32 %v2315_v58 }
  0x83   : > { %v2470_v22 = vpop.eup %2469  ;;  %v951_v23 = vadd.f32 %v3268_v55, %v950_v15  ;;  %v1025_v60 = vmul.f32 %v3291_v59, %v1024_v16  ;;  %v420_v26 = vmul.f32 %v372_v53, %v324_v11  ;;  %v419_v25 = vmul.f32 %v371_v14, %v323_v61 }
  0x84   : > { %v1008_v32 = vmul.f32 %v2470_v22, %v3266_v54  ;;  %vm1013_vm5 = vweird.f32 %v2470_v22  ;;  %vm997_vm7 = vweird.f32 %v3289_v2  ;;  %v1001_v24 = vand.u32 2147483647, %v3289_v2 }
  0x85   : > { %v955_v30 = vsel %vm3325_vm1, %v3268_v55, %v951_v23  ;;  %v1026_v35 = vadd.f32 %v3291_v59, %v1025_v60  ;;  %v2314_v36 = vmul.f32 -1.442695, %v420_v26  ;;  %v2313_v37 = vmul.f32 -1.442695, %v419_v25  ;;  %vm3380_vm8 = vmor %vm1012_vm2, %vm1013_vm5 }
  0x86   : > { %v960_v39 = vsel %vm3260_vm11, %v3264_v40, %v955_v30  ;;  %v1009_v41 = vsub.f32 1.0, %v1008_v32  ;;  %v424_v43 = vmul.f32 %v376_v17, %v328_v21  ;;  %v423_v44 = vmul.f32 %v375_v28, %v327_v27  ;;  %v333_v28 = vld [vmem:[%s4359_s3 + $0x128] sm:$0xff] }
  0x87   : > { %v2472_v47 = vpop.eup %2471  ;;  %1507 = vperm.xlu0 %2362, %v960_v39   ;;  %v1030_v42 = vsel %vm3351_vm3, %v3291_v59, %v1026_v35  ;;  %v1003_v46 = vand.u32 2147483648, %v3289_v2  ;;  %2475 = vpow2.f32 %v2314_v36  ;;  %v422_v48 = vmul.f32 %v374_v33, %v326_v29  ;;  %v378_v59 = vld [vmem:[%s2648_s8 + $0x110] sm:$0xff]  ;;  %v381_v29 = vld [vmem:[%s2648_s8 + $0x128] sm:$0xff] }
  0x88   : > { %v2474_v49 = vpop.eup %2473  ;;  %v1035_v50 = vsel %vm3293_vm15, %v1034_v56, %v1030_v42  ;;  %v1010_v51 = vmul.f32 %v2470_v22, %v1009_v41  ;;  %v993_v52 = vmul.f32 %v2472_v47, %v3289_v2  ;;  %v427_v40 = vmul.f32 %v379_v38, %v331_v34 }
  0x89   : > { %1532 = vperm.xlu2 %2364, %v1035_v50   ;;  %v3384_v57 = vadd.f32 1.0, %v2474_v49  ;;  %2477 = vpow2.f32 %v2313_v37  ;;  %v2318_v62 = vmul.f32 -1.442695, %v424_v43  ;;  %v2317_v63 = vmul.f32 -1.442695, %v423_v44 }
  0x8a   : > { %v1011_v58 = vadd.f32 %v2470_v22, %v1010_v51  ;;  %v994_v0 = vsub.f32 1.0, %v993_v52  ;;  %vm998_vm9 = vweird.f32 %v2472_v47  ;;  %v2316_v45 = vmul.f32 -1.442695, %v422_v48 }
  0x8b   : > { %vm3390_vm10 = vcmp.eq.f32.partialorder %v1001_v24, 8.507059e+37  ;;  %v1004_v3 = vor.u32 1.1754944e-38, %v1003_v46  ;;  %2479 = vrcp.f32 %v3384_v57  ;;  %v1076_v7 = vand.u32 2147483647, %v3384_v57  ;;  %vm3407_vm11 = vmor %vm997_vm7, %vm998_vm9 }
  0x8c   : > { %v1015_v5 = vsel %vm3380_vm8, %v2470_v22, %v1011_v58  ;;  %v995_v6 = vmul.f32 %v2472_v47, %v994_v0  ;;  %2481 = vpow2.f32 %v2318_v62  ;;  %v1078_v4 = vand.u32 2147483648, %v3384_v57 }
  0x8d   : > { %v2476_v10 = vpop.eup %2475  ;;  %v1020_v11 = vsel %vm3330_vm4, %v1019_v20, %v1015_v5  ;;  %2483 = vpow2.f32 %v2317_v63  ;;  %v426_v56 = vmul.f32 %v378_v59, %v330_v1  ;;  %v2321_v14 = vmul.f32 -1.442695, %v427_v40  ;;  %v384_v5 = vld [vmem:[%s2648_s8 + $0x140] sm:$0xff] }
  0x8e   : > { %1527 = vperm.xlu1 %2363, %v1020_v11   ;;  %v996_v53 = vadd.f32 %v2472_v47, %v995_v6  ;;  %v3412_v61 = vadd.f32 1.0, %v2476_v10  ;;  %2485 = vpow2.f32 %v2316_v45  ;;  %v425_v15 = vmul.f32 %v377_v9, %v329_v8 }
  0x8f   : > { %v2478_v12 = vpop.eup %2477  ;;  %vm1072_vm12 = vweird.f32 %v3384_v57  ;;  %vm3417_vm13 = vcmp.eq.f32.partialorder %v1076_v7, 8.507059e+37  ;;  %v1079_v17 = vor.u32 1.1754944e-38, %v1078_v4  ;;  %v2320_v23 = vmul.f32 -1.442695, %v426_v56 }
  0x90   : > { %v1000_v2 = vsel %vm3407_vm11, %v2472_v47, %v996_v53  ;;  %2487 = vrcp.f32 %v3412_v61  ;;  %v3428_v22 = vadd.f32 1.0, %v2478_v12  ;;  %v1061_v25 = vand.u32 2147483647, %v3412_v61 }
  0x91   : > { %v2480_v20 = vpop.eup %2479  ;;  %v1005_v21 = vsel %vm3390_vm10, %v1004_v3, %v1000_v2  ;;  %v1063_v27 = vand.u32 2147483648, %v3412_v61  ;;  %2489 = vpow2.f32 %v2321_v14  ;;  %v2319_v32 = vmul.f32 -1.442695, %v425_v15 }
  0x92   : > { %v2482_v60 = vpop.eup %2481  ;;  %1522 = vperm.xlu0 %2362, %v1005_v21   ;;  %v1068_v26 = vmul.f32 %v2480_v20, %v3384_v57  ;;  %vm1073_vm14 = vweird.f32 %v2480_v20  ;;  %2491 = vrcp.f32 %v3428_v22  ;;  %v430_v24 = vmul.f32 %v382_v19, %v334_v18 }
  0x93   : > { %v2484_v31 = vpop.eup %2483  ;;  %v1046_v30 = vand.u32 2147483647, %v3428_v22  ;;  %v3439_v35 = vadd.f32 1.0, %v2482_v60  ;;  %vm1057_vm15 = vweird.f32 %v3412_v61  ;;  %v1048_v37 = vand.u32 2147483648, %v3428_v22  ;;  %vm3455_vm6 = vmor %vm1072_vm12, %vm1073_vm14 }
  0x94   : > { %v2486_v33 = vpop.eup %2485  ;;  %v1069_v34 = vsub.f32 1.0, %v1068_v26  ;;  %v3441_v36 = vadd.f32 1.0, %v2484_v31  ;;  %2493 = vpow2.f32 %v2320_v23  ;;  %v3445_v38 = vmul.f32 %v381_v29, %v333_v28 }
  0x95   : > { %vm3447_vm0 = vcmp.eq.f32.partialorder %v1061_v25, 8.507059e+37  ;;  %v1064_v44 = vor.u32 1.1754944e-38, %v1063_v27  ;;  %2495 = vrcp.f32 %v3439_v35  ;;  %vm1042_vm1 = vweird.f32 %v3428_v22 }
  0x96   : > { %v2488_v39 = vpop.eup %2487  ;;  %v1070_v41 = vmul.f32 %v2480_v20, %v1069_v34  ;;  %v3461_v46 = vadd.f32 1.0, %v2486_v33  ;;  %2497 = vpow2.f32 %v2319_v32  ;;  %vm3463_vm2 = vcmp.eq.f32.partialorder %v1046_v30, 8.507059e+37 }
  0x97   : > { %v1053_v42 = vmul.f32 %v2488_v39, %v3412_v61  ;;  %v2490_v48 = vpop.eup %2489  ;;  %v1121_v51 = vand.u32 2147483647, %v3439_v35  ;;  %2499 = vrcp.f32 %v3441_v36  ;;  %v3469_v52 = vmul.f32 -1.442695, %v430_v24 }
  0x98   : > { %v1071_v49 = vadd.f32 %v2480_v20, %v1070_v41  ;;  %v2492_v40 = vpop.eup %2491  ;;  %vm1058_vm4 = vweird.f32 %v2488_v39  ;;  %v1049_v57 = vor.u32 1.1754944e-38, %v1048_v37  ;;  %v1123_v62 = vand.u32 2147483648, %v3439_v35 }
  0x99   : > { %v1054_v55 = vsub.f32 1.0, %v1053_v42  ;;  %v1038_v58 = vmul.f32 %v2492_v40, %v3428_v22  ;;  %v1106_v0 = vand.u32 2147483647, %v3441_v36  ;;  %v1108_v45 = vand.u32 2147483648, %v3441_v36  ;;  %vm3483_vm5 = vmor %vm1057_vm15, %vm1058_vm4 }
  0x9a   : > { %v1075_v63 = vsel %vm3455_vm6, %v2480_v20, %v1071_v49  ;;  %v2494_v1 = vpop.eup %2493  ;;  %vm1117_vm3 = vweird.f32 %v3439_v35  ;;  %2501 = vrcp.f32 %v3461_v46  ;;  %vm1043_vm7 = vweird.f32 %v2492_v40 }
  0x9b   : > { %v1080_v59 = vsel %vm3417_vm13, %v1079_v17, %v1075_v63  ;;  %v1055_v54 = vmul.f32 %v2488_v39, %v1054_v55  ;;  %v2496_v3 = vpop.eup %2495  ;;  %v1039_v6 = vsub.f32 1.0, %v1038_v58  ;;  %vm3487_vm8 = vcmp.eq.f32.partialorder %v1121_v51, 8.507059e+37  ;;  %vm3505_vm11 = vmor %vm1042_vm1, %vm1043_vm7  ;;  %v380_v58 = vld [vmem:[%s2648_s8 + $0x120] sm:$0xff] }
  0x9c   : > { %1547 = vperm.xlu2 %2364, %v1080_v59   ;;  %vm1102_vm9 = vweird.f32 %v3441_v36  ;;  %v2498_v8 = vpop.eup %2497  ;;  %v1113_v10 = vmul.f32 %v2496_v3, %v3439_v35  ;;  %v1124_v11 = vor.u32 1.1754944e-38, %v1123_v62  ;;  %v3493_v13 = vadd.f32 1.0, %v2490_v48  ;;  %v386_v48 = vld [vmem:[%s2648_s8 + $0x150] sm:$0xff] }
  0x9d   : > { %v1056_v9 = vadd.f32 %v2488_v39, %v1055_v54  ;;  %v2500_v4 = vpop.eup %2499  ;;  %v1040_v56 = vmul.f32 %v2492_v40, %v1039_v6  ;;  %vm3495_vm10 = vcmp.eq.f32.partialorder %v1106_v0, 8.507059e+37  ;;  %v1109_v61 = vor.u32 1.1754944e-38, %v1108_v45  ;;  %v337_v0 = vld [vmem:[%s4359_s3 + $0x148] sm:$0x1]  ;;  %v336_v45 = vld [vmem:[%s4359_s3 + $0x140] sm:$0xff] }
  0x9e   : > { %v3499_v14 = vadd.f32 1.0, %v2494_v1  ;;  %v1114_v2 = vsub.f32 1.0, %v1113_v10  ;;  %vm1118_vm12 = vweird.f32 %v2496_v3  ;;  %v1098_v16 = vmul.f32 %v2500_v4, %v3441_v36  ;;  %v383_v10 = vld [vmem:[%s2648_s8 + $0x138] sm:$0xff] }
  0x9f   : > { %v1060_v12 = vsel %vm3483_vm5, %v2488_v39, %v1056_v9  ;;  %v1041_v19 = vadd.f32 %v2492_v40, %v1040_v56  ;;  %v1091_v20 = vand.u32 2147483647, %v3461_v46  ;;  %2503 = vrcp.f32 %v3493_v13  ;;  %vm3519_vm14 = vmor %vm1117_vm3, %vm1118_vm12  ;;  %v335_v9 = vld [vmem:[%s4359_s3 + $0x138] sm:$0xff]  ;;  %v388_v56 = vld [vmem:[%s2648_s8 + $0x160] sm:$0x1] }
  0xa0   : > { %v1065_v18 = vsel %vm3447_vm0, %v1064_v44, %v1060_v12  ;;  %v2502_v21 = vpop.eup %2501  ;;  %v1115_v17 = vmul.f32 %v2496_v3, %v1114_v2  ;;  %v1099_v22 = vsub.f32 1.0, %v1098_v16  ;;  %vm1103_vm13 = vweird.f32 %v2500_v4 }
  0xa1   : > { %1542 = vperm.xlu1 %2363, %v1065_v18   ;;  %v1093_v23 = vand.u32 2147483648, %v3461_v46  ;;  %v1045_v60 = vsel %vm3505_vm11, %v2492_v40, %v1041_v19  ;;  %v1083_v25 = vmul.f32 %v2502_v21, %v3461_v46  ;;  %v1166_v27 = vand.u32 2147483647, %v3493_v13  ;;  %vm3531_vm15 = vmor %vm1102_vm9, %vm1103_vm13 }
  0xa2   : > { %2505 = vrcp.f32 %v3499_v14  ;;  %v1050_v28 = vsel %vm3463_vm2, %v1049_v57, %v1045_v60  ;;  %v1116_v29 = vadd.f32 %v2496_v3, %v1115_v17  ;;  %v1100_v31 = vmul.f32 %v2500_v4, %v1099_v22  ;;  %v332_v57 = vld [vmem:[%s4359_s3 + $0x120] sm:$0xff] }
  0xa3   : > { %v1168_v32 = vand.u32 2147483648, %v3493_v13  ;;  %1537 = vperm.xlu0 %2362, %v1050_v28   ;;  %v1084_v33 = vsub.f32 1.0, %v1083_v25  ;;  %vm1087_vm0 = vweird.f32 %v3461_v46  ;;  %vm1088_vm6 = vweird.f32 %v2502_v21  ;;  %v339_v28 = vld [vmem:[%s4359_s3 + $0x158] sm:$0xff] }
  0xa4   : > { %vm3536_vm1 = vcmp.eq.f32.partialorder %v1091_v20, 8.507059e+37  ;;  %v1120_v30 = vsel %vm3519_vm14, %v2496_v3, %v1116_v29  ;;  %v1101_v35 = vadd.f32 %v2500_v4, %v1100_v31  ;;  %v1094_v37 = vor.u32 1.1754944e-38, %v1093_v23  ;;  %vm3552_vm4 = vmor %vm1087_vm0, %vm1088_vm6  ;;  %v385_v3 = vld [vmem:[%s2648_s8 + $0x148] sm:$0x1]  ;;  %v387_v29 = vld [vmem:[%s2648_s8 + $0x158] sm:$0xff] }
  0xa5   : > { %v3542_v39 = vadd.f32 1.0, %v2498_v8  ;;  %v3544_v36 = vpop.eup %2503  ;;  %v1125_v41 = vsel %vm3487_vm8, %v1124_v11, %v1120_v30  ;;  %v1085_v43 = vmul.f32 %v2502_v21, %v1084_v33  ;;  %vm1162_vm2 = vweird.f32 %v3493_v13 }
  0xa6   : > { %v1151_v44 = vand.u32 2147483647, %v3499_v14  ;;  %1562 = vperm.xlu2 %2364, %v1125_v41   ;;  %v1105_v47 = vsel %vm3531_vm15, %v2500_v4, %v1101_v35  ;;  %v1158_v46 = vmul.f32 %v3544_v36, %v3493_v13  ;;  %vm3558_vm3 = vcmp.eq.f32.partialorder %v1166_v27, 8.507059e+37  ;;  %v340_v4 = vld [vmem:[%s4359_s3 + $0x160] sm:$0x1] }
  0xa7   : > { %v1169_v49 = vor.u32 1.1754944e-38, %v1168_v32  ;;  %v1110_v51 = vsel %vm3495_vm10, %v1109_v61, %v1105_v47  ;;  %v1086_v40 = vadd.f32 %v2502_v21, %v1085_v43  ;;  %v1153_v55 = vand.u32 2147483648, %v3499_v14 }
  0xa8   : > { %v3562_v50 = vpop.eup %2505  ;;  %2507 = vrcp.f32 %v3542_v39  ;;  %v1159_v62 = vsub.f32 1.0, %v1158_v46  ;;  %vm1163_vm5 = vweird.f32 %v3544_v36  ;;  %vm1147_vm7 = vweird.f32 %v3499_v14 }
  0xa9   : > { %1557 = vperm.xlu1 %2363, %v1110_v51   ;;  %v1143_v63 = vmul.f32 %v3562_v50, %v3499_v14  ;;  %v1090_v1 = vsel %vm3552_vm4, %v2502_v21, %v1086_v40  ;;  %vm3584_vm8 = vcmp.eq.f32.partialorder %v1151_v44, 8.507059e+37  ;;  %2509 = vpow2.f32 %v3469_v52  ;;  %vm3604_vm10 = vmor %vm1162_vm2, %vm1163_vm5  ;;  %v3630_v14 = vpop.permute.xlu2 %1422 }
  0xaa   : > { %v2323_v54 = vmul.f32 -1.442695, %v3445_v38  ;;  %v1095_v6 = vsel %vm3536_vm1, %v1094_v37, %v1090_v1  ;;  %v1160_v7 = vmul.f32 %v3544_v36, %v1159_v62  ;;  %vm1148_vm9 = vweird.f32 %v3562_v50  ;;  %v391_v62 = vld [vmem:[%s2648_s8 + $0x178] sm:$0x1] }
  0xab   : > { %v1144_v8 = vsub.f32 1.0, %v1143_v63  ;;  %1552 = vperm.xlu0 %2362, %v1095_v6   ;;  %v1154_v52 = vor.u32 1.1754944e-38, %v1153_v55  ;;  %vm1132_vm11 = vweird.f32 %v3542_v39  ;;  %v428_v11 = vmul.f32 %v380_v58, %v332_v57  ;;  %vm3619_vm12 = vmor %vm1147_vm7, %vm1148_vm9  ;;  %v343_v57 = vld [vmem:[%s4359_s3 + $0x178] sm:$0x1] }
  0xac   : > { %2511 = vpow2.f32 %v2323_v54  ;;  %v1161_v53 = vadd.f32 %v3544_v36, %v1160_v7  ;;  %v433_v12 = vmul.f32 %v385_v3, %v337_v0  ;;  %v432_v13 = vmul.f32 %v384_v5, %v336_v45 }
  0xad   : > { %v1145_v61 = vmul.f32 %v3562_v50, %v1144_v8  ;;  %v1136_v16 = vand.u32 2147483647, %v3542_v39  ;;  %v1138_v18 = vand.u32 2147483648, %v3542_v39  ;;  %v2322_v19 = vmul.f32 -1.442695, %v428_v11 }
  0xae   : > { %v2508_v15 = vpop.eup %2507  ;;  %v431_v20 = vmul.f32 %v383_v10, %v335_v9  ;;  %v1165_v21 = vsel %vm3604_vm10, %v3544_v36, %v1161_v53  ;;  %v436_v23 = vmul.f32 %v388_v56, %v340_v4  ;;  %v2327_v25 = vmul.f32 -1.442695, %v433_v12 }
  0xaf   : > { %v1146_v17 = vadd.f32 %v3562_v50, %v1145_v61  ;;  %v1128_v22 = vmul.f32 %v2508_v15, %v3542_v39  ;;  %v2510_v60 = vpop.eup %2509  ;;  %v1170_v26 = vsel %vm3558_vm3, %v1169_v49, %v1165_v21  ;;  %2513 = vpow2.f32 %v2322_v19  ;;  %v338_v39 = vld [vmem:[%s4359_s3 + $0x150] sm:$0xff] }
  0xb0   : > { %v2326_v27 = vmul.f32 -1.442695, %v432_v13  ;;  %1577 = vperm.xlu2 %2364, %v1170_v26   ;;  %vm1133_vm13 = vweird.f32 %v2508_v15  ;;  %v3641_v24 = vadd.f32 1.0, %v2510_v60  ;;  %2515 = vpow2.f32 %v2327_v25 }
  0xb1   : > { %v1150_v31 = vsel %vm3619_vm12, %v3562_v50, %v1146_v17  ;;  %v1129_v32 = vsub.f32 1.0, %v1128_v22  ;;  %v2325_v35 = vmul.f32 -1.442695, %v431_v20  ;;  %v435_v37 = vmul.f32 %v387_v29, %v339_v28  ;;  %vm3648_vm14 = vmor %vm1132_vm11, %vm1133_vm13  ;;  %v3672_v45 = vpop.permute.xlu2 %1427 }
  0xb2   : > { %v2512_v33 = vpop.eup %2511  ;;  %v1155_v34 = vsel %vm3584_vm8, %v1154_v52, %v1150_v31  ;;  %2517 = vrcp.f32 %v3641_v24  ;;  %v1139_v41 = vor.u32 1.1754944e-38, %v1138_v18  ;;  %v2330_v44 = vmul.f32 -1.442695, %v436_v23 }
  0xb3   : > { %1572 = vperm.xlu1 %2363, %v1155_v34   ;;  %v1130_v30 = vmul.f32 %v2508_v15, %v1129_v32  ;;  %v3652_v43 = vadd.f32 1.0, %v2512_v33  ;;  %2519 = vpow2.f32 %v2326_v27  ;;  %vm1137_vm15 = vcmp.eq.f32.partialorder %v1136_v16, 8.507059e+37 }
  0xb4   : > { %v1211_v46 = vand.u32 2147483647, %v3641_v24  ;;  %v2329_v51 = vmul.f32 -1.442695, %v435_v37  ;;  %vm1207_vm0 = vweird.f32 %v3641_v24  ;;  %v1213_v58 = vand.u32 2147483648, %v3641_v24 }
  0xb5   : > { %v1131_v47 = vadd.f32 %v2508_v15, %v1130_v30  ;;  %v2514_v42 = vpop.eup %2513  ;;  %2521 = vrcp.f32 %v3652_v43  ;;  %v1196_v0 = vand.u32 2147483647, %v3652_v43  ;;  %v434_v1 = vmul.f32 %v386_v48, %v338_v39 }
  0xb6   : > { %v3662_v50 = vadd.f32 1.0, %v2514_v42  ;;  %2523 = vpow2.f32 %v2325_v35  ;;  %v2516_v40 = vpop.eup %2515  ;;  %vm3675_vm6 = vcmp.eq.f32.partialorder %v1211_v46, 8.507059e+37  ;;  %v1198_v5 = vand.u32 2147483648, %v3652_v43 }
  0xb7   : > { %v1135_v49 = vsel %vm3648_vm14, %v2508_v15, %v1131_v47  ;;  %2525 = vpow2.f32 %v2330_v44  ;;  %v3680_v6 = vadd.f32 1.0, %v2516_v40  ;;  %v3685_v9 = vmul.f32 %v391_v62, %v343_v57 }
  0xb8   : > { %v1140_v55 = vsel %vm1137_vm15, %v1139_v41, %v1135_v49  ;;  %v2518_v63 = vpop.eup %2517  ;;  %2527 = vrcp.f32 %v3662_v50  ;;  %v1181_v7 = vand.u32 2147483647, %v3662_v50  ;;  %v1183_v52 = vand.u32 2147483648, %v3662_v50 }
  0xb9   : > { %1567 = vperm.xlu0 %2362, %v1140_v55   ;;  %v2520_v59 = vpop.eup %2519  ;;  %v1203_v54 = vmul.f32 %v2518_v63, %v3641_v24  ;;  %2529 = vpow2.f32 %v2329_v51  ;;  %vm1208_vm1 = vweird.f32 %v2518_v63  ;;  %v1214_v4 = vor.u32 1.1754944e-38, %v1213_v58  ;;  %v3726_v30 = vpop.permute.xlu2 %1442 }
  0xba   : > { %v3683_v8 = vadd.f32 1.0, %v2520_v59  ;;  %2531 = vrcp.f32 %v3680_v6  ;;  %vm1192_vm2 = vweird.f32 %v3652_v43  ;;  %vm3691_vm4 = vcmp.eq.f32.partialorder %v1196_v0, 8.507059e+37  ;;  %vm3698_vm3 = vmor %vm1207_vm0, %vm1208_vm1 }
  0xbb   : > { %v2522_v10 = vpop.eup %2521  ;;  %v1204_v38 = vsub.f32 1.0, %v1203_v54  ;;  %v1199_v13 = vor.u32 1.1754944e-38, %v1198_v5  ;;  %v2328_v15 = vmul.f32 -1.442695, %v434_v1  ;;  %vm1177_vm7 = vweird.f32 %v3662_v50 }
  0xbc   : > { %v2524_v11 = vpop.eup %2523  ;;  %v1188_v56 = vmul.f32 %v2522_v10, %v3652_v43  ;;  %2533 = vrcp.f32 %v3683_v8  ;;  %vm1193_vm5 = vweird.f32 %v2522_v10  ;;  %vm3703_vm8 = vcmp.eq.f32.partialorder %v1181_v7, 8.507059e+37 }
  0xbd   : > { %v2526_v61 = vpop.eup %2525  ;;  %v1205_v12 = vmul.f32 %v2518_v63, %v1204_v38  ;;  %v1184_v17 = vor.u32 1.1754944e-38, %v1183_v52  ;;  %vm1252_vm9 = vweird.f32 %v3680_v6  ;;  %v1256_v60 = vand.u32 2147483647, %v3680_v6  ;;  %vm3717_vm10 = vmor %vm1192_vm2, %vm1193_vm5 }
  0xbe   : > { %v2528_v2 = vpop.eup %2527  ;;  %v1189_v18 = vsub.f32 1.0, %v1188_v56  ;;  %v1258_v26 = vand.u32 2147483648, %v3680_v6  ;;  %v3711_v25 = vadd.f32 1.0, %v2524_v11  ;;  %v3721_v32 = vadd.f32 1.0, %v2526_v61 }
  0xbf   : > { %v1206_v20 = vadd.f32 %v2518_v63, %v1205_v12  ;;  %v1173_v21 = vmul.f32 %v2528_v2, %v3662_v50  ;;  %v2530_v22 = vpop.eup %2529  ;;  %vm1178_vm11 = vweird.f32 %v2528_v2  ;;  %2535 = vpow2.f32 %v2328_v15  ;;  %v3786_v12 = vpop.permute.xlu1 %1412 }
  0xc0   : > { %v1190_v23 = vmul.f32 %v2522_v10, %v1189_v18  ;;  %v2532_v27 = vpop.eup %2531  ;;  %vm1237_vm12 = vweird.f32 %v3683_v8  ;;  %2537 = vrcp.f32 %v3711_v25  ;;  %v3730_v36 = vadd.f32 1.0, %v2530_v22  ;;  %vm3736_vm13 = vmor %vm1177_vm7, %vm1178_vm11 }
  0xc1   : > { %v1210_v28 = vsel %vm3698_vm3, %v2518_v63, %v1206_v20  ;;  %v1174_v31 = vsub.f32 1.0, %v1173_v21  ;;  %v1248_v34 = vmul.f32 %v2532_v27, %v3680_v6  ;;  %vm1253_vm14 = vweird.f32 %v2532_v27  ;;  %v3784_v61 = vpop.permute.xlu2 %1457  ;;  %v342_v21 = vld [vmem:[%s4359_s3 + $0x170] sm:$0xff] }
  0xc2   : > { %v1215_v24 = vsel %vm3675_vm6, %v1214_v4, %v1210_v28  ;;  %v1191_v33 = vadd.f32 %v2522_v10, %v1190_v23  ;;  %v2534_v35 = vpop.eup %2533  ;;  %v1241_v39 = vand.u32 2147483647, %v3683_v8  ;;  %v1243_v48 = vand.u32 2147483648, %v3683_v8  ;;  %vm3750_vm0 = vmor %vm1252_vm9, %vm1253_vm14 }
  0xc3   : > { %1592 = vperm.xlu2 %2364, %v1215_v24   ;;  %v1175_v37 = vmul.f32 %v2528_v2, %v1174_v31  ;;  %v1249_v44 = vsub.f32 1.0, %v1248_v34  ;;  %v1233_v47 = vmul.f32 %v2534_v35, %v3683_v8  ;;  %vm1238_vm15 = vweird.f32 %v2534_v35 }
  0xc4   : > { %v1195_v41 = vsel %vm3717_vm10, %v2522_v10, %v1191_v33  ;;  %2539 = vrcp.f32 %v3721_v32  ;;  %vm3754_vm6 = vcmp.eq.f32.partialorder %v1256_v60, 8.507059e+37  ;;  %v1259_v57 = vor.u32 1.1754944e-38, %v1258_v26  ;;  %vm3764_vm1 = vmor %vm1237_vm12, %vm1238_vm15  ;;  %v341_v26 = vld [vmem:[%s4359_s3 + $0x168] sm:$0xff] }
  0xc5   : > { %v1200_v42 = vsel %vm3691_vm4, %v1199_v13, %v1195_v41  ;;  %v1176_v46 = vadd.f32 %v2528_v2, %v1175_v37  ;;  %v1250_v49 = vmul.f32 %v2532_v27, %v1249_v44  ;;  %v1234_v51 = vsub.f32 1.0, %v1233_v47  ;;  %v2536_v63 = vpop.eup %2535 }
  0xc6   : > { %1587 = vperm.xlu1 %2363, %v1200_v42   ;;  %v1226_v62 = vand.u32 2147483647, %v3711_v25  ;;  %2541 = vrcp.f32 %v3730_v36  ;;  %v2538_v59 = vpop.eup %2537  ;;  %v1244_v3 = vor.u32 1.1754944e-38, %v1243_v48  ;;  %v1228_v5 = vand.u32 2147483648, %v3711_v25 }
  0xc7   : > { %v1180_v50 = vsel %vm3736_vm13, %v2528_v2, %v1176_v46  ;;  %v1251_v0 = vadd.f32 %v2532_v27, %v1250_v49  ;;  %v1235_v1 = vmul.f32 %v2534_v35, %v1234_v51  ;;  %vm1242_vm2 = vcmp.eq.f32.partialorder %v1241_v39, 8.507059e+37  ;;  %v3790_v2 = vpop.permute.xlu0 %1402 }
  0xc8   : > { %v1185_v58 = vsel %vm3703_vm8, %v1184_v17, %v1180_v50  ;;  %v1218_v10 = vmul.f32 %v2538_v59, %v3711_v25  ;;  %vm1222_vm4 = vweird.f32 %v3711_v25  ;;  %v3775_v8 = vadd.f32 1.0, %v2536_v63  ;;  %v390_v17 = vld [vmem:[%s2648_s8 + $0x170] sm:$0xff] }
  0xc9   : > { %1582 = vperm.xlu0 %2362, %v1185_v58   ;;  %v1255_v6 = vsel %vm3750_vm0, %v2532_v27, %v1251_v0  ;;  %v1236_v7 = vadd.f32 %v2534_v35, %v1235_v1  ;;  %v2333_v52 = vmul.f32 -1.442695, %v3685_v9  ;;  %vm1223_vm3 = vweird.f32 %v2538_v59  ;;  %v389_v27 = vld [vmem:[%s2648_s8 + $0x168] sm:$0xff]  ;;  %v3846_v58 = vpop.permute.xlu2 %1472  ;;  %v3848_v0 = vpop.permute.xlu1 %1417 }
  0xca   : > { %v1260_v38 = vsel %vm3754_vm6, %v1259_v57, %v1255_v6  ;;  %v2540_v11 = vpop.eup %2539  ;;  %v1219_v56 = vsub.f32 1.0, %v1218_v10  ;;  %vm3780_vm5 = vcmp.eq.f32.partialorder %v1226_v62, 8.507059e+37  ;;  %v1229_v15 = vor.u32 1.1754944e-38, %v1228_v5  ;;  %vm3802_vm8 = vmor %vm1222_vm4, %vm1223_vm3 }
  0xcb   : > { %1607 = vperm.xlu2 %2364, %v1260_v38   ;;  %v1240_v4 = vsel %vm3764_vm1, %v2534_v35, %v1236_v7  ;;  %v1293_v9 = vmul.f32 %v2540_v11, %v3721_v32  ;;  %vm1297_vm7 = vweird.f32 %v3721_v32  ;;  %v1301_v19 = vand.u32 2147483647, %v3721_v32 }
  0xcc   : > { %v1245_v13 = vsel %vm1242_vm2, %v1244_v3, %v1240_v4  ;;  %v2542_v16 = vpop.eup %2541  ;;  %v1220_v18 = vmul.f32 %v2538_v59, %v1219_v56  ;;  %v1303_v20 = vand.u32 2147483648, %v3721_v32  ;;  %2543 = vrcp.f32 %v3775_v8 }
  0xcd   : > { %v1294_v23 = vsub.f32 1.0, %v1293_v9  ;;  %vm1298_vm9 = vweird.f32 %v2540_v11  ;;  %v1278_v60 = vmul.f32 %v2542_v16, %v3730_v36  ;;  %vm1282_vm10 = vweird.f32 %v3730_v36 }
  0xce   : > { %1602 = vperm.xlu1 %2363, %v1245_v13   ;;  %v1221_v28 = vadd.f32 %v2538_v59, %v1220_v18  ;;  %v1286_v29 = vand.u32 2147483647, %v3730_v36  ;;  %v1288_v25 = vand.u32 2147483648, %v3730_v36  ;;  %2545 = vpow2.f32 %v2333_v52  ;;  %vm3818_vm12 = vmor %vm1297_vm7, %vm1298_vm9 }
  0xcf   : > { %v1295_v31 = vmul.f32 %v2540_v11, %v1294_v23  ;;  %v1279_v24 = vsub.f32 1.0, %v1278_v60  ;;  %vm1283_vm11 = vweird.f32 %v2542_v16  ;;  %v438_v33 = vmul.f32 %v390_v17, %v342_v21  ;;  %v3852_v3 = vpop.permute.xlu0 %1407 }
  0xd0   : > { %v1225_v34 = vsel %vm3802_vm8, %v2538_v59, %v1221_v28  ;;  %vm3822_vm13 = vcmp.eq.f32.partialorder %v1301_v19, 8.507059e+37  ;;  %v1304_v41 = vor.u32 1.1754944e-38, %v1303_v20  ;;  %v437_v43 = vmul.f32 %v389_v27, %v341_v26  ;;  %vm3830_vm14 = vmor %vm1282_vm10, %vm1283_vm11 }
  0xd1   : > { %v1230_v44 = vsel %vm3780_vm5, %v1229_v15, %v1225_v34  ;;  %v1296_v47 = vadd.f32 %v2540_v11, %v1295_v31  ;;  %v1280_v42 = vmul.f32 %v2542_v16, %v1279_v24  ;;  %v2332_v46 = vmul.f32 -1.442695, %v438_v33  ;;  %v3859_v9 = vpop.permute.xlu2 %1487 }
  0xd2   : > { %v2544_v39 = vpop.eup %2543  ;;  %1597 = vperm.xlu0 %2362, %v1230_v44   ;;  %vm3834_vm15 = vcmp.eq.f32.partialorder %v1286_v29, 8.507059e+37  ;;  %v1289_v49 = vor.u32 1.1754944e-38, %v1288_v25  ;;  %vm1267_vm0 = vweird.f32 %v3775_v8  ;;  %v2331_v51 = vmul.f32 -1.442695, %v437_v43 }
  0xd3   : > { %v1300_v50 = vsel %vm3818_vm12, %v2540_v11, %v1296_v47  ;;  %v1281_v40 = vadd.f32 %v2542_v16, %v1280_v42  ;;  %v1263_v55 = vmul.f32 %v2544_v39, %v3775_v8  ;;  %v1271_v36 = vand.u32 2147483647, %v3775_v8 }
  0xd4   : > { %v2546_v57 = vpop.eup %2545  ;;  %v1305_v62 = vsel %vm3822_vm13, %v1304_v41, %v1300_v50  ;;  %vm1268_vm6 = vweird.f32 %v2544_v39  ;;  %v1273_v63 = vand.u32 2147483648, %v3775_v8  ;;  %2547 = vpow2.f32 %v2332_v46  ;;  %v1690_v46 = vld [vmem:[%s4360_s4 + $0x10] sm:$0x1] }
  0xd5   : > { %1622 = vperm.xlu2 %2364, %v1305_v62   ;;  %v1285_v1 = vsel %vm3830_vm14, %v2542_v16, %v1281_v40  ;;  %v1264_v59 = vsub.f32 1.0, %v1263_v55  ;;  %v631_v54 = vadd.f32 1.0, %v2546_v57  ;;  %2549 = vpow2.f32 %v2331_v51  ;;  %vm1269_vm1 = vmor %vm1267_vm0, %vm1268_vm6  ;;  %v3861_v16 = vpop.permute.xlu1 %1437  ;;  %v1689_v62 = vld [vmem:[%s4360_s4 + $0x8] sm:$0xff] }
  0xd6   : > { %v1290_v5 = vsel %vm3834_vm15, %v1289_v49, %v1285_v1  ;;  %v1274_v7 = vor.u32 1.1754944e-38, %v1273_v63  ;;  %vm1272_vm2 = vcmp.eq.f32.partialorder %v1271_v36, 8.507059e+37  ;;  %v1737_v63 = vld [vmem:[%s3875_s18 + $0x8] sm:$0xff]  ;;  %v1688_v1 = vld [vmem:[%s4360_s4] sm:$0xff]  ;;  %vm2123_vm0 = vcmask 131072  }
  0xd7   : > { %1617 = vperm.xlu1 %2363, %v1290_v5   ;;  %v1265_v6 = vmul.f32 %v2544_v39, %v1264_v59  ;;  %2551 = vrcp.f32 %v631_v54  ;;  %v1348_v8 = vand.u32 2147483648, %v631_v54  ;;  %v3863_v18 = vpop.permute.xlu0 %1432  ;;  %vm1342_vm4 = vweird.f32 %v631_v54  ;;  %v1736_v59 = vld [vmem:[%s3875_s18] sm:$0xff]  ;;  %v1741_v5 = vld [vmem:[%s3875_s18 + $0x28] sm:$0x1] }
  0xd8   : > { %v1346_v20 = vand.u32 2147483647, %v631_v54  ;;  %vm2120_vm6 = vcmask 138240  }
  0xd9   : > { %v1266_v10 = vadd.f32 %v2544_v39, %v1265_v6  ;;  %v1349_v23 = vor.u32 1.1754944e-38, %v1348_v8  ;;  %v3877_v43 = vpop.permute.xlu2 %1502  ;;  %v1785_v6 = vmul.f32 %v1737_v63, %v1689_v62  ;;  %v1744_v8 = vld [vmem:[%s3875_s18 + $0x40] sm:$0x1] }
  0xda   : > { %v2548_v38 = vpop.eup %2547  ;;  %vm1347_vm7 = vcmp.eq.f32.partialorder %v1346_v20, 8.507059e+37 }
  0xdb   : > { %v2550_v52 = vpop.eup %2549  ;;  %v1270_v11 = vsel %vm1269_vm1, %v2544_v39, %v1266_v10  ;;  %v630_v4 = vadd.f32 1.0, %v2548_v38  ;;  %v1738_v39 = vld [vmem:[%s3875_s18 + $0x10] sm:$0x1]  ;;  %v1784_v38 = vmul.f32 %v1736_v59, %v1688_v1  ;;  %v1705_v1 = vld [vmem:[%s4360_s4 + $0x88] sm:$0x1] }
  0xdc   : > { %v1275_v56 = vsel %vm1272_vm2, %v1274_v7, %v1270_v11  ;;  %v629_v53 = vadd.f32 1.0, %v2550_v52  ;;  %v1786_v40 = vmul.f32 %v1738_v39, %v1690_v46  ;;  %v1745_v46 = vld [vmem:[%s3875_s18 + $0x48] sm:$0xff]  ;;  %v1702_v39 = vld [vmem:[%s4360_s4 + $0x70] sm:$0x1] }
  0xdd   : > { %v2552_v13 = vpop.eup %2551  ;;  %1612 = vperm.xlu0 %2362, %v1275_v56   ;;  %2553 = vrcp.f32 %v630_v4  ;;  %vm1327_vm8 = vweird.f32 %v630_v4  ;;  %v1331_v28 = vand.u32 2147483647, %v630_v4  ;;  %v1333_v29 = vand.u32 2147483648, %v630_v4  ;;  %v3879_v44 = vpop.permute.xlu1 %1452  ;;  %v1740_v56 = vld [vmem:[%s3875_s18 + $0x20] sm:$0xff]  ;;  %v1753_v59 = vld [vmem:[%s3875_s18 + $0x88] sm:$0x1] }
  0xde   : > { %v1338_v15 = vmul.f32 %v2552_v13, %v631_v54  ;;  %2555 = vrcp.f32 %v629_v53  ;;  %vm1343_vm3 = vweird.f32 %v2552_v13  ;;  %vm1312_vm9 = vweird.f32 %v629_v53  ;;  %v1693_v54 = vld [vmem:[%s4360_s4 + $0x28] sm:$0x1] }
  0xdf   : > { %vm3865_vm5 = vmor %vm1342_vm4, %vm1343_vm3  ;;  %v1318_v33 = vand.u32 2147483648, %v629_v53  ;;  %v1316_v37 = vand.u32 2147483647, %v629_v53  ;;  %v1334_v47 = vor.u32 1.1754944e-38, %v1333_v29  ;;  %v3886_v32 = vpop.permute.xlu0 %1447  ;;  %vm1332_vm13 = vcmp.eq.f32.partialorder %v1331_v28, 8.507059e+37  ;;  %v1742_v28 = vld [vmem:[%s3875_s18 + $0x30] sm:$0xff] }
  0xe0   : > { %v1339_v19 = vsub.f32 1.0, %v1338_v15  ;;  %v1789_v11 = vmul.f32 %v1741_v5, %v1693_v54  ;;  %v1696_v15 = vld [vmem:[%s4360_s4 + $0x40] sm:$0x1]  ;;  %v1699_v29 = vld [vmem:[%s4360_s4 + $0x58] sm:$0x1] }
  0xe1   : > { %v1319_v49 = vor.u32 1.1754944e-38, %v1318_v33  ;;  %vm1317_vm15 = vcmp.eq.f32.partialorder %v1316_v37, 8.507059e+37  ;;  %v3901_v7 = vpop.permute.xlu2 %1517  ;;  %v1698_v37 = vld [vmem:[%s4360_s4 + $0x50] sm:$0xff] }
  0xe2   : > { %v1340_v21 = vmul.f32 %v2552_v13, %v1339_v19 }
  0xe3   : > { %v2554_v17 = vpop.eup %2553 }
  0xe4   : > { %v2556_v60 = vpop.eup %2555  ;;  %v1341_v26 = vadd.f32 %v2552_v13, %v1340_v21  ;;  %v1323_v27 = vmul.f32 %v2554_v17, %v630_v4  ;;  %vm1328_vm10 = vweird.f32 %v2554_v17  ;;  %v1692_v4 = vld [vmem:[%s4360_s4 + $0x20] sm:$0xff]  ;;  %v1792_v21 = vmul.f32 %v1744_v8, %v1696_v15 }
  0xe5   : > { %v1308_v25 = vmul.f32 %v2556_v60, %v629_v53  ;;  %vm1313_vm11 = vweird.f32 %v2556_v60  ;;  %vm1329_vm12 = vmor %vm1327_vm8, %vm1328_vm10  ;;  %v3903_v10 = vpop.permute.xlu1 %1467  ;;  %v1691_v53 = vld [vmem:[%s4360_s4 + $0x18] sm:$0xff]  ;;  %v1788_v19 = vmul.f32 %v1740_v56, %v1692_v4  ;;  %v1752_v4 = vld [vmem:[%s3875_s18 + $0x80] sm:$0xff] }
  0xe6   : > { %v1345_v31 = vsel %vm3865_vm5, %v2552_v13, %v1341_v26  ;;  %v1324_v24 = vsub.f32 1.0, %v1323_v27  ;;  %vm1314_vm14 = vmor %vm1312_vm9, %vm1313_vm11  ;;  %v1739_v13 = vld [vmem:[%s3875_s18 + $0x18] sm:$0xff]  ;;  %v1694_v27 = vld [vmem:[%s4360_s4 + $0x30] sm:$0xff] }
  0xe7   : > { %v1350_v34 = vsel %vm1347_vm7, %v1349_v23, %v1345_v31  ;;  %v1309_v35 = vsub.f32 1.0, %v1308_v25  ;;  %v3905_v52 = vpop.permute.xlu0 %1462  ;;  %v1787_v20 = vmul.f32 %v1739_v13, %v1691_v53  ;;  %v1743_v26 = vld [vmem:[%s3875_s18 + $0x38] sm:$0xff]  ;;  %v1708_v13 = vld [vmem:[%s4360_s4 + $0xa0] sm:$0x1] }
  0xe8   : > { %1637 = vperm.xlu2 %2364, %v1350_v34   ;;  %v1325_v41 = vmul.f32 %v2554_v17, %v1324_v24  ;;  %v1747_v25 = vld [vmem:[%s3875_s18 + $0x58] sm:$0x1]  ;;  %v1790_v24 = vmul.f32 %v1742_v28, %v1694_v27  ;;  %v1756_v15 = vld [vmem:[%s3875_s18 + $0xa0] sm:$0x1] }
  0xe9   : > { %v1310_v42 = vmul.f32 %v2556_v60, %v1309_v35  ;;  %v1795_v33 = vmul.f32 %v1747_v25, %v1699_v29  ;;  %v1703_v56 = vld [vmem:[%s4360_s4 + $0x78] sm:$0xff]  ;;  %v1706_v29 = vld [vmem:[%s4360_s4 + $0x90] sm:$0xff] }
  0xea   : > { %v1326_v48 = vadd.f32 %v2554_v17, %v1325_v41  ;;  %v1746_v41 = vld [vmem:[%s3875_s18 + $0x50] sm:$0xff]  ;;  %v1751_v53 = vld [vmem:[%s3875_s18 + $0x78] sm:$0xff] }
  0xeb   : > { %v1311_v51 = vadd.f32 %v2556_v60, %v1310_v42  ;;  %v1697_v42 = vld [vmem:[%s4360_s4 + $0x48] sm:$0xff]  ;;  %v1707_v27 = vld [vmem:[%s4360_s4 + $0x98] sm:$0xff]  ;;  %v1754_v25 = vld [vmem:[%s3875_s18 + $0x90] sm:$0xff] }
  0xec   : > { %v1330_v50 = vsel %vm1329_vm12, %v2554_v17, %v1326_v48  ;;  %v3919_v17 = vpop.permute.xlu2 %1532  ;;  %v1750_v48 = vld [vmem:[%s3875_s18 + $0x70] sm:$0x1]  ;;  %v1755_v28 = vld [vmem:[%s3875_s18 + $0x98] sm:$0xff] }
  0xed   : > { %v1335_v55 = vsel %vm1332_vm13, %v1334_v47, %v1330_v50  ;;  %v1315_v36 = vsel %vm1314_vm14, %v2556_v60, %v1311_v51  ;;  %v3921_v22 = vpop.permute.xlu1 %1482  ;;  %v1695_v60 = vld [vmem:[%s4360_s4 + $0x38] sm:$0xff]  ;;  %v1793_v51 = vmul.f32 %v1745_v46, %v1697_v42  ;;  %v1798_v50 = vmul.f32 %v1750_v48, %v1702_v39  ;;  %v1710_v48 = vld [vmem:[%s4360_s4 + $0xb0] sm:$0xff] }
  0xee   : > { %1632 = vperm.xlu1 %2363, %v1335_v55   ;;  %v1320_v57 = vsel %vm1317_vm15, %v1319_v49, %v1315_v36  ;;  %v1791_v31 = vmul.f32 %v1743_v26, %v1695_v60  ;;  %v1794_v49 = vmul.f32 %v1746_v41, %v1698_v37  ;;  %v1749_v55 = vld [vmem:[%s3875_s18 + $0x68] sm:$0xff]  ;;  %v1700_v36 = vld [vmem:[%s4360_s4 + $0x60] sm:$0xff]  ;;  %v1804_v26 = vmul.f32 %v1756_v15, %v1708_v13 }
  0xef   : > { %1627 = vperm.xlu0 %2362, %v1320_v57   ;;  %v3923_v23 = vpop.permute.xlu0 %1477  ;;  %v1748_v57 = vld [vmem:[%s3875_s18 + $0x60] sm:$0xff]  ;;  %v1802_v37 = vmul.f32 %v1754_v25, %v1706_v29  ;;  %v1765_v13 = vld [vmem:[%s3875_s18 + $0xe8] sm:$0x1]  ;;  %v1763_v29 = vld [vmem:[%s3875_s18 + $0xd8] sm:$0xff] }
  0xf0   : > { %1844 = vperm.xlu2 %2364, %v1786_v40   ;;  %v1701_v40 = vld [vmem:[%s4360_s4 + $0x68] sm:$0xff] }
  0xf1   : > { %v1797_v5 = vmul.f32 %v1749_v55, %v1701_v40  ;;  %v1714_v40 = vld [vmem:[%s4360_s4 + $0xd0] sm:$0x1] }
  0xf2   : > { %v1762_v55 = vld [vmem:[%s3875_s18 + $0xd0] sm:$0x1] }
  0xf5   : > { %v3939_v35 = vpop.permute.xlu1 %1497 }
  0xf6   : > { %1839 = vperm.xlu1 %2363, %v1785_v6   ;;  %v3937_v34 = vpop.permute.xlu2 %1547  ;;  %v1796_v6 = vmul.f32 %v1748_v57, %v1700_v36 }
  0xf7   : > { %1834 = vperm.xlu0 %2362, %v1784_v38   ;;  %v3945_v47 = vpop.permute.xlu0 %1492  ;;  %v1801_v38 = vmul.f32 %v1753_v59, %v1705_v1  ;;  %v1810_v1 = vmul.f32 %v1762_v55, %v1714_v40  ;;  %v1718_v40 = vld [vmem:[%s4360_s4 + $0xf0] sm:$0xff] }
  0xf8   : > { %1859 = vperm.xlu2 %2364, %v1789_v11   ;;  %v1704_v11 = vld [vmem:[%s4360_s4 + $0x80] sm:$0xff]  ;;  %v1766_v55 = vld [vmem:[%s3875_s18 + $0xf0] sm:$0xff] }
  0xf9   : > { %v1800_v8 = vmul.f32 %v1752_v4, %v1704_v11  ;;  %v1712_v4 = vld [vmem:[%s4360_s4 + $0xc0] sm:$0xff] }
  0xfd   : > { %v3965_v63 = vpop.permute.xlu1 %1512 }
  0xfe   : > { %1854 = vperm.xlu1 %2363, %v1788_v19  }
  0xff   : > { %1849 = vperm.xlu0 %2362, %v1787_v20   ;;  %v3971_v54 = vpop.permute.xlu0 %1507 }
 0x100   : > { %1874 = vperm.xlu2 %2364, %v1792_v21   ;;  %v3963_v62 = vpop.permute.xlu2 %1562  ;;  %v1799_v21 = vmul.f32 %v1751_v53, %v1703_v56  ;;  %v1760_v56 = vld [vmem:[%s3875_s18 + $0xc0] sm:$0xff]  ;;  %v1717_v53 = vld [vmem:[%s4360_s4 + $0xe8] sm:$0x1] }
 0x105   : > { %v3987_v20 = vpop.permute.xlu1 %1527 }
 0x106   : > { %1869 = vperm.xlu1 %2363, %v1791_v31   ;;  %v1711_v31 = vld [vmem:[%s4360_s4 + $0xb8] sm:$0x1] }
 0x107   : > { %1864 = vperm.xlu0 %2362, %v1790_v24   ;;  %v3989_v60 = vpop.permute.xlu0 %1522  ;;  %v1759_v24 = vld [vmem:[%s3875_s18 + $0xb8] sm:$0x1] }
 0x108   : > { %1889 = vperm.xlu2 %2364, %v1795_v33   ;;  %v1803_v33 = vmul.f32 %v1755_v28, %v1707_v27  ;;  %v1807_v41 = vmul.f32 %v1759_v24, %v1711_v31  ;;  %v1764_v27 = vld [vmem:[%s3875_s18 + $0xe0] sm:$0xff]  ;;  %v1715_v28 = vld [vmem:[%s4360_s4 + $0xd8] sm:$0xff] }
 0x10a   : > { %v3985_v19 = vpop.permute.xlu2 %1577 }
 0x10e   : > { %1884 = vperm.xlu1 %2363, %v1794_v49   ;;  %v1758_v49 = vld [vmem:[%s3875_s18 + $0xb0] sm:$0xff] }
 0x10f   : > { %1879 = vperm.xlu0 %2362, %v1793_v51   ;;  %v1709_v51 = vld [vmem:[%s4360_s4 + $0xa8] sm:$0xff]  ;;  %v1806_v36 = vmul.f32 %v1758_v49, %v1710_v48  ;;  %v1811_v48 = vmul.f32 %v1763_v29, %v1715_v28  ;;  %v1726_v28 = vld [vmem:[%s4360_s4 + $0x130] sm:$0x1] }
 0x110   : > { %1904 = vperm.xlu2 %2364, %v1798_v50   ;;  %v1757_v50 = vld [vmem:[%s3875_s18 + $0xa8] sm:$0xff]  ;;  %v1774_v29 = vld [vmem:[%s3875_s18 + $0x130] sm:$0x1] }
 0x111   : > { %v1805_v57 = vmul.f32 %v1757_v50, %v1709_v51  ;;  %v1719_v51 = vld [vmem:[%s4360_s4 + $0xf8] sm:$0xff] }
 0x112   : > { %v1767_v50 = vld [vmem:[%s3875_s18 + $0xf8] sm:$0xff] }
 0x113   : > { %v4005_v46 = vpop.permute.xlu1 %1542 }
 0x115   : > { %v4007_v39 = vpop.permute.xlu0 %1537 }
 0x116   : > { %1899 = vperm.xlu1 %2363, %v1797_v5  }
 0x117   : > { %1894 = vperm.xlu0 %2362, %v1796_v6   ;;  %v1713_v6 = vld [vmem:[%s4360_s4 + $0xc8] sm:$0xff] }
 0x118   : > { %1919 = vperm.xlu2 %2364, %v1801_v38   ;;  %v1761_v38 = vld [vmem:[%s3875_s18 + $0xc8] sm:$0xff] }
 0x119   : > { %v1809_v15 = vmul.f32 %v1761_v38, %v1713_v6 }
 0x11b   : > { %v4023_v5 = vpop.permute.xlu1 %1557 }
 0x11d   : > { %v4003_v42 = vpop.permute.xlu2 %1592  ;;  %v4029_v11 = vpop.permute.xlu0 %1552 }
 0x11e   : > { %1914 = vperm.xlu1 %2363, %v1800_v8   ;;  %v1808_v8 = vmul.f32 %v1760_v56, %v1712_v4  ;;  %v1814_v4 = vmul.f32 %v1766_v55, %v1718_v40  ;;  %v1725_v40 = vld [vmem:[%s4360_s4 + $0x128] sm:$0xff] }
 0x11f   : > { %1909 = vperm.xlu0 %2362, %v1799_v21   ;;  %v1813_v21 = vmul.f32 %v1765_v13, %v1717_v53  ;;  %v1354_v13 = vld [vmem:[%s4077_s9 + $0x10] sm:$0x1]  ;;  %v1773_v55 = vld [vmem:[%s3875_s18 + $0x128] sm:$0xff] }
 0x120   : > { %1934 = vperm.xlu2 %2364, %v1804_v26   ;;  %v1716_v26 = vld [vmem:[%s4360_s4 + $0xe0] sm:$0xff] }
 0x125   : > { %v4021_v59 = vpop.permute.xlu2 %1607  ;;  %v4049_v31 = vpop.permute.xlu1 %1572 }
 0x126   : > { %1929 = vperm.xlu1 %2363, %v1803_v33   ;;  %v1720_v33 = vld [vmem:[%s4360_s4 + $0x100] sm:$0x1] }
 0x127   : > { %1924 = vperm.xlu0 %2362, %v1802_v37   ;;  %v1768_v37 = vld [vmem:[%s3875_s18 + $0x100] sm:$0x1] }
 0x128   : > { %1949 = vperm.xlu2 %2364, %v1807_v41   ;;  %v1812_v41 = vmul.f32 %v1764_v27, %v1716_v26  ;;  %v1816_v49 = vmul.f32 %v1768_v37, %v1720_v33  ;;  %v1769_v26 = vld [vmem:[%s3875_s18 + $0x108] sm:$0xff]  ;;  %v1642_v27 = vmul.f32 %v3786_v12, %v1354_v13  ;;  %v1821_v13 = vmul.f32 %v1773_v55, %v1725_v40 }
 0x12b   : > { %v4051_v24 = vpop.permute.xlu0 %1567 }
 0x12e   : > { %1944 = vperm.xlu1 %2363, %v1806_v36   ;;  %v1723_v36 = vld [vmem:[%s4360_s4 + $0x118] sm:$0x1] }
 0x12f   : > { %1939 = vperm.xlu0 %2362, %v1805_v57   ;;  %v4047_v25 = vpop.permute.xlu2 %1622  ;;  %v1771_v57 = vld [vmem:[%s3875_s18 + $0x118] sm:$0x1] }
 0x130   : > { %1964 = vperm.xlu2 %2364, %v1810_v1   ;;  %v1815_v1 = vmul.f32 %v1767_v50, %v1719_v51  ;;  %v1819_v53 = vmul.f32 %v1771_v57, %v1723_v36  ;;  %v1357_v50 = vld [vmem:[%s4077_s9 + $0x28] sm:$0x1]  ;;  %v1724_v36 = vld [vmem:[%s4360_s4 + $0x120] sm:$0xff] }
 0x131   : > { %v1772_v57 = vld [vmem:[%s3875_s18 + $0x120] sm:$0xff] }
 0x136   : > { %1959 = vperm.xlu1 %2363, %v1809_v15   ;;  %v1722_v15 = vld [vmem:[%s4360_s4 + $0x110] sm:$0xff] }
 0x137   : > { %1954 = vperm.xlu0 %2362, %v1808_v8   ;;  %v1770_v8 = vld [vmem:[%s3875_s18 + $0x110] sm:$0xff] }
 0x138   : > { %1979 = vperm.xlu2 %2364, %v1813_v21   ;;  %v4071_v38 = vpop.permute.xlu1 %1587  ;;  %v1721_v21 = vld [vmem:[%s4360_s4 + $0x108] sm:$0xff]  ;;  %v1818_v33 = vmul.f32 %v1770_v8, %v1722_v15  ;;  %v1820_v8 = vmul.f32 %v1772_v57, %v1724_v36 }
 0x13b   : > { %v4079_v56 = vpop.permute.xlu0 %1582 }
 0x13e   : > { %1974 = vperm.xlu1 %2363, %v1812_v41   ;;  %v1817_v41 = vmul.f32 %v1769_v26, %v1721_v21 }
 0x13f   : > { %1969 = vperm.xlu0 %2362, %v1811_v48  }
 0x140   : > { %1994 = vperm.xlu2 %2364, %v1816_v49   ;;  %v4101_v12 = vpop.permute.xlu1 %1602  ;;  %v1822_v49 = vmul.f32 %v1774_v29, %v1726_v28  ;;  %v1728_v29 = vld [vmem:[%s4360_s4 + $0x140] sm:$0xff] }
 0x142   : > { %v4069_v6 = vpop.permute.xlu2 %1637 }
 0x144   : > { %v4105_v51 = vpop.permute.xlu0 %1597 }
 0x146   : > { %1989 = vperm.xlu1 %2363, %v1815_v1   ;;  %v1645_v1 = vmul.f32 %v3672_v45, %v1357_v50  ;;  %v1780_v50 = vld [vmem:[%s3875_s18 + $0x160] sm:$0x1] }
 0x147   : > { %1984 = vperm.xlu0 %2362, %v1814_v4   ;;  %v1729_v4 = vld [vmem:[%s4360_s4 + $0x148] sm:$0x1] }
 0x148   : > { %2009 = vperm.xlu2 %2364, %v1819_v53   ;;  %v1777_v53 = vld [vmem:[%s3875_s18 + $0x148] sm:$0x1] }
 0x149   : > { %v1825_v26 = vmul.f32 %v1777_v53, %v1729_v4  ;;  %v4124_v28 = vpop.permute.xlu1 %1617  ;;  %v1363_v4 = vld [vmem:[%s4077_s9 + $0x58] sm:$0x1] }
 0x14a   : > { %v1845_v37 = vpop.permute.xlu2 %1844  ;;  %v1779_v53 = vld [vmem:[%s3875_s18 + $0x158] sm:$0xff] }
 0x14b   : > { %v2074_v48 = vadd.f32 %v1845_v37, %v1642_v27  ;;  %v1360_v27 = vld [vmem:[%s4077_s9 + $0x40] sm:$0x1]  ;;  %v1727_v37 = vld [vmem:[%s4360_s4 + $0x138] sm:$0xff] }
 0x14d   : > { %2124 = vst.msk [vmem:[%s4099_s17 + $0x10] sm:$0x1] %vm2123_vm0, %v2074_v48  ;;  %v1648_v48 = vmul.f32 %v3726_v30, %v1360_v27  ;;  %v1731_v30 = vld [vmem:[%s4360_s4 + $0x158] sm:$0xff] }
 0x14e   : > { %2004 = vperm.xlu1 %2363, %v1818_v33   ;;  %v1776_v33 = vld [vmem:[%s3875_s18 + $0x140] sm:$0xff]  ;;  %v1735_v27 = vld [vmem:[%s4360_s4 + $0x178] sm:$0x1] }
 0x14f   : > { %1999 = vperm.xlu0 %2362, %v1817_v41   ;;  %v4126_v45 = vpop.permute.xlu0 %1612  ;;  %v1775_v41 = vld [vmem:[%s3875_s18 + $0x138] sm:$0xff]  ;;  %v1824_v40 = vmul.f32 %v1776_v33, %v1728_v29  ;;  %v1827_v33 = vmul.f32 %v1779_v53, %v1731_v30  ;;  %v1781_v30 = vld [vmem:[%s3875_s18 + $0x168] sm:$0xff] }
 0x150   : > { %2024 = vperm.xlu2 %2364, %v1822_v49   ;;  %v1732_v49 = vld [vmem:[%s4360_s4 + $0x160] sm:$0x1]  ;;  %v1823_v36 = vmul.f32 %v1775_v41, %v1727_v37  ;;  %v1783_v29 = vld [vmem:[%s3875_s18 + $0x178] sm:$0x1] }
 0x152   : > { %v1860_v15 = vpop.permute.xlu2 %1859 }
 0x153   : > { %v2077_v21 = vadd.f32 %v1860_v15, %v1645_v1  ;;  %v1828_v1 = vmul.f32 %v1780_v50, %v1732_v49  ;;  %v1730_v15 = vld [vmem:[%s4360_s4 + $0x150] sm:$0xff]  ;;  %v1353_v49 = vld [vmem:[%s4077_s9 + $0x8] sm:$0xff]  ;;  %v1831_v50 = vmul.f32 %v1783_v29, %v1735_v27 }
 0x155   : > { %2127 = vst.msk [vmem:[%s4099_s17 + $0x28] sm:$0x1] %vm2123_vm0, %v2077_v21  ;;  %v1651_v21 = vmul.f32 %v3784_v61, %v1363_v4  ;;  %v1641_v61 = vmul.f32 %v3852_v3, %v1353_v49  ;;  %v1733_v3 = vld [vmem:[%s4360_s4 + $0x168] sm:$0xff] }
 0x156   : > { %2019 = vperm.xlu1 %2363, %v1821_v13  }
 0x157   : > { %2014 = vperm.xlu0 %2362, %v1820_v8   ;;  %v1778_v8 = vld [vmem:[%s3875_s18 + $0x150] sm:$0xff] }
 0x158   : > { %2039 = vperm.xlu2 %2364, %v1825_v26   ;;  %v1826_v41 = vmul.f32 %v1778_v8, %v1730_v15 }
 0x15a   : > { %v1875_v55 = vpop.permute.xlu2 %1874 }
 0x15b   : > { %v2080_v57 = vadd.f32 %v1875_v55, %v1648_v48  ;;  %v1366_v55 = vld [vmem:[%s4077_s9 + $0x70] sm:$0x1] }
 0x15c   : > { %v1654_v53 = vmul.f32 %v3846_v58, %v1366_v55  ;;  %v1369_v58 = vld [vmem:[%s4077_s9 + $0x88] sm:$0x1] }
 0x15d   : > { %2130 = vst.msk [vmem:[%s4099_s17 + $0x40] sm:$0x1] %vm2123_vm0, %v2080_v57  ;;  %v1782_v57 = vld [vmem:[%s3875_s18 + $0x170] sm:$0xff] }
 0x15e   : > { %2034 = vperm.xlu1 %2363, %v1824_v40   ;;  %v1352_v40 = vld [vmem:[%s4077_s9] sm:$0xff] }
 0x15f   : > { %2029 = vperm.xlu0 %2362, %v1823_v36   ;;  %v1734_v36 = vld [vmem:[%s4360_s4 + $0x170] sm:$0xff] }
 0x160   : > { %v4148_v13 = vpop.permute.xlu1 %1632  ;;  %2054 = vperm.xlu2 %2364, %v1828_v1   ;;  %v1640_v1 = vmul.f32 %v3790_v2, %v1352_v40  ;;  %v1830_v27 = vmul.f32 %v1782_v57, %v1734_v36  ;;  %v1829_v2 = vmul.f32 %v1781_v30, %v1733_v3  ;;  %v1657_v40 = vmul.f32 %v3859_v9, %v1369_v58 }
 0x161   : > { %v4155_v26 = vpop.permute.xlu0 %1627 }
 0x162   : > { %v1890_v37 = vpop.permute.xlu2 %1889 }
 0x163   : > { %v2083_v48 = vadd.f32 %v1890_v37, %v1651_v21  ;;  %v1356_v37 = vld [vmem:[%s4077_s9 + $0x20] sm:$0xff] }
 0x165   : > { %2133 = vst.msk [vmem:[%s4099_s17 + $0x58] sm:$0x1] %vm2123_vm0, %v2083_v48  ;;  %v1644_v48 = vmul.f32 %v3630_v14, %v1356_v37  ;;  %v1358_v14 = vld [vmem:[%s4077_s9 + $0x30] sm:$0xff] }
 0x166   : > { %2049 = vperm.xlu1 %2363, %v1827_v33   ;;  %v1646_v3 = vmul.f32 %v3863_v18, %v1358_v14  ;;  %v1375_v18 = vld [vmem:[%s4077_s9 + $0xb8] sm:$0x1] }
 0x167   : > { %2044 = vperm.xlu0 %2362, %v1826_v41   ;;  %v1355_v41 = vld [vmem:[%s4077_s9 + $0x18] sm:$0xff] }
 0x168   : > { %v1840_v4 = vpop.permute.xlu1 %1839  ;;  %2069 = vperm.xlu2 %2364, %v1831_v50   ;;  %v1643_v49 = vmul.f32 %v3848_v0, %v1355_v41  ;;  %v1372_v0 = vld [vmem:[%s4077_s9 + $0xa0] sm:$0x1]  ;;  %v1663_v41 = vmul.f32 %v3901_v7, %v1375_v18 }
 0x169   : > { %v2073_v15 = vadd.f32 %v1840_v4, %v1641_v61  ;;  %v1835_v8 = vpop.permute.xlu0 %1834  ;;  %v1359_v4 = vld [vmem:[%s4077_s9 + $0x38] sm:$0xff] }
 0x16a   : > { %v2072_v21 = vadd.f32 %v1835_v8, %v1640_v1  ;;  %v1905_v29 = vpop.permute.xlu2 %1904  ;;  %v1647_v9 = vmul.f32 %v3861_v16, %v1359_v4  ;;  %v1361_v16 = vld [vmem:[%s4077_s9 + $0x48] sm:$0xff] }
 0x16b   : > { %2122 = vst.msk [vmem:[%s4099_s17 + $0x8] sm:$0xff] %vm2120_vm6, %v2073_v15  ;;  %v2086_v33 = vadd.f32 %v1905_v29, %v1654_v53  ;;  %v1660_v53 = vmul.f32 %v3877_v43, %v1372_v0 }
 0x16c   : > { %2121 = vst.msk [vmem:[%s4099_s17] sm:$0xff] %vm2120_vm6, %v2072_v21 }
 0x16d   : > { %2136 = vst.msk [vmem:[%s4099_s17 + $0x70] sm:$0x1] %vm2123_vm0, %v2086_v33  ;;  %v1649_v33 = vmul.f32 %v3886_v32, %v1361_v16  ;;  %v1378_v32 = vld [vmem:[%s4077_s9 + $0xd0] sm:$0x1]  ;;  %v1371_v16 = vld [vmem:[%s4077_s9 + $0x98] sm:$0xff] }
 0x16e   : > { %2064 = vperm.xlu1 %2363, %v1830_v27  }
 0x16f   : > { %2059 = vperm.xlu0 %2362, %v1829_v2   ;;  %v1362_v2 = vld [vmem:[%s4077_s9 + $0x50] sm:$0xff] }
 0x170   : > { %v1855_v50 = vpop.permute.xlu1 %1854  ;;  %v1650_v43 = vmul.f32 %v3879_v44, %v1362_v2  ;;  %v1364_v44 = vld [vmem:[%s4077_s9 + $0x60] sm:$0xff] }
 0x171   : > { %v2076_v55 = vadd.f32 %v1855_v50, %v1644_v48  ;;  %v1850_v61 = vpop.permute.xlu0 %1849 }
 0x172   : > { %v2075_v36 = vadd.f32 %v1850_v61, %v1643_v49  ;;  %v1920_v57 = vpop.permute.xlu2 %1919  ;;  %v1652_v61 = vmul.f32 %v3905_v52, %v1364_v44  ;;  %v1381_v52 = vld [vmem:[%s4077_s9 + $0xe8] sm:$0x1] }
 0x173   : > { %2126 = vst.msk [vmem:[%s4099_s17 + $0x20] sm:$0xff] %vm2120_vm6, %v2076_v55  ;;  %v2089_v1 = vadd.f32 %v1920_v57, %v1657_v40  ;;  %v1365_v55 = vld [vmem:[%s4077_s9 + $0x68] sm:$0xff]  ;;  %v1666_v57 = vmul.f32 %v3919_v17, %v1378_v32 }
 0x174   : > { %2125 = vst.msk [vmem:[%s4099_s17 + $0x18] sm:$0xff] %vm2120_vm6, %v2075_v36  ;;  %v1653_v7 = vmul.f32 %v3903_v10, %v1365_v55  ;;  %v1367_v10 = vld [vmem:[%s4077_s9 + $0x78] sm:$0xff] }
 0x175   : > { %2139 = vst.msk [vmem:[%s4099_s17 + $0x88] sm:$0x1] %vm2123_vm0, %v2089_v1 }
 0x178   : > { %v1870_v30 = vpop.permute.xlu1 %1869 }
 0x179   : > { %v2079_v15 = vadd.f32 %v1870_v30, %v1647_v9  ;;  %v1865_v8 = vpop.permute.xlu0 %1864  ;;  %v1655_v30 = vmul.f32 %v3923_v23, %v1367_v10  ;;  %v1384_v23 = vld [vmem:[%s4077_s9 + $0x100] sm:$0x1] }
 0x17a   : > { %v2078_v21 = vadd.f32 %v1865_v8, %v1646_v3  ;;  %v1935_v27 = vpop.permute.xlu2 %1934  ;;  %v1368_v3 = vld [vmem:[%s4077_s9 + $0x80] sm:$0xff] }
 0x17b   : > { %2129 = vst.msk [vmem:[%s4099_s17 + $0x38] sm:$0xff] %vm2120_vm6, %v2079_v15  ;;  %v2092_v29 = vadd.f32 %v1935_v27, %v1660_v53  ;;  %v1656_v17 = vmul.f32 %v3921_v22, %v1368_v3  ;;  %v1669_v15 = vmul.f32 %v3937_v34, %v1381_v52  ;;  %v1370_v22 = vld [vmem:[%s4077_s9 + $0x90] sm:$0xff]  ;;  %v1659_v34 = vmul.f32 %v3939_v35, %v1371_v16  ;;  %v1373_v35 = vld [vmem:[%s4077_s9 + $0xa8] sm:$0xff] }
 0x17c   : > { %2128 = vst.msk [vmem:[%s4099_s17 + $0x30] sm:$0xff] %vm2120_vm6, %v2078_v21  ;;  %v1658_v18 = vmul.f32 %v3945_v47, %v1370_v22  ;;  %v1387_v47 = vld [vmem:[%s4077_s9 + $0x118] sm:$0x1] }
 0x17d   : > { %2142 = vst.msk [vmem:[%s4099_s17 + $0xa0] sm:$0x1] %vm2123_vm0, %v2092_v29  ;;  %v1675_v44 = vmul.f32 %v3985_v19, %v1387_v47  ;;  %v1383_v22 = vld [vmem:[%s4077_s9 + $0xf8] sm:$0xff] }
 0x180   : > { %v1885_v37 = vpop.permute.xlu1 %1884 }
 0x181   : > { %v2082_v58 = vadd.f32 %v1885_v37, %v1650_v43  ;;  %v1880_v48 = vpop.permute.xlu0 %1879 }
 0x182   : > { %v2081_v49 = vadd.f32 %v1880_v48, %v1649_v33  ;;  %v1950_v50 = vpop.permute.xlu2 %1949  ;;  %v1672_v33 = vmul.f32 %v3963_v62, %v1384_v23 }
 0x183   : > { %2132 = vst.msk [vmem:[%s4099_s17 + $0x50] sm:$0xff] %vm2120_vm6, %v2082_v58  ;;  %v2095_v40 = vadd.f32 %v1950_v50, %v1663_v41  ;;  %v1374_v50 = vld [vmem:[%s4077_s9 + $0xb0] sm:$0xff] }
 0x184   : > { %2131 = vst.msk [vmem:[%s4099_s17 + $0x48] sm:$0xff] %vm2120_vm6, %v2081_v49  ;;  %v1662_v62 = vmul.f32 %v3965_v63, %v1374_v50  ;;  %v1376_v63 = vld [vmem:[%s4077_s9 + $0xc0] sm:$0xff] }
 0x185   : > { %2145 = vst.msk [vmem:[%s4099_s17 + $0xb8] sm:$0x1] %vm2123_vm0, %v2095_v40  ;;  %v1661_v40 = vmul.f32 %v3971_v54, %v1373_v35  ;;  %v1390_v54 = vld [vmem:[%s4077_s9 + $0x130] sm:$0x1] }
 0x188   : > { %v1900_v36 = vpop.permute.xlu1 %1899 }
 0x189   : > { %v2085_v1 = vadd.f32 %v1900_v36, %v1653_v7  ;;  %v1895_v4 = vpop.permute.xlu0 %1894 }
 0x18a   : > { %v2084_v14 = vadd.f32 %v1895_v4, %v1652_v61  ;;  %v1965_v0 = vpop.permute.xlu2 %1964  ;;  %v1664_v4 = vmul.f32 %v3989_v60, %v1376_v63  ;;  %v1393_v60 = vld [vmem:[%s4077_s9 + $0x148] sm:$0x1]  ;;  %v1391_v63 = vld [vmem:[%s4077_s9 + $0x138] sm:$0xff] }
 0x18b   : > { %2135 = vst.msk [vmem:[%s4099_s17 + $0x68] sm:$0xff] %vm2120_vm6, %v2085_v1  ;;  %v2098_v9 = vadd.f32 %v1965_v0, %v1666_v57  ;;  %v1377_v1 = vld [vmem:[%s4077_s9 + $0xc8] sm:$0xff]  ;;  %v1678_v0 = vmul.f32 %v4003_v42, %v1390_v54 }
 0x18c   : > { %2134 = vst.msk [vmem:[%s4099_s17 + $0x60] sm:$0xff] %vm2120_vm6, %v2084_v14  ;;  %v1665_v19 = vmul.f32 %v3987_v20, %v1377_v1  ;;  %v1379_v20 = vld [vmem:[%s4077_s9 + $0xd8] sm:$0xff]  ;;  %v1392_v1 = vld [vmem:[%s4077_s9 + $0x140] sm:$0xff] }
 0x18d   : > { %2148 = vst.msk [vmem:[%s4099_s17 + $0xd0] sm:$0x1] %vm2123_vm0, %v2098_v9  ;;  %v1680_v54 = vmul.f32 %v4101_v12, %v1392_v1 }
 0x190   : > { %v1915_v53 = vpop.permute.xlu1 %1914 }
 0x191   : > { %v2088_v8 = vadd.f32 %v1915_v53, %v1656_v17  ;;  %v1910_v21 = vpop.permute.xlu0 %1909  ;;  %v1667_v53 = vmul.f32 %v4007_v39, %v1379_v20  ;;  %v1396_v39 = vld [vmem:[%s4077_s9 + $0x160] sm:$0x1]  ;;  %v1397_v20 = vld [vmem:[%s4077_s9 + $0x168] sm:$0xff] }
 0x192   : > { %v2087_v27 = vadd.f32 %v1910_v21, %v1655_v30  ;;  %v1980_v29 = vpop.permute.xlu2 %1979  ;;  %v1380_v30 = vld [vmem:[%s4077_s9 + $0xe0] sm:$0xff] }
 0x193   : > { %2138 = vst.msk [vmem:[%s4099_s17 + $0x80] sm:$0xff] %vm2120_vm6, %v2088_v8  ;;  %v2101_v2 = vadd.f32 %v1980_v29, %v1669_v15  ;;  %v1668_v42 = vmul.f32 %v4005_v46, %v1380_v30  ;;  %v1681_v8 = vmul.f32 %v4021_v59, %v1393_v60  ;;  %v1382_v46 = vld [vmem:[%s4077_s9 + $0xf0] sm:$0xff]  ;;  %v1671_v59 = vmul.f32 %v4023_v5, %v1383_v22  ;;  %v1385_v5 = vld [vmem:[%s4077_s9 + $0x108] sm:$0xff] }
 0x194   : > { %2137 = vst.msk [vmem:[%s4099_s17 + $0x78] sm:$0xff] %vm2120_vm6, %v2087_v27  ;;  %v1670_v23 = vmul.f32 %v4029_v11, %v1382_v46  ;;  %v1399_v11 = vld [vmem:[%s4077_s9 + $0x178] sm:$0x1]  ;;  %v1398_v30 = vld [vmem:[%s4077_s9 + $0x170] sm:$0xff] }
 0x195   : > { %2151 = vst.msk [vmem:[%s4099_s17 + $0xe8] sm:$0x1] %vm2123_vm0, %v2101_v2  ;;  %v1687_v35 = vmul.f32 %v4069_v6, %v1399_v11  ;;  %v1686_v60 = vmul.f32 %v4148_v13, %v1398_v30 }
 0x198   : > { %v1930_v43 = vpop.permute.xlu1 %1929 }
 0x199   : > { %v2091_v37 = vadd.f32 %v1930_v43, %v1659_v34  ;;  %v1925_v41 = vpop.permute.xlu0 %1924 }
 0x19a   : > { %v2090_v58 = vadd.f32 %v1925_v41, %v1658_v18  ;;  %v1995_v48 = vpop.permute.xlu2 %1994  ;;  %v1684_v18 = vmul.f32 %v4047_v25, %v1396_v39 }
 0x19b   : > { %2141 = vst.msk [vmem:[%s4099_s17 + $0x98] sm:$0xff] %vm2120_vm6, %v2091_v37  ;;  %v2104_v49 = vadd.f32 %v1995_v48, %v1672_v33  ;;  %v1386_v48 = vld [vmem:[%s4077_s9 + $0x110] sm:$0xff] }
 0x19c   : > { %2140 = vst.msk [vmem:[%s4099_s17 + $0x90] sm:$0xff] %vm2120_vm6, %v2090_v58  ;;  %v1674_v25 = vmul.f32 %v4049_v31, %v1386_v48  ;;  %v1388_v31 = vld [vmem:[%s4077_s9 + $0x120] sm:$0xff] }
 0x19d   : > { %2154 = vst.msk [vmem:[%s4099_s17 + $0x100] sm:$0x1] %vm2123_vm0, %v2104_v49  ;;  %v1673_v49 = vmul.f32 %v4051_v24, %v1385_v5  ;;  %v1676_v6 = vmul.f32 %v4079_v56, %v1388_v31 }
 0x1a0   : > { %v1945_v55 = vpop.permute.xlu1 %1944 }
 0x1a1   : > { %v2094_v32 = vadd.f32 %v1945_v55, %v1662_v62  ;;  %v1940_v7 = vpop.permute.xlu0 %1939 }
 0x1a2   : > { %v2093_v61 = vadd.f32 %v1940_v7, %v1661_v40  ;;  %v2010_v36 = vpop.permute.xlu2 %2009 }
 0x1a3   : > { %2144 = vst.msk [vmem:[%s4099_s17 + $0xb0] sm:$0xff] %vm2120_vm6, %v2094_v32  ;;  %v2107_v57 = vadd.f32 %v2010_v36, %v1675_v44  ;;  %v1389_v32 = vld [vmem:[%s4077_s9 + $0x128] sm:$0xff] }
 0x1a4   : > { %2143 = vst.msk [vmem:[%s4099_s17 + $0xa8] sm:$0xff] %vm2120_vm6, %v2093_v61  ;;  %v1677_v24 = vmul.f32 %v4071_v38, %v1389_v32  ;;  %v1679_v38 = vmul.f32 %v4105_v51, %v1391_v63 }
 0x1a5   : > { %2157 = vst.msk [vmem:[%s4099_s17 + $0x118] sm:$0x1] %vm2123_vm0, %v2107_v57 }
 0x1a8   : > { %v1960_v14 = vpop.permute.xlu1 %1959 }
 0x1a9   : > { %v2097_v9 = vadd.f32 %v1960_v14, %v1665_v19  ;;  %v1955_v3 = vpop.permute.xlu0 %1954 }
 0x1aa   : > { %v2096_v10 = vadd.f32 %v1955_v3, %v1664_v4  ;;  %v2025_v52 = vpop.permute.xlu2 %2024 }
 0x1ab   : > { %2147 = vst.msk [vmem:[%s4099_s17 + $0xc8] sm:$0xff] %vm2120_vm6, %v2097_v9  ;;  %v2110_v17 = vadd.f32 %v2025_v52, %v1678_v0  ;;  %v1395_v0 = vld [vmem:[%s4077_s9 + $0x158] sm:$0xff]  ;;  %v1394_v9 = vld [vmem:[%s4077_s9 + $0x150] sm:$0xff] }
 0x1ac   : > { %2146 = vst.msk [vmem:[%s4099_s17 + $0xc0] sm:$0xff] %vm2120_vm6, %v2096_v10  ;;  %v1683_v3 = vmul.f32 %v4124_v28, %v1395_v0  ;;  %v1682_v12 = vmul.f32 %v4126_v45, %v1394_v9 }
 0x1ad   : > { %2160 = vst.msk [vmem:[%s4099_s17 + $0x130] sm:$0x1] %vm2123_vm0, %v2110_v17 }
 0x1b0   : > { %v1975_v15 = vpop.permute.xlu1 %1974 }
 0x1b1   : > { %v2100_v21 = vadd.f32 %v1975_v15, %v1668_v42  ;;  %v1970_v27 = vpop.permute.xlu0 %1969  ;;  %v1685_v42 = vmul.f32 %v4155_v26, %v1397_v20 }
 0x1b2   : > { %v2099_v29 = vadd.f32 %v1970_v27, %v1667_v53  ;;  %v2040_v2 = vpop.permute.xlu2 %2039 }
 0x1b3   : > { %2150 = vst.msk [vmem:[%s4099_s17 + $0xe0] sm:$0xff] %vm2120_vm6, %v2100_v21  ;;  %v2113_v16 = vadd.f32 %v2040_v2, %v1681_v8 }
 0x1b4   : > { %2149 = vst.msk [vmem:[%s4099_s17 + $0xd8] sm:$0xff] %vm2120_vm6, %v2099_v29 }
 0x1b5   : > { %2163 = vst.msk [vmem:[%s4099_s17 + $0x148] sm:$0x1] %vm2123_vm0, %v2113_v16 }
 0x1b8   : > { %v1990_v34 = vpop.permute.xlu1 %1989 }
 0x1b9   : > { %v2103_v43 = vadd.f32 %v1990_v34, %v1671_v59  ;;  %v1985_v33 = vpop.permute.xlu0 %1984 }
 0x1ba   : > { %v2102_v37 = vadd.f32 %v1985_v33, %v1670_v23  ;;  %v2055_v41 = vpop.permute.xlu2 %2054 }
 0x1bb   : > { %2153 = vst.msk [vmem:[%s4099_s17 + $0xf8] sm:$0xff] %vm2120_vm6, %v2103_v43  ;;  %v2116_v58 = vadd.f32 %v2055_v41, %v1684_v18 }
 0x1bc   : > { %2152 = vst.msk [vmem:[%s4099_s17 + $0xf0] sm:$0xff] %vm2120_vm6, %v2102_v37 }
 0x1bd   : > { %2166 = vst.msk [vmem:[%s4099_s17 + $0x160] sm:$0x1] %vm2123_vm0, %v2116_v58 }
 0x1c0   : > { %v2005_v50 = vpop.permute.xlu1 %2004 }
 0x1c1   : > { %v2106_v47 = vadd.f32 %v2005_v50, %v1674_v25  ;;  %v2000_v62 = vpop.permute.xlu0 %1999 }
 0x1c2   : > { %v2105_v40 = vadd.f32 %v2000_v62, %v1673_v49  ;;  %v2070_v55 = vpop.permute.xlu2 %2069 }
 0x1c3   : > { %2156 = vst.msk [vmem:[%s4099_s17 + $0x110] sm:$0xff] %vm2120_vm6, %v2106_v47  ;;  %v2119_v44 = vadd.f32 %v2070_v55, %v1687_v35 }
 0x1c4   : > { %2155 = vst.msk [vmem:[%s4099_s17 + $0x108] sm:$0xff] %vm2120_vm6, %v2105_v40 }
 0x1c5   : > { %2169 = vst.msk [vmem:[%s4099_s17 + $0x178] sm:$0x1] %vm2123_vm0, %v2119_v44 }
 0x1c8   : > { %v2020_v7 = vpop.permute.xlu1 %2019 }
 0x1c9   : > { %v2109_v61 = vadd.f32 %v2020_v7, %v1677_v24  ;;  %v2015_v36 = vpop.permute.xlu0 %2014 }
 0x1ca   : > { %v2108_v57 = vadd.f32 %v2015_v36, %v1676_v6 }
 0x1cb   : > { %2159 = vst.msk [vmem:[%s4099_s17 + $0x128] sm:$0xff] %vm2120_vm6, %v2109_v61 }
 0x1cc   : > { %2158 = vst.msk [vmem:[%s4099_s17 + $0x120] sm:$0xff] %vm2120_vm6, %v2108_v57 }
 0x1d0   : > { %v2035_v56 = vpop.permute.xlu1 %2034 }
 0x1d1   : > { %v2112_v19 = vadd.f32 %v2035_v56, %v1680_v54  ;;  %v2030_v4 = vpop.permute.xlu0 %2029 }
 0x1d2   : > { %v2111_v14 = vadd.f32 %v2030_v4, %v1679_v38 }
 0x1d3   : > { %2162 = vst.msk [vmem:[%s4099_s17 + $0x140] sm:$0xff] %vm2120_vm6, %v2112_v19 }
 0x1d4   : > { %2161 = vst.msk [vmem:[%s4099_s17 + $0x138] sm:$0xff] %vm2120_vm6, %v2111_v14 }
 0x1d8   : > { %v2050_v51 = vpop.permute.xlu1 %2049 }
 0x1d9   : > { %v2115_v10 = vadd.f32 %v2050_v51, %v1683_v3  ;;  %v2045_v52 = vpop.permute.xlu0 %2044 }
 0x1da   : > { %v2114_v17 = vadd.f32 %v2045_v52, %v1682_v12 }
 0x1db   : > { %2165 = vst.msk [vmem:[%s4099_s17 + $0x158] sm:$0xff] %vm2120_vm6, %v2115_v10 }
 0x1dc   : > { %2164 = vst.msk [vmem:[%s4099_s17 + $0x150] sm:$0xff] %vm2120_vm6, %v2114_v17 }
 0x1e0   : > { %v2065_v53 = vpop.permute.xlu1 %2064 }
 0x1e1   : > { %v2118_v28 = vadd.f32 %v2065_v53, %v1686_v60  ;;  %v2060_v15 = vpop.permute.xlu0 %2059 }
 0x1e2   : > { %v2117_v8 = vadd.f32 %v2060_v15, %v1685_v42 }
 0x1e3   : > { %2168 = vst.msk [vmem:[%s4099_s17 + $0x170] sm:$0xff] %vm2120_vm6, %v2118_v28 }
 0x1e4   : > { %2167 = vst.msk [vmem:[%s4099_s17 + $0x168] sm:$0xff] %vm2120_vm6, %v2117_v8 }
 0x1e5 PF: > { %s15_s20 = sadd.s32 1, %s2579_s20   ;;  %s4536_s18 = smov %s2575_s19 }
 0x1e6   : > { %p12_p5 = scmp.ge.s32.totalorder %s15_s20, 4   ;;  %s4537_s19 = smov %s4539_s21 }
 0x1e8   :  { %14 = sbr.rel (!%p12_p5) target bundleno = 2 (0x2), region = 76 }

// kernel: _lambda_.59
= control target key start
LH: loop header
LB: loop body
LE: loop exit
PB: predicated region body
PF: predicated region fallthrough
CT: control target
= control target key end

     0   :  { %vm40_vm0 = vcmask 1041408   ;;  %vm24_vm1 = vcmask 277504   ;;  %vm89_vm2 = vcmask 261120   ;;  %vm94_vm3 = vcmask 254976   ;;  %s216_s1 = inlined_call_operand.vmem [shape: f32[34,32], index: 1, kind: input, shape index: {}]   ;;  %s217_s2 = inlined_call_operand.vmem [shape: f32[1,32], index: 2, kind: input, shape index: {}]   ;;  %s218_s0 = inlined_call_operand.vmem [shape: f32[34,34], index: 0, kind: input, shape index: {}]   ;;  %s219_s3 = inlined_call_operand.vmem [shape: f32[34,32], index: 3, kind: output, shape index: {}]  }
   0x1   :  { %v23_v0 = vld [vmem:[%s216_s1 + $0x20] sm:$0x3]  ;;  %v22_v1 = vld [vmem:[%s216_s1 + $0x18] sm:$0xff]  ;;  %v21_v2 = vld [vmem:[%s216_s1 + $0x10] sm:$0xff] }
   0x2   :  { %129 = vmatpush.msk.msra.mxu3 %vm40_vm0, %v23_v0  ;;  %128 = vmatpush.msk.msra.mxu2 %vm40_vm0, %v23_v0  ;;  %v20_v3 = vld [vmem:[%s216_s1 + $0x8] sm:$0xff]  ;;  %v19_v4 = vld [vmem:[%s216_s1] sm:$0xff]  ;;  %v17_v5 = vld [vmem:[%s218_s0 + $0x18] sm:$0xff] }
   0x3   :  { %121 = vmatpush.msk.msra.mxu0 %vm40_vm0, %v23_v0  ;;  %127 = vmatpush.msk.msra.mxu1 %vm40_vm0, %v23_v0  ;;  %v16_v6 = vld [vmem:[%s218_s0 + $0x10] sm:$0xff]  ;;  %v14_v7 = vld [vmem:[%s218_s0] sm:$0xff]  ;;  %v15_v8 = vld [vmem:[%s218_s0 + $0x8] sm:$0xff] }
   0x4   :  { %132 = vmatpush.msra.mxu3 %v22_v1  ;;  %131 = vmatpush.msra.mxu2 %v22_v1  ;;  %v18_v9 = vld [vmem:[%s218_s0 + $0x20] sm:$0x3] }
   0x5   :  { %56 = vmatpush.msra.mxu0 %v22_v1  ;;  %130 = vmatpush.msra.mxu1 %v22_v1  ;;  %v142_v10 = vld [vmem:[%s217_s2] ss:$0 sm:$0xff] }
   0x6   :  { %135 = vmatpush.msra.mxu3 %v21_v2  ;;  %134 = vmatpush.msra.mxu2 %v21_v2 }
   0x7   :  { %57 = vmatpush.msra.mxu0 %v21_v2  ;;  %133 = vmatpush.msra.mxu1 %v21_v2 }
   0x8   :  { %138 = vmatpush.msra.mxu3 %v20_v3  ;;  %137 = vmatpush.msra.mxu2 %v20_v3 }
   0x9   :  { %58 = vmatpush.msra.mxu0 %v20_v3  ;;  %136 = vmatpush.msra.mxu1 %v20_v3 }
   0xa   :  { %141 = vmatpush.msra.mxu3 %v19_v4  ;;  %140 = vmatpush.msra.mxu2 %v19_v4 }
   0xb   :  { %125 = vmatmul.msk.f32.vlgmr.msra.gmra.mxu3 %vm24_vm1, %v17_v5  ;;  %124 = vmatmul.msk.f32.vlgmr.msra.gmra.mxu2 %vm24_vm1, %v16_v6 }
   0xc   :  { %59 = vmatpush.msra.mxu0 %v19_v4  ;;  %139 = vmatpush.msra.mxu1 %v19_v4 }
   0xd   :  { %122 = vmatmul.msk.f32.vlgmr.msra.gmra.mxu0 %vm24_vm1, %v14_v7  ;;  %123 = vmatmul.msk.f32.vlgmr.msra.gmra.mxu1 %vm24_vm1, %v15_v8 }
  0x13   :  { %126 = vmatmul.msk.f32.gmra.mxu3 %vm24_vm1, %v18_v9 }
  0x8a   :  { %v61_v11 = vpop.f32.mrf.mxu0  ;;  %v64_v12 = vpop.f32.mrf.mxu1 }
  0x8b   :  { %v84_v13 = vadd.f32 %v142_v10, %v61_v11  ;;  %v85_v14 = vadd.f32 %v142_v10, %v64_v12 }
  0x8d   :  { %90 = vst.msk [vmem:[%s219_s3] sm:$0xff] %vm89_vm2, %v84_v13 }
  0x8e   :  { %v70_v15 = vpop.f32.mrf.mxu3  ;;  %91 = vst.msk [vmem:[%s219_s3 + $0x8] sm:$0xff] %vm89_vm2, %v85_v14  ;;  %v67_v16 = vpop.f32.mrf.mxu2 }
  0x8f   :  { %v87_v17 = vadd.f32 %v142_v10, %v70_v15  ;;  %v86_v18 = vadd.f32 %v142_v10, %v67_v16 }
  0x91   :  { %93 = vst.msk [vmem:[%s219_s3 + $0x18] sm:$0xff] %vm89_vm2, %v87_v17 }
  0x92   :  { %92 = vst.msk [vmem:[%s219_s3 + $0x10] sm:$0xff] %vm89_vm2, %v86_v18 }
  0x96   :  { %v73_v19 = vpop.f32.mrf.mxu3 }
  0x97   :  { %v88_v20 = vadd.f32 %v142_v10, %v73_v19 }
  0x99   :  { %95 = vst.msk [vmem:[%s219_s3 + $0x20] sm:$0x3] %vm94_vm3, %v88_v20 }

</bundles_post_ra>
